<compile_context>
chip_gen: v5e
topology: v5e:2x2
jax: 0.10.0
libtpu: 0.0.40
codegen_flags: <defaults>
</compile_context>

<pallas_src>
import functools

import jax
import jax.numpy as jnp
from jax import lax
from jax.experimental import pallas as pl
from jax.experimental.pallas import tpu as pltpu


def conv_block_kernel(x_ref, b_ref, shift_ref, alpha_ref, out_ref, *,
                      k, activation, compute_dtype):
    """One batch block (Nb images) per grid step.

    x_ref     : (Nb, H, W*Cin)      lane-dense input slab (f32)
    b_ref     : (k*W*Cin, W*Cout)   banded im2col weight, BN scale folded (compute dtype)
    shift_ref : (1, W*Cout)         BN shift with conv bias folded, tiled over W (f32)
    alpha_ref : (1, 1) SMEM         PReLU / LeakyReLU negative slope
    out_ref   : (Nb, H, W*Cout)     lane-dense output slab (f32)
    """
    Nb, H, WC_in = x_ref.shape
    WC_out = out_ref.shape[2]
    halo = k // 2

    # Cast once; all tap / patch construction happens in the (bf16) compute dtype.
    x3d = x_ref[...].astype(compute_dtype)                     # (Nb, H, W*Cin)

    # Row taps: output row h reads input rows h-halo .. h+halo of the SAME image.
    # "Same" padding in H is realized with zero rows; these are plain sublane
    # shifts of the lane-dense slab (per image, axis=1) — no strided-window
    # slice + reshape relayouts, no cross-image contamination.
    taps = []
    for oy in range(k):
        d = oy - halo
        if d == 0:
            taps.append(x3d)
        elif d > 0:
            pad = jnp.zeros((Nb, d, WC_in), compute_dtype)
            taps.append(jnp.concatenate([x3d[:, d:, :], pad], axis=1))
        else:
            pad = jnp.zeros((Nb, -d, WC_in), compute_dtype)
            taps.append(jnp.concatenate([pad, x3d[:, :d, :]], axis=1))

    # im2col over the row taps -> (Nb, H, k*W*Cin) -> (Nb*H, k*W*Cin).
    # Merging the two leading dims keeps the lane dim; with H % 8 == 0 the
    # reshape is layout-free.  The column (dx) taps, the "same" padding in W and
    # the BN scale are all folded into the banded weight, so ONE deep matmul with
    # M = Nb*H performs the whole convolution on the MXU.
    patch = jnp.concatenate(taps, axis=2).reshape(Nb * H, k * WC_in)
    acc = jnp.dot(patch, b_ref[...], preferred_element_type=jnp.float32)

    # Eval-mode BatchNorm shift (conv bias + BN mean/beta folded); scale already
    # lives in the weight columns.
    acc = acc + shift_ref[...]

    if activation in ("prelu", "leakyrelu"):
        a = alpha_ref[0, 0]
        acc = jnp.where(acc >= 0.0, acc, a * acc)
    elif activation == "tanh":
        acc = jnp.tanh(acc)
    # activation is None -> identity

    # Unmasked, lane-dense full-block store.
    out_ref[...] = acc.reshape(Nb, H, WC_out).astype(out_ref.dtype)


def fold_params(conv_w, conv_b, bn, act_param, W, weight_dtype=jnp.bfloat16):
    """Fold PyTorch-layout parameters into the kernel's layout (cache the result!).

    conv_w : (Cout, Cin, k, k)  (OIHW, PyTorch)
    conv_b : (Cout,)
    bn     : None or (gamma, beta, running_mean, running_var, eps)
    Returns (b_mats, shift_w, alpha) with
      b_mats  : (k*W*Cin, W*Cout)  banded im2col weight, BN scale folded (weight_dtype)
      shift_w : (1, W*Cout) f32
      alpha   : (1, 1) f32
    """
    C_out, C_in, k, _ = conv_w.shape
    halo = k // 2
    w_hwio = jnp.transpose(conv_w, (2, 3, 1, 0)).astype(jnp.float32)  # (k,k,Cin,Cout)

    if bn is None:
        s = jnp.ones((C_out,), jnp.float32)
        sh = conv_b.astype(jnp.float32)
    else:
        gamma, beta, mean, var, eps = bn
        s = gamma / jnp.sqrt(var + eps)
        sh = beta + s * (conv_b - mean)

    # Banded matrix per row-tap oy: B_oy[(wo+off)*Cin+ci, wo*Cout+co] = w[oy, dx, ci, co]
    # with off = dx - halo;  jnp.eye(k=-off) drops out-of-image columns ("same" pad in W).
    # TODO(synk): this O(W^2*Cin*Cout) f32 intermediate is a memory hazard at real
    # resolutions; replace with the W-tiled band together with the kernel tiling.
    rows = []
    for oy in range(k):
        b = jnp.zeros((W * C_in, W * C_out), jnp.float32)
        for dx in range(k):
            off = dx - halo
            b = b + jnp.kron(jnp.eye(W, W, k=-off, dtype=jnp.float32), w_hwio[oy, dx])
        rows.append(b)
    band = jnp.concatenate(rows, axis=0)                         # (k*W*Cin, W*Cout)

    # Fold the eval-mode BN scale into the band's output columns, in f32, BEFORE
    # the weight-dtype cast.
    scale_cols = jnp.tile(s, W)                                  # (W*Cout,)
    b_mats = (band * scale_cols[None, :]).astype(weight_dtype)

    shift_w = jnp.tile(sh, W).reshape(1, W * C_out).astype(jnp.float32)
    alpha = jnp.full((1, 1), act_param, jnp.float32)
    return b_mats, shift_w, alpha


def _pick_batch_block(N, H, target_rows=256):
    """Smallest divisor Nb of N with Nb*H >= target_rows, preferring grid >= 2 (v7x).

    target_rows=256 fills v6e/v7x MXU rows; 128 already suffices on v5e.
    """
    divs = [d for d in range(1, N + 1) if N % d == 0]
    for d in divs:
        if d * H >= target_rows and N // d >= 2:
            return d
    for d in divs:
        if d * H >= target_rows:
            return d
    return N


def convolutional_block_slab(x_slab, params, *, kernel_size, activation,
                             compute_dtype=jnp.bfloat16, batch_block=None,
                             target_rows=256):
    """Lane-dense entry point: x_slab (N, H, W*Cin) f32 -> (N, H, W*Cout) f32.

    Use this directly between stacked ConvolutionalBlocks so activations stay in
    the kernel's native NHWC slab layout (transpose only at network boundaries).
    """
    assert activation in (None, "prelu", "leakyrelu", "tanh")
    b_mats, shift_w, alpha = params
    N, H, WC_in = x_slab.shape
    WC_out = shift_w.shape[1]
    assert b_mats.shape == (kernel_size * WC_in, WC_out), (b_mats.shape,)
    # Fail loudly on shapes that would produce masked / relayouted stores.
    assert WC_in % 128 == 0 and WC_out % 128 == 0, "need W*C a multiple of 128"
    assert H % 8 == 0, "need H a multiple of 8 (sublane tiling)"

    if batch_block is None:
        batch_block = _pick_batch_block(N, H, target_rows)
    assert N % batch_block == 0, (N, batch_block)
    grid_n = N // batch_block

    kern = functools.partial(conv_block_kernel, k=kernel_size,
                             activation=activation, compute_dtype=compute_dtype)

    # Explicit scoped-VMEM budget (v7x: 64 MiB physical / 32 MiB default scoped).
    # Demo-size usage is ~8 MiB; 48 MiB is a safe ceiling on all generations.
    # TODO(synk): re-derive together with the W-tiled band for real resolutions.
    vmem_limit_bytes = 48 * 1024 * 1024

    out = pl.pallas_call(
        kern,
        out_shape=jax.ShapeDtypeStruct((N, H, WC_out), jnp.float32),
        grid_spec=pltpu.PrefetchScalarGridSpec(
            num_scalar_prefetch=0,
            grid=(grid_n,),                      # Nb images per grid step
            in_specs=[
                pl.BlockSpec((batch_block, H, WC_in), lambda n: (n, 0, 0)),
                # Constant index_maps: the weight/shift are DMA'd once and reused.
                pl.BlockSpec((kernel_size * WC_in, WC_out), lambda n: (0, 0)),
                pl.BlockSpec((1, WC_out), lambda n: (0, 0)),
                pl.BlockSpec(memory_space=pltpu.MemorySpace.SMEM),
            ],
            out_specs=pl.BlockSpec((batch_block, H, WC_out), lambda n: (n, 0, 0)),
        ),
        compiler_params=pltpu.CompilerParams(
            dimension_semantics=("parallel",),   # batch-block axis -> v7x megacore
            vmem_limit_bytes=vmem_limit_bytes),
    )(x_slab, b_mats, shift_w, alpha)
    return out


def convolutional_block(x_nchw, params, *, kernel_size, activation, stride=1,
                        compute_dtype=jnp.bfloat16, batch_block=None):
    """x_nchw: (N, Cin, H, W) f32 -> (N, Cout, H, W) f32 (PyTorch-layout wrapper)."""
    assert stride == 1  # TODO(synk): stride > 1 not implemented.
    b_mats, shift_w, alpha = params
    N, C_in, H, W = x_nchw.shape
    WC_out = shift_w.shape[1]
    C_out = WC_out // W

    # NOTE: for stacked blocks keep activations in slab layout and call
    # convolutional_block_slab directly; these transposes are full HBM passes.
    x_slab = jnp.transpose(x_nchw, (0, 2, 3, 1)).reshape(N, H, W * C_in)
    out_slab = convolutional_block_slab(
        x_slab, params, kernel_size=kernel_size, activation=activation,
        compute_dtype=compute_dtype, batch_block=batch_block)
    return jnp.transpose(out_slab.reshape(N, H, W, C_out), (0, 3, 1, 2))


def ref_conv_block(x_nchw, conv_w, conv_b, bn, activation, act_param):
    """Pure-JAX reference with the same (eval-mode) semantics."""
    x = jnp.transpose(x_nchw, (0, 2, 3, 1))
    w_hwio = jnp.transpose(conv_w, (2, 3, 1, 0))
    y = lax.conv_general_dilated(x, w_hwio, (1, 1), "SAME",
                                 dimension_numbers=("NHWC", "HWIO", "NHWC"),
                                 precision=lax.Precision.HIGHEST)
    y = y + conv_b
    if bn is not None:
        gamma, beta, mean, var, eps = bn
        y = gamma * (y - mean) / jnp.sqrt(var + eps) + beta
    if activation in ("prelu", "leakyrelu"):
        y = jnp.where(y >= 0, y, act_param * y)
    elif activation == "tanh":
        y = jnp.tanh(y)
    return jnp.transpose(y, (0, 3, 1, 2))


if __name__ == "__main__":
    # W*C = 512 (lane dense); N=32 -> batch_block=16 -> M = 256 rows, grid = (2,).
    N, C_in, C_out, H, W, k = 32, 32, 32, 16, 16, 3
    key = jax.random.PRNGKey(0)
    kx, kw, kb, kg, kbe, km, kv = jax.random.split(key, 7)

    x = jax.random.normal(kx, (N, C_in, H, W), jnp.float32)          # NCHW input
    conv_w = jax.random.normal(kw, (C_out, C_in, k, k), jnp.float32) * 0.05
    conv_b = jax.random.normal(kb, (C_out,), jnp.float32) * 0.05
    bn = (jax.random.uniform(kg, (C_out,), jnp.float32, 0.5, 1.5),   # gamma
          jax.random.normal(kbe, (C_out,), jnp.float32) * 0.1,       # beta
          jax.random.normal(km, (C_out,), jnp.float32) * 0.1,        # running mean
          jax.random.uniform(kv, (C_out,), jnp.float32, 0.5, 1.5),   # running var
          1e-5)

    ref = ref_conv_block(x, conv_w, conv_b, bn, "prelu", 0.25)

    # --- Config A (default perf path): 3x3 + BN + PReLU, bf16 operands / f32 acc ---
    p_bf16 = fold_params(conv_w, conv_b, bn, 0.25, W, jnp.bfloat16)  # fold once, reuse
    out_bf = jax.block_until_ready(
        convolutional_block(x, p_bf16, kernel_size=k, activation="prelu"))
    assert out_bf.shape == (N, C_out, H, W)
    err_bf = float(jnp.max(jnp.abs(out_bf - ref)))
    assert err_bf < 1e-1, err_bf          # tolerance sized for bf16 operand rounding

    # --- Config A with f32 operands (accuracy check of the banded fold) ---
    p_f32 = fold_params(conv_w, conv_b, bn, 0.25, W, jnp.float32)
    out_f32 = jax.block_until_ready(
        convolutional_block(x, p_f32, kernel_size=k, activation="prelu",
                            compute_dtype=jnp.float32))
    err_f32 = float(jnp.max(jnp.abs(out_f32 - ref)))
    assert err_f32 < 2e-2, err_f32        # covers MXU default-precision f32 paths

    # --- Config B: 3x3 conv, no BN, tanh (other module branches) ---
    p_b = fold_params(conv_w, conv_b, None, 0.0, W, jnp.float32)
    out_b = jax.block_until_ready(
        convolutional_block(x, p_b, kernel_size=k, activation="tanh",
                            compute_dtype=jnp.float32))
    ref_b = ref_conv_block(x, conv_w, conv_b, None, "tanh", 0.0)
    err_b = float(jnp.max(jnp.abs(out_b - ref_b)))
    assert err_b < 2e-2, err_b

    print("KERNEL_OK")
</pallas_src>

<mosaic_0001>
module attributes {stable_mosaic.version = 11 : i64} {
  func.func @conv_block_kernel(%arg0: i32, %arg1: memref<16x16x512xf32, #tpu.memory_space<vmem>>, %arg2: memref<1536x512xbf16, #tpu.memory_space<vmem>>, %arg3: memref<1x512xf32, #tpu.memory_space<vmem>>, %arg4: memref<1x1xf32, #tpu.memory_space<smem>>, %arg5: memref<16x16x512xf32, #tpu.memory_space<vmem>>) attributes {dimension_semantics = [#tpu.dimension_semantics<parallel>], iteration_bounds = array<i64: 2>, scalar_prefetch = 0 : i64, scratch_operands = 0 : i64, tpu.core_type = #tpu.core_type<tc>, window_params = [{transform_indices = @transform_0, window_bounds = array<i64: 16, 16, 512>}, {pipeline_mode = #tpu.pipeline_mode<synchronous>, transform_indices = @transform_1, window_bounds = array<i64: 1536, 512>}, {pipeline_mode = #tpu.pipeline_mode<synchronous>, transform_indices = @transform_2, window_bounds = array<i64: 1, 512>}, {transform_indices = @transform_3, window_bounds = array<i64: 1, 1>}, {transform_indices = @transform_4, window_bounds = array<i64: 16, 16, 512>}]} {
    %c0 = arith.constant 0 : index
    %c0_0 = arith.constant 0 : index
    %c0_1 = arith.constant 0 : index
    %0 = vector.load %arg1[%c0, %c0_0, %c0_1] : memref<16x16x512xf32, #tpu.memory_space<vmem>>, vector<16x16x512xf32>
    %1 = arith.truncf %0 : vector<16x16x512xf32> to vector<16x16x512xbf16>
    %cst = arith.constant 0.000000e+00 : bf16
    %2 = vector.broadcast %cst : bf16 to vector<16x1x512xbf16>
    %3 = vector.extract_strided_slice %1 {offsets = [0, 0, 0], sizes = [16, 15, 512], strides = [1, 1, 1]} : vector<16x16x512xbf16> to vector<16x15x512xbf16>
    %4 = tpu.concatenate %2, %3 in 1 : vector<16x1x512xbf16>, vector<16x15x512xbf16> -> vector<16x16x512xbf16>
    %cst_2 = arith.constant 0.000000e+00 : bf16
    %5 = vector.broadcast %cst_2 : bf16 to vector<16x1x512xbf16>
    %6 = vector.extract_strided_slice %1 {offsets = [0, 1, 0], sizes = [16, 15, 512], strides = [1, 1, 1]} : vector<16x16x512xbf16> to vector<16x15x512xbf16>
    %7 = tpu.concatenate %6, %5 in 1 : vector<16x15x512xbf16>, vector<16x1x512xbf16> -> vector<16x16x512xbf16>
    %8 = tpu.concatenate %4, %1, %7 in 2 : vector<16x16x512xbf16>, vector<16x16x512xbf16>, vector<16x16x512xbf16> -> vector<16x16x1536xbf16>
    %9 = vector.shape_cast %8 : vector<16x16x1536xbf16> to vector<256x1536xbf16>
    %c0_3 = arith.constant 0 : index
    %c0_4 = arith.constant 0 : index
    %10 = vector.load %arg2[%c0_3, %c0_4] : memref<1536x512xbf16, #tpu.memory_space<vmem>>, vector<1536x512xbf16>
    %cst_5 = arith.constant dense<0.000000e+00> : vector<256x512xf32>
    %11 = tpu.matmul %9, %10, %cst_5 {dimension_numbers = #tpu.dot_dimension_numbers<[1], [0], [0], [1], [0, 0, 1, 1], [], []>} : vector<256x1536xbf16>, vector<1536x512xbf16>, vector<256x512xf32> -> vector<256x512xf32>
    %c0_6 = arith.constant 0 : index
    %c0_7 = arith.constant 0 : index
    %12 = vector.load %arg3[%c0_6, %c0_7] : memref<1x512xf32, #tpu.memory_space<vmem>>, vector<1x512xf32>
    %13 = vector.broadcast %12 : vector<1x512xf32> to vector<256x512xf32>
    %14 = arith.addf %11, %13 : vector<256x512xf32>
    %c0_8 = arith.constant 0 : index
    %c0_9 = arith.constant 0 : index
    %15 = memref.load %arg4[%c0_8, %c0_9] : memref<1x1xf32, #tpu.memory_space<smem>>
    %cst_10 = arith.constant 0.000000e+00 : f32
    %16 = vector.broadcast %cst_10 : f32 to vector<256x512xf32>
    %17 = arith.cmpf oge, %14, %16 : vector<256x512xf32>
    %18 = vector.broadcast %15 : f32 to vector<256x512xf32>
    %19 = arith.mulf %18, %14 : vector<256x512xf32>
    %20 = arith.select %17, %14, %19 : vector<256x512xi1>, vector<256x512xf32>
    %21 = vector.shape_cast %20 : vector<256x512xf32> to vector<16x16x512xf32>
    %c0_11 = arith.constant 0 : index
    %c0_12 = arith.constant 0 : index
    %c0_13 = arith.constant 0 : index
    %22 = vector.load %arg5[%c0_11, %c0_12, %c0_13] : memref<16x16x512xf32, #tpu.memory_space<vmem>>, vector<16x16x512xf32>
    tpu.vector_store %arg5[%c0_11, %c0_12, %c0_13], %21 {strides = array<i32>} : memref<16x16x512xf32, #tpu.memory_space<vmem>>, vector<16x16x512xf32>,
    return
  }
  func.func @transform_0(%arg0: i32) -> (i32, i32, i32) {
    %c0_i32 = arith.constant 0 : i32
    %c0_i32_0 = arith.constant 0 : i32
    %c0_i32_1 = arith.constant 0 : i32
    return %arg0, %c0_i32, %c0_i32_0 : i32, i32, i32
  }
  func.func @transform_1(%arg0: i32) -> (i32, i32) {
    %c0_i32 = arith.constant 0 : i32
    %c0_i32_0 = arith.constant 0 : i32
    %c0_i32_1 = arith.constant 0 : i32
    return %c0_i32, %c0_i32_0 : i32, i32
  }
  func.func @transform_2(%arg0: i32) -> (i32, i32) {
    %c0_i32 = arith.constant 0 : i32
    %c0_i32_0 = arith.constant 0 : i32
    %c0_i32_1 = arith.constant 0 : i32
    return %c0_i32, %c0_i32_0 : i32, i32
  }
  func.func @transform_3(%arg0: i32) -> (i32, i32) {
    %c0_i32 = arith.constant 0 : i32
    %c0_i32_0 = arith.constant 0 : i32
    %c0_i32_1 = arith.constant 0 : i32
    return %c0_i32, %c0_i32_0 : i32, i32
  }
  func.func @transform_4(%arg0: i32) -> (i32, i32, i32) {
    %c0_i32 = arith.constant 0 : i32
    %c0_i32_0 = arith.constant 0 : i32
    %c0_i32_1 = arith.constant 0 : i32
    return %arg0, %c0_i32, %c0_i32_0 : i32, i32, i32
  }
}

</mosaic_0001>

<bundles_post_ra>
// kernel: tpu_custom_call.1
= control target key start
LH: loop header
LB: loop body
LE: loop exit
PB: predicated region body
PF: predicated region fallthrough
CT: control target
= control target key end

     0   :  { %s14571_s0 = inlined_call_operand.hbm [shape: f32[32,16,512], index: 0, kind: input, shape index: {}]   ;;  %s14572_s1 = inlined_call_operand.hbm [shape: bf16[1536,512], index: 1, kind: input, shape index: {}]   ;;  %s14573_s2 = inlined_call_operand.hbm [shape: f32[1,512], index: 2, kind: input, shape index: {}]   ;;  %s14574_s3 = inlined_call_operand.<no memory space> [shape: f32[1,1], index: 3, kind: input, shape index: {}]   ;;  %s14575_s4 = inlined_call_operand.hbm [shape: f32[32,16,512], index: 4, kind: output, shape index: {}]  }
   0x1   :  { %9 = sst [smem:[#allocation2]] %s14574_s3 }
   0x2   :  { %10 = vsyncpa [#allocation4], 0 }
   0x3   :  { %12 = vsyncpa [#allocation4 + $0x1], 0 }
   0x4   :  { %13 = vsyncpa [#allocation7], 0 }
   0x5   :  { %14 = vsyncpa [#allocation5], 0 }
   0x6   :  { %16 = vsyncpa [#allocation5 + $0x1], 0  ;;  %s11031_s17 = smov 0   ;;  %s11033_s18 = smov 0  }
   0x7   :  { %s11035_s19 = smov 0   ;;  %s11037_s20 = smov 0  }
   0x8 LB: > { %s11052_s3 = sadd.s32 4294967295, %s10993_s20   ;;  %s8813_s21 = sadd.s32 4294967294, %s10993_s20   ;;  %s10993_s20 = sphi %s11037_s20, %s16132_s20   ;;  %s10989_s19 = sphi %s11035_s19, %s16131_s19   ;;  %s10985_s18 = sphi %s11033_s18, %s16130_s18   ;;  %s10981_s17 = sphi %s11031_s17, %s16129_s17  }
   0x9   : > { %p42_p0 = scmp.ne.s32.totalorder %s10985_s18, %s10981_s17  ;;  %p43_p1 = scmp.eq.s32.totalorder %s11052_s3, 0 }
   0xa   : > { %p129_p2 = scmp.eq.s32.totalorder %s11052_s3, 1  ;;  %p135_p3 = scmp.eq.s32.totalorder %s8813_s21, 1 }
   0xb   : > { %p11061_p4 = por %p43_p1, %p42_p0  ;;  %p8814_p5 = scmp.ge.s32.totalorder %s10993_s20, 1 }
   0xc   : > { %p11066_p6 = por %p135_p3, %p42_p0  ;;  %p142_p7 = scmp.lt.s32.totalorder %s10993_s20, 3 }
   0xd   : > { %s153_s26 = sshll.u32 %s14572_s1, 4  ;;  %s10995_s28 = smov [#allocation6]   ;;  %s154_s26 = int_to_ptr.hbm [resolvable:$true] %s153_s26 }
   0xe   : > { %p11074_p8 = pnand %p8814_p5, %p142_p7  ;;  %s155_s29 = sshll.u32 %s10995_s28, 4  ;;  %s156_s29 = int_to_ptr.vmem [resolvable:$true] %s155_s29 }
   0xf   : > { %s168_s6 = sshll.u32 %s14573_s2, 4  ;;  %s10996_s7 = smov 256   ;;  %s169_s6 = int_to_ptr.hbm [resolvable:$true] %s168_s6 }
  0x10   : > { %p10769_p9 = pneg %p11074_p8  ;;  %s10997_s8 = smov 16  }
  0x11   : > { %s10998_s9 = smov [#allocation8]   ;;  %s11087_s11 = sadd.s32 1, %s10993_s20  }
  0x12   : > { %p10770_p10 = pnand %p10769_p9, %p43_p1  ;;  %s170_s10 = sshll.u32 %s10998_s9, 4  ;;  %s171_s10 = int_to_ptr.vmem [resolvable:$true] %s170_s10 }
  0x13   : > { %s29_s12 = sadd.s32 1, %s10989_s19  ;;  %s26_s13 = ssub.s32 %s10993_s20, %s11087_s11 }
  0x14   : > { %10772 = dma.hbm_to_vmem [thread:$0]  (!%p10770_p10), %s154_s26, 49152, %s156_s29, [#allocation7], %s10996_s7, %s10996_s7, %s10997_s8  }
  0x15   : > { %10775 = dma.hbm_to_vmem [thread:$0]  (!%p10770_p10), %s169_s6, 64, %s171_s10, [#allocation7]  }
  0x16   : > { %p36_p12 = scmp.ne.s32.totalorder %s10989_s19, %s10985_s18  ;;  %p27_p13 = scmp.eq.s32.totalorder %s26_s13, 0 }
  0x17   : > { %p37_p0 = scmp.eq.s32.totalorder %s10993_s20, 0  ;;  %p10786_p5 = scmp.lt.s32.totalorder %s10993_s20, 2 }
  0x18   : > { %p11097_p3 = por %p129_p2, %p36_p12  ;;  %s184_s16 = sand.u32 1, %s10989_s19  }
  0x19   : > { %s11103_s15 = scalar_select %p27_p13, %s10989_s19, %s29_s12  }
  0x1a   : > { %p38_p7 = por %p37_p0, %p36_p12  ;;  %s8818_s21 = sshll.u32 %s184_s16, 10 }
  0x1b   : > { %s10370_s24 = sshll.u32 %s10993_s20, 10  ;;  %s188_s29 = scalar_lea.vmem [#allocation3], %s8818_s21 }
  0x1c   : > { %s194_s28 = scalar_lea.hbm %s14571_s0, %s10370_s24  ;;  %s197_s30 = sshll.u32 %s188_s29, 4  ;;  %s198_s30 = int_to_ptr.vmem [resolvable:$true] %s197_s30 }
  0x1d   : > { %s195_s5 = sshll.u32 %s194_s28, 4  ;;  %p11110_p2 = pnand %p10786_p5, %p38_p7  ;;  %s196_s5 = int_to_ptr.hbm [resolvable:$true] %s195_s5 }
  0x1e   : > { %s185_s7 = scalar_lea.sflag [#allocation4], %s184_s16  ;;  %s10893_s8 = sshra.s32 %s196_s5, 4  ;;  %s10894_s8 = int_to_ptr.hbm [resolvable:$true] %s10893_s8 }
  0x1f   : > { %s10895_s9 = scalar_lea.hbm %s10894_s8, 1024  ;;  %p10897_p10 = pneg %p11110_p2 }
  0x20   : > { %p10896_p9 = scmp.ne.s32.totalorder %s10894_s8, %s10895_s9  ;;  %s10900_s13 = scalar_lea.hbm %s14571_s0, 2048 }
  0x21   : > { %p10901_p0 = scmp.lt.s32.totalorder %s10894_s8, %s14571_s0  ;;  %p10902_p5 = scmp.lt.s32.totalorder %s10900_s13, %s10895_s9 }
  0x22   : > { %p10898_p12 = pnand %p10897_p10, %p10896_p9 }
  0x23   : > { %p10903_p7 = por %p10902_p5, %p10901_p0 }
  0x24   : > { %p10899_p13 = pneg %p10898_p12 }
  0x26   : > { %p10904_p11 = pnand %p10903_p7, %p10899_p13 }
  0x28   : > { %10907 = shalt.err (!%p10904_p11)
}
  0x29   : > { %s10999_s16 = smov 512   ;;  %s11000_s25 = smov 32  }
  0x2a   : > { %10779 = dma.hbm_to_vmem [thread:$0]  (!%p11110_p2), %s196_s5, 16384, %s198_s30, %s185_s7, %s10999_s16, %s10999_s16, %s11000_s25  }
  0x2b   : > { %209 = sbr.rel (%p11074_p8) target bundleno = 3309 (0xced), region = 36 }
  0x30   : > { %s11127_s26 = sand.u32 1, %s10985_s18  }
  0x31   : > { %s8823_s28 = sshll.u32 %s11127_s26, 10  ;;  %s212_s29 = scalar_lea.sflag [#allocation4], %s11127_s26 }
  0x32   : > { %s11133_s8 = scalar_lea.vmem [#allocation3], %s8823_s28 }
  0x33   : > { %10968 = dma.done.wait (%p11061_p4), %s212_s29, 16384  }
  0x34   : > { %10970 = vsyncadd (%p11061_p4), %s212_s29, 4294950912 }
  0x35   : > { %10972 = dma.done.wait (%p43_p1), [#allocation7], 49216  }
  0x36   : > { %10974 = vsyncadd (%p43_p1), [#allocation7], 4294918080  ;;  %v8941_v0 = vld [vmem:[#allocation6 + $0xe0] sm:$0xf]  ;;  %v10401_v1 = vld [vmem:[#allocation6 + $0xec] sm:$0xf0] }
  0x37   : > { %v9069_v2 = vld [vmem:[#allocation6 + $0x1e0] sm:$0xf]  ;;  %v8942_v3 = vor.u32 %v10401_v1, %v8941_v0  ;;  %v10433_v4 = vld [vmem:[#allocation6 + $0x1ec] sm:$0xf0]  ;;  %vm1215_vm0 = vsmask.f32 256 }
  0x38   : > { %v9197_v5 = vld [vmem:[#allocation6 + $0x2e0] sm:$0xf]  ;;  %v10465_v6 = vld [vmem:[#allocation6 + $0x2ec] sm:$0xf0]  ;;  %v9070_v7 = vor.u32 %v10433_v4, %v9069_v2  ;;  %vm1214_vm1 = vcmask 1040384   ;;  %vm1473_vm3 = vcmask 1047552  }
  0x39   : > { %v9198_v8 = vor.u32 %v10465_v6, %v9197_v5  ;;  %v9325_v9 = vld [vmem:[#allocation6 + $0x3e0] sm:$0xf]  ;;  %v10497_v10 = vld [vmem:[#allocation6 + $0x3ec] sm:$0xf0]  ;;  %3918 = vmatpush.bf16.msra.mxu0 %v8942_v3  ;;  %vm11215_vm2 = vmand %vm1214_vm1, %vm1215_vm0  ;;  %vm1474_vm4 = vsmask.f32 7424 }
  0x3a   : > { %v8925_v11 = vld [vmem:[#allocation6 + $0xc0] sm:$0xf]  ;;  %v9326_v12 = vor.u32 %v10497_v10, %v9325_v9  ;;  %v10397_v13 = vld [vmem:[#allocation6 + $0xcc] sm:$0xf0]  ;;  %4007 = vmatpush.bf16.msra.mxu1 %v9070_v7  ;;  %vm12371_vm5 = vmand %vm1473_vm3, %vm1474_vm4  ;;  %s8190_s22 = sld [smem:[#allocation2]]  ;;  %s12768_s27 = scalar_lea.vmem [#allocation9], %s8823_s28 }
  0x3b   : > { %v9053_v14 = vld [vmem:[#allocation6 + $0x1c0] sm:$0xf]  ;;  %v10429_v15 = vld [vmem:[#allocation6 + $0x1cc] sm:$0xf0]  ;;  %4096 = vmatpush.bf16.msra.mxu2 %v9198_v8  ;;  %v8926_v16 = vor.u32 %v10397_v13, %v8925_v11  ;;  %s10756_s30 = sshll.u32 %s11052_s3, 10  ;;  %s8718_s9 = sshll.u32 %s12768_s27, 4  ;;  %s8719_s9 = int_to_ptr.vmem [resolvable:$true] %s8718_s9 }
  0x3c   : > { %v9054_v17 = vor.u32 %v10429_v15, %v9053_v14  ;;  %v9181_v18 = vld [vmem:[#allocation6 + $0x2c0] sm:$0xf]  ;;  %v10461_v19 = vld [vmem:[#allocation6 + $0x2cc] sm:$0xf0]  ;;  %4185 = vmatpush.bf16.msra.mxu3 %v9326_v12  ;;  %s8717_s7 = scalar_lea.hbm %s14575_s4, %s10756_s30  ;;  %s8705_s3 = scalar_lea.sflag [#allocation5], %s11127_s26 }
  0x3d   : > { %v9309_v20 = vld [vmem:[#allocation6 + $0x3c0] sm:$0xf]  ;;  %v9182_v21 = vor.u32 %v10461_v19, %v9181_v18  ;;  %v10493_v22 = vld [vmem:[#allocation6 + $0x3cc] sm:$0xf0]  ;;  %3919 = vmatpush.bf16.msra.mxu0 %v8926_v16  ;;  %s8720_s10 = sshll.u32 %s8717_s7, 4  ;;  %s10943_s16 = scalar_lea.hbm %s14575_s4, 2048  ;;  %s8721_s10 = int_to_ptr.hbm [resolvable:$true] %s8720_s10 }
  0x3e   : > { %v8909_v23 = vld [vmem:[#allocation6 + $0xa0] sm:$0xf]  ;;  %v10393_v24 = vld [vmem:[#allocation6 + $0xac] sm:$0xf0]  ;;  %v9310_v25 = vor.u32 %v10493_v22, %v9309_v20  ;;  %4008 = vmatpush.bf16.msra.mxu1 %v9054_v17  ;;  %s10937_s12 = sshra.s32 %s8721_s10, 4  ;;  %s10938_s12 = int_to_ptr.hbm [resolvable:$true] %s10937_s12 }
  0x3f   : > { %v9037_v26 = vld [vmem:[#allocation6 + $0x1a0] sm:$0xf]  ;;  %v10425_v27 = vld [vmem:[#allocation6 + $0x1ac] sm:$0xf0]  ;;  %v8910_v29 = vor.u32 %v10393_v24, %v8909_v23  ;;  %4097 = vmatpush.bf16.msra.mxu2 %v9182_v21  ;;  %v255_v24 = vld [vmem:[%s11133_s8 + $0x8] sm:$0xff]  ;;  %s10939_s13 = scalar_lea.hbm %s10938_s12, 1024  ;;  %p10944_p11 = scmp.lt.s32.totalorder %s10938_s12, %s14575_s4 }
  0x40   : > { %v9165_v28 = vld [vmem:[#allocation6 + $0x2a0] sm:$0xf]  ;;  %v10457_v30 = vld [vmem:[#allocation6 + $0x2ac] sm:$0xf0]  ;;  %v9038_v33 = vor.u32 %v10425_v27, %v9037_v26  ;;  %4186 = vmatpush.bf16.msra.mxu3 %v9310_v25  ;;  %p10940_p1 = scmp.ne.s32.totalorder %s10938_s12, %s10939_s13  ;;  %p10945_p2 = scmp.lt.s32.totalorder %s10943_s16, %s10939_s13 }
  0x41   : > { %v9293_v31 = vld [vmem:[#allocation6 + $0x3a0] sm:$0xf]  ;;  %v10489_v32 = vld [vmem:[#allocation6 + $0x3ac] sm:$0xf0]  ;;  %v9166_v34 = vor.u32 %v10457_v30, %v9165_v28  ;;  %3920 = vmatpush.bf16.msra.mxu0 %v8910_v29  ;;  %v259_v28 = vld [vmem:[%s11133_s8 + $0x28] sm:$0xff] }
  0x42   : > { %v8893_v35 = vld [vmem:[#allocation6 + $0x80] sm:$0xf]  ;;  %v10389_v36 = vld [vmem:[#allocation6 + $0x8c] sm:$0xf0]  ;;  %v9294_v38 = vor.u32 %v10489_v32, %v9293_v31  ;;  %4009 = vmatpush.bf16.msra.mxu1 %v9038_v33  ;;  %p10941_p4 = pnand %p10940_p1, %p11097_p3  ;;  %p10946_p9 = por %p10945_p2, %p10944_p11 }
  0x43   : > { %v9021_v37 = vld [vmem:[#allocation6 + $0x180] sm:$0xf]  ;;  %v10421_v39 = vld [vmem:[#allocation6 + $0x18c] sm:$0xf0]  ;;  %v8894_v44 = vor.u32 %v10389_v36, %v8893_v35  ;;  %4098 = vmatpush.bf16.msra.mxu2 %v9166_v34  ;;  %v257_v36 = vld [vmem:[%s11133_s8 + $0x18] sm:$0xff] }
  0x44   : > { %v9149_v40 = vld [vmem:[#allocation6 + $0x280] sm:$0xf]  ;;  %v10453_v41 = vld [vmem:[#allocation6 + $0x28c] sm:$0xf0]  ;;  %v9022_v46 = vor.u32 %v10421_v39, %v9021_v37  ;;  %4187 = vmatpush.bf16.msra.mxu3 %v9294_v38  ;;  %p10942_p8 = pneg %p10941_p4 }
  0x45   : > { %v9277_v42 = vld [vmem:[#allocation6 + $0x380] sm:$0xf]  ;;  %v10485_v43 = vld [vmem:[#allocation6 + $0x38c] sm:$0xf0]  ;;  %v9150_v47 = vor.u32 %v10453_v41, %v9149_v40  ;;  %3921 = vmatpush.bf16.msra.mxu0 %v8894_v44  ;;  %v261_v41 = vld [vmem:[%s11133_s8 + $0x38] sm:$0xff] }
  0x46   : > { %v8877_v45 = vld [vmem:[#allocation6 + $0x60] sm:$0xf]  ;;  %v10385_v48 = vld [vmem:[#allocation6 + $0x6c] sm:$0xf0]  ;;  %v9278_v51 = vor.u32 %v10485_v43, %v9277_v42  ;;  %4010 = vmatpush.bf16.msra.mxu1 %v9022_v46  ;;  %p10947_p10 = pnand %p10946_p9, %p10942_p8 }
  0x47   : > { %v9005_v49 = vld [vmem:[#allocation6 + $0x160] sm:$0xf]  ;;  %v10417_v50 = vld [vmem:[#allocation6 + $0x16c] sm:$0xf0]  ;;  %v8878_v58 = vor.u32 %v10385_v48, %v8877_v45  ;;  %4099 = vmatpush.bf16.msra.mxu2 %v9150_v47 }
  0x48   : > { %v9133_v52 = vld [vmem:[#allocation6 + $0x260] sm:$0xf]  ;;  %v10449_v53 = vld [vmem:[#allocation6 + $0x26c] sm:$0xf0]  ;;  %v9006_v62 = vor.u32 %v10417_v50, %v9005_v49  ;;  %4188 = vmatpush.bf16.msra.mxu3 %v9278_v51 }
  0x49   : > { %v9261_v54 = vld [vmem:[#allocation6 + $0x360] sm:$0xf]  ;;  %v10481_v55 = vld [vmem:[#allocation6 + $0x36c] sm:$0xf0]  ;;  %v9134_v63 = vor.u32 %v10449_v53, %v9133_v52  ;;  %3922 = vmatpush.bf16.msra.mxu0 %v8878_v58 }
  0x4a   : > { %v8861_v56 = vld [vmem:[#allocation6 + $0x40] sm:$0xf]  ;;  %v10381_v57 = vld [vmem:[#allocation6 + $0x4c] sm:$0xf0]  ;;  %v9262_v3 = vor.u32 %v10481_v55, %v9261_v54  ;;  %4011 = vmatpush.bf16.msra.mxu1 %v9006_v62 }
  0x4b   : > { %v8989_v59 = vld [vmem:[#allocation6 + $0x140] sm:$0xf]  ;;  %v10413_v60 = vld [vmem:[#allocation6 + $0x14c] sm:$0xf0]  ;;  %v8862_v12 = vor.u32 %v10381_v57, %v8861_v56  ;;  %4100 = vmatpush.bf16.msra.mxu2 %v9134_v63 }
  0x4c   : > { %v9117_v61 = vld [vmem:[#allocation6 + $0x240] sm:$0xf]  ;;  %v10445_v0 = vld [vmem:[#allocation6 + $0x24c] sm:$0xf0]  ;;  %v8990_v16 = vor.u32 %v10413_v60, %v8989_v59  ;;  %4189 = vmatpush.bf16.msra.mxu3 %v9262_v3  ;;  %v267_v3 = vld [vmem:[%s11133_s8 + $0x68] sm:$0xff] }
  0x4d   : > { %v9245_v1 = vld [vmem:[#allocation6 + $0x340] sm:$0xf]  ;;  %v10477_v2 = vld [vmem:[#allocation6 + $0x34c] sm:$0xf0]  ;;  %v9118_v17 = vor.u32 %v10445_v0, %v9117_v61  ;;  %3923 = vmatpush.bf16.msra.mxu0 %v8862_v12  ;;  %v263_v61 = vld [vmem:[%s11133_s8 + $0x48] sm:$0xff] }
  0x4e   : > { %v8845_v4 = vld [vmem:[#allocation6 + $0x20] sm:$0xf]  ;;  %v10377_v5 = vld [vmem:[#allocation6 + $0x2c] sm:$0xf0]  ;;  %v9246_v21 = vor.u32 %v10477_v2, %v9245_v1  ;;  %4012 = vmatpush.bf16.msra.mxu1 %v8990_v16 }
  0x4f   : > { %v11143_v6 = vld [vmem:[#allocation6 + $0x120] sm:$0xf]  ;;  %v11145_v7 = vld [vmem:[#allocation6 + $0x12c] sm:$0xf0]  ;;  %v8846_v25 = vor.u32 %v10377_v5, %v8845_v4  ;;  %4101 = vmatpush.bf16.msra.mxu2 %v9118_v17 }
  0x50   : > { %v11147_v8 = vld [vmem:[#allocation6 + $0x220] sm:$0xf]  ;;  %v11149_v9 = vld [vmem:[#allocation6 + $0x22c] sm:$0xf0]  ;;  %v8974_v26 = vor.u32 %v11145_v7, %v11143_v6  ;;  %4190 = vmatpush.bf16.msra.mxu3 %v9246_v21 }
  0x51   : > { %v11151_v10 = vld [vmem:[#allocation6 + $0x320] sm:$0xf]  ;;  %v11153_v11 = vld [vmem:[#allocation6 + $0x32c] sm:$0xf0]  ;;  %v9102_v31 = vor.u32 %v11149_v9, %v11147_v8  ;;  %3924 = vmatpush.bf16.msra.mxu0 %v8846_v25 }
  0x52   : > { %v11155_v13 = vld [vmem:[#allocation6] sm:$0xf]  ;;  %v11157_v14 = vld [vmem:[#allocation6 + $0xc] sm:$0xf0]  ;;  %v9230_v32 = vor.u32 %v11153_v11, %v11151_v10  ;;  %4013 = vmatpush.bf16.msra.mxu1 %v8974_v26 }
  0x53   : > { %v11159_v15 = vld [vmem:[#allocation6 + $0x100] sm:$0xf]  ;;  %v11161_v18 = vld [vmem:[#allocation6 + $0x10c] sm:$0xf0]  ;;  %v8830_v33 = vor.u32 %v11157_v14, %v11155_v13  ;;  %4102 = vmatpush.bf16.msra.mxu2 %v9102_v31  ;;  %v269_v31 = vld [vmem:[%s11133_s8 + $0x78] sm:$0xff] }
  0x54   : > { %v11163_v19 = vld [vmem:[#allocation6 + $0x200] sm:$0xf]  ;;  %v11165_v20 = vld [vmem:[#allocation6 + $0x20c] sm:$0xf0]  ;;  %v8958_v38 = vor.u32 %v11161_v18, %v11159_v15  ;;  %4191 = vmatpush.bf16.msra.mxu3 %v9230_v32 }
  0x55   : > { %v11167_v22 = vld [vmem:[#allocation6 + $0x300] sm:$0xf]  ;;  %v256_v30 = vld [vmem:[%s11133_s8 + $0x10] sm:$0xff]  ;;  %v9086_v44 = vor.u32 %v11165_v20, %v11163_v19  ;;  %3925 = vmatpush.bf16.msra.mxu0 %v8830_v33 }
  0x56   : > { %v254_v23 = vld [vmem:[%s11133_s8] sm:$0xff]  ;;  %v11182_v34 = vld [vmem:[#allocation6 + $0x30c] sm:$0xf0]  ;;  %v383_v42 = vpack.c.bf16 %v257_v36, %v256_v30  ;;  %4014 = vmatpush.bf16.msra.mxu1 %v8958_v38 }
  0x57   : > { %v258_v27 = vld [vmem:[%s11133_s8 + $0x20] sm:$0xff]  ;;  %v382_v29 = vpack.c.bf16 %v255_v24, %v254_v23  ;;  %v260_v37 = vld [vmem:[%s11133_s8 + $0x30] sm:$0xff]  ;;  %v9214_v51 = vor.u32 %v11182_v34, %v11167_v22  ;;  %4103 = vmatpush.bf16.msra.mxu2 %v9086_v44 }
  0x58   : > { %v384_v35 = vpack.c.bf16 %v259_v28, %v258_v27  ;;  %v9709_v43 = vld [vmem:[#allocation6 + $0x6e0] sm:$0xf]  ;;  %v385_v47 = vpack.c.bf16 %v261_v41, %v260_v37  ;;  %v10593_v48 = vld [vmem:[#allocation6 + $0x6ec] sm:$0xf0]  ;;  %v512_v52 = vunpack.c.l.b16 %v383_v42  ;;  %v513_v53 = vunpack.c.h.b16 %v383_v42  ;;  %v265_v27 = vld [vmem:[%s11133_s8 + $0x58] sm:$0xff] }
  0x59   : > { %v510_v39 = vunpack.c.l.b16 %v382_v29  ;;  %v511_v40 = vunpack.c.h.b16 %v382_v29  ;;  %v9453_v49 = vld [vmem:[#allocation6 + $0x4e0] sm:$0xf]  ;;  %v10529_v50 = vld [vmem:[#allocation6 + $0x4ec] sm:$0xf0]  ;;  %v9710_v63 = vor.u32 %v10593_v48, %v9709_v43  ;;  %4192 = vmatpush.bf16.msra.mxu3 %v9214_v51  ;;  %v271_v43 = vld [vmem:[%s11133_s8 + $0x88] sm:$0xff] }
  0x5a   : > { %v514_v45 = vunpack.c.l.b16 %v384_v35  ;;  %v515_v46 = vunpack.c.h.b16 %v384_v35  ;;  %v9837_v54 = vld [vmem:[#allocation6 + $0x7e0] sm:$0xf]  ;;  %v10625_v55 = vld [vmem:[#allocation6 + $0x7ec] sm:$0xf0]  ;;  %v516_v58 = vunpack.c.l.b16 %v385_v47  ;;  %v517_v59 = vunpack.c.h.b16 %v385_v47 }
  0x5b   : > { %v262_v60 = vld [vmem:[%s11133_s8 + $0x40] sm:$0xff]  ;;  %v9454_v0 = vor.u32 %v10529_v50, %v9453_v49  ;;  %v10561_v2 = vld [vmem:[#allocation6 + $0x5ec] sm:$0xf0]  ;;  %v9838_v11 = vor.u32 %v10625_v55, %v9837_v54  ;;  %4452 = vmatpush.bf16.msrb.mxu2 %v9710_v63 }
  0x5c   : > { %v11193_v56 = vpack.c.b16 %v514_v45, %v510_v39  ;;  %v11195_v57 = vpack.c.b16 %v515_v46, %v511_v40  ;;  %v266_v62 = vld [vmem:[%s11133_s8 + $0x60] sm:$0xff]  ;;  %v386_v4 = vpack.c.bf16 %v263_v61, %v262_v60  ;;  %v11205_v9 = vpack.c.b16 %v516_v58, %v512_v52  ;;  %v264_v26 = vld [vmem:[%s11133_s8 + $0x50] sm:$0xff]  ;;  %v275_v45 = vld [vmem:[%s11133_s8 + $0xa8] sm:$0xff] }
  0x5d   : > { %v9581_v1 = vld [vmem:[#allocation6 + $0x5e0] sm:$0xf]  ;;  %v11207_v10 = vpack.c.b16 %v517_v59, %v513_v53  ;;  %v388_v12 = vpack.c.bf16 %v267_v3, %v266_v62  ;;  %4274 = vmatpush.bf16.msrb.mxu0 %v9454_v0  ;;  %4541 = vmatpush.bf16.msrb.mxu3 %v9838_v11  ;;  %v268_v30 = vld [vmem:[%s11133_s8 + $0x70] sm:$0xff]  ;;  %v387_v38 = vpack.c.bf16 %v265_v27, %v264_v26  ;;  %v273_v53 = vld [vmem:[%s11133_s8 + $0x98] sm:$0xff] }
  0x5e   : > { %15080 = vst [vmem:[#allocation13_spill] sm:$0xff] %v11193_v56  ;;  %v14603_v5 = vshrl.u32 %v11193_v56, 16  ;;  %v14616_v6 = vshll.u32 %v11193_v56, 16  ;;  %v14596_v7 = vshrl.u32 %v11195_v57, 16  ;;  %v14615_v8 = vshll.u32 %v11195_v57, 16  ;;  %v270_v39 = vld [vmem:[%s11133_s8 + $0x80] sm:$0xff] }
  0x5f   : > { %15081 = vst [vmem:[#allocation14_spill] sm:$0xff] %v11195_v57  ;;  %v9582_v15 = vor.u32 %v10561_v2, %v9581_v1  ;;  %v518_v16 = vunpack.c.l.b16 %v386_v4  ;;  %v14595_v18 = vshrl.u32 %v11205_v9, 16  ;;  %v14613_v19 = vshll.u32 %v11205_v9, 16  ;;  %v274_v44 = vld [vmem:[%s11133_s8 + $0xa0] sm:$0xff]  ;;  %v272_v52 = vld [vmem:[%s11133_s8 + $0x90] sm:$0xff]  ;;  %v277_v61 = vld [vmem:[%s11133_s8 + $0xb8] sm:$0xff] }
  0x60   : > { %15082 = vst [vmem:[#allocation15_spill] sm:$0xff] %v11205_v9  ;;  %v705_v13 = vrot.slane %v14603_v5, 7  ;;  %v712_v14 = vrot.slane %v14596_v7, 7  ;;  %v14594_v20 = vshrl.u32 %v11207_v10, 16  ;;  %v14604_v21 = vshll.u32 %v11207_v10, 16  ;;  %v276_v60 = vld [vmem:[%s11133_s8 + $0xb0] sm:$0xff] }
  0x61   : > { %15083 = vst [vmem:[#allocation16_spill] sm:$0xff] %v11207_v10  ;;  %v522_v24 = vunpack.c.l.b16 %v388_v12  ;;  %v519_v25 = vunpack.c.h.b16 %v386_v4  ;;  %v719_v28 = vrot.slane %v14595_v18, 7  ;;  %4363 = vmatpush.bf16.msrb.mxu1 %v9582_v15  ;;  %v523_v35 = vunpack.c.h.b16 %v388_v12 }
  0x62   : > { %v708_v22 = vor.u32 %v14616_v6, %v705_v13  ;;  %v715_v23 = vor.u32 %v14615_v8, %v712_v14  ;;  %v726_v29 = vrot.slane %v14594_v20, 7  ;;  %v389_v42 = vpack.c.bf16 %v269_v31, %v268_v30  ;;  %v9405_v6 = vld [vmem:[#allocation6 + $0x480] sm:$0xf] }
  0x63   : > { %v11243_v34 = vpack.c.b16 %v522_v24, %v518_v16  ;;  %v722_v36 = vor.u32 %v14613_v19, %v719_v28  ;;  %v11253_v41 = vpack.c.b16 %v523_v35, %v519_v25  ;;  %v520_v48 = vunpack.c.l.b16 %v387_v38  ;;  %v9661_v19 = vld [vmem:[#allocation6 + $0x680] sm:$0xf] }
  0x64   : > { %v11237_v32 = vsel %vm11215_vm2, 0, %v708_v22  ;;  %v11241_v33 = vsel %vm11215_vm2, 0, %v715_v23  ;;  %v729_v37 = vor.u32 %v14604_v21, %v726_v29  ;;  %v521_v49 = vunpack.c.h.b16 %v387_v38  ;;  %v9437_v38 = vld [vmem:[#allocation6 + $0x4c0] sm:$0xf] }
  0x65   : > { %15086 = vst [vmem:[#allocation17_spill] sm:$0xff] %v11237_v32  ;;  %3926 = vmatmul.bf16.vlgmr.msra.gmra.mxu0 %v11237_v32  ;;  %4015 = vmatmul.bf16.vlgmr.msra.gmra.mxu1 %v11241_v33  ;;  %v14587_v40 = vshrl.u32 %v11243_v34, 16  ;;  %v11260_v46 = vsel %vm11215_vm2, 0, %v722_v36  ;;  %v14586_v50 = vshrl.u32 %v11253_v41, 16  ;;  %v524_v51 = vunpack.c.l.b16 %v389_v42  ;;  %v9693_v36 = vld [vmem:[#allocation6 + $0x6c0] sm:$0xf] }
  0x66   : > { %15087 = vst [vmem:[#allocation18_spill] sm:$0xff] %v11241_v33  ;;  %v11264_v47 = vsel %vm11215_vm2, 0, %v729_v37  ;;  %4104 = vmatmul.bf16.vlgmr.msra.gmra.mxu2 %v11260_v46  ;;  %v14591_v54 = vshll.u32 %v11243_v34, 16  ;;  %v525_v55 = vunpack.c.h.b16 %v389_v42  ;;  %v390_v58 = vpack.c.bf16 %v271_v43, %v270_v39  ;;  %v10589_v37 = vld [vmem:[#allocation6 + $0x6cc] sm:$0xf0] }
  0x67   : > { %15088 = vst [vmem:[#allocation19_spill] sm:$0xff] %v11243_v34  ;;  %4193 = vmatmul.bf16.vlgmr.msra.gmra.mxu3 %v11264_v47  ;;  %v392_v59 = vpack.c.bf16 %v275_v45, %v274_v44  ;;  %v733_v62 = vrot.slane %v14587_v40, 7  ;;  %v740_v63 = vrot.slane %v14586_v50, 7  ;;  %v14590_v0 = vshll.u32 %v11253_v41, 16  ;;  %v10525_v44 = vld [vmem:[#allocation6 + $0x4cc] sm:$0xf0] }
  0x68   : > { %15089 = vst [vmem:[#allocation20_spill] sm:$0xff] %v11253_v41  ;;  %v11279_v1 = vpack.c.b16 %v524_v51, %v520_v48  ;;  %v11281_v2 = vpack.c.b16 %v525_v55, %v521_v49  ;;  %v526_v3 = vunpack.c.l.b16 %v390_v58  ;;  %v391_v11 = vpack.c.bf16 %v273_v53, %v272_v52  ;;  %v9821_v45 = vld [vmem:[#allocation6 + $0x7c0] sm:$0xf]  ;;  %v10621_v48 = vld [vmem:[#allocation6 + $0x7cc] sm:$0xf0] }
  0x69   : > { %15090 = vst [vmem:[#allocation21_spill] sm:$0xff] %v11260_v46  ;;  %v530_v4 = vunpack.c.l.b16 %v392_v59  ;;  %v527_v14 = vunpack.c.h.b16 %v390_v58  ;;  %v393_v15 = vpack.c.bf16 %v277_v61, %v276_v60  ;;  %v531_v23 = vunpack.c.h.b16 %v392_v59  ;;  %v9565_v52 = vld [vmem:[#allocation6 + $0x5c0] sm:$0xf]  ;;  %v10557_v53 = vld [vmem:[#allocation6 + $0x5cc] sm:$0xf0] }
  0x6a   : > { %15091 = vst [vmem:[#allocation22_spill] sm:$0xff] %v11264_v47  ;;  %v14585_v12 = vshrl.u32 %v11279_v1, 16  ;;  %v14589_v13 = vshll.u32 %v11279_v1, 16  ;;  %v14584_v16 = vshrl.u32 %v11281_v2, 16  ;;  %v14588_v22 = vshll.u32 %v11281_v2, 16 }
  0x6b   : > { %15092 = vst [vmem:[#allocation23_spill] sm:$0xff] %v11279_v1  ;;  %v736_v24 = vor.u32 %v14591_v54, %v733_v62  ;;  %v743_v25 = vor.u32 %v14590_v0, %v740_v63  ;;  %v11295_v28 = vpack.c.b16 %v530_v4, %v526_v3  ;;  %v11299_v30 = vpack.c.b16 %v531_v23, %v527_v14  ;;  %v278_v14 = vld [vmem:[%s11133_s8 + $0xc0] sm:$0xff] }
  0x6c   : > { %15093 = vst [vmem:[#allocation24_spill] sm:$0xff] %v11281_v2  ;;  %v747_v26 = vrot.slane %v14585_v12, 7  ;;  %v754_v27 = vrot.slane %v14584_v16, 7  ;;  %v528_v31 = vunpack.c.l.b16 %v391_v11  ;;  %v532_v35 = vunpack.c.l.b16 %v393_v15  ;;  %v282_v23 = vld [vmem:[%s11133_s8 + $0xe0] sm:$0xff] }
  0x6d   : > { %15094 = vst [vmem:[#allocation25_spill] sm:$0xff] %v11295_v28  ;;  %v529_v42 = vunpack.c.h.b16 %v391_v11  ;;  %v533_v43 = vunpack.c.h.b16 %v393_v15  ;;  %v11305_v49 = vsel %vm11215_vm2, 0, %v736_v24  ;;  %v11309_v51 = vsel %vm11215_vm2, 0, %v743_v25  ;;  %v279_v15 = vld [vmem:[%s11133_s8 + $0xc8] sm:$0xff]  ;;  %v9421_v16 = vld [vmem:[#allocation6 + $0x4a0] sm:$0xf] }
  0x6e   : > { %v750_v29 = vor.u32 %v14589_v13, %v747_v26  ;;  %15095 = vst [vmem:[#allocation26_spill] sm:$0xff] %v11299_v30  ;;  %v757_v39 = vor.u32 %v14588_v22, %v754_v27  ;;  %v14579_v55 = vshrl.u32 %v11295_v28, 16  ;;  %v9694_v58 = vor.u32 %v10589_v37, %v9693_v36  ;;  %v283_v24 = vld [vmem:[%s11133_s8 + $0xe8] sm:$0xff]  ;;  %v280_v27 = vld [vmem:[%s11133_s8 + $0xd0] sm:$0xff]  ;;  %v9549_v13 = vld [vmem:[#allocation6 + $0x5a0] sm:$0xf] }
  0x6f   : > { %15096 = vst [vmem:[#allocation27_spill] sm:$0xff] %v11305_v49  ;;  %v14578_v60 = vshrl.u32 %v11299_v30, 16  ;;  %v11317_v61 = vpack.c.b16 %v532_v35, %v528_v31  ;;  %v9438_v62 = vor.u32 %v10525_v44, %v9437_v38  ;;  %v11325_v3 = vpack.c.b16 %v533_v43, %v529_v42  ;;  %v284_v38 = vld [vmem:[%s11133_s8 + $0xf0] sm:$0xff] }
  0x70   : > { %15097 = vst [vmem:[#allocation28_spill] sm:$0xff] %v11309_v51  ;;  %v11314_v59 = vsel %vm11215_vm2, 0, %v750_v29  ;;  %v11323_v63 = vsel %vm11215_vm2, 0, %v757_v39  ;;  %v9822_v4 = vor.u32 %v10621_v48, %v9821_v45  ;;  %v9566_v11 = vor.u32 %v10557_v53, %v9565_v52  ;;  %4453 = vmatpush.bf16.msrb.mxu2 %v9694_v58  ;;  %v281_v29 = vld [vmem:[%s11133_s8 + $0xd8] sm:$0xff]  ;;  %v10617_v22 = vld [vmem:[#allocation6 + $0x7ac] sm:$0xf0] }
  0x71   : > { %15098 = vst [vmem:[#allocation29_spill] sm:$0xff] %v11314_v59  ;;  %4275 = vmatpush.bf16.msrb.mxu0 %v9438_v62  ;;  %v761_v25 = vrot.slane %v14579_v55, 7  ;;  %v14583_v26 = vshll.u32 %v11295_v28, 16  ;;  %v768_v31 = vrot.slane %v14578_v60, 7  ;;  %v14582_v35 = vshll.u32 %v11299_v30, 16  ;;  %v285_v39 = vld [vmem:[%s11133_s8 + $0xf8] sm:$0xff] }
  0x72   : > { %15099 = vst [vmem:[#allocation30_spill] sm:$0xff] %v11317_v61  ;;  %4542 = vmatpush.bf16.msrb.mxu3 %v9822_v4  ;;  %4364 = vmatpush.bf16.msrb.mxu1 %v9566_v11  ;;  %v14577_v36 = vshrl.u32 %v11317_v61, 16  ;;  %v14576_v37 = vshrl.u32 %v11325_v3, 16  ;;  %v394_v42 = vpack.c.bf16 %v279_v15, %v278_v14  ;;  %v396_v43 = vpack.c.bf16 %v283_v24, %v282_v23  ;;  %v10585_v60 = vld [vmem:[#allocation6 + $0x6ac] sm:$0xf0] }
  0x73   : > { %15100 = vst [vmem:[#allocation31_spill] sm:$0xff] %v11323_v63  ;;  %v764_v44 = vor.u32 %v14583_v26, %v761_v25  ;;  %v14581_v45 = vshll.u32 %v11317_v61, 16  ;;  %v395_v48 = vpack.c.bf16 %v281_v29, %v280_v27  ;;  %v397_v52 = vpack.c.bf16 %v285_v39, %v284_v38 }
  0x74   : > { %15101 = vst [vmem:[#allocation32_spill] sm:$0xff] %v11325_v3  ;;  %v771_v53 = vor.u32 %v14582_v35, %v768_v31  ;;  %v775_v58 = vrot.slane %v14577_v36, 7  ;;  %v782_v62 = vrot.slane %v14576_v37, 7  ;;  %v14580_v4 = vshll.u32 %v11325_v3, 16  ;;  %v293_v35 = vld [vmem:[%s11133_s8 + $0x138] sm:$0xff] }
  0x75   : > { %3931 = vmatmul.bf16.gmra.mxu0 %v11305_v49  ;;  %4020 = vmatmul.bf16.gmra.mxu1 %v11309_v51  ;;  %v534_v11 = vunpack.c.l.b16 %v394_v42  ;;  %v538_v14 = vunpack.c.l.b16 %v396_v43  ;;  %v535_v15 = vunpack.c.h.b16 %v394_v42  ;;  %v539_v23 = vunpack.c.h.b16 %v396_v43 }
  0x76   : > { %4109 = vmatmul.bf16.gmra.mxu2 %v11314_v59  ;;  %v536_v24 = vunpack.c.l.b16 %v395_v48  ;;  %v540_v25 = vunpack.c.l.b16 %v397_v52  ;;  %v778_v27 = vor.u32 %v14581_v45, %v775_v58  ;;  %v785_v29 = vor.u32 %v14580_v4, %v782_v62  ;;  %v286_v62 = vld [vmem:[%s11133_s8 + $0x100] sm:$0xff] }
  0x77   : > { %4198 = vmatmul.bf16.gmra.mxu3 %v11323_v63  ;;  %v537_v31 = vunpack.c.h.b16 %v395_v48  ;;  %v541_v38 = vunpack.c.h.b16 %v397_v52  ;;  %v11361_v39 = vsel %vm11215_vm2, 0, %v764_v44  ;;  %v11365_v42 = vsel %vm11215_vm2, 0, %v771_v53  ;;  %v287_v53 = vld [vmem:[%s11133_s8 + $0x108] sm:$0xff] }
  0x78   : > { %15102 = vst [vmem:[#allocation33_spill] sm:$0xff] %v11361_v39  ;;  %v11367_v43 = vpack.c.b16 %v538_v14, %v534_v11  ;;  %v11369_v58 = vpack.c.b16 %v539_v23, %v535_v15  ;;  %v11371_v37 = vpack.c.b16 %v540_v25, %v536_v24  ;;  %v11378_v44 = vsel %vm11215_vm2, 0, %v778_v27  ;;  %v290_v11 = vld [vmem:[%s11133_s8 + $0x120] sm:$0xff]  ;;  %v291_v14 = vld [vmem:[%s11133_s8 + $0x128] sm:$0xff]  ;;  %v288_v24 = vld [vmem:[%s11133_s8 + $0x110] sm:$0xff] }
  0x79   : > { %15103 = vst [vmem:[#allocation34_spill] sm:$0xff] %v11365_v42  ;;  %v11382_v48 = vsel %vm11215_vm2, 0, %v785_v29  ;;  %v11384_v52 = vpack.c.b16 %v541_v38, %v537_v31  ;;  %v289_v25 = vld [vmem:[%s11133_s8 + $0x118] sm:$0xff]  ;;  %v398_v29 = vpack.c.bf16 %v287_v53, %v286_v62  ;;  %v400_v36 = vpack.c.bf16 %v291_v14, %v290_v11  ;;  %v292_v31 = vld [vmem:[%s11133_s8 + $0x130] sm:$0xff]  ;;  %v9677_v38 = vld [vmem:[#allocation6 + $0x6a0] sm:$0xf] }
  0x7a   : > { %15104 = vst [vmem:[#allocation35_spill] sm:$0xff] %v11367_v43  ;;  %v14592_v15 = vshrl.u32 %v11367_v43, 16  ;;  %v14593_v23 = vshrl.u32 %v11369_v58, 16  ;;  %v14598_v27 = vshrl.u32 %v11371_v37, 16  ;;  %v14602_v55 = vshll.u32 %v11367_v43, 16 }
  0x7b   : > { %15105 = vst [vmem:[#allocation36_spill] sm:$0xff] %v11369_v58  ;;  %v14601_v4 = vshll.u32 %v11369_v58, 16  ;;  %v14597_v45 = vshrl.u32 %v11384_v52, 16  ;;  %v9678_v26 = vor.u32 %v10585_v60, %v9677_v38  ;;  %v10521_v62 = vld [vmem:[#allocation6 + $0x4ac] sm:$0xf0]  ;;  %v14600_v11 = vshll.u32 %v11371_v37, 16 }
  0x7c   : > { %15106 = vst [vmem:[#allocation37_spill] sm:$0xff] %v11371_v37  ;;  %v789_v12 = vrot.slane %v14592_v15, 7  ;;  %v796_v50 = vrot.slane %v14593_v23, 7  ;;  %v9805_v53 = vld [vmem:[#allocation6 + $0x7a0] sm:$0xf]  ;;  %v399_v14 = vpack.c.bf16 %v289_v25, %v288_v24  ;;  %v9422_v40 = vor.u32 %v10521_v62, %v9421_v16 }
  0x7d   : > { %15107 = vst [vmem:[#allocation38_spill] sm:$0xff] %v11378_v44  ;;  %4454 = vmatpush.bf16.msrb.mxu2 %v9678_v26  ;;  %v803_v0 = vrot.slane %v14598_v27, 7  ;;  %v14599_v60 = vshll.u32 %v11384_v52, 16  ;;  %v542_v38 = vunpack.c.l.b16 %v398_v29  ;;  %v9806_v54 = vor.u32 %v10617_v22, %v9805_v53  ;;  %v10553_v15 = vld [vmem:[#allocation6 + $0x5ac] sm:$0xf0] }
  0x7e   : > { %15108 = vst [vmem:[#allocation39_spill] sm:$0xff] %v11382_v48  ;;  %v810_v23 = vrot.slane %v14597_v45, 7  ;;  %v546_v20 = vunpack.c.l.b16 %v400_v36  ;;  %v401_v18 = vpack.c.bf16 %v293_v35, %v292_v31  ;;  %4276 = vmatpush.bf16.msrb.mxu0 %v9422_v40  ;;  %v9550_v7 = vor.u32 %v10553_v15, %v9549_v13  ;;  %v299_v31 = vld [vmem:[%s11133_s8 + $0x168] sm:$0xff]  ;;  %v301_v45 = vld [vmem:[%s11133_s8 + $0x178] sm:$0xff] }
  0x7f   : > { %15109 = vst [vmem:[#allocation40_spill] sm:$0xff] %v11384_v52  ;;  %v792_v16 = vor.u32 %v14602_v55, %v789_v12  ;;  %v799_v26 = vor.u32 %v14601_v4, %v796_v50  ;;  %v543_v24 = vunpack.c.h.b16 %v398_v29  ;;  %v547_v25 = vunpack.c.h.b16 %v400_v36  ;;  %4543 = vmatpush.bf16.msrb.mxu3 %v9806_v54  ;;  %v295_v29 = vld [vmem:[%s11133_s8 + $0x148] sm:$0xff] }
  0x80   : > { %4365 = vmatpush.bf16.msrb.mxu1 %v9550_v7  ;;  %v806_v22 = vor.u32 %v14600_v11, %v803_v0  ;;  %v544_v35 = vunpack.c.l.b16 %v399_v14  ;;  %v813_v40 = vor.u32 %v14599_v60, %v810_v23  ;;  %v548_v13 = vunpack.c.l.b16 %v401_v18  ;;  %v294_v0 = vld [vmem:[%s11133_s8 + $0x140] sm:$0xff] }
  0x81   : > { %v545_v12 = vunpack.c.h.b16 %v399_v14  ;;  %v549_v15 = vunpack.c.h.b16 %v401_v18  ;;  %v11421_v50 = vsel %vm11215_vm2, 0, %v792_v16  ;;  %v11425_v36 = vsel %vm11215_vm2, 0, %v799_v26  ;;  %v298_v23 = vld [vmem:[%s11133_s8 + $0x160] sm:$0xff] }
  0x82   : > { %15110 = vst [vmem:[#allocation41_spill] sm:$0xff] %v11421_v50  ;;  %v11427_v54 = vpack.c.b16 %v546_v20, %v542_v38  ;;  %v11429_v7 = vpack.c.b16 %v547_v25, %v543_v24  ;;  %v11439_v18 = vsel %vm11215_vm2, 0, %v806_v22  ;;  %v11443_v20 = vsel %vm11215_vm2, 0, %v813_v40  ;;  %v296_v24 = vld [vmem:[%s11133_s8 + $0x150] sm:$0xff]  ;;  %v297_v25 = vld [vmem:[%s11133_s8 + $0x158] sm:$0xff] }
  0x83   : > { %15111 = vst [vmem:[#allocation42_spill] sm:$0xff] %v11425_v36  ;;  %v11445_v62 = vpack.c.b16 %v548_v13, %v544_v35  ;;  %v11447_v53 = vpack.c.b16 %v549_v15, %v545_v12  ;;  %v402_v16 = vpack.c.bf16 %v295_v29, %v294_v0  ;;  %v404_v26 = vpack.c.bf16 %v299_v31, %v298_v23  ;;  %v300_v22 = vld [vmem:[%s11133_s8 + $0x170] sm:$0xff] }
  0x84   : > { %15112 = vst [vmem:[#allocation43_spill] sm:$0xff] %v11427_v54  ;;  %v14605_v14 = vshrl.u32 %v11427_v54, 16  ;;  %v14606_v38 = vshrl.u32 %v11429_v7, 16  ;;  %v14612_v40 = vshll.u32 %v11427_v54, 16  ;;  %v14611_v35 = vshll.u32 %v11429_v7, 16 }
  0x85   : > { %3936 = vmatmul.bf16.gmra.mxu0 %v11361_v39  ;;  %4025 = vmatmul.bf16.gmra.mxu1 %v11365_v42  ;;  %15113 = vst [vmem:[#allocation44_spill] sm:$0xff] %v11429_v7  ;;  %v14608_v13 = vshrl.u32 %v11445_v62, 16  ;;  %v14607_v12 = vshrl.u32 %v11447_v53, 16  ;;  %v550_v29 = vunpack.c.l.b16 %v402_v16  ;;  %v551_v23 = vunpack.c.h.b16 %v402_v16  ;;  %v9773_v42 = vld [vmem:[#allocation6 + $0x760] sm:$0xf] }
  0x86   : > { %4114 = vmatmul.bf16.gmra.mxu2 %v11378_v44  ;;  %15114 = vst [vmem:[#allocation45_spill] sm:$0xff] %v11439_v18  ;;  %v817_v15 = vrot.slane %v14605_v14, 7  ;;  %v824_v0 = vrot.slane %v14606_v38, 7  ;;  %v554_v31 = vunpack.c.l.b16 %v404_v26  ;;  %v555_v27 = vunpack.c.h.b16 %v404_v26 }
  0x87   : > { %4203 = vmatmul.bf16.gmra.mxu3 %v11382_v48  ;;  %15115 = vst [vmem:[#allocation46_spill] sm:$0xff] %v11443_v20  ;;  %v403_v60 = vpack.c.bf16 %v297_v25, %v296_v24  ;;  %v405_v11 = vpack.c.bf16 %v301_v45, %v300_v22  ;;  %v831_v4 = vrot.slane %v14608_v13, 7  ;;  %v14610_v55 = vshll.u32 %v11445_v62, 16 }
  0x88   : > { %15116 = vst [vmem:[#allocation47_spill] sm:$0xff] %v11445_v62  ;;  %v838_v5 = vrot.slane %v14607_v12, 7  ;;  %v14609_v21 = vshll.u32 %v11447_v53, 16  ;;  %v820_v14 = vor.u32 %v14612_v40, %v817_v15  ;;  %v827_v16 = vor.u32 %v14611_v35, %v824_v0  ;;  %v308_v35 = vld [vmem:[%s11133_s8 + $0x1b0] sm:$0xff]  ;;  %v309_v40 = vld [vmem:[%s11133_s8 + $0x1b8] sm:$0xff] }
  0x89   : > { %15117 = vst [vmem:[#allocation48_spill] sm:$0xff] %v11447_v53  ;;  %v11475_v38 = vpack.c.b16 %v554_v31, %v550_v29  ;;  %v11477_v26 = vpack.c.b16 %v555_v27, %v551_v23  ;;  %v552_v45 = vunpack.c.l.b16 %v403_v60  ;;  %v556_v24 = vunpack.c.l.b16 %v405_v11  ;;  %v302_v31 = vld [vmem:[%s11133_s8 + $0x180] sm:$0xff] }
  0x8a   : > { %v553_v25 = vunpack.c.h.b16 %v403_v60  ;;  %v557_v22 = vunpack.c.h.b16 %v405_v11  ;;  %v834_v12 = vor.u32 %v14610_v55, %v831_v4  ;;  %v841_v13 = vor.u32 %v14609_v21, %v838_v5  ;;  %v304_v21 = vld [vmem:[%s11133_s8 + $0x190] sm:$0xff]  ;;  %v305_v55 = vld [vmem:[%s11133_s8 + $0x198] sm:$0xff]  ;;  %v9789_v23 = vld [vmem:[#allocation6 + $0x780] sm:$0xf] }
  0x8b   : > { %15118 = vst [vmem:[#allocation49_spill] sm:$0xff] %v11475_v38  ;;  %v11485_v15 = vsel %vm11215_vm2, 0, %v820_v14  ;;  %v11489_v27 = vsel %vm11215_vm2, 0, %v827_v16  ;;  %v14614_v60 = vshrl.u32 %v11475_v38, 16  ;;  %v14617_v11 = vshrl.u32 %v11477_v26, 16 }
  0x8c   : > { %15119 = vst [vmem:[#allocation50_spill] sm:$0xff] %v11477_v26  ;;  %v11493_v0 = vpack.c.b16 %v556_v24, %v552_v45  ;;  %v11495_v4 = vpack.c.b16 %v557_v22, %v553_v25  ;;  %v11501_v5 = vsel %vm11215_vm2, 0, %v834_v12  ;;  %v11505_v14 = vsel %vm11215_vm2, 0, %v841_v13  ;;  %v303_v24 = vld [vmem:[%s11133_s8 + $0x188] sm:$0xff]  ;;  %v306_v25 = vld [vmem:[%s11133_s8 + $0x1a0] sm:$0xff] }
  0x8d   : > { %15120 = vst [vmem:[#allocation51_spill] sm:$0xff] %v11485_v15  ;;  %v845_v16 = vrot.slane %v14614_v60, 7  ;;  %v852_v45 = vrot.slane %v14617_v11, 7  ;;  %v307_v22 = vld [vmem:[%s11133_s8 + $0x1a8] sm:$0xff]  ;;  %v10581_v60 = vld [vmem:[#allocation6 + $0x68c] sm:$0xf0]  ;;  %v406_v12 = vpack.c.bf16 %v303_v24, %v302_v31  ;;  %v407_v24 = vpack.c.bf16 %v305_v55, %v304_v21 }
  0x8e   : > { %15121 = vst [vmem:[#allocation52_spill] sm:$0xff] %v11489_v27  ;;  %v9662_v8 = vor.u32 %v10581_v60, %v9661_v19  ;;  %v10517_v11 = vld [vmem:[#allocation6 + $0x48c] sm:$0xf0]  ;;  %v408_v29 = vpack.c.bf16 %v307_v22, %v306_v25  ;;  %v15127_v48 = vshrl.u32 %v11493_v0, 16  ;;  %v15128_v60 = vshrl.u32 %v11495_v4, 16  ;;  %v311_v22 = vld [vmem:[%s11133_s8 + $0x1c8] sm:$0xff] }
  0x8f   : > { %15122 = vst [vmem:[#allocation53_spill] sm:$0xff] %v11493_v0  ;;  %v14638_v31 = vshll.u32 %v11495_v4, 16  ;;  %v409_v25 = vpack.c.bf16 %v309_v40, %v308_v35  ;;  %v561_v21 = vunpack.c.h.b16 %v407_v24 }
  0x90   : > { %15123 = vst [vmem:[#allocation54_spill] sm:$0xff] %v11495_v4  ;;  %4455 = vmatpush.bf16.msrb.mxu2 %v9662_v8  ;;  %v859_v19 = vrot.slane %v15127_v48, 7  ;;  %v866_v44 = vrot.slane %v15128_v60, 7  ;;  %v558_v8 = vunpack.c.l.b16 %v406_v12 }
  0x91   : > { %15124 = vst [vmem:[#allocation55_spill] sm:$0xff] %v11501_v5  ;;  %v565_v55 = vunpack.c.h.b16 %v409_v25 }
  0x92   : > { %15125 = vst [vmem:[#allocation56_spill] sm:$0xff] %v11505_v14 }
  0x95   : > { %3941 = vmatmul.bf16.gmra.mxu0 %v11421_v50  ;;  %4030 = vmatmul.bf16.gmra.mxu1 %v11425_v36  ;;  %v15126_v36 = vshll.u32 %v11475_v38, 16 }
  0x96   : > { %4119 = vmatmul.bf16.gmra.mxu2 %v11439_v18 }
  0x97   : > { %4208 = vmatmul.bf16.gmra.mxu3 %v11443_v20  ;;  %v9533_v20 = vld [vmem:[#allocation6 + $0x580] sm:$0xf]  ;;  %v848_v50 = vor.u32 %v15126_v36, %v845_v16  ;;  %v559_v36 = vunpack.c.h.b16 %v406_v12  ;;  %v11564_v12 = vpack.c.b16 %v565_v55, %v561_v21 }
  0x99   : > { %15137 = vst [vmem:[#allocation64_spill] sm:$0xff] %v11564_v12 }
  0xa5   : > { %3946 = vmatmul.bf16.gmra.mxu0 %v11485_v15  ;;  %4035 = vmatmul.bf16.gmra.mxu1 %v11489_v27  ;;  %v9406_v27 = vor.u32 %v10517_v11, %v9405_v6  ;;  %v10613_v15 = vld [vmem:[#allocation6 + $0x78c] sm:$0xf0]  ;;  %v15129_v6 = vshll.u32 %v11477_v26, 16 }
  0xa6   : > { %4124 = vmatmul.bf16.gmra.mxu2 %v11501_v5  ;;  %v10549_v5 = vld [vmem:[#allocation6 + $0x58c] sm:$0xf0]  ;;  %v9790_v13 = vor.u32 %v10613_v15, %v9789_v23  ;;  %v563_v15 = vunpack.c.h.b16 %v408_v29  ;;  %v564_v23 = vunpack.c.l.b16 %v409_v25 }
  0xa7   : > { %4213 = vmatmul.bf16.gmra.mxu3 %v11505_v14  ;;  %v14639_v14 = vshll.u32 %v11493_v0, 16  ;;  %v9534_v18 = vor.u32 %v10549_v5, %v9533_v20  ;;  %4277 = vmatpush.bf16.msrb.mxu0 %v9406_v27  ;;  %v855_v11 = vor.u32 %v15129_v6, %v852_v45  ;;  %v562_v20 = vunpack.c.l.b16 %v408_v29 }
  0xa8   : > { %4544 = vmatpush.bf16.msrb.mxu3 %v9790_v13  ;;  %v869_v5 = vor.u32 %v14638_v31, %v866_v44  ;;  %v560_v27 = vunpack.c.l.b16 %v407_v24  ;;  %v11549_v29 = vpack.c.b16 %v563_v15, %v559_v36  ;;  %v310_v44 = vld [vmem:[%s11133_s8 + $0x1c0] sm:$0xff]  ;;  %v317_v36 = vld [vmem:[%s11133_s8 + $0x1f8] sm:$0xff] }
  0xa9   : > { %4366 = vmatpush.bf16.msrb.mxu1 %v9534_v18  ;;  %v862_v48 = vor.u32 %v14639_v14, %v859_v19  ;;  %v11541_v18 = vsel %vm11215_vm2, 0, %v848_v50  ;;  %v11545_v40 = vsel %vm11215_vm2, 0, %v855_v11  ;;  %v11547_v35 = vpack.c.b16 %v562_v20, %v558_v8  ;;  %v314_v13 = vld [vmem:[%s11133_s8 + $0x1e0] sm:$0xff]  ;;  %v315_v19 = vld [vmem:[%s11133_s8 + $0x1e8] sm:$0xff]  ;;  %v312_v11 = vld [vmem:[%s11133_s8 + $0x1d0] sm:$0xff] }
  0xaa   : > { %15130 = vst [vmem:[#allocation57_spill] sm:$0xff] %v11541_v18  ;;  %v11560_v16 = vsel %vm11215_vm2, 0, %v869_v5  ;;  %v11562_v45 = vpack.c.b16 %v564_v23, %v560_v27  ;;  %v14643_v6 = vshrl.u32 %v11549_v29, 16  ;;  %v410_v24 = vpack.c.bf16 %v311_v22, %v310_v44  ;;  %v313_v8 = vld [vmem:[%s11133_s8 + $0x1d8] sm:$0xff]  ;;  %v316_v20 = vld [vmem:[%s11133_s8 + $0x1f0] sm:$0xff] }
  0xab   : > { %15131 = vst [vmem:[#allocation58_spill] sm:$0xff] %v11545_v40  ;;  %v11556_v50 = vsel %vm11215_vm2, 0, %v862_v48  ;;  %v14640_v60 = vshrl.u32 %v11547_v35, 16  ;;  %v412_v25 = vpack.c.bf16 %v315_v19, %v314_v13  ;;  %v14649_v48 = vshrl.u32 %v11564_v12, 16 }
  0xac   : > { %15132 = vst [vmem:[#allocation59_spill] sm:$0xff] %v11547_v35  ;;  %v14646_v15 = vshrl.u32 %v11562_v45, 16  ;;  %v880_v23 = vrot.slane %v14643_v6, 7  ;;  %v14650_v21 = vshll.u32 %v11549_v29, 16  ;;  %v411_v55 = vpack.c.bf16 %v313_v8, %v312_v11 }
  0xad   : > { %15133 = vst [vmem:[#allocation60_spill] sm:$0xff] %v11549_v29  ;;  %v873_v5 = vrot.slane %v14640_v60, 7  ;;  %v413_v44 = vpack.c.bf16 %v317_v36, %v316_v20  ;;  %v566_v19 = vunpack.c.l.b16 %v410_v24  ;;  %v570_v31 = vunpack.c.l.b16 %v412_v25 }
  0xae   : > { %15134 = vst [vmem:[#allocation61_spill] sm:$0xff] %v11556_v50  ;;  %v887_v14 = vrot.slane %v14646_v15, 7  ;;  %v894_v60 = vrot.slane %v14649_v48, 7  ;;  %v567_v27 = vunpack.c.h.b16 %v410_v24  ;;  %v15138_v6 = vshll.u32 %v11547_v35, 16 }
  0xaf   : > { %15135 = vst [vmem:[#allocation62_spill] sm:$0xff] %v11560_v16  ;;  %v883_v11 = vor.u32 %v14650_v21, %v880_v23  ;;  %v568_v8 = vunpack.c.l.b16 %v411_v55  ;;  %v572_v20 = vunpack.c.l.b16 %v413_v44  ;;  %v569_v36 = vunpack.c.h.b16 %v411_v55  ;;  %v10513_v55 = vld [vmem:[#allocation6 + $0x46c] sm:$0xf0] }
  0xb0   : > { %15136 = vst [vmem:[#allocation63_spill] sm:$0xff] %v11562_v45  ;;  %v573_v13 = vunpack.c.h.b16 %v413_v44  ;;  %v11595_v22 = vpack.c.b16 %v570_v31, %v566_v19  ;;  %v15140_v15 = vshll.u32 %v11562_v45, 16  ;;  %v15141_v48 = vshll.u32 %v11564_v12, 16  ;;  %v322_v19 = vld [vmem:[%s11133_s8 + $0x220] sm:$0xff] }
  0xb1   : > { %v11611_v31 = vpack.c.b16 %v572_v20, %v568_v8  ;;  %v320_v8 = vld [vmem:[%s11133_s8 + $0x210] sm:$0xff]  ;;  %v321_v20 = vld [vmem:[%s11133_s8 + $0x218] sm:$0xff]  ;;  %v9389_v44 = vld [vmem:[#allocation6 + $0x460] sm:$0xf] }
  0xb2   : > { %15139 = vst [vmem:[#allocation65_spill] sm:$0xff] %v11595_v22  ;;  %v897_v24 = vor.u32 %v15141_v48, %v894_v60  ;;  %v11613_v23 = vpack.c.b16 %v573_v13, %v569_v36  ;;  %v318_v48 = vld [vmem:[%s11133_s8 + $0x200] sm:$0xff]  ;;  %v319_v13 = vld [vmem:[%s11133_s8 + $0x208] sm:$0xff] }
  0xb3   : > { %15145 = vst [vmem:[#allocation69_spill] sm:$0xff] %v11611_v31  ;;  %v9645_v36 = vld [vmem:[#allocation6 + $0x660] sm:$0xf]  ;;  %v14674_v59 = vshll.u32 %v11611_v31, 16 }
  0xb4   : > { %15146 = vst [vmem:[#allocation70_spill] sm:$0xff] %v11613_v23  ;;  %v15150_v51 = vshrl.u32 %v11613_v23, 16 }
  0xb5   : > { %3951 = vmatmul.bf16.gmra.mxu0 %v11541_v18  ;;  %4040 = vmatmul.bf16.gmra.mxu1 %v11545_v40  ;;  %v890_v40 = vor.u32 %v15140_v15, %v887_v14  ;;  %v14665_v14 = vshrl.u32 %v11595_v22, 16  ;;  %v325_v18 = vld [vmem:[%s11133_s8 + $0x238] sm:$0xff] }
  0xb6   : > { %4129 = vmatmul.bf16.gmra.mxu2 %v11556_v50  ;;  %v876_v50 = vor.u32 %v15138_v6, %v873_v5  ;;  %v11609_v5 = vsel %vm11215_vm2, 0, %v883_v11 }
  0xb7   : > { %4218 = vmatmul.bf16.gmra.mxu3 %v11560_v16  ;;  %v571_v16 = vunpack.c.h.b16 %v412_v25  ;;  %15144 = vst [vmem:[#allocation68_spill] sm:$0xff] %v11609_v5  ;;  %v901_v11 = vrot.slane %v14665_v14, 7  ;;  %v15149_v14 = vshrl.u32 %v11611_v31, 16 }
  0xb8   : > { %v11605_v6 = vsel %vm11215_vm2, 0, %v876_v50  ;;  %v11620_v50 = vsel %vm11215_vm2, 0, %v890_v40  ;;  %v323_v40 = vld [vmem:[%s11133_s8 + $0x228] sm:$0xff] }
  0xb9   : > { %v11601_v25 = vpack.c.b16 %v571_v16, %v567_v27  ;;  %15143 = vst [vmem:[#allocation67_spill] sm:$0xff] %v11605_v6  ;;  %v11624_v16 = vsel %vm11215_vm2, 0, %v897_v24  ;;  %v10577_v24 = vld [vmem:[#allocation6 + $0x66c] sm:$0xf0]  ;;  %v915_v63 = vrot.slane %v15149_v14, 7 }
  0xba   : > { %15147 = vst [vmem:[#allocation71_spill] sm:$0xff] %v11620_v50  ;;  %v324_v27 = vld [vmem:[%s11133_s8 + $0x230] sm:$0xff]  ;;  %v9646_v15 = vor.u32 %v10577_v24, %v9645_v36  ;;  %v14673_v36 = vshll.u32 %v11613_v23, 16  ;;  %v9517_v24 = vld [vmem:[#allocation6 + $0x560] sm:$0xf] }
  0xbb   : > { %15142 = vst [vmem:[#allocation66_spill] sm:$0xff] %v11601_v25  ;;  %v14672_v60 = vshrl.u32 %v11601_v25, 16 }
  0xbc   : > { %15148 = vst [vmem:[#allocation72_spill] sm:$0xff] %v11624_v16  ;;  %4456 = vmatpush.bf16.msrb.mxu2 %v9646_v15  ;;  %v417_v15 = vpack.c.bf16 %v325_v18, %v324_v27 }
  0xbd   : > { %v908_v21 = vrot.slane %v14672_v60, 7  ;;  %v922_v60 = vrot.slane %v15150_v51, 7  ;;  %v10545_v51 = vld [vmem:[#allocation6 + $0x56c] sm:$0xf0] }
  0xbe   : > { %v580_v18 = vunpack.c.l.b16 %v417_v15  ;;  %v581_v27 = vunpack.c.h.b16 %v417_v15 }
  0xc5   : > { %3956 = vmatmul.bf16.gmra.mxu0 %v11605_v6  ;;  %4045 = vmatmul.bf16.gmra.mxu1 %v11609_v5  ;;  %v414_v5 = vpack.c.bf16 %v319_v13, %v318_v48  ;;  %v416_v6 = vpack.c.bf16 %v323_v40, %v322_v19  ;;  %v15151_v48 = vshll.u32 %v11595_v22, 16  ;;  %v415_v19 = vpack.c.bf16 %v321_v20, %v320_v8 }
  0xc6   : > { %4134 = vmatmul.bf16.gmra.mxu2 %v11620_v50  ;;  %v9390_v50 = vor.u32 %v10513_v55, %v9389_v44  ;;  %v15152_v55 = vshll.u32 %v11601_v25, 16 }
  0xc7   : > { %4223 = vmatmul.bf16.gmra.mxu3 %v11624_v16  ;;  %v10609_v16 = vld [vmem:[#allocation6 + $0x76c] sm:$0xf0]  ;;  %v904_v13 = vor.u32 %v15151_v48, %v901_v11  ;;  %v575_v14 = vunpack.c.h.b16 %v414_v5  ;;  %v579_v40 = vunpack.c.h.b16 %v416_v6  ;;  %v918_v11 = vor.u32 %v14674_v59, %v915_v63  ;;  %v326_v48 = vld [vmem:[%s11133_s8 + $0x240] sm:$0xff] }
  0xc8   : > { %v9774_v39 = vor.u32 %v10609_v16, %v9773_v42  ;;  %4278 = vmatpush.bf16.msrb.mxu0 %v9390_v50  ;;  %v911_v44 = vor.u32 %v15152_v55, %v908_v21  ;;  %v574_v42 = vunpack.c.l.b16 %v414_v5  ;;  %v578_v16 = vunpack.c.l.b16 %v416_v6  ;;  %v330_v55 = vld [vmem:[%s11133_s8 + $0x260] sm:$0xff] }
  0xc9   : > { %v9518_v50 = vor.u32 %v10545_v51, %v9517_v24  ;;  %v925_v21 = vor.u32 %v14673_v36, %v922_v60  ;;  %v576_v8 = vunpack.c.l.b16 %v415_v19  ;;  %v11661_v6 = vsel %vm11215_vm2, 0, %v904_v13  ;;  %v327_v60 = vld [vmem:[%s11133_s8 + $0x248] sm:$0xff]  ;;  %v328_v51 = vld [vmem:[%s11133_s8 + $0x250] sm:$0xff]  ;;  %v333_v36 = vld [vmem:[%s11133_s8 + $0x278] sm:$0xff] }
  0xca   : > { %4545 = vmatpush.bf16.msrb.mxu3 %v9774_v39  ;;  %v577_v39 = vunpack.c.h.b16 %v415_v19  ;;  %15153 = vst [vmem:[#allocation73_spill] sm:$0xff] %v11661_v6  ;;  %v11665_v5 = vsel %vm11215_vm2, 0, %v911_v44  ;;  %v11667_v20 = vpack.c.b16 %v578_v16, %v574_v42  ;;  %v11669_v63 = vpack.c.b16 %v579_v40, %v575_v14  ;;  %v331_v19 = vld [vmem:[%s11133_s8 + $0x268] sm:$0xff] }
  0xcb   : > { %4367 = vmatpush.bf16.msrb.mxu1 %v9518_v50  ;;  %15154 = vst [vmem:[#allocation74_spill] sm:$0xff] %v11665_v5  ;;  %v11679_v13 = vsel %vm11215_vm2, 0, %v918_v11  ;;  %v11683_v44 = vsel %vm11215_vm2, 0, %v925_v21  ;;  %v11685_v15 = vpack.c.b16 %v580_v18, %v576_v8  ;;  %v418_v40 = vpack.c.bf16 %v327_v60, %v326_v48  ;;  %v329_v50 = vld [vmem:[%s11133_s8 + $0x258] sm:$0xff]  ;;  %v332_v11 = vld [vmem:[%s11133_s8 + $0x270] sm:$0xff] }
  0xcc   : > { %15155 = vst [vmem:[#allocation75_spill] sm:$0xff] %v11667_v20  ;;  %v11687_v42 = vpack.c.b16 %v581_v27, %v577_v39  ;;  %v14681_v16 = vshrl.u32 %v11667_v20, 16  ;;  %v14686_v14 = vshrl.u32 %v11669_v63, 16  ;;  %v420_v24 = vpack.c.bf16 %v331_v19, %v330_v55 }
  0xcd   : > { %15156 = vst [vmem:[#allocation76_spill] sm:$0xff] %v11669_v63  ;;  %v582_v60 = vunpack.c.l.b16 %v418_v40  ;;  %v419_v19 = vpack.c.bf16 %v329_v50, %v328_v51  ;;  %v421_v59 = vpack.c.bf16 %v333_v36, %v332_v11  ;;  %v15161_v8 = vshrl.u32 %v11685_v15, 16 }
  0xce   : > { %15157 = vst [vmem:[#allocation77_spill] sm:$0xff] %v11679_v13  ;;  %v929_v18 = vrot.slane %v14681_v16, 7  ;;  %v936_v27 = vrot.slane %v14686_v14, 7  ;;  %v586_v55 = vunpack.c.l.b16 %v420_v24  ;;  %v15162_v16 = vshrl.u32 %v11687_v42, 16 }
  0xcf   : > { %15158 = vst [vmem:[#allocation78_spill] sm:$0xff] %v11683_v44  ;;  %v587_v49 = vunpack.c.h.b16 %v420_v24  ;;  %v15163_v14 = vshll.u32 %v11667_v20, 16  ;;  %v15164_v47 = vshll.u32 %v11669_v63, 16  ;;  %v584_v11 = vunpack.c.l.b16 %v419_v19  ;;  %v9757_v63 = vld [vmem:[#allocation6 + $0x740] sm:$0xf] }
  0xd0   : > { %15159 = vst [vmem:[#allocation79_spill] sm:$0xff] %v11685_v15  ;;  %v950_v39 = vrot.slane %v15162_v16, 7  ;;  %v11717_v50 = vpack.c.b16 %v586_v55, %v582_v60  ;;  %v588_v21 = vunpack.c.l.b16 %v421_v59  ;;  %v589_v46 = vunpack.c.h.b16 %v421_v59  ;;  %v334_v60 = vld [vmem:[%s11133_s8 + $0x280] sm:$0xff]  ;;  %v335_v55 = vld [vmem:[%s11133_s8 + $0x288] sm:$0xff] }
  0xd1   : > { %15160 = vst [vmem:[#allocation80_spill] sm:$0xff] %v11687_v42  ;;  %v932_v48 = vor.u32 %v15163_v14, %v929_v18  ;;  %v939_v51 = vor.u32 %v15164_v47, %v936_v27  ;;  %v15167_v16 = vshll.u32 %v11687_v42, 16 }
  0xd2   : > { %15165 = vst [vmem:[#allocation81_spill] sm:$0xff] %v11717_v50  ;;  %v14693_v18 = vshrl.u32 %v11717_v50, 16 }
  0xd3   : > { %v11731_v59 = vsel %vm11215_vm2, 0, %v939_v51 }
  0xd4   : > { %15170 = vst [vmem:[#allocation84_spill] sm:$0xff] %v11731_v59 }
  0xd5   : > { %3961 = vmatmul.bf16.gmra.mxu0 %v11661_v6  ;;  %4050 = vmatmul.bf16.gmra.mxu1 %v11665_v5  ;;  %v943_v5 = vrot.slane %v15161_v8, 7  ;;  %v583_v6 = vunpack.c.h.b16 %v418_v40  ;;  %v15166_v8 = vshll.u32 %v11685_v15, 16  ;;  %v953_v40 = vor.u32 %v15167_v16, %v950_v39  ;;  %v341_v15 = vld [vmem:[%s11133_s8 + $0x2b8] sm:$0xff]  ;;  %v10605_v16 = vld [vmem:[#allocation6 + $0x74c] sm:$0xf0] }
  0xd6   : > { %4139 = vmatmul.bf16.gmra.mxu2 %v11679_v13  ;;  %v585_v13 = vunpack.c.h.b16 %v419_v19  ;;  %v11735_v39 = vpack.c.b16 %v588_v21, %v584_v11  ;;  %v957_v19 = vrot.slane %v14693_v18, 7  ;;  %v422_v18 = vpack.c.bf16 %v335_v55, %v334_v60 }
  0xd7   : > { %4228 = vmatmul.bf16.gmra.mxu3 %v11683_v44  ;;  %v1988_v44 = vld [vmem:[#allocation8] sm:$0xf]  ;;  %v946_v33 = vor.u32 %v15166_v8, %v943_v5  ;;  %v11723_v24 = vpack.c.b16 %v587_v49, %v583_v6  ;;  %v336_v8 = vld [vmem:[%s11133_s8 + $0x290] sm:$0xff] }
  0xd8   : > { %v11715_v36 = vperm.slane %v1988_v44, 0  ;;  %v11727_v44 = vsel %vm11215_vm2, 0, %v932_v48  ;;  %15171 = vst [vmem:[#allocation85_spill] sm:$0xff] %v11735_v39  ;;  %v11737_v49 = vpack.c.b16 %v589_v46, %v585_v13  ;;  %v11747_v48 = vsel %vm11215_vm2, 0, %v953_v40  ;;  %v338_v46 = vld [vmem:[%s11133_s8 + $0x2a0] sm:$0xff]  ;;  %v339_v13 = vld [vmem:[%s11133_s8 + $0x2a8] sm:$0xff] }
  0xd9   : > { %15168 = vst [vmem:[#allocation82_spill] sm:$0xff] %v11723_v24  ;;  %v11743_v27 = vsel %vm11215_vm2, 0, %v946_v33  ;;  %v14716_v21 = vshrl.u32 %v11723_v24, 16  ;;  %v337_v40 = vld [vmem:[%s11133_s8 + $0x298] sm:$0xff]  ;;  %v424_v51 = vpack.c.bf16 %v339_v13, %v338_v46  ;;  %v10509_v33 = vld [vmem:[#allocation6 + $0x44c] sm:$0xf0]  ;;  %v9758_v46 = vor.u32 %v10605_v16, %v9757_v63 }
  0xda   : > { %15169 = vst [vmem:[#allocation83_spill] sm:$0xff] %v11727_v44  ;;  %v14725_v55 = vshll.u32 %v11737_v49, 16  ;;  %v590_v22 = vunpack.c.l.b16 %v422_v18  ;;  %v591_v63 = vunpack.c.h.b16 %v422_v18 }
  0xdb   : > { %15172 = vst [vmem:[#allocation86_spill] sm:$0xff] %v11737_v49  ;;  %v594_v12 = vunpack.c.l.b16 %v424_v51  ;;  %4546 = vmatpush.bf16.msrb.mxu3 %v9758_v46 }
  0xdc   : > { %15173 = vst [vmem:[#allocation87_spill] sm:$0xff] %v11743_v27 }
  0xdd   : > { %15174 = vst [vmem:[#allocation88_spill] sm:$0xff] %v11747_v48 }
  0xe2   : > { %v3927_v14 = vpop.f32.mrf.mxu0  ;;  %v4016_v47 = vpop.f32.mrf.mxu1 }
  0xe3   : > { %v3928_v5 = vadd.f32 %v3927_v14, %v11715_v36  ;;  %v9629_v14 = vld [vmem:[#allocation6 + $0x640] sm:$0xf] }
  0xe5   : > { %v4017_v6 = vadd.f32 %v4016_v47, %v3928_v5  ;;  %3966 = vmatmul.bf16.gmra.mxu0 %v11727_v44  ;;  %4055 = vmatmul.bf16.gmra.mxu1 %v11731_v59  ;;  %v10573_v47 = vld [vmem:[#allocation6 + $0x64c] sm:$0xf0]  ;;  %v964_v5 = vrot.slane %v14716_v21, 7  ;;  %v9373_v44 = vld [vmem:[#allocation6 + $0x440] sm:$0xf]  ;;  %v15175_v21 = vshll.u32 %v11717_v50, 16 }
  0xe6   : > { %4144 = vmatmul.bf16.gmra.mxu2 %v11743_v27  ;;  %v340_v59 = vld [vmem:[%s11133_s8 + $0x2b0] sm:$0xff]  ;;  %v9630_v11 = vor.u32 %v10573_v47, %v9629_v14  ;;  %v15176_v14 = vshrl.u32 %v11735_v39, 16  ;;  %v15177_v27 = vshrl.u32 %v11737_v49, 16 }
  0xe7   : > { %4233 = vmatmul.bf16.gmra.mxu3 %v11747_v48  ;;  %v9374_v48 = vor.u32 %v10509_v33, %v9373_v44  ;;  %v960_v60 = vor.u32 %v15175_v21, %v957_v19  ;;  %v423_v33 = vpack.c.bf16 %v337_v40, %v336_v8  ;;  %v15179_v21 = vshll.u32 %v11723_v24, 16 }
  0xe8   : > { %4457 = vmatpush.bf16.msrb.mxu2 %v9630_v11  ;;  %v971_v47 = vrot.slane %v15176_v14, 7  ;;  %v978_v44 = vrot.slane %v15177_v27, 7  ;;  %v10541_v11 = vld [vmem:[#allocation6 + $0x54c] sm:$0xf0]  ;;  %v15180_v27 = vshll.u32 %v11735_v39, 16 }
  0xe9   : > { %v4105_v20 = vpop.f32.mrf.mxu2  ;;  %4279 = vmatpush.bf16.msrb.mxu0 %v9374_v48  ;;  %v967_v19 = vor.u32 %v15179_v21, %v964_v5  ;;  %v11789_v40 = vsel %vm11215_vm2, 0, %v960_v60 }
  0xea   : > { %v3929_v32 = vpop.f32.mrf.mxu0  ;;  %v4018_v42 = vpop.f32.mrf.mxu1  ;;  %v4106_v13 = vadd.f32 %v4105_v20, %v4017_v6  ;;  %v595_v20 = vunpack.c.h.b16 %v424_v51  ;;  %v9501_v6 = vld [vmem:[#allocation6 + $0x540] sm:$0xf]  ;;  %v974_v8 = vor.u32 %v15180_v27, %v971_v47  ;;  %15182 = vst [vmem:[#allocation91_spill] sm:$0xff] %v11789_v40  ;;  %v343_v47 = vld [vmem:[%s11133_s8 + $0x2c8] sm:$0xff] }
  0xeb   : > { %v4194_v23 = vpop.f32.mrf.mxu3  ;;  %v3930_v31 = vadd.f32 %v3929_v32, %v11715_v36  ;;  %v425_v32 = vpack.c.bf16 %v341_v15, %v340_v59  ;;  %v9502_v16 = vor.u32 %v10541_v11, %v9501_v6  ;;  %v592_v15 = vunpack.c.l.b16 %v423_v33 }
  0xec   : > { %v11777_v50 = vadd.f32 %v4194_v23, %v4106_v13  ;;  %v11785_v23 = vpack.c.b16 %v594_v12, %v590_v22  ;;  %v593_v59 = vunpack.c.h.b16 %v423_v33  ;;  %v11793_v5 = vsel %vm11215_vm2, 0, %v967_v19  ;;  %v342_v13 = vld [vmem:[%s11133_s8 + $0x2c0] sm:$0xff]  ;;  %v347_v33 = vld [vmem:[%s11133_s8 + $0x2e8] sm:$0xff] }
  0xed   : > { %v4019_v25 = vadd.f32 %v4018_v42, %v3930_v31  ;;  %v981_v31 = vor.u32 %v14725_v55, %v978_v44  ;;  %v596_v42 = vunpack.c.l.b16 %v425_v32  ;;  %v597_v18 = vunpack.c.h.b16 %v425_v32  ;;  %4368 = vmatpush.bf16.msrb.mxu1 %v9502_v16  ;;  %15183 = vst [vmem:[#allocation92_spill] sm:$0xff] %v11793_v5  ;;  %v346_v44 = vld [vmem:[%s11133_s8 + $0x2e0] sm:$0xff] }
  0xee   : > { %15178 = vst [vmem:[#allocation89_spill] sm:$0xff] %v11777_v50  ;;  %v11795_v46 = vpack.c.b16 %v595_v20, %v591_v63  ;;  %v11804_v60 = vsel %vm11215_vm2, 0, %v974_v8  ;;  %v14728_v63 = vshrl.u32 %v11785_v23, 16  ;;  %v426_v16 = vpack.c.bf16 %v343_v47, %v342_v13  ;;  %v344_v8 = vld [vmem:[%s11133_s8 + $0x2d0] sm:$0xff] }
  0xef   : > { %15181 = vst [vmem:[#allocation90_spill] sm:$0xff] %v11785_v23  ;;  %v11808_v21 = vsel %vm11215_vm2, 0, %v981_v31  ;;  %v11813_v20 = vpack.c.b16 %v596_v42, %v592_v15  ;;  %v428_v27 = vpack.c.bf16 %v347_v33, %v346_v44  ;;  %v345_v31 = vld [vmem:[%s11133_s8 + $0x2d8] sm:$0xff] }
  0xf0   : > { %15184 = vst [vmem:[#allocation93_spill] sm:$0xff] %v11795_v46  ;;  %v14737_v11 = vshrl.u32 %v11795_v46, 16  ;;  %v985_v15 = vrot.slane %v14728_v63, 7  ;;  %v598_v47 = vunpack.c.l.b16 %v426_v16  ;;  %v427_v33 = vpack.c.bf16 %v345_v31, %v344_v8 }
  0xf1   : > { %v4107_v12 = vpop.f32.mrf.mxu2  ;;  %15185 = vst [vmem:[#allocation94_spill] sm:$0xff] %v11804_v60  ;;  %v602_v44 = vunpack.c.l.b16 %v428_v27  ;;  %v603_v63 = vunpack.c.h.b16 %v428_v27  ;;  %v15193_v31 = vshll.u32 %v11785_v23, 16  ;;  %v10601_v23 = vld [vmem:[#allocation6 + $0x72c] sm:$0xf0] }
  0xf2   : > { %v3932_v48 = vpop.f32.mrf.mxu0  ;;  %v4021_v51 = vpop.f32.mrf.mxu1  ;;  %v4108_v32 = vadd.f32 %v4107_v12, %v4019_v25  ;;  %15186 = vst [vmem:[#allocation95_spill] sm:$0xff] %v11808_v21  ;;  %v11815_v25 = vpack.c.b16 %v597_v18, %v593_v59  ;;  %v349_v12 = vld [vmem:[%s11133_s8 + $0x2f8] sm:$0xff]  ;;  %v14743_v59 = vshll.u32 %v11813_v20, 16  ;;  %v15190_v18 = vshrl.u32 %v11813_v20, 16 }
  0xf3   : > { %v4196_v22 = vpop.f32.mrf.mxu3  ;;  %v3933_v14 = vadd.f32 %v3932_v48, %v11715_v36  ;;  %15187 = vst [vmem:[#allocation96_spill] sm:$0xff] %v11813_v20  ;;  %v356_v20 = vld [vmem:[%s11133_s8 + $0x330] sm:$0xff] }
  0xf4   : > { %15188 = vst [vmem:[#allocation97_spill] sm:$0xff] %v11815_v25  ;;  %v11817_v6 = vadd.f32 %v4196_v22, %v4108_v32  ;;  %v15191_v49 = vshrl.u32 %v11815_v25, 16  ;;  %v14741_v39 = vshll.u32 %v11815_v25, 16 }
  0xf5   : > { %v4022_v19 = vadd.f32 %v4021_v51, %v3933_v14  ;;  %3971 = vmatmul.bf16.gmra.mxu0 %v11789_v40  ;;  %4060 = vmatmul.bf16.gmra.mxu1 %v11793_v5  ;;  %v348_v51 = vld [vmem:[%s11133_s8 + $0x2f0] sm:$0xff]  ;;  %v992_v14 = vrot.slane %v14737_v11, 7  ;;  %v999_v40 = vrot.slane %v15190_v18, 7  ;;  %v601_v18 = vunpack.c.h.b16 %v427_v33 }
  0xf6   : > { %15189 = vst [vmem:[#allocation98_spill] sm:$0xff] %v11817_v6  ;;  %4149 = vmatmul.bf16.gmra.mxu2 %v11804_v60  ;;  %v429_v60 = vpack.c.bf16 %v349_v12, %v348_v51  ;;  %v1006_v11 = vrot.slane %v15191_v49, 7 }
  0xf7   : > { %4238 = vmatmul.bf16.gmra.mxu3 %v11808_v21  ;;  %v599_v21 = vunpack.c.h.b16 %v426_v16  ;;  %v15194_v16 = vshll.u32 %v11795_v46, 16  ;;  %v1002_v49 = vor.u32 %v14743_v59, %v999_v40  ;;  %v9357_v59 = vld [vmem:[#allocation6 + $0x420] sm:$0xf] }
  0xf8   : > { %v604_v12 = vunpack.c.l.b16 %v429_v60 }
  0xf9   : > { %v4110_v32 = vpop.f32.mrf.mxu2  ;;  %v995_v27 = vor.u32 %v15194_v16, %v992_v14  ;;  %v11849_v51 = vpack.c.b16 %v603_v63, %v599_v21 }
  0xfa   : > { %v3934_v13 = vpop.f32.mrf.mxu0  ;;  %v4023_v22 = vpop.f32.mrf.mxu1  ;;  %v4111_v42 = vadd.f32 %v4110_v32, %v4022_v19  ;;  %v11847_v19 = vpack.c.b16 %v602_v44, %v598_v47 }
  0xfb   : > { %v4199_v55 = vpop.f32.mrf.mxu3  ;;  %v3935_v48 = vadd.f32 %v3934_v13, %v11715_v36  ;;  %v988_v13 = vor.u32 %v15193_v31, %v985_v15  ;;  %15196 = vst [vmem:[#allocation101_spill] sm:$0xff] %v11849_v51  ;;  %v11861_v21 = vsel %vm11215_vm2, 0, %v995_v27 }
  0xfc   : > { %v11841_v8 = vadd.f32 %v4199_v55, %v4111_v42  ;;  %15195 = vst [vmem:[#allocation100_spill] sm:$0xff] %v11847_v19  ;;  %v1009_v55 = vor.u32 %v14741_v39, %v1006_v11  ;;  %v14740_v63 = vshrl.u32 %v11847_v19, 16  ;;  %v14742_v11 = vshrl.u32 %v11849_v51, 16 }
  0xfd   : > { %v4024_v5 = vadd.f32 %v4023_v22, %v3935_v48  ;;  %v600_v48 = vunpack.c.l.b16 %v427_v33  ;;  %v605_v22 = vunpack.c.h.b16 %v429_v60  ;;  %v11857_v15 = vsel %vm11215_vm2, 0, %v988_v13  ;;  %15198 = vst [vmem:[#allocation103_spill] sm:$0xff] %v11861_v21 }
  0xfe   : > { %15192 = vst [vmem:[#allocation99_spill] sm:$0xff] %v11841_v8  ;;  %v11874_v13 = vsel %vm11215_vm2, 0, %v1002_v49  ;;  %v11878_v16 = vsel %vm11215_vm2, 0, %v1009_v55  ;;  %v10505_v49 = vld [vmem:[#allocation6 + $0x42c] sm:$0xf0] }
  0xff   : > { %15197 = vst [vmem:[#allocation102_spill] sm:$0xff] %v11857_v15  ;;  %v11866_v47 = vpack.c.b16 %v604_v12, %v600_v48  ;;  %v11868_v33 = vpack.c.b16 %v605_v22, %v601_v18  ;;  %v350_v12 = vld [vmem:[%s11133_s8 + $0x300] sm:$0xff]  ;;  %v351_v18 = vld [vmem:[%s11133_s8 + $0x308] sm:$0xff]  ;;  %v1020_v22 = vrot.slane %v14742_v11, 7  ;;  %v9358_v46 = vor.u32 %v10505_v49, %v9357_v59 }
 0x100   : > { %15201 = vst [vmem:[#allocation106_spill] sm:$0xff] %v11874_v13  ;;  %v430_v39 = vpack.c.bf16 %v351_v18, %v350_v12  ;;  %v9741_v48 = vld [vmem:[#allocation6 + $0x720] sm:$0xf]  ;;  %v15205_v12 = vshll.u32 %v11849_v51, 16 }
 0x101   : > { %v4112_v60 = vpop.f32.mrf.mxu2  ;;  %15199 = vst [vmem:[#allocation104_spill] sm:$0xff] %v11866_v47  ;;  %v14765_v18 = vshll.u32 %v11866_v47, 16  ;;  %v14764_v59 = vshll.u32 %v11868_v33, 16  ;;  %4280 = vmatpush.bf16.msrb.mxu0 %v9358_v46 }
 0x102   : > { %v3937_v42 = vpop.f32.mrf.mxu0  ;;  %v4026_v32 = vpop.f32.mrf.mxu1  ;;  %v4113_v44 = vadd.f32 %v4112_v60, %v4024_v5  ;;  %15200 = vst [vmem:[#allocation105_spill] sm:$0xff] %v11868_v33  ;;  %v1013_v5 = vrot.slane %v14740_v63, 7  ;;  %v355_v60 = vld [vmem:[%s11133_s8 + $0x328] sm:$0xff]  ;;  %v10569_v63 = vld [vmem:[#allocation6 + $0x62c] sm:$0xf0] }
 0x103   : > { %v4201_v14 = vpop.f32.mrf.mxu3  ;;  %v3938_v40 = vadd.f32 %v3937_v42, %v11715_v36  ;;  %15202 = vst [vmem:[#allocation107_spill] sm:$0xff] %v11878_v16 }
 0x104   : > { %v11880_v27 = vadd.f32 %v4201_v14, %v4113_v44  ;;  %v352_v14 = vld [vmem:[%s11133_s8 + $0x310] sm:$0xff]  ;;  %v9613_v44 = vld [vmem:[#allocation6 + $0x620] sm:$0xf] }
 0x105   : > { %v4027_v31 = vadd.f32 %v4026_v32, %v3938_v40  ;;  %3976 = vmatmul.bf16.gmra.mxu0 %v11857_v15  ;;  %4065 = vmatmul.bf16.gmra.mxu1 %v11861_v21  ;;  %v354_v32 = vld [vmem:[%s11133_s8 + $0x320] sm:$0xff]  ;;  %v353_v40 = vld [vmem:[%s11133_s8 + $0x318] sm:$0xff]  ;;  %v9614_v11 = vor.u32 %v10569_v63, %v9613_v44  ;;  %v15204_v15 = vshll.u32 %v11847_v19, 16  ;;  %v1023_v63 = vor.u32 %v15205_v12, %v1020_v22 }
 0x106   : > { %15203 = vst [vmem:[#allocation108_spill] sm:$0xff] %v11880_v27  ;;  %4154 = vmatmul.bf16.gmra.mxu2 %v11874_v13  ;;  %v432_v25 = vpack.c.bf16 %v355_v60, %v354_v32  ;;  %v9742_v44 = vor.u32 %v10601_v23, %v9741_v48  ;;  %v15206_v19 = vshrl.u32 %v11866_v47, 16  ;;  %v606_v60 = vunpack.c.l.b16 %v430_v39  ;;  %v10537_v48 = vld [vmem:[#allocation6 + $0x52c] sm:$0xf0] }
 0x107   : > { %4243 = vmatmul.bf16.gmra.mxu3 %v11878_v16  ;;  %v1016_v13 = vor.u32 %v15204_v15, %v1013_v5  ;;  %v357_v16 = vld [vmem:[%s11133_s8 + $0x338] sm:$0xff]  ;;  %4458 = vmatpush.bf16.msrb.mxu2 %v9614_v11  ;;  %v15207_v5 = vshrl.u32 %v11868_v33, 16  ;;  %v607_v11 = vunpack.c.h.b16 %v430_v39 }
 0x108   : > { %v1027_v15 = vrot.slane %v15206_v19, 7  ;;  %v433_v6 = vpack.c.bf16 %v357_v16, %v356_v20  ;;  %4547 = vmatpush.bf16.msrb.mxu3 %v9742_v44  ;;  %v610_v12 = vunpack.c.l.b16 %v432_v25  ;;  %v611_v23 = vunpack.c.h.b16 %v432_v25 }
 0x109   : > { %v4115_v55 = vpop.f32.mrf.mxu2  ;;  %v1034_v32 = vrot.slane %v15207_v5, 7  ;;  %v11919_v16 = vsel %vm11215_vm2, 0, %v1016_v13  ;;  %v358_v5 = vld [vmem:[%s11133_s8 + $0x340] sm:$0xff] }
 0x10a   : > { %v3939_v42 = vpop.f32.mrf.mxu0  ;;  %v4028_v21 = vpop.f32.mrf.mxu1  ;;  %v4116_v8 = vadd.f32 %v4115_v55, %v4027_v31  ;;  %v9485_v31 = vld [vmem:[#allocation6 + $0x520] sm:$0xf]  ;;  %v1030_v19 = vor.u32 %v14765_v18, %v1027_v15  ;;  %15209 = vst [vmem:[#allocation110_spill] sm:$0xff] %v11919_v16 }
 0x10b   : > { %v4204_v27 = vpop.f32.mrf.mxu3  ;;  %v3940_v24 = vadd.f32 %v3939_v42, %v11715_v36  ;;  %v431_v42 = vpack.c.bf16 %v353_v40, %v352_v14  ;;  %v9486_v55 = vor.u32 %v10537_v48, %v9485_v31  ;;  %v1037_v46 = vor.u32 %v14764_v59, %v1034_v32  ;;  %v359_v32 = vld [vmem:[%s11133_s8 + $0x348] sm:$0xff]  ;;  %v362_v31 = vld [vmem:[%s11133_s8 + $0x360] sm:$0xff] }
 0x10c   : > { %v11911_v22 = vadd.f32 %v4204_v27, %v4116_v8  ;;  %v613_v8 = vunpack.c.h.b16 %v433_v6  ;;  %v11923_v27 = vsel %vm11215_vm2, 0, %v1023_v63  ;;  %v11925_v14 = vpack.c.b16 %v610_v12, %v606_v60  ;;  %v363_v63 = vld [vmem:[%s11133_s8 + $0x368] sm:$0xff] }
 0x10d   : > { %v4029_v49 = vadd.f32 %v4028_v21, %v3940_v24  ;;  %v608_v24 = vunpack.c.l.b16 %v431_v42  ;;  %v612_v21 = vunpack.c.l.b16 %v433_v6  ;;  %v609_v20 = vunpack.c.h.b16 %v431_v42  ;;  %4369 = vmatpush.bf16.msrb.mxu1 %v9486_v55  ;;  %15210 = vst [vmem:[#allocation111_spill] sm:$0xff] %v11923_v27 }
 0x10e   : > { %15208 = vst [vmem:[#allocation109_spill] sm:$0xff] %v11911_v22  ;;  %v11927_v40 = vpack.c.b16 %v611_v23, %v607_v11  ;;  %v11934_v13 = vsel %vm11215_vm2, 0, %v1030_v19  ;;  %v11942_v12 = vsel %vm11215_vm2, 0, %v1037_v46  ;;  %v14776_v48 = vshrl.u32 %v11925_v14, 16  ;;  %v364_v46 = vld [vmem:[%s11133_s8 + $0x370] sm:$0xff] }
 0x10f   : > { %15211 = vst [vmem:[#allocation112_spill] sm:$0xff] %v11925_v14  ;;  %v11944_v11 = vpack.c.b16 %v612_v21, %v608_v24  ;;  %v434_v19 = vpack.c.bf16 %v359_v32, %v358_v5 }
 0x110   : > { %15212 = vst [vmem:[#allocation113_spill] sm:$0xff] %v11927_v40  ;;  %v14779_v55 = vshrl.u32 %v11927_v40, 16  ;;  %v1041_v5 = vrot.slane %v14776_v48, 7 }
 0x111   : > { %v4117_v44 = vpop.f32.mrf.mxu2  ;;  %15213 = vst [vmem:[#allocation114_spill] sm:$0xff] %v11934_v13  ;;  %v15218_v48 = vshrl.u32 %v11944_v11, 16 }
 0x112   : > { %v3942_v39 = vpop.f32.mrf.mxu0  ;;  %v4031_v25 = vpop.f32.mrf.mxu1  ;;  %v4118_v42 = vadd.f32 %v4117_v44, %v4029_v49  ;;  %15214 = vst [vmem:[#allocation115_spill] sm:$0xff] %v11942_v12  ;;  %v11946_v49 = vpack.c.b16 %v613_v8, %v609_v20  ;;  %v361_v44 = vld [vmem:[%s11133_s8 + $0x358] sm:$0xff]  ;;  %v1048_v32 = vrot.slane %v14779_v55, 7  ;;  %v14784_v20 = vshll.u32 %v11944_v11, 16 }
 0x113   : > { %v4206_v15 = vpop.f32.mrf.mxu3  ;;  %v3943_v6 = vadd.f32 %v3942_v39, %v11715_v36  ;;  %15215 = vst [vmem:[#allocation116_spill] sm:$0xff] %v11944_v11  ;;  %v436_v39 = vpack.c.bf16 %v363_v63, %v362_v31  ;;  %v614_v31 = vunpack.c.l.b16 %v434_v19  ;;  %v1055_v47 = vrot.slane %v15218_v48, 7 }
 0x114   : > { %15216 = vst [vmem:[#allocation117_spill] sm:$0xff] %v11946_v49  ;;  %v11948_v23 = vadd.f32 %v4206_v15, %v4118_v42  ;;  %v15219_v55 = vshrl.u32 %v11946_v49, 16  ;;  %v14782_v51 = vshll.u32 %v11946_v49, 16 }
 0x115   : > { %v4032_v60 = vadd.f32 %v4031_v25, %v3943_v6  ;;  %3981 = vmatmul.bf16.gmra.mxu0 %v11919_v16  ;;  %4070 = vmatmul.bf16.gmra.mxu1 %v11923_v27  ;;  %v360_v25 = vld [vmem:[%s11133_s8 + $0x350] sm:$0xff]  ;;  %v365_v6 = vld [vmem:[%s11133_s8 + $0x378] sm:$0xff]  ;;  %v618_v24 = vunpack.c.l.b16 %v436_v39  ;;  %v615_v27 = vunpack.c.h.b16 %v434_v19  ;;  %v619_v16 = vunpack.c.h.b16 %v436_v39 }
 0x116   : > { %15217 = vst [vmem:[#allocation118_spill] sm:$0xff] %v11948_v23  ;;  %4159 = vmatmul.bf16.gmra.mxu2 %v11934_v13  ;;  %v437_v21 = vpack.c.bf16 %v365_v6, %v364_v46  ;;  %v1062_v42 = vrot.slane %v15219_v55, 7  ;;  %v1058_v48 = vor.u32 %v14784_v20, %v1055_v47 }
 0x117   : > { %4248 = vmatmul.bf16.gmra.mxu3 %v11942_v12  ;;  %v435_v12 = vpack.c.bf16 %v361_v44, %v360_v25  ;;  %v11979_v46 = vpack.c.b16 %v618_v24, %v614_v31  ;;  %v11981_v39 = vpack.c.b16 %v619_v16, %v615_v27  ;;  %v366_v31 = vld [vmem:[%s11133_s8 + $0x380] sm:$0xff] }
 0x118   : > { %v621_v55 = vunpack.c.h.b16 %v437_v21 }
 0x119   : > { %v4120_v63 = vpop.f32.mrf.mxu2  ;;  %15223 = vst [vmem:[#allocation120_spill] sm:$0xff] %v11979_v46  ;;  %v616_v19 = vunpack.c.l.b16 %v435_v12 }
 0x11a   : > { %v3944_v8 = vpop.f32.mrf.mxu0  ;;  %v4033_v15 = vpop.f32.mrf.mxu1  ;;  %v4121_v13 = vadd.f32 %v4120_v63, %v4032_v60  ;;  %v15222_v60 = vshll.u32 %v11927_v40, 16  ;;  %15224 = vst [vmem:[#allocation121_spill] sm:$0xff] %v11981_v39  ;;  %v9725_v40 = vld [vmem:[#allocation6 + $0x700] sm:$0xf] }
 0x11b   : > { %v4209_v59 = vpop.f32.mrf.mxu3  ;;  %v3945_v18 = vadd.f32 %v3944_v8, %v11715_v36  ;;  %v15221_v8 = vshll.u32 %v11925_v14, 16 }
 0x11c   : > { %v11973_v23 = vadd.f32 %v4209_v59, %v4121_v13  ;;  %v1051_v44 = vor.u32 %v15222_v60, %v1048_v32  ;;  %v1065_v59 = vor.u32 %v14782_v51, %v1062_v42  ;;  %v617_v13 = vunpack.c.h.b16 %v435_v12  ;;  %v9597_v51 = vld [vmem:[#allocation6 + $0x600] sm:$0xf] }
 0x11d   : > { %v4034_v33 = vadd.f32 %v4033_v15, %v3945_v18  ;;  %v1044_v25 = vor.u32 %v15221_v8, %v1041_v5  ;;  %v620_v18 = vunpack.c.l.b16 %v437_v21  ;;  %v14783_v12 = vshrl.u32 %v11979_v46, 16 }
 0x11e   : > { %15220 = vst [vmem:[#allocation119_spill] sm:$0xff] %v11973_v23  ;;  %v11993_v16 = vsel %vm11215_vm2, 0, %v1051_v44  ;;  %v14799_v42 = vshrl.u32 %v11981_v39, 16  ;;  %v12005_v8 = vsel %vm11215_vm2, 0, %v1058_v48  ;;  %v12011_v60 = vpack.c.b16 %v621_v55, %v617_v13  ;;  %v370_v44 = vld [vmem:[%s11133_s8 + $0x3a0] sm:$0xff] }
 0x11f   : > { %v11989_v5 = vsel %vm11215_vm2, 0, %v1044_v25  ;;  %15226 = vst [vmem:[#allocation123_spill] sm:$0xff] %v11993_v16  ;;  %v11997_v21 = vpack.c.b16 %v620_v18, %v616_v19  ;;  %v12009_v25 = vsel %vm11215_vm2, 0, %v1065_v59  ;;  %v371_v19 = vld [vmem:[%s11133_s8 + $0x3a8] sm:$0xff]  ;;  %v368_v59 = vld [vmem:[%s11133_s8 + $0x390] sm:$0xff] }
 0x120   : > { %15225 = vst [vmem:[#allocation122_spill] sm:$0xff] %v11989_v5  ;;  %v1076_v13 = vrot.slane %v14799_v42, 7  ;;  %v10597_v42 = vld [vmem:[#allocation6 + $0x70c] sm:$0xf0] }
 0x121   : > { %v4122_v27 = vpop.f32.mrf.mxu2  ;;  %15227 = vst [vmem:[#allocation124_spill] sm:$0xff] %v11997_v21 }
 0x122   : > { %v3947_v6 = vpop.f32.mrf.mxu0  ;;  %v4036_v15 = vpop.f32.mrf.mxu1  ;;  %v4123_v32 = vadd.f32 %v4122_v27, %v4034_v33  ;;  %15228 = vst [vmem:[#allocation125_spill] sm:$0xff] %v12005_v8  ;;  %v367_v33 = vld [vmem:[%s11133_s8 + $0x388] sm:$0xff]  ;;  %v10501_v27 = vld [vmem:[#allocation6 + $0x40c] sm:$0xf0] }
 0x123   : > { %v4211_v47 = vpop.f32.mrf.mxu3  ;;  %v3948_v24 = vadd.f32 %v3947_v6, %v11715_v36  ;;  %15229 = vst [vmem:[#allocation126_spill] sm:$0xff] %v12009_v25  ;;  %v1069_v6 = vrot.slane %v14783_v12, 7  ;;  %v438_v55 = vpack.c.bf16 %v367_v33, %v366_v31  ;;  %v10565_v12 = vld [vmem:[#allocation6 + $0x60c] sm:$0xf0] }
 0x124   : > { %15230 = vst [vmem:[#allocation127_spill] sm:$0xff] %v12011_v60  ;;  %v12016_v18 = vadd.f32 %v4211_v47, %v4123_v32  ;;  %v440_v47 = vpack.c.bf16 %v371_v19, %v370_v44  ;;  %v372_v32 = vld [vmem:[%s11133_s8 + $0x3b0] sm:$0xff]  ;;  %v9598_v48 = vor.u32 %v10565_v12, %v9597_v51  ;;  %v15232_v19 = vshrl.u32 %v11997_v21, 16 }
 0x125   : > { %v4037_v63 = vadd.f32 %v4036_v15, %v3948_v24  ;;  %3986 = vmatmul.bf16.gmra.mxu0 %v11989_v5  ;;  %4075 = vmatmul.bf16.gmra.mxu1 %v11993_v16  ;;  %v369_v24 = vld [vmem:[%s11133_s8 + $0x398] sm:$0xff]  ;;  %v9341_v16 = vld [vmem:[#allocation6 + $0x400] sm:$0xf]  ;;  %v9726_v51 = vor.u32 %v10597_v42, %v9725_v40 }
 0x126   : > { %15231 = vst [vmem:[#allocation128_spill] sm:$0xff] %v12016_v18  ;;  %4164 = vmatmul.bf16.gmra.mxu2 %v12005_v8  ;;  %v373_v15 = vld [vmem:[%s11133_s8 + $0x3b8] sm:$0xff]  ;;  %v9342_v11 = vor.u32 %v10501_v27, %v9341_v16  ;;  %v1083_v20 = vrot.slane %v15232_v19, 7  ;;  %v439_v14 = vpack.c.bf16 %v369_v24, %v368_v59  ;;  %v622_v18 = vunpack.c.l.b16 %v438_v55  ;;  %v9469_v42 = vld [vmem:[#allocation6 + $0x500] sm:$0xf] }
 0x127   : > { %4253 = vmatmul.bf16.gmra.mxu3 %v12009_v25  ;;  %4459 = vmatpush.bf16.msrb.mxu2 %v9598_v48  ;;  %v626_v23 = vunpack.c.l.b16 %v440_v47  ;;  %v441_v22 = vpack.c.bf16 %v373_v15, %v372_v32  ;;  %v15233_v16 = vshrl.u32 %v12011_v60, 16  ;;  %v623_v25 = vunpack.c.h.b16 %v438_v55 }
 0x128   : > { %4281 = vmatpush.bf16.msrb.mxu0 %v9342_v11  ;;  %v627_v50 = vunpack.c.h.b16 %v440_v47  ;;  %4548 = vmatpush.bf16.msrb.mxu3 %v9726_v51  ;;  %v15235_v48 = vshll.u32 %v11981_v39, 16  ;;  %v15236_v11 = vshll.u32 %v11997_v21, 16  ;;  %v624_v24 = vunpack.c.l.b16 %v439_v14 }
 0x129   : > { %v4125_v31 = vpop.f32.mrf.mxu2  ;;  %v1090_v27 = vrot.slane %v15233_v16, 7  ;;  %v12047_v15 = vpack.c.b16 %v626_v23, %v622_v18  ;;  %v628_v55 = vunpack.c.l.b16 %v441_v22  ;;  %v15238_v47 = vshll.u32 %v12011_v60, 16 }
 0x12a   : > { %v3949_v5 = vpop.f32.mrf.mxu0  ;;  %v4038_v49 = vpop.f32.mrf.mxu1  ;;  %v4126_v12 = vadd.f32 %v4125_v31, %v4037_v63  ;;  %v1079_v40 = vor.u32 %v15235_v48, %v1076_v13  ;;  %v10533_v63 = vld [vmem:[#allocation6 + $0x50c] sm:$0xf0]  ;;  %v12051_v31 = vpack.c.b16 %v627_v50, %v623_v25  ;;  %v374_v48 = vld [vmem:[%s11133_s8 + $0x3c0] sm:$0xff] }
 0x12b   : > { %v4214_v33 = vpop.f32.mrf.mxu3  ;;  %v3950_v44 = vadd.f32 %v3949_v5, %v11715_v36  ;;  %v15234_v5 = vshll.u32 %v11979_v46, 16  ;;  %v9470_v59 = vor.u32 %v10533_v63, %v9469_v42  ;;  %15237 = vst [vmem:[#allocation129_spill] sm:$0xff] %v12047_v15  ;;  %v1093_v32 = vor.u32 %v15238_v47, %v1090_v27  ;;  %v378_v42 = vld [vmem:[%s11133_s8 + $0x3e0] sm:$0xff]  ;;  %v379_v63 = vld [vmem:[%s11133_s8 + $0x3e8] sm:$0xff]  ;;  %v380_v47 = vld [vmem:[%s11133_s8 + $0x3f0] sm:$0xff] }
 0x12c   : > { %v12039_v45 = vadd.f32 %v4214_v33, %v4126_v12  ;;  %15239 = vst [vmem:[#allocation130_spill] sm:$0xff] %v12051_v31  ;;  %v625_v33 = vunpack.c.h.b16 %v439_v14  ;;  %v12059_v23 = vsel %vm11215_vm2, 0, %v1079_v40  ;;  %v14804_v25 = vshrl.u32 %v12047_v15, 16  ;;  %v375_v40 = vld [vmem:[%s11133_s8 + $0x3c8] sm:$0xff] }
 0x12d   : > { %v4039_v8 = vadd.f32 %v4038_v49, %v3950_v44  ;;  %v1072_v19 = vor.u32 %v15234_v5, %v1069_v6  ;;  %v1086_v49 = vor.u32 %v15236_v11, %v1083_v20  ;;  %v629_v6 = vunpack.c.h.b16 %v441_v22  ;;  %4370 = vmatpush.bf16.msrb.mxu1 %v9470_v59  ;;  %15241 = vst [vmem:[#allocation132_spill] sm:$0xff] %v12059_v23  ;;  %v376_v59 = vld [vmem:[%s11133_s8 + $0x3d0] sm:$0xff] }
 0x12e   : > { %v12067_v12 = vpack.c.b16 %v628_v55, %v624_v24  ;;  %v12073_v27 = vsel %vm11215_vm2, 0, %v1093_v32  ;;  %v1097_v11 = vrot.slane %v14804_v25, 7  ;;  %v377_v55 = vld [vmem:[%s11133_s8 + $0x3d8] sm:$0xff] }
 0x12f   : > { %v12055_v51 = vsel %vm11215_vm2, 0, %v1072_v19  ;;  %v12064_v14 = vsel %vm11215_vm2, 0, %v1086_v49  ;;  %15244 = vst [vmem:[#allocation135_spill] sm:$0xff] %v12073_v27  ;;  %v12076_v5 = vpack.c.b16 %v629_v6, %v625_v33  ;;  %v381_v32 = vld [vmem:[%s11133_s8 + $0x3f8] sm:$0xff] }
 0x130   : > { %15240 = vst [vmem:[#allocation131_spill] sm:$0xff] %v12055_v51  ;;  %v15247_v6 = vshrl.u32 %v12067_v12, 16 }
 0x131   : > { %v4127_v20 = vpop.f32.mrf.mxu2  ;;  %15242 = vst [vmem:[#allocation133_spill] sm:$0xff] %v12064_v14 }
 0x132   : > { %v3952_v44 = vpop.f32.mrf.mxu0  ;;  %v4041_v13 = vpop.f32.mrf.mxu1  ;;  %v4128_v22 = vadd.f32 %v4127_v20, %v4039_v8  ;;  %15243 = vst [vmem:[#allocation134_spill] sm:$0xff] %v12067_v12  ;;  %v14813_v8 = vshrl.u32 %v12051_v31, 16  ;;  %v1111_v60 = vrot.slane %v15247_v6, 7  ;;  %v15249_v6 = vshll.u32 %v12067_v12, 16 }
 0x133   : > { %v4216_v18 = vpop.f32.mrf.mxu3  ;;  %v3953_v50 = vadd.f32 %v3952_v44, %v11715_v36  ;;  %15245 = vst [vmem:[#allocation136_spill] sm:$0xff] %v12076_v5  ;;  %v14818_v44 = vshrl.u32 %v12076_v5, 16 }
 0x134   : > { %v12078_v19 = vadd.f32 %v4216_v18, %v4128_v22  ;;  %v1104_v33 = vrot.slane %v14813_v8, 7 }
 0x135   : > { %v4042_v16 = vadd.f32 %v4041_v13, %v3953_v50  ;;  %3991 = vmatmul.bf16.gmra.mxu0 %v12055_v51  ;;  %4080 = vmatmul.bf16.gmra.mxu1 %v12059_v23  ;;  %v442_v13 = vpack.c.bf16 %v375_v40, %v374_v48  ;;  %v444_v50 = vpack.c.bf16 %v379_v63, %v378_v42  ;;  %v15246_v51 = vshll.u32 %v12047_v15, 16 }
 0x136   : > { %4169 = vmatmul.bf16.gmra.mxu2 %v12064_v14  ;;  %v445_v14 = vpack.c.bf16 %v381_v32, %v380_v47  ;;  %v14819_v48 = vshll.u32 %v12076_v5, 16  ;;  %v15248_v42 = vshll.u32 %v12051_v31, 16 }
 0x137   : > { %4258 = vmatmul.bf16.gmra.mxu3 %v12073_v27  ;;  %v443_v27 = vpack.c.bf16 %v377_v55, %v376_v59  ;;  %v1100_v8 = vor.u32 %v15246_v51, %v1097_v11  ;;  %v630_v21 = vunpack.c.l.b16 %v442_v13  ;;  %v634_v59 = vunpack.c.l.b16 %v444_v50 }
 0x138   : > { %v1107_v63 = vor.u32 %v15248_v42, %v1104_v33  ;;  %v635_v55 = vunpack.c.h.b16 %v444_v50  ;;  %v636_v51 = vunpack.c.l.b16 %v445_v14  ;;  %v637_v32 = vunpack.c.h.b16 %v445_v14 }
 0x139   : > { %v4130_v22 = vpop.f32.mrf.mxu2  ;;  %v632_v47 = vunpack.c.l.b16 %v443_v27  ;;  %v633_v11 = vunpack.c.h.b16 %v443_v27  ;;  %v12117_v42 = vsel %vm11215_vm2, 0, %v1100_v8 }
 0x13a   : > { %v3954_v20 = vpop.f32.mrf.mxu0  ;;  %v4043_v18 = vpop.f32.mrf.mxu1  ;;  %v4131_v23 = vadd.f32 %v4130_v22, %v4042_v16  ;;  %v631_v16 = vunpack.c.h.b16 %v442_v13  ;;  %v1114_v22 = vor.u32 %v15249_v6, %v1111_v60  ;;  %15250 = vst [vmem:[#allocation137_spill] sm:$0xff] %v12117_v42 }
 0x13b   : > { %v4219_v25 = vpop.f32.mrf.mxu3  ;;  %v3955_v49 = vadd.f32 %v3954_v20, %v11715_v36  ;;  %v1118_v20 = vrot.slane %v14818_v44, 7  ;;  %v12128_v50 = vpack.c.b16 %v636_v51, %v632_v47 }
 0x13c   : > { %v12109_v24 = vadd.f32 %v4219_v25, %v4131_v23  ;;  %v12121_v23 = vsel %vm11215_vm2, 0, %v1107_v63  ;;  %v12123_v25 = vpack.c.b16 %v634_v59, %v630_v21  ;;  %v12125_v27 = vpack.c.b16 %v635_v55, %v631_v16 }
 0x13d   : > { %v4044_v40 = vadd.f32 %v4043_v18, %v3955_v49  ;;  %v1121_v49 = vor.u32 %v14819_v48, %v1118_v20  ;;  %15251 = vst [vmem:[#allocation138_spill] sm:$0xff] %v12121_v23  ;;  %v12130_v20 = vpack.c.b16 %v637_v32, %v633_v11  ;;  %v12136_v21 = vsel %vm11215_vm2, 0, %v1114_v22  ;;  %v10221_v11 = vld [vmem:[#allocation6 + $0xae0] sm:$0xf]  ;;  %v10721_v32 = vld [vmem:[#allocation6 + $0xaec] sm:$0xf0] }
 0x13e   : > { %15252 = vst [vmem:[#allocation139_spill] sm:$0xff] %v12123_v25  ;;  %v14828_v59 = vshrl.u32 %v12123_v25, 16  ;;  %v14831_v16 = vshrl.u32 %v12125_v27, 16  ;;  %v9965_v22 = vld [vmem:[#allocation6 + $0x8e0] sm:$0xf] }
 0x13f   : > { %15253 = vst [vmem:[#allocation140_spill] sm:$0xff] %v12125_v27  ;;  %v12140_v8 = vsel %vm11215_vm2, 0, %v1121_v49  ;;  %v10222_v49 = vor.u32 %v10721_v32, %v10221_v11  ;;  %v14833_v11 = vshll.u32 %v12128_v50, 16 }
 0x140   : > { %15254 = vst [vmem:[#allocation141_spill] sm:$0xff] %v12128_v50  ;;  %v1132_v48 = vrot.slane %v14831_v16, 7 }
 0x141   : > { %v4132_v14 = vpop.f32.mrf.mxu2  ;;  %15255 = vst [vmem:[#allocation142_spill] sm:$0xff] %v12130_v20  ;;  %4808 = vmatpush.bf16.msra.mxu2 %v10222_v49  ;;  %v10093_v49 = vld [vmem:[#allocation6 + $0x9e0] sm:$0xf] }
 0x142   : > { %v3957_v33 = vpop.f32.mrf.mxu0  ;;  %v4046_v18 = vpop.f32.mrf.mxu1  ;;  %v4133_v6 = vadd.f32 %v4132_v14, %v4044_v40  ;;  %15256 = vst [vmem:[#allocation143_spill] sm:$0xff] %v12136_v21  ;;  %v10753_v14 = vld [vmem:[#allocation6 + $0xbec] sm:$0xf0] }
 0x143   : > { %v4221_v13 = vpop.f32.mrf.mxu3  ;;  %v3958_v60 = vadd.f32 %v3957_v33, %v11715_v36  ;;  %15257 = vst [vmem:[#allocation144_spill] sm:$0xff] %v12140_v8  ;;  %v10657_v33 = vld [vmem:[#allocation6 + $0x8ec] sm:$0xf0] }
 0x144   : > { %v12142_v63 = vadd.f32 %v4221_v13, %v4133_v6  ;;  %v1125_v6 = vrot.slane %v14828_v59, 7  ;;  %v9966_v55 = vor.u32 %v10657_v33, %v9965_v22  ;;  %v15259_v59 = vshrl.u32 %v12130_v20, 16 }
 0x145   : > { %v4047_v44 = vadd.f32 %v4046_v18, %v3958_v60  ;;  %3996 = vmatmul.bf16.gmra.mxu0 %v12117_v42  ;;  %4085 = vmatmul.bf16.gmra.mxu1 %v12121_v23  ;;  %v10349_v18 = vld [vmem:[#allocation6 + $0xbe0] sm:$0xf]  ;;  %v15258_v23 = vshrl.u32 %v12128_v50, 16  ;;  %v14832_v22 = vshll.u32 %v12130_v20, 16 }
 0x146   : > { %4174 = vmatmul.bf16.gmra.mxu2 %v12136_v21  ;;  %v10350_v40 = vor.u32 %v10753_v14, %v10349_v18  ;;  %4630 = vmatpush.bf16.msra.mxu0 %v9966_v55  ;;  %v1146_v5 = vrot.slane %v15259_v59, 7  ;;  %v15260_v18 = vshll.u32 %v12123_v25, 16  ;;  %v10689_v55 = vld [vmem:[#allocation6 + $0x9ec] sm:$0xf0] }
 0x147   : > { %4263 = vmatmul.bf16.gmra.mxu3 %v12140_v8  ;;  %v1139_v42 = vrot.slane %v15258_v23, 7 }
 0x148   : > { %4897 = vmatpush.bf16.msra.mxu3 %v10350_v40  ;;  %v1128_v14 = vor.u32 %v15260_v18, %v1125_v6  ;;  %v10094_v40 = vor.u32 %v10689_v55, %v10093_v49  ;;  %v1149_v23 = vor.u32 %v14832_v22, %v1146_v5 }
 0x149   : > { %v4135_v51 = vpop.f32.mrf.mxu2 }
 0x14a   : > { %v3959_v13 = vpop.f32.mrf.mxu0  ;;  %v4048_v60 = vpop.f32.mrf.mxu1  ;;  %v4136_v21 = vadd.f32 %v4135_v51, %v4047_v44  ;;  %v15261_v44 = vshll.u32 %v12125_v27, 16  ;;  %4719 = vmatpush.bf16.msra.mxu1 %v10094_v40 }
 0x14b   : > { %v4224_v47 = vpop.f32.mrf.mxu3  ;;  %v3960_v8 = vadd.f32 %v3959_v13, %v11715_v36 }
 0x14c   : > { %v12163_v33 = vadd.f32 %v4224_v47, %v4136_v21  ;;  %v1135_v51 = vor.u32 %v15261_v44, %v1132_v48  ;;  %v12175_v21 = vsel %vm11215_vm2, 0, %v1128_v14  ;;  %v12190_v14 = vsel %vm11215_vm2, 0, %v1149_v23 }
 0x14d   : > { %v4049_v32 = vadd.f32 %v4048_v60, %v3960_v8  ;;  %v1142_v8 = vor.u32 %v14833_v11, %v1139_v42  ;;  %15262 = vst [vmem:[#allocation145_spill] sm:$0xff] %v12175_v21 }
 0x14e   : > { %v12179_v47 = vsel %vm11215_vm2, 0, %v1135_v51  ;;  %15265 = vst [vmem:[#allocation148_spill] sm:$0xff] %v12190_v14 }
 0x14f   : > { %15263 = vst [vmem:[#allocation146_spill] sm:$0xff] %v12179_v47  ;;  %v12186_v5 = vsel %vm11215_vm2, 0, %v1142_v8 }
 0x150   : > { %15264 = vst [vmem:[#allocation147_spill] sm:$0xff] %v12186_v5 }
 0x151   : > { %v4137_v48 = vpop.f32.mrf.mxu2 }
 0x152   : > { %v3962_v59 = vpop.f32.mrf.mxu0  ;;  %v4051_v13 = vpop.f32.mrf.mxu1  ;;  %v4138_v18 = vadd.f32 %v4137_v48, %v4049_v32 }
 0x153   : > { %v4226_v60 = vpop.f32.mrf.mxu3  ;;  %v3963_v6 = vadd.f32 %v3962_v59, %v11715_v36 }
 0x154   : > { %v12192_v44 = vadd.f32 %v4226_v60, %v4138_v18 }
 0x155   : > { %v4052_v42 = vadd.f32 %v4051_v13, %v3963_v6  ;;  %4001 = vmatmul.bf16.gmra.mxu0 %v12175_v21  ;;  %4090 = vmatmul.bf16.gmra.mxu1 %v12179_v47  ;;  %v10077_v47 = vld [vmem:[#allocation6 + $0x9c0] sm:$0xf] }
 0x156   : > { %4179 = vmatmul.bf16.gmra.mxu2 %v12186_v5 }
 0x157   : > { %4268 = vmatmul.bf16.gmra.mxu3 %v12190_v14 }
 0x159   : > { %v4140_v49 = vpop.f32.mrf.mxu2 }
 0x15a   : > { %v3964_v32 = vpop.f32.mrf.mxu0  ;;  %v4053_v51 = vpop.f32.mrf.mxu1  ;;  %v4141_v59 = vadd.f32 %v4140_v49, %v4052_v42  ;;  %v10205_v42 = vld [vmem:[#allocation6 + $0xac0] sm:$0xf] }
 0x15b   : > { %v4229_v55 = vpop.f32.mrf.mxu3  ;;  %v3965_v40 = vadd.f32 %v3964_v32, %v11715_v36  ;;  %v10717_v32 = vld [vmem:[#allocation6 + $0xacc] sm:$0xf0] }
 0x15c   : > { %v12197_v8 = vadd.f32 %v4229_v55, %v4141_v59  ;;  %v10206_v49 = vor.u32 %v10717_v32, %v10205_v42  ;;  %v10653_v55 = vld [vmem:[#allocation6 + $0x8cc] sm:$0xf0] }
 0x15d   : > { %v4054_v13 = vadd.f32 %v4053_v51, %v3965_v40  ;;  %v9949_v51 = vld [vmem:[#allocation6 + $0x8c0] sm:$0xf]  ;;  %v10749_v59 = vld [vmem:[#allocation6 + $0xbcc] sm:$0xf0] }
 0x15e   : > { %v10333_v40 = vld [vmem:[#allocation6 + $0xbc0] sm:$0xf]  ;;  %4809 = vmatpush.bf16.msra.mxu2 %v10206_v49  ;;  %v10685_v42 = vld [vmem:[#allocation6 + $0x9cc] sm:$0xf0] }
 0x15f   : > { %v10078_v32 = vor.u32 %v10685_v42, %v10077_v47 }
 0x161   : > { %v4142_v23 = vpop.f32.mrf.mxu2  ;;  %4720 = vmatpush.bf16.msra.mxu1 %v10078_v32 }
 0x162   : > { %v3967_v48 = vpop.f32.mrf.mxu0  ;;  %v4056_v17 = vpop.f32.mrf.mxu1  ;;  %v4143_v18 = vadd.f32 %v4142_v23, %v4054_v13  ;;  %v10334_v23 = vor.u32 %v10749_v59, %v10333_v40 }
 0x163   : > { %v4231_v6 = vpop.f32.mrf.mxu3  ;;  %v3968_v60 = vadd.f32 %v3967_v48, %v11715_v36 }
 0x164   : > { %v12202_v22 = vadd.f32 %v4231_v6, %v4143_v18  ;;  %4898 = vmatpush.bf16.msra.mxu3 %v10334_v23 }
 0x165   : > { %v4057_v16 = vadd.f32 %v4056_v17, %v3968_v60  ;;  %4282 = vmatmul.bf16.vlgmr.msrb.gmra.mxu0 %v11193_v56  ;;  %4371 = vmatmul.bf16.vlgmr.msrb.gmra.mxu1 %v11195_v57  ;;  %v9950_v17 = vor.u32 %v10653_v55, %v9949_v51 }
 0x166   : > { %4460 = vmatmul.bf16.vlgmr.msrb.gmra.mxu2 %v11205_v9 }
 0x167   : > { %4549 = vmatmul.bf16.vlgmr.msrb.gmra.mxu3 %v11207_v10  ;;  %4631 = vmatpush.bf16.msra.mxu0 %v9950_v17 }
 0x169   : > { %v4145_v60 = vpop.f32.mrf.mxu2 }
 0x16a   : > { %v3969_v48 = vpop.f32.mrf.mxu0  ;;  %v4058_v13 = vpop.f32.mrf.mxu1  ;;  %v4146_v18 = vadd.f32 %v4145_v60, %v4057_v16 }
 0x16b   : > { %v4234_v11 = vpop.f32.mrf.mxu3  ;;  %v3970_v6 = vadd.f32 %v3969_v48, %v11715_v36 }
 0x16c   : > { %v12207_v5 = vadd.f32 %v4234_v11, %v4146_v18 }
 0x16d   : > { %v4059_v14 = vadd.f32 %v4058_v13, %v3970_v6 }
 0x171   : > { %v4147_v9 = vpop.f32.mrf.mxu2 }
 0x172   : > { %v3972_v21 = vpop.f32.mrf.mxu0  ;;  %v4061_v10 = vpop.f32.mrf.mxu1  ;;  %v4148_v40 = vadd.f32 %v4147_v9, %v4059_v14 }
 0x173   : > { %v4236_v51 = vpop.f32.mrf.mxu3  ;;  %v3973_v55 = vadd.f32 %v3972_v21, %v11715_v36 }
 0x174   : > { %v12212_v16 = vadd.f32 %v4236_v51, %v4148_v40  ;;  %v10189_v51 = vld [vmem:[#allocation6 + $0xaa0] sm:$0xf] }
 0x175   : > { %v4062_v59 = vadd.f32 %v4061_v10, %v3973_v55  ;;  %4287 = vmatmul.bf16.gmra.mxu0 %v11243_v34  ;;  %4376 = vmatmul.bf16.gmra.mxu1 %v11253_v41  ;;  %v10713_v55 = vld [vmem:[#allocation6 + $0xaac] sm:$0xf0]  ;;  %v9933_v40 = vld [vmem:[#allocation6 + $0x8a0] sm:$0xf] }
 0x176   : > { %4465 = vmatmul.bf16.gmra.mxu2 %v11279_v1 }
 0x177   : > { %4554 = vmatmul.bf16.gmra.mxu3 %v11281_v2 }
 0x179   : > { %v4150_v49 = vpop.f32.mrf.mxu2 }
 0x17a   : > { %v3974_v11 = vpop.f32.mrf.mxu0  ;;  %v4063_v47 = vpop.f32.mrf.mxu1  ;;  %v4151_v17 = vadd.f32 %v4150_v49, %v4062_v59  ;;  %v10190_v59 = vor.u32 %v10713_v55, %v10189_v51  ;;  %v10745_v49 = vld [vmem:[#allocation6 + $0xbac] sm:$0xf0] }
 0x17b   : > { %v4239_v48 = vpop.f32.mrf.mxu3  ;;  %v3975_v13 = vadd.f32 %v3974_v11, %v11715_v36  ;;  %v10649_v11 = vld [vmem:[#allocation6 + $0x8ac] sm:$0xf0] }
 0x17c   : > { %v12217_v9 = vadd.f32 %v4239_v48, %v4151_v17  ;;  %v9934_v17 = vor.u32 %v10649_v11, %v9933_v40  ;;  %4810 = vmatpush.bf16.msra.mxu2 %v10190_v59  ;;  %v10681_v51 = vld [vmem:[#allocation6 + $0x9ac] sm:$0xf0] }
 0x17d   : > { %v4064_v21 = vadd.f32 %v4063_v47, %v3975_v13  ;;  %v10317_v47 = vld [vmem:[#allocation6 + $0xba0] sm:$0xf] }
 0x17e   : > { %4632 = vmatpush.bf16.msra.mxu0 %v9934_v17 }
 0x181   : > { %v4152_v23 = vpop.f32.mrf.mxu2 }
 0x182   : > { %v3977_v10 = vpop.f32.mrf.mxu0  ;;  %v4066_v14 = vpop.f32.mrf.mxu1  ;;  %v4153_v18 = vadd.f32 %v4152_v23, %v4064_v21  ;;  %v10318_v21 = vor.u32 %v10745_v49, %v10317_v47 }
 0x183   : > { %v4241_v60 = vpop.f32.mrf.mxu3  ;;  %v3978_v6 = vadd.f32 %v3977_v10, %v11715_v36 }
 0x184   : > { %v12222_v32 = vadd.f32 %v4241_v60, %v4153_v18  ;;  %4899 = vmatpush.bf16.msra.mxu3 %v10318_v21 }
 0x185   : > { %v4067_v42 = vadd.f32 %v4066_v14, %v3978_v6  ;;  %4292 = vmatmul.bf16.gmra.mxu0 %v11295_v28  ;;  %4381 = vmatmul.bf16.gmra.mxu1 %v11299_v30 }
 0x186   : > { %15266 = vst [vmem:[#allocation149_spill] sm:$0xff] %v12222_v32  ;;  %4470 = vmatmul.bf16.gmra.mxu2 %v11317_v61 }
 0x187   : > { %4559 = vmatmul.bf16.gmra.mxu3 %v11325_v3  ;;  %v10061_v3 = vld [vmem:[#allocation6 + $0x9a0] sm:$0xf] }
 0x188   : > { %v10062_v55 = vor.u32 %v10681_v51, %v10061_v3 }
 0x189   : > { %v4155_v10 = vpop.f32.mrf.mxu2 }
 0x18a   : > { %v3979_v48 = vpop.f32.mrf.mxu0  ;;  %v4068_v13 = vpop.f32.mrf.mxu1  ;;  %v4156_v60 = vadd.f32 %v4155_v10, %v4067_v42  ;;  %4721 = vmatpush.bf16.msra.mxu1 %v10062_v55 }
 0x18b   : > { %v4244_v14 = vpop.f32.mrf.mxu3  ;;  %v3980_v23 = vadd.f32 %v3979_v48, %v11715_v36 }
 0x18c   : > { %v12227_v18 = vadd.f32 %v4244_v14, %v4156_v60 }
 0x18d   : > { %v4069_v6 = vadd.f32 %v4068_v13, %v3980_v23 }
 0x191   : > { %v4157_v30 = vpop.f32.mrf.mxu2 }
 0x192   : > { %v3982_v61 = vpop.f32.mrf.mxu0  ;;  %v4071_v32 = vpop.f32.mrf.mxu1  ;;  %v4158_v47 = vadd.f32 %v4157_v30, %v4069_v6 }
 0x193   : > { %v4246_v40 = vpop.f32.mrf.mxu3  ;;  %v3983_v11 = vadd.f32 %v3982_v61, %v11715_v36 }
 0x194   : > { %v12232_v42 = vadd.f32 %v4246_v40, %v4158_v47  ;;  %v10173_v40 = vld [vmem:[#allocation6 + $0xa80] sm:$0xf] }
 0x195   : > { %v4072_v49 = vadd.f32 %v4071_v32, %v3983_v11  ;;  %4297 = vmatmul.bf16.gmra.mxu0 %v11367_v43  ;;  %4386 = vmatmul.bf16.gmra.mxu1 %v11369_v58  ;;  %v10709_v11 = vld [vmem:[#allocation6 + $0xa8c] sm:$0xf0]  ;;  %v9917_v47 = vld [vmem:[#allocation6 + $0x880] sm:$0xf] }
 0x196   : > { %4475 = vmatmul.bf16.gmra.mxu2 %v11371_v37 }
 0x197   : > { %4564 = vmatmul.bf16.gmra.mxu3 %v11384_v52 }
 0x199   : > { %v4160_v48 = vpop.f32.mrf.mxu2 }
 0x19a   : > { %v3984_v3 = vpop.f32.mrf.mxu0  ;;  %v4073_v59 = vpop.f32.mrf.mxu1  ;;  %v4161_v21 = vadd.f32 %v4160_v48, %v4072_v49  ;;  %v10174_v49 = vor.u32 %v10709_v11, %v10173_v40  ;;  %v10741_v48 = vld [vmem:[#allocation6 + $0xb8c] sm:$0xf0] }
 0x19b   : > { %v4249_v13 = vpop.f32.mrf.mxu3  ;;  %v3985_v17 = vadd.f32 %v3984_v3, %v11715_v36  ;;  %v10645_v3 = vld [vmem:[#allocation6 + $0x88c] sm:$0xf0] }
 0x19c   : > { %v12237_v30 = vadd.f32 %v4249_v13, %v4161_v21  ;;  %v9918_v21 = vor.u32 %v10645_v3, %v9917_v47  ;;  %4811 = vmatpush.bf16.msra.mxu2 %v10174_v49  ;;  %v10677_v40 = vld [vmem:[#allocation6 + $0x98c] sm:$0xf0] }
 0x19d   : > { %v4074_v61 = vadd.f32 %v4073_v59, %v3985_v17  ;;  %v10301_v59 = vld [vmem:[#allocation6 + $0xb80] sm:$0xf] }
 0x19e   : > { %4633 = vmatpush.bf16.msra.mxu0 %v9918_v21 }
 0x1a1   : > { %v4162_v14 = vpop.f32.mrf.mxu2 }
 0x1a2   : > { %v3987_v32 = vpop.f32.mrf.mxu0  ;;  %v4076_v10 = vpop.f32.mrf.mxu1  ;;  %v4163_v6 = vadd.f32 %v4162_v14, %v4074_v61  ;;  %v10302_v61 = vor.u32 %v10741_v48, %v10301_v59 }
 0x1a3   : > { %v4251_v23 = vpop.f32.mrf.mxu3  ;;  %v3988_v60 = vadd.f32 %v3987_v32, %v11715_v36 }
 0x1a4   : > { %v12242_v55 = vadd.f32 %v4251_v23, %v4163_v6  ;;  %4900 = vmatpush.bf16.msra.mxu3 %v10302_v61 }
 0x1a5   : > { %v4077_v51 = vadd.f32 %v4076_v10, %v3988_v60  ;;  %4302 = vmatmul.bf16.gmra.mxu0 %v11427_v54  ;;  %4391 = vmatmul.bf16.gmra.mxu1 %v11429_v7 }
 0x1a6   : > { %15267 = vst [vmem:[#allocation150_spill] sm:$0xff] %v12242_v55  ;;  %4480 = vmatmul.bf16.gmra.mxu2 %v11445_v62 }
 0x1a7   : > { %4569 = vmatmul.bf16.gmra.mxu3 %v11447_v53  ;;  %v10045_v53 = vld [vmem:[#allocation6 + $0x980] sm:$0xf] }
 0x1a8   : > { %v10046_v11 = vor.u32 %v10677_v40, %v10045_v53 }
 0x1a9   : > { %v4165_v32 = vpop.f32.mrf.mxu2 }
 0x1aa   : > { %v3989_v13 = vpop.f32.mrf.mxu0  ;;  %v4078_v17 = vpop.f32.mrf.mxu1  ;;  %v4166_v23 = vadd.f32 %v4165_v32, %v4077_v51  ;;  %4722 = vmatpush.bf16.msra.mxu1 %v10046_v11 }
 0x1ab   : > { %v4254_v10 = vpop.f32.mrf.mxu3  ;;  %v3990_v14 = vadd.f32 %v3989_v13, %v11715_v36 }
 0x1ac   : > { %v12247_v6 = vadd.f32 %v4254_v10, %v4166_v23 }
 0x1ad   : > { %v4079_v60 = vadd.f32 %v4078_v17, %v3990_v14 }
 0x1b1   : > { %v4167_v7 = vpop.f32.mrf.mxu2 }
 0x1b2   : > { %v3992_v62 = vpop.f32.mrf.mxu0  ;;  %v4081_v55 = vpop.f32.mrf.mxu1  ;;  %v4168_v59 = vadd.f32 %v4167_v7, %v4079_v60 }
 0x1b3   : > { %v4256_v47 = vpop.f32.mrf.mxu3  ;;  %v3993_v3 = vadd.f32 %v3992_v62, %v11715_v36 }
 0x1b4   : > { %v12252_v51 = vadd.f32 %v4256_v47, %v4168_v59  ;;  %v15270_v47 = vld [vmem:[#allocation63_spill] sm:$0xff]  ;;  %v10157_v59 = vld [vmem:[#allocation6 + $0xa60] sm:$0xf] }
 0x1b5   : > { %v4082_v48 = vadd.f32 %v4081_v55, %v3993_v3  ;;  %4307 = vmatmul.bf16.gmra.mxu0 %v11475_v38  ;;  %4396 = vmatmul.bf16.gmra.mxu1 %v11477_v26  ;;  %v15271_v3 = vld [vmem:[#allocation64_spill] sm:$0xff] }
 0x1b6   : > { %4485 = vmatmul.bf16.gmra.mxu2 %v11493_v0 }
 0x1b7   : > { %4574 = vmatmul.bf16.gmra.mxu3 %v11495_v4 }
 0x1b9   : > { %v4170_v13 = vpop.f32.mrf.mxu2 }
 0x1ba   : > { %v3994_v53 = vpop.f32.mrf.mxu0  ;;  %v4083_v49 = vpop.f32.mrf.mxu1  ;;  %v4171_v61 = vadd.f32 %v4170_v13, %v4082_v48  ;;  %v10705_v48 = vld [vmem:[#allocation6 + $0xa6c] sm:$0xf0] }
 0x1bb   : > { %v4259_v17 = vpop.f32.mrf.mxu3  ;;  %v3995_v21 = vadd.f32 %v3994_v53, %v11715_v36  ;;  %v9901_v53 = vld [vmem:[#allocation6 + $0x860] sm:$0xf]  ;;  %v10641_v13 = vld [vmem:[#allocation6 + $0x86c] sm:$0xf0] }
 0x1bc   : > { %v12257_v7 = vadd.f32 %v4259_v17, %v4171_v61  ;;  %v10285_v17 = vld [vmem:[#allocation6 + $0xb60] sm:$0xf] }
 0x1bd   : > { %v4084_v62 = vadd.f32 %v4083_v49, %v3995_v21  ;;  %v10158_v49 = vor.u32 %v10705_v48, %v10157_v59  ;;  %v10737_v21 = vld [vmem:[#allocation6 + $0xb6c] sm:$0xf0] }
 0x1be   : > { %15268 = vst [vmem:[#allocation151_spill] sm:$0xff] %v12257_v7  ;;  %v10673_v59 = vld [vmem:[#allocation6 + $0x96c] sm:$0xf0] }
 0x1bf   : > { %4812 = vmatpush.bf16.msra.mxu2 %v10158_v49 }
 0x1c1   : > { %v4172_v10 = vpop.f32.mrf.mxu2 }
 0x1c2   : > { %v3997_v55 = vpop.f32.mrf.mxu0  ;;  %v4086_v32 = vpop.f32.mrf.mxu1  ;;  %v4173_v60 = vadd.f32 %v4172_v10, %v4084_v62 }
 0x1c3   : > { %v4261_v14 = vpop.f32.mrf.mxu3  ;;  %v3998_v23 = vadd.f32 %v3997_v55, %v11715_v36  ;;  %v9902_v55 = vor.u32 %v10641_v13, %v9901_v53 }
 0x1c4   : > { %v12262_v11 = vadd.f32 %v4261_v14, %v4173_v60 }
 0x1c5   : > { %v4087_v40 = vadd.f32 %v4086_v32, %v3998_v23  ;;  %4312 = vmatmul.bf16.gmra.mxu0 %v11547_v35  ;;  %4401 = vmatmul.bf16.gmra.mxu1 %v11549_v29  ;;  %v10286_v32 = vor.u32 %v10737_v21, %v10285_v17 }
 0x1c6   : > { %15269 = vst [vmem:[#allocation152_spill] sm:$0xff] %v12262_v11  ;;  %4490 = vmatmul.bf16.gmra.mxu2 %v15270_v47  ;;  %4634 = vmatpush.bf16.msra.mxu0 %v9902_v55  ;;  %v10029_v11 = vld [vmem:[#allocation6 + $0x960] sm:$0xf]  ;;  %v15277_v55 = vld [vmem:[#allocation70_spill] sm:$0xff] }
 0x1c7   : > { %4579 = vmatmul.bf16.gmra.mxu3 %v15271_v3  ;;  %v10030_v48 = vor.u32 %v10673_v59, %v10029_v11 }
 0x1c8   : > { %4901 = vmatpush.bf16.msra.mxu3 %v10286_v32 }
 0x1c9   : > { %v4175_v10 = vpop.f32.mrf.mxu2  ;;  %4723 = vmatpush.bf16.msra.mxu1 %v10030_v48 }
 0x1ca   : > { %v3999_v61 = vpop.f32.mrf.mxu0  ;;  %v4088_v62 = vpop.f32.mrf.mxu1  ;;  %v4176_v60 = vadd.f32 %v4175_v10, %v4087_v40  ;;  %v15274_v40 = vld [vmem:[#allocation66_spill] sm:$0xff] }
 0x1cb   : > { %v4264_v23 = vpop.f32.mrf.mxu3  ;;  %v4000_v14 = vadd.f32 %v3999_v61, %v11715_v36  ;;  %v15273_v61 = vld [vmem:[#allocation65_spill] sm:$0xff] }
 0x1cc   : > { %v12267_v47 = vadd.f32 %v4264_v23, %v4176_v60 }
 0x1cd   : > { %v4089_v3 = vadd.f32 %v4088_v62, %v4000_v14  ;;  %v15276_v62 = vld [vmem:[#allocation69_spill] sm:$0xff] }
 0x1ce   : > { %15272 = vst [vmem:[#allocation153_spill] sm:$0xff] %v12267_v47 }
 0x1d1   : > { %v4177_v7 = vpop.f32.mrf.mxu2 }
 0x1d2   : > { %v4002_v29 = vpop.f32.mrf.mxu0  ;;  %v4091_v35 = vpop.f32.mrf.mxu1  ;;  %v4178_v17 = vadd.f32 %v4177_v7, %v4089_v3 }
 0x1d3   : > { %v4266_v53 = vpop.f32.mrf.mxu3  ;;  %v4003_v13 = vadd.f32 %v4002_v29, %v11715_v36 }
 0x1d4   : > { %v12272_v49 = vadd.f32 %v4266_v53, %v4178_v17  ;;  %v15279_v53 = vld [vmem:[#allocation89_spill] sm:$0xff] }
 0x1d5   : > { %v4092_v21 = vadd.f32 %v4091_v35, %v4003_v13  ;;  %4317 = vmatmul.bf16.gmra.mxu0 %v15273_v61  ;;  %4406 = vmatmul.bf16.gmra.mxu1 %v15274_v40  ;;  %v15283_v61 = vld [vmem:[#allocation79_spill] sm:$0xff] }
 0x1d6   : > { %15275 = vst [vmem:[#allocation154_spill] sm:$0xff] %v12272_v49  ;;  %4495 = vmatmul.bf16.gmra.mxu2 %v15276_v62  ;;  %v15280_v49 = vld [vmem:[#allocation75_spill] sm:$0xff] }
 0x1d7   : > { %4584 = vmatmul.bf16.gmra.mxu3 %v15277_v55  ;;  %v15281_v55 = vld [vmem:[#allocation76_spill] sm:$0xff] }
 0x1d9   : > { %v4180_v10 = vpop.f32.mrf.mxu2 }
 0x1da   : > { %v4004_v11 = vpop.f32.mrf.mxu0  ;;  %v4093_v32 = vpop.f32.mrf.mxu1  ;;  %v4181_v60 = vadd.f32 %v4180_v10, %v4092_v21  ;;  %v10141_v21 = vld [vmem:[#allocation6 + $0xa40] sm:$0xf] }
 0x1db   : > { %v4269_v23 = vpop.f32.mrf.mxu3  ;;  %v4005_v14 = vadd.f32 %v4004_v11, %v11715_v36  ;;  %v15284_v36 = vld [vmem:[#allocation80_spill] sm:$0xff]  ;;  %v10701_v11 = vld [vmem:[#allocation6 + $0xa4c] sm:$0xf0] }
 0x1dc   : > { %v12277_v7 = vadd.f32 %v4269_v23, %v4181_v60  ;;  %v10142_v10 = vor.u32 %v10701_v11, %v10141_v21  ;;  %v10637_v23 = vld [vmem:[#allocation6 + $0x84c] sm:$0xf0] }
 0x1dd   : > { %v4094_v29 = vadd.f32 %v4093_v32, %v4005_v14  ;;  %v9885_v32 = vld [vmem:[#allocation6 + $0x840] sm:$0xf]  ;;  %v10733_v60 = vld [vmem:[#allocation6 + $0xb4c] sm:$0xf0] }
 0x1de   : > { %15278 = vst [vmem:[#allocation155_spill] sm:$0xff] %v12277_v7  ;;  %v10269_v14 = vld [vmem:[#allocation6 + $0xb40] sm:$0xf]  ;;  %4813 = vmatpush.bf16.msra.mxu2 %v10142_v10  ;;  %v10669_v21 = vld [vmem:[#allocation6 + $0x94c] sm:$0xf0] }
 0x1e1   : > { %v4182_v59 = vpop.f32.mrf.mxu2 }
 0x1e2   : > { %v4283_v35 = vpop.f32.mrf.mxu0  ;;  %v4372_v3 = vpop.f32.mrf.mxu1  ;;  %v4183_v17 = vadd.f32 %v4182_v59, %v4094_v29  ;;  %v10270_v59 = vor.u32 %v10733_v60, %v10269_v14 }
 0x1e3   : > { %v4271_v48 = vpop.f32.mrf.mxu3  ;;  %v4284_v13 = vadd.f32 %v4283_v35, %v15279_v53 }
 0x1e4   : > { %v12282_v40 = vadd.f32 %v4271_v48, %v4183_v17  ;;  %4902 = vmatpush.bf16.msra.mxu3 %v10270_v59 }
 0x1e5   : > { %v4373_v62 = vadd.f32 %v4372_v3, %v4284_v13  ;;  %4322 = vmatmul.bf16.gmra.mxu0 %v15280_v49  ;;  %4411 = vmatmul.bf16.gmra.mxu1 %v15281_v55  ;;  %v9886_v3 = vor.u32 %v10637_v23, %v9885_v32  ;;  %v15285_v55 = vld [vmem:[#allocation98_spill] sm:$0xff]  ;;  %v15287_v23 = vld [vmem:[#allocation99_spill] sm:$0xff] }
 0x1e6   : > { %15282 = vst [vmem:[#allocation89_spill] sm:$0xff] %v12282_v40  ;;  %4500 = vmatmul.bf16.gmra.mxu2 %v15283_v61  ;;  %v10013_v40 = vld [vmem:[#allocation6 + $0x940] sm:$0xf] }
 0x1e7   : > { %4589 = vmatmul.bf16.gmra.mxu3 %v15284_v36  ;;  %4635 = vmatpush.bf16.msra.mxu0 %v9886_v3  ;;  %v10014_v11 = vor.u32 %v10669_v21, %v10013_v40 }
 0x1e9   : > { %v4461_v53 = vpop.f32.mrf.mxu2  ;;  %4724 = vmatpush.bf16.msra.mxu1 %v10014_v11 }
 0x1ea   : > { %v4285_v35 = vpop.f32.mrf.mxu0  ;;  %v4374_v29 = vpop.f32.mrf.mxu1  ;;  %v4462_v17 = vadd.f32 %v4461_v53, %v4373_v62  ;;  %v15289_v62 = vld [vmem:[#allocation82_spill] sm:$0xff] }
 0x1eb   : > { %v4550_v13 = vpop.f32.mrf.mxu3  ;;  %v4286_v48 = vadd.f32 %v4285_v35, %v15285_v55  ;;  %v15288_v55 = vld [vmem:[#allocation81_spill] sm:$0xff] }
 0x1ec   : > { %v12287_v61 = vadd.f32 %v4550_v13, %v4462_v17  ;;  %v15291_v35 = vld [vmem:[#allocation85_spill] sm:$0xff]  ;;  %v15293_v13 = vld [vmem:[#allocation108_spill] sm:$0xff] }
 0x1ed   : > { %v4375_v36 = vadd.f32 %v4374_v29, %v4286_v48  ;;  %v15292_v29 = vld [vmem:[#allocation86_spill] sm:$0xff] }
 0x1ee   : > { %15286 = vst [vmem:[#allocation98_spill] sm:$0xff] %v12287_v61 }
 0x1f1   : > { %v4463_v47 = vpop.f32.mrf.mxu2 }
 0x1f2   : > { %v4288_v49 = vpop.f32.mrf.mxu0  ;;  %v4377_v7 = vpop.f32.mrf.mxu1  ;;  %v4464_v60 = vadd.f32 %v4463_v47, %v4375_v36 }
 0x1f3   : > { %v4552_v32 = vpop.f32.mrf.mxu3  ;;  %v4289_v14 = vadd.f32 %v4288_v49, %v15287_v23 }
 0x1f4   : > { %v12292_v10 = vadd.f32 %v4552_v32, %v4464_v60  ;;  %v15295_v32 = vld [vmem:[#allocation109_spill] sm:$0xff] }
 0x1f5   : > { %v4378_v4 = vadd.f32 %v4377_v7, %v4289_v14  ;;  %4327 = vmatmul.bf16.gmra.mxu0 %v15288_v55  ;;  %4416 = vmatmul.bf16.gmra.mxu1 %v15289_v62  ;;  %v15299_v62 = vld [vmem:[#allocation96_spill] sm:$0xff] }
 0x1f6   : > { %15290 = vst [vmem:[#allocation99_spill] sm:$0xff] %v12292_v10  ;;  %4505 = vmatmul.bf16.gmra.mxu2 %v15291_v35  ;;  %v15296_v10 = vld [vmem:[#allocation90_spill] sm:$0xff] }
 0x1f7   : > { %4594 = vmatmul.bf16.gmra.mxu3 %v15292_v29  ;;  %v15297_v29 = vld [vmem:[#allocation93_spill] sm:$0xff] }
 0x1f9   : > { %v4466_v59 = vpop.f32.mrf.mxu2 }
 0x1fa   : > { %v4290_v40 = vpop.f32.mrf.mxu0  ;;  %v4379_v3 = vpop.f32.mrf.mxu1  ;;  %v4467_v17 = vadd.f32 %v4466_v59, %v4378_v4  ;;  %v15300_v4 = vld [vmem:[#allocation97_spill] sm:$0xff]  ;;  %v9869_v59 = vld [vmem:[#allocation6 + $0x820] sm:$0xf] }
 0x1fb   : > { %v4555_v53 = vpop.f32.mrf.mxu3  ;;  %v4291_v48 = vadd.f32 %v4290_v40, %v15293_v13  ;;  %v10125_v40 = vld [vmem:[#allocation6 + $0xa20] sm:$0xf]  ;;  %v10633_v13 = vld [vmem:[#allocation6 + $0x82c] sm:$0xf0] }
 0x1fc   : > { %v12297_v47 = vadd.f32 %v4555_v53, %v4467_v17  ;;  %v10729_v17 = vld [vmem:[#allocation6 + $0xb2c] sm:$0xf0] }
 0x1fd   : > { %v4380_v49 = vadd.f32 %v4379_v3, %v4291_v48  ;;  %v10697_v3 = vld [vmem:[#allocation6 + $0xa2c] sm:$0xf0]  ;;  %v10253_v48 = vld [vmem:[#allocation6 + $0xb20] sm:$0xf] }
 0x1fe   : > { %15294 = vst [vmem:[#allocation108_spill] sm:$0xff] %v12297_v47  ;;  %v10126_v53 = vor.u32 %v10697_v3, %v10125_v40  ;;  %v10665_v40 = vld [vmem:[#allocation6 + $0x92c] sm:$0xf0] }
 0x200   : > { %4814 = vmatpush.bf16.msra.mxu2 %v10126_v53 }
 0x201   : > { %v4468_v21 = vpop.f32.mrf.mxu2 }
 0x202   : > { %v4293_v7 = vpop.f32.mrf.mxu0  ;;  %v4382_v36 = vpop.f32.mrf.mxu1  ;;  %v4469_v14 = vadd.f32 %v4468_v21, %v4380_v49  ;;  %v10254_v21 = vor.u32 %v10729_v17, %v10253_v48 }
 0x203   : > { %v4557_v11 = vpop.f32.mrf.mxu3  ;;  %v4294_v23 = vadd.f32 %v4293_v7, %v15295_v32 }
 0x204   : > { %v12302_v35 = vadd.f32 %v4557_v11, %v4469_v14  ;;  %4903 = vmatpush.bf16.msra.mxu3 %v10254_v21 }
 0x205   : > { %v4383_v60 = vadd.f32 %v4382_v36, %v4294_v23  ;;  %4332 = vmatmul.bf16.gmra.mxu0 %v15296_v10  ;;  %4421 = vmatmul.bf16.gmra.mxu1 %v15297_v29  ;;  %v9870_v36 = vor.u32 %v10633_v13, %v9869_v59  ;;  %v15301_v29 = vld [vmem:[#allocation118_spill] sm:$0xff]  ;;  %v15302_v13 = vld [vmem:[#allocation119_spill] sm:$0xff] }
 0x206   : > { %15298 = vst [vmem:[#allocation109_spill] sm:$0xff] %v12302_v35  ;;  %4510 = vmatmul.bf16.gmra.mxu2 %v15299_v62  ;;  %v9997_v62 = vld [vmem:[#allocation6 + $0x920] sm:$0xf] }
 0x207   : > { %4599 = vmatmul.bf16.gmra.mxu3 %v15300_v4  ;;  %4636 = vmatpush.bf16.msra.mxu0 %v9870_v36  ;;  %v9998_v3 = vor.u32 %v10665_v40, %v9997_v62 }
 0x209   : > { %v4471_v32 = vpop.f32.mrf.mxu2  ;;  %4725 = vmatpush.bf16.msra.mxu1 %v9998_v3 }
 0x20a   : > { %v4295_v7 = vpop.f32.mrf.mxu0  ;;  %v4384_v49 = vpop.f32.mrf.mxu1  ;;  %v4472_v14 = vadd.f32 %v4471_v32, %v4383_v60  ;;  %v15304_v60 = vld [vmem:[#allocation101_spill] sm:$0xff] }
 0x20b   : > { %v4560_v23 = vpop.f32.mrf.mxu3  ;;  %v4296_v11 = vadd.f32 %v4295_v7, %v15301_v29  ;;  %v15303_v29 = vld [vmem:[#allocation100_spill] sm:$0xff] }
 0x20c   : > { %v12307_v4 = vadd.f32 %v4560_v23, %v4472_v14  ;;  %v15306_v7 = vld [vmem:[#allocation104_spill] sm:$0xff] }
 0x20d   : > { %v4385_v35 = vadd.f32 %v4384_v49, %v4296_v11  ;;  %v15307_v49 = vld [vmem:[#allocation105_spill] sm:$0xff]  ;;  %v15308_v23 = vld [vmem:[#allocation128_spill] sm:$0xff] }
 0x211   : > { %v4473_v55 = vpop.f32.mrf.mxu2 }
 0x212   : > { %v4298_v10 = vpop.f32.mrf.mxu0  ;;  %v4387_v47 = vpop.f32.mrf.mxu1  ;;  %v4474_v17 = vadd.f32 %v4473_v55, %v4385_v35 }
 0x213   : > { %v4562_v59 = vpop.f32.mrf.mxu3  ;;  %v4299_v48 = vadd.f32 %v4298_v10, %v15302_v13 }
 0x214   : > { %v12312_v53 = vadd.f32 %v4562_v59, %v4474_v17  ;;  %v15310_v17 = vld [vmem:[#allocation112_spill] sm:$0xff] }
 0x215   : > { %v4388_v61 = vadd.f32 %v4387_v47, %v4299_v48  ;;  %4337 = vmatmul.bf16.gmra.mxu0 %v15303_v29  ;;  %4426 = vmatmul.bf16.gmra.mxu1 %v15304_v60 }
 0x216   : > { %15305 = vst [vmem:[#allocation118_spill] sm:$0xff] %v12312_v53  ;;  %4515 = vmatmul.bf16.gmra.mxu2 %v15306_v7  ;;  %v15311_v53 = vld [vmem:[#allocation113_spill] sm:$0xff]  ;;  %v15313_v7 = vld [vmem:[#allocation116_spill] sm:$0xff] }
 0x217   : > { %4604 = vmatmul.bf16.gmra.mxu3 %v15307_v49 }
 0x219   : > { %v4476_v21 = vpop.f32.mrf.mxu2 }
 0x21a   : > { %v4300_v62 = vpop.f32.mrf.mxu0  ;;  %v4389_v36 = vpop.f32.mrf.mxu1  ;;  %v4477_v14 = vadd.f32 %v4476_v21, %v4388_v61  ;;  %v15314_v61 = vld [vmem:[#allocation117_spill] sm:$0xff]  ;;  %v9853_v21 = vld [vmem:[#allocation6 + $0x800] sm:$0xf] }
 0x21b   : > { %v4565_v32 = vpop.f32.mrf.mxu3  ;;  %v4301_v11 = vadd.f32 %v4300_v62, %v15308_v23  ;;  %v10109_v62 = vld [vmem:[#allocation6 + $0xa00] sm:$0xf]  ;;  %v10629_v23 = vld [vmem:[#allocation6 + $0x80c] sm:$0xf0] }
 0x21c   : > { %v12317_v55 = vadd.f32 %v4565_v32, %v4477_v14  ;;  %v10725_v14 = vld [vmem:[#allocation6 + $0xb0c] sm:$0xf0] }
 0x21d   : > { %v4390_v10 = vadd.f32 %v4389_v36, %v4301_v11  ;;  %v10693_v36 = vld [vmem:[#allocation6 + $0xa0c] sm:$0xf0]  ;;  %v10237_v11 = vld [vmem:[#allocation6 + $0xb00] sm:$0xf] }
 0x21e   : > { %15309 = vst [vmem:[#allocation119_spill] sm:$0xff] %v12317_v55  ;;  %v10110_v32 = vor.u32 %v10693_v36, %v10109_v62  ;;  %v10661_v62 = vld [vmem:[#allocation6 + $0x90c] sm:$0xf0] }
 0x220   : > { %4815 = vmatpush.bf16.msra.mxu2 %v10110_v32  ;;  %v15316_v32 = vld [vmem:[#allocation127_spill] sm:$0xff] }
 0x221   : > { %v4478_v40 = vpop.f32.mrf.mxu2 }
 0x222   : > { %v4303_v35 = vpop.f32.mrf.mxu0  ;;  %v4392_v47 = vpop.f32.mrf.mxu1  ;;  %v4479_v13 = vadd.f32 %v4478_v40, %v4390_v10 }
 0x223   : > { %v4567_v3 = vpop.f32.mrf.mxu3  ;;  %v4304_v59 = vadd.f32 %v4303_v35, %v12039_v45  ;;  %v9854_v35 = vor.u32 %v10629_v23, %v9853_v21 }
 0x224   : > { %v12322_v49 = vadd.f32 %v4567_v3, %v4479_v13 }
 0x225   : > { %v4393_v48 = vadd.f32 %v4392_v47, %v4304_v59  ;;  %4342 = vmatmul.bf16.gmra.mxu0 %v15310_v17  ;;  %4431 = vmatmul.bf16.gmra.mxu1 %v15311_v53  ;;  %v10238_v47 = vor.u32 %v10725_v14, %v10237_v11 }
 0x226   : > { %15312 = vst [vmem:[#allocation100_spill] sm:$0xff] %v12322_v49  ;;  %4520 = vmatmul.bf16.gmra.mxu2 %v15313_v7  ;;  %4637 = vmatpush.bf16.msra.mxu0 %v9854_v35  ;;  %v9981_v7 = vld [vmem:[#allocation6 + $0x900] sm:$0xf] }
 0x227   : > { %4609 = vmatmul.bf16.gmra.mxu3 %v15314_v61  ;;  %v9982_v36 = vor.u32 %v10661_v62, %v9981_v7 }
 0x228   : > { %4904 = vmatpush.bf16.msra.mxu3 %v10238_v47 }
 0x229   : > { %v4481_v40 = vpop.f32.mrf.mxu2  ;;  %4726 = vmatpush.bf16.msra.mxu1 %v9982_v36 }
 0x22a   : > { %v4305_v45 = vpop.f32.mrf.mxu0  ;;  %v4394_v10 = vpop.f32.mrf.mxu1  ;;  %v4482_v13 = vadd.f32 %v4481_v40, %v4393_v48  ;;  %v15315_v48 = vld [vmem:[#allocation124_spill] sm:$0xff] }
 0x22b   : > { %v4570_v59 = vpop.f32.mrf.mxu3  ;;  %v4306_v3 = vadd.f32 %v4305_v45, %v12078_v19 }
 0x22c   : > { %v12327_v61 = vadd.f32 %v4570_v59, %v4482_v13 }
 0x22d   : > { %v4395_v49 = vadd.f32 %v4394_v10, %v4306_v3 }
 0x231   : > { %v4483_v55 = vpop.f32.mrf.mxu2 }
 0x232   : > { %v4308_v53 = vpop.f32.mrf.mxu0  ;;  %v4397_v17 = vpop.f32.mrf.mxu1  ;;  %v4484_v11 = vadd.f32 %v4483_v55, %v4395_v49 }
 0x233   : > { %v4572_v21 = vpop.f32.mrf.mxu3  ;;  %v4309_v23 = vadd.f32 %v4308_v53, %v12109_v24 }
 0x234   : > { %v12332_v19 = vadd.f32 %v4572_v21, %v4484_v11  ;;  %v10463_v21 = vld [vmem:[#allocation6 + $0x2e4] sm:$0xf] }
 0x235   : > { %v4398_v14 = vadd.f32 %v4397_v17, %v4309_v23  ;;  %4347 = vmatmul.bf16.gmra.mxu0 %v11979_v46  ;;  %4436 = vmatmul.bf16.gmra.mxu1 %v11981_v39  ;;  %v9199_v23 = vld [vmem:[#allocation6 + $0x2f0] sm:$0xf0]  ;;  %v10399_v11 = vld [vmem:[#allocation6 + $0xe4] sm:$0xf] }
 0x236   : > { %4525 = vmatmul.bf16.gmra.mxu2 %v15315_v48 }
 0x237   : > { %4614 = vmatmul.bf16.gmra.mxu3 %v15316_v32 }
 0x239   : > { %v4486_v10 = vpop.f32.mrf.mxu2 }
 0x23a   : > { %v4310_v7 = vpop.f32.mrf.mxu0  ;;  %v4399_v45 = vpop.f32.mrf.mxu1  ;;  %v4487_v40 = vadd.f32 %v4486_v10, %v4398_v14  ;;  %v8943_v14 = vld [vmem:[#allocation6 + $0xf0] sm:$0xf0]  ;;  %v9202_v10 = vor.u32 %v10463_v21, %v9199_v23 }
 0x23b   : > { %v4575_v35 = vpop.f32.mrf.mxu3  ;;  %v4311_v47 = vadd.f32 %v4310_v7, %v12142_v63  ;;  %v15318_v63 = vld [vmem:[#allocation136_spill] sm:$0xff] }
 0x23c   : > { %v12337_v53 = vadd.f32 %v4575_v35, %v4487_v40  ;;  %v10495_v35 = vld [vmem:[#allocation6 + $0x3e4] sm:$0xf]  ;;  %5164 = vmatpush.bf16.msrb.mxu2 %v9202_v10 }
 0x23d   : > { %v4400_v24 = vadd.f32 %v4399_v45, %v4311_v47  ;;  %v9327_v47 = vld [vmem:[#allocation6 + $0x3f0] sm:$0xf0] }
 0x241   : > { %v4488_v17 = vpop.f32.mrf.mxu2 }
 0x242   : > { %v4313_v49 = vpop.f32.mrf.mxu0  ;;  %v4402_v55 = vpop.f32.mrf.mxu1  ;;  %v4489_v13 = vadd.f32 %v4488_v17, %v4400_v24 }
 0x243   : > { %v4577_v59 = vpop.f32.mrf.mxu3  ;;  %v4314_v3 = vadd.f32 %v4313_v49, %v12163_v33  ;;  %v8946_v33 = vor.u32 %v10399_v11, %v8943_v14 }
 0x244   : > { %v12342_v36 = vadd.f32 %v4577_v59, %v4489_v13  ;;  %v10431_v13 = vld [vmem:[#allocation6 + $0x1e4] sm:$0xf] }
 0x245   : > { %v4403_v62 = vadd.f32 %v4402_v55, %v4314_v3  ;;  %4352 = vmatmul.bf16.gmra.mxu0 %v12047_v15  ;;  %4441 = vmatmul.bf16.gmra.mxu1 %v12051_v31  ;;  %v9330_v55 = vor.u32 %v10495_v35, %v9327_v47 }
 0x246   : > { %15317 = vst [vmem:[#allocation101_spill] sm:$0xff] %v12342_v36  ;;  %4530 = vmatmul.bf16.gmra.mxu2 %v12067_v12  ;;  %4986 = vmatpush.bf16.msrb.mxu0 %v8946_v33  ;;  %v9071_v36 = vld [vmem:[#allocation6 + $0x1f0] sm:$0xf0] }
 0x247   : > { %4619 = vmatmul.bf16.gmra.mxu3 %v15318_v63  ;;  %v9074_v63 = vor.u32 %v10431_v13, %v9071_v36  ;;  %v15319_v36 = vshll.u32 %v11193_v56, 16 }
 0x248   : > { %5253 = vmatpush.bf16.msrb.mxu3 %v9330_v55 }
 0x249   : > { %v4491_v40 = vpop.f32.mrf.mxu2  ;;  %5075 = vmatpush.bf16.msrb.mxu1 %v9074_v63  ;;  %v1281_v63 = vrot.slane %v15319_v36, 1 }
 0x24a   : > { %v4315_v7 = vpop.f32.mrf.mxu0  ;;  %v4404_v45 = vpop.f32.mrf.mxu1  ;;  %v4492_v17 = vadd.f32 %v4491_v40, %v4403_v62 }
 0x24b   : > { %v4580_v24 = vpop.f32.mrf.mxu3  ;;  %v4316_v49 = vadd.f32 %v4315_v7, %v12192_v44  ;;  %v15320_v7 = vshll.u32 %v11195_v57, 16 }
 0x24c   : > { %v12347_v3 = vadd.f32 %v4580_v24, %v4492_v17 }
 0x24d   : > { %v4405_v59 = vadd.f32 %v4404_v45, %v4316_v49  ;;  %v1283_v45 = vrot.slane %v15320_v7, 1  ;;  %v15323_v49 = vld [vmem:[#allocation16_spill] sm:$0xff] }
 0x24e   : > { %v15324_v55 = vshll.u32 %v15323_v49, 16  ;;  %v15330_v7 = vshrl.u32 %v15323_v49, 16 }
 0x250   : > { %v1287_v17 = vrot.slane %v15324_v55, 1 }
 0x251   : > { %v4493_v11 = vpop.f32.mrf.mxu2 }
 0x252   : > { %v4318_v21 = vpop.f32.mrf.mxu0  ;;  %v4407_v23 = vpop.f32.mrf.mxu1  ;;  %v4494_v31 = vadd.f32 %v4493_v11, %v4405_v59  ;;  %v15326_v11 = vshrl.u32 %v11195_v57, 16 }
 0x253   : > { %v4582_v14 = vpop.f32.mrf.mxu3  ;;  %v4319_v12 = vadd.f32 %v4318_v21, %v12197_v8  ;;  %v15325_v21 = vshrl.u32 %v11193_v56, 16  ;;  %v15470_v56 = vld [vmem:[#allocation99_spill] sm:$0xff] }
 0x254   : > { %v12352_v62 = vadd.f32 %v4582_v14, %v4494_v31  ;;  %v15321_v31 = vld [vmem:[#allocation15_spill] sm:$0xff]  ;;  %v1284_v14 = vor.u32 %v1283_v45, %v15326_v11  ;;  %v10395_v11 = vld [vmem:[#allocation6 + $0xc4] sm:$0xf] }
 0x255   : > { %v4408_v44 = vadd.f32 %v4407_v23, %v4319_v12  ;;  %4357 = vmatmul.bf16.gmra.mxu0 %v12123_v25  ;;  %4446 = vmatmul.bf16.gmra.mxu1 %v12125_v27  ;;  %v15322_v40 = vshll.u32 %v15321_v31, 16  ;;  %v1282_v23 = vor.u32 %v1281_v63, %v15325_v21 }
 0x256   : > { %4535 = vmatmul.bf16.gmra.mxu2 %v12128_v50  ;;  %v12385_v63 = vsel %vm12371_vm5, %v1284_v14, 0  ;;  %v8927_v14 = vld [vmem:[#allocation6 + $0xd0] sm:$0xf0] }
 0x257   : > { %4624 = vmatmul.bf16.gmra.mxu3 %v12130_v20  ;;  %v1285_v24 = vrot.slane %v15322_v40, 1  ;;  %15332 = vst [vmem:[#allocation156_spill] sm:$0xff] %v12385_v63 }
 0x259   : > { %v4496_v33 = vpop.f32.mrf.mxu2 }
 0x25a   : > { %v4320_v10 = vpop.f32.mrf.mxu0  ;;  %v4409_v8 = vpop.f32.mrf.mxu1  ;;  %v4497_v47 = vadd.f32 %v4496_v33, %v4408_v44  ;;  %v15329_v44 = vshrl.u32 %v15321_v31, 16  ;;  %v15338_v31 = vshll.u32 %v11281_v2, 16 }
 0x25b   : > { %v4585_v12 = vpop.f32.mrf.mxu3  ;;  %v4321_v35 = vadd.f32 %v4320_v10, %v12202_v22  ;;  %v1288_v10 = vor.u32 %v1287_v17, %v15330_v7 }
 0x25c   : > { %v12365_v13 = vadd.f32 %v4585_v12, %v4497_v47  ;;  %v1286_v36 = vor.u32 %v1285_v24, %v15329_v44  ;;  %v12381_v12 = vsel %vm12371_vm5, %v1282_v23, 0  ;;  %v10491_v44 = vld [vmem:[#allocation6 + $0x3c4] sm:$0xf] }
 0x25d   : > { %v4410_v59 = vadd.f32 %v4409_v8, %v4321_v35  ;;  %15331 = vst [vmem:[#allocation128_spill] sm:$0xff] %v12381_v12  ;;  %v12396_v17 = vsel %vm12371_vm5, %v1288_v10, 0  ;;  %v15336_v10 = vshll.u32 %v11253_v41, 16 }
 0x25e   : > { %v12392_v24 = vsel %vm12371_vm5, %v1286_v36, 0  ;;  %15334 = vst [vmem:[#allocation158_spill] sm:$0xff] %v12396_v17  ;;  %v15335_v36 = vshll.u32 %v11243_v34, 16 }
 0x25f   : > { %15333 = vst [vmem:[#allocation157_spill] sm:$0xff] %v12392_v24 }
 0x261   : > { %v4498_v45 = vpop.f32.mrf.mxu2 }
 0x262   : > { %v4323_v33 = vpop.f32.mrf.mxu0  ;;  %v4412_v8 = vpop.f32.mrf.mxu1  ;;  %v4499_v40 = vadd.f32 %v4498_v45, %v4410_v59  ;;  %v9183_v59 = vld [vmem:[#allocation6 + $0x2d0] sm:$0xf0]  ;;  %v1291_v45 = vrot.slane %v15336_v10, 1  ;;  %v15340_v10 = vshrl.u32 %v11253_v41, 16 }
 0x263   : > { %v4587_v35 = vpop.f32.mrf.mxu3  ;;  %v4324_v47 = vadd.f32 %v4323_v33, %v12207_v5  ;;  %v10459_v5 = vld [vmem:[#allocation6 + $0x2c4] sm:$0xf] }
 0x264   : > { %v12398_v21 = vadd.f32 %v4587_v35, %v4499_v40  ;;  %v9186_v23 = vor.u32 %v10459_v5, %v9183_v59  ;;  %v8930_v35 = vor.u32 %v10395_v11, %v8927_v14  ;;  %v15339_v11 = vshrl.u32 %v11243_v34, 16 }
 0x265   : > { %v4413_v55 = vadd.f32 %v4412_v8, %v4324_v47  ;;  %4638 = vmatmul.bf16.vlgmr.msra.gmra.mxu0 %v12381_v12  ;;  %4727 = vmatmul.bf16.vlgmr.msra.gmra.mxu1 %v12385_v63  ;;  %v1289_v8 = vrot.slane %v15335_v36, 1  ;;  %v9311_v47 = vld [vmem:[#allocation6 + $0x3d0] sm:$0xf0]  ;;  %v15337_v12 = vshll.u32 %v11279_v1, 16  ;;  %v1295_v36 = vrot.slane %v15338_v31, 1 }
 0x266   : > { %4816 = vmatmul.bf16.vlgmr.msra.gmra.mxu2 %v12392_v24  ;;  %v9314_v63 = vor.u32 %v10491_v44, %v9311_v47  ;;  %4987 = vmatpush.bf16.msrb.mxu0 %v8930_v35  ;;  %v9055_v44 = vld [vmem:[#allocation6 + $0x1d0] sm:$0xf0] }
 0x267   : > { %4905 = vmatmul.bf16.vlgmr.msra.gmra.mxu3 %v12396_v17  ;;  %5165 = vmatpush.bf16.msrb.mxu2 %v9186_v23  ;;  %v1293_v49 = vrot.slane %v15337_v12, 1  ;;  %v1290_v14 = vor.u32 %v1289_v8, %v15339_v11  ;;  %v10427_v23 = vld [vmem:[#allocation6 + $0x1c4] sm:$0xf]  ;;  %v15342_v12 = vshrl.u32 %v11281_v2, 16 }
 0x268   : > { %5254 = vmatpush.bf16.msrb.mxu3 %v9314_v63 }
 0x269   : > { %v4501_v40 = vpop.f32.mrf.mxu2 }
 0x26a   : > { %v4325_v7 = vpop.f32.mrf.mxu0  ;;  %v4414_v33 = vpop.f32.mrf.mxu1  ;;  %v4502_v5 = vadd.f32 %v4501_v40, %v4413_v55  ;;  %v9058_v55 = vor.u32 %v10427_v23, %v9055_v44 }
 0x26b   : > { %v4590_v24 = vpop.f32.mrf.mxu3  ;;  %v4326_v17 = vadd.f32 %v4325_v7, %v12212_v16  ;;  %v1292_v16 = vor.u32 %v1291_v45, %v15340_v10 }
 0x26c   : > { %v12411_v57 = vadd.f32 %v4590_v24, %v4502_v5  ;;  %5076 = vmatpush.bf16.msrb.mxu1 %v9058_v55  ;;  %v12423_v24 = vsel %vm12371_vm5, %v1290_v14, 0  ;;  %v15347_v14 = vshll.u32 %v11295_v28, 16 }
 0x26d   : > { %v4415_v59 = vadd.f32 %v4414_v33, %v4326_v17  ;;  %v15341_v17 = vshrl.u32 %v11279_v1, 16  ;;  %v1296_v33 = vor.u32 %v1295_v36, %v15342_v12  ;;  %15343 = vst [vmem:[#allocation159_spill] sm:$0xff] %v12423_v24  ;;  %v12427_v8 = vsel %vm12371_vm5, %v1292_v16, 0  ;;  %v15348_v16 = vld [vmem:[#allocation26_spill] sm:$0xff] }
 0x26e   : > { %15344 = vst [vmem:[#allocation160_spill] sm:$0xff] %v12427_v8  ;;  %v1297_v10 = vrot.slane %v15347_v14, 1  ;;  %v15349_v23 = vshll.u32 %v15348_v16, 16 }
 0x26f   : > { %v1294_v7 = vor.u32 %v1293_v49, %v15341_v17  ;;  %v12438_v36 = vsel %vm12371_vm5, %v1296_v33, 0 }
 0x270   : > { %15346 = vst [vmem:[#allocation162_spill] sm:$0xff] %v12438_v36  ;;  %v1299_v44 = vrot.slane %v15349_v23, 1 }
 0x271   : > { %v4503_v45 = vpop.f32.mrf.mxu2  ;;  %v12434_v5 = vsel %vm12371_vm5, %v1294_v7, 0  ;;  %v15350_v7 = vld [vmem:[#allocation149_spill] sm:$0xff] }
 0x272   : > { %v4328_v31 = vpop.f32.mrf.mxu0  ;;  %v4417_v63 = vpop.f32.mrf.mxu1  ;;  %v4504_v40 = vadd.f32 %v4503_v45, %v4415_v59  ;;  %15345 = vst [vmem:[#allocation161_spill] sm:$0xff] %v12434_v5 }
 0x273   : > { %v4592_v35 = vpop.f32.mrf.mxu3  ;;  %v4329_v47 = vadd.f32 %v4328_v31, %v12217_v9 }
 0x274   : > { %v12440_v11 = vadd.f32 %v4592_v35, %v4504_v40 }
 0x275   : > { %v4418_v49 = vadd.f32 %v4417_v63, %v4329_v47  ;;  %4643 = vmatmul.bf16.gmra.mxu0 %v12423_v24  ;;  %4732 = vmatmul.bf16.gmra.mxu1 %v12427_v8  ;;  %v15351_v63 = vld [vmem:[#allocation30_spill] sm:$0xff]  ;;  %v15353_v47 = vld [vmem:[#allocation32_spill] sm:$0xff]  ;;  %v15355_v8 = vshrl.u32 %v11295_v28, 16  ;;  %v15356_v24 = vshrl.u32 %v15348_v16, 16 }
 0x276   : > { %4821 = vmatmul.bf16.gmra.mxu2 %v12434_v5  ;;  %v15352_v45 = vshll.u32 %v15351_v63, 16  ;;  %v15354_v40 = vshll.u32 %v15353_v47, 16  ;;  %v15357_v2 = vshrl.u32 %v15351_v63, 16 }
 0x277   : > { %4910 = vmatmul.bf16.gmra.mxu3 %v12438_v36  ;;  %v1298_v14 = vor.u32 %v1297_v10, %v15355_v8  ;;  %v1300_v23 = vor.u32 %v1299_v44, %v15356_v24 }
 0x278   : > { %v1301_v35 = vrot.slane %v15352_v45, 1  ;;  %v1303_v36 = vrot.slane %v15354_v40, 1  ;;  %v8911_v40 = vld [vmem:[#allocation6 + $0xb0] sm:$0xf0] }
 0x279   : > { %v4506_v55 = vpop.f32.mrf.mxu2 }
 0x27a   : > { %v4330_v9 = vpop.f32.mrf.mxu0  ;;  %v4419_v59 = vpop.f32.mrf.mxu1  ;;  %v4507_v33 = vadd.f32 %v4506_v55, %v4418_v49  ;;  %v1302_v1 = vor.u32 %v1301_v35, %v15357_v2  ;;  %v15358_v49 = vshrl.u32 %v15353_v47, 16  ;;  %v10391_v35 = vld [vmem:[#allocation6 + $0xa4] sm:$0xf]  ;;  %v15366_v47 = vshll.u32 %v11384_v52, 16 }
 0x27b   : > { %v4595_v17 = vpop.f32.mrf.mxu3  ;;  %v4331_v12 = vadd.f32 %v4330_v9, %v15350_v7  ;;  %v12465_v7 = vsel %vm12371_vm5, %v1298_v14, 0  ;;  %v10487_v14 = vld [vmem:[#allocation6 + $0x3a4] sm:$0xf] }
 0x27c   : > { %v12453_v5 = vadd.f32 %v4595_v17, %v4507_v33  ;;  %v1304_v9 = vor.u32 %v1303_v36, %v15358_v49  ;;  %15359 = vst [vmem:[#allocation149_spill] sm:$0xff] %v12465_v7  ;;  %v12469_v17 = vsel %vm12371_vm5, %v1300_v23, 0  ;;  %v12476_v2 = vsel %vm12371_vm5, %v1302_v1, 0 }
 0x27d   : > { %v4420_v31 = vadd.f32 %v4419_v59, %v4331_v12  ;;  %15360 = vst [vmem:[#allocation163_spill] sm:$0xff] %v12469_v17  ;;  %v15363_v1 = vshll.u32 %v11367_v43, 16 }
 0x27e   : > { %15361 = vst [vmem:[#allocation164_spill] sm:$0xff] %v12476_v2  ;;  %v12480_v36 = vsel %vm12371_vm5, %v1304_v9, 0  ;;  %v15364_v9 = vshll.u32 %v11369_v58, 16 }
 0x27f   : > { %15362 = vst [vmem:[#allocation165_spill] sm:$0xff] %v12480_v36 }
 0x281   : > { %v4508_v8 = vpop.f32.mrf.mxu2 }
 0x282   : > { %v4333_v59 = vpop.f32.mrf.mxu0  ;;  %v4422_v55 = vpop.f32.mrf.mxu1  ;;  %v4509_v44 = vadd.f32 %v4508_v8, %v4420_v31  ;;  %v9167_v31 = vld [vmem:[#allocation6 + $0x2b0] sm:$0xf0]  ;;  %v8914_v8 = vor.u32 %v10391_v35, %v8911_v40  ;;  %v15367_v35 = vshrl.u32 %v11367_v43, 16 }
 0x283   : > { %v4597_v10 = vpop.f32.mrf.mxu3  ;;  %v4334_v24 = vadd.f32 %v4333_v59, %v12227_v18  ;;  %v10455_v18 = vld [vmem:[#allocation6 + $0x2a4] sm:$0xf]  ;;  %v1305_v59 = vrot.slane %v15363_v1, 1  ;;  %v1311_v1 = vrot.slane %v15366_v47, 1 }
 0x284   : > { %v12482_v33 = vadd.f32 %v4597_v10, %v4509_v44  ;;  %v9170_v45 = vor.u32 %v10455_v18, %v9167_v31  ;;  %v9295_v10 = vld [vmem:[#allocation6 + $0x3b0] sm:$0xf0]  ;;  %4988 = vmatpush.bf16.msrb.mxu0 %v8914_v8 }
 0x285   : > { %v4423_v12 = vadd.f32 %v4422_v55, %v4334_v24  ;;  %4648 = vmatmul.bf16.gmra.mxu0 %v12465_v7  ;;  %4737 = vmatmul.bf16.gmra.mxu1 %v12469_v17  ;;  %v1307_v55 = vrot.slane %v15364_v9, 1  ;;  %v15365_v17 = vshll.u32 %v11371_v37, 16  ;;  %v1306_v40 = vor.u32 %v1305_v59, %v15367_v35 }
 0x286   : > { %4826 = vmatmul.bf16.gmra.mxu2 %v12476_v2  ;;  %v9298_v2 = vor.u32 %v10487_v14, %v9295_v10  ;;  %v15368_v9 = vshrl.u32 %v11369_v58, 16  ;;  %v9039_v14 = vld [vmem:[#allocation6 + $0x1b0] sm:$0xf0]  ;;  %v15430_v58 = vld [vmem:[#allocation70_spill] sm:$0xff] }
 0x287   : > { %4915 = vmatmul.bf16.gmra.mxu3 %v12480_v36  ;;  %5166 = vmatpush.bf16.msrb.mxu2 %v9170_v45  ;;  %v1309_v7 = vrot.slane %v15365_v17, 1  ;;  %v10423_v45 = vld [vmem:[#allocation6 + $0x1a4] sm:$0xf]  ;;  %v15370_v17 = vshrl.u32 %v11384_v52, 16  ;;  %v12507_v8 = vsel %vm12371_vm5, %v1306_v40, 0  ;;  %v15375_v40 = vshll.u32 %v11427_v54, 16 }
 0x288   : > { %5255 = vmatpush.bf16.msrb.mxu3 %v9298_v2  ;;  %15371 = vst [vmem:[#allocation166_spill] sm:$0xff] %v12507_v8  ;;  %v15431_v43 = vshll.u32 %v15430_v58, 16 }
 0x289   : > { %v4511_v24 = vpop.f32.mrf.mxu2 }
 0x28a   : > { %v4335_v23 = vpop.f32.mrf.mxu0  ;;  %v4424_v49 = vpop.f32.mrf.mxu1  ;;  %v4512_v18 = vadd.f32 %v4511_v24, %v4423_v12  ;;  %v9042_v12 = vor.u32 %v10423_v45, %v9039_v14 }
 0x28b   : > { %v4600_v44 = vpop.f32.mrf.mxu3  ;;  %v4336_v36 = vadd.f32 %v4335_v23, %v12232_v42  ;;  %v1308_v42 = vor.u32 %v1307_v55, %v15368_v9  ;;  %v1313_v9 = vrot.slane %v15375_v40, 1 }
 0x28c   : > { %v12495_v63 = vadd.f32 %v4600_v44, %v4512_v18  ;;  %5077 = vmatpush.bf16.msrb.mxu1 %v9042_v12 }
 0x28d   : > { %v4425_v31 = vadd.f32 %v4424_v49, %v4336_v36  ;;  %v15369_v36 = vshrl.u32 %v11371_v37, 16  ;;  %v1312_v49 = vor.u32 %v1311_v1, %v15370_v17  ;;  %v12511_v59 = vsel %vm12371_vm5, %v1308_v42, 0  ;;  %v15376_v42 = vld [vmem:[#allocation44_spill] sm:$0xff] }
 0x28e   : > { %15372 = vst [vmem:[#allocation167_spill] sm:$0xff] %v12511_v59  ;;  %v15377_v45 = vshll.u32 %v15376_v42, 16 }
 0x28f   : > { %v1310_v23 = vor.u32 %v1309_v7, %v15369_v36  ;;  %v12522_v1 = vsel %vm12371_vm5, %v1312_v49, 0 }
 0x290   : > { %15374 = vst [vmem:[#allocation169_spill] sm:$0xff] %v12522_v1  ;;  %v1315_v14 = vrot.slane %v15377_v45, 1 }
 0x291   : > { %v4513_v55 = vpop.f32.mrf.mxu2  ;;  %v12518_v18 = vsel %vm12371_vm5, %v1310_v23, 0  ;;  %v15378_v23 = vld [vmem:[#allocation150_spill] sm:$0xff] }
 0x292   : > { %v4338_v47 = vpop.f32.mrf.mxu0  ;;  %v4427_v2 = vpop.f32.mrf.mxu1  ;;  %v4514_v44 = vadd.f32 %v4513_v55, %v4425_v31  ;;  %15373 = vst [vmem:[#allocation168_spill] sm:$0xff] %v12518_v18 }
 0x293   : > { %v4602_v10 = vpop.f32.mrf.mxu3  ;;  %v4339_v24 = vadd.f32 %v4338_v47, %v12237_v30 }
 0x294   : > { %v12524_v35 = vadd.f32 %v4602_v10, %v4514_v44 }
 0x295   : > { %v4428_v7 = vadd.f32 %v4427_v2, %v4339_v24  ;;  %4653 = vmatmul.bf16.gmra.mxu0 %v12507_v8  ;;  %4742 = vmatmul.bf16.gmra.mxu1 %v12511_v59  ;;  %v15379_v2 = vld [vmem:[#allocation47_spill] sm:$0xff]  ;;  %v15381_v24 = vld [vmem:[#allocation48_spill] sm:$0xff]  ;;  %v15383_v59 = vshrl.u32 %v11427_v54, 16  ;;  %v15384_v8 = vshrl.u32 %v15376_v42, 16 }
 0x296   : > { %4831 = vmatmul.bf16.gmra.mxu2 %v12518_v18  ;;  %v15380_v55 = vshll.u32 %v15379_v2, 16  ;;  %v15382_v44 = vshll.u32 %v15381_v24, 16  ;;  %v15385_v52 = vshrl.u32 %v15379_v2, 16 }
 0x297   : > { %4920 = vmatmul.bf16.gmra.mxu3 %v12522_v1  ;;  %v1314_v40 = vor.u32 %v1313_v9, %v15383_v59  ;;  %v1316_v45 = vor.u32 %v1315_v14, %v15384_v8 }
 0x298   : > { %v1317_v10 = vrot.slane %v15380_v55, 1  ;;  %v1319_v1 = vrot.slane %v15382_v44, 1  ;;  %v8895_v44 = vld [vmem:[#allocation6 + $0x90] sm:$0xf0] }
 0x299   : > { %v4516_v12 = vpop.f32.mrf.mxu2 }
 0x29a   : > { %v4340_v30 = vpop.f32.mrf.mxu0  ;;  %v4429_v31 = vpop.f32.mrf.mxu1  ;;  %v4517_v49 = vadd.f32 %v4516_v12, %v4428_v7  ;;  %v1318_v37 = vor.u32 %v1317_v10, %v15385_v52  ;;  %v15386_v7 = vshrl.u32 %v15381_v24, 16  ;;  %v10387_v10 = vld [vmem:[#allocation6 + $0x84] sm:$0xf]  ;;  %v15394_v24 = vld [vmem:[#allocation54_spill] sm:$0xff] }
 0x29b   : > { %v4605_v36 = vpop.f32.mrf.mxu3  ;;  %v4341_v17 = vadd.f32 %v4340_v30, %v15378_v23  ;;  %v12549_v23 = vsel %vm12371_vm5, %v1314_v40, 0  ;;  %v10483_v40 = vld [vmem:[#allocation6 + $0x384] sm:$0xf]  ;;  %v15395_v2 = vshll.u32 %v15394_v24, 16 }
 0x29c   : > { %v12537_v18 = vadd.f32 %v4605_v36, %v4517_v49  ;;  %v1320_v30 = vor.u32 %v1319_v1, %v15386_v7  ;;  %15387 = vst [vmem:[#allocation150_spill] sm:$0xff] %v12549_v23  ;;  %v12553_v36 = vsel %vm12371_vm5, %v1316_v45, 0  ;;  %v12560_v52 = vsel %vm12371_vm5, %v1318_v37, 0 }
 0x29d   : > { %v4430_v47 = vadd.f32 %v4429_v31, %v4341_v17  ;;  %15388 = vst [vmem:[#allocation170_spill] sm:$0xff] %v12553_v36  ;;  %v15391_v37 = vshll.u32 %v11475_v38, 16 }
 0x29e   : > { %15389 = vst [vmem:[#allocation171_spill] sm:$0xff] %v12560_v52  ;;  %v12564_v1 = vsel %vm12371_vm5, %v1320_v30, 0  ;;  %v15392_v30 = vshll.u32 %v11477_v26, 16 }
 0x29f   : > { %15390 = vst [vmem:[#allocation172_spill] sm:$0xff] %v12564_v1 }
 0x2a1   : > { %v4518_v59 = vpop.f32.mrf.mxu2 }
 0x2a2   : > { %v4343_v31 = vpop.f32.mrf.mxu0  ;;  %v4432_v12 = vpop.f32.mrf.mxu1  ;;  %v4519_v14 = vadd.f32 %v4518_v59, %v4430_v47  ;;  %v9151_v47 = vld [vmem:[#allocation6 + $0x290] sm:$0xf0]  ;;  %v8898_v59 = vor.u32 %v10387_v10, %v8895_v44  ;;  %v15396_v10 = vshrl.u32 %v11475_v38, 16 }
 0x2a3   : > { %v4607_v9 = vpop.f32.mrf.mxu3  ;;  %v4344_v8 = vadd.f32 %v4343_v31, %v12247_v6  ;;  %v10451_v6 = vld [vmem:[#allocation6 + $0x284] sm:$0xf]  ;;  %v1321_v31 = vrot.slane %v15391_v37, 1  ;;  %v1327_v37 = vrot.slane %v15395_v2, 1 }
 0x2a4   : > { %v12566_v49 = vadd.f32 %v4607_v9, %v4519_v14  ;;  %v9154_v55 = vor.u32 %v10451_v6, %v9151_v47  ;;  %v9279_v9 = vld [vmem:[#allocation6 + $0x390] sm:$0xf0]  ;;  %4989 = vmatpush.bf16.msrb.mxu0 %v8898_v59 }
 0x2a5   : > { %v4433_v17 = vadd.f32 %v4432_v12, %v4344_v8  ;;  %4658 = vmatmul.bf16.gmra.mxu0 %v12549_v23  ;;  %4747 = vmatmul.bf16.gmra.mxu1 %v12553_v36  ;;  %v1323_v12 = vrot.slane %v15392_v30, 1  ;;  %v15393_v36 = vshll.u32 %v11493_v0, 16  ;;  %v1322_v44 = vor.u32 %v1321_v31, %v15396_v10 }
 0x2a6   : > { %4836 = vmatmul.bf16.gmra.mxu2 %v12560_v52  ;;  %v9282_v52 = vor.u32 %v10483_v40, %v9279_v9  ;;  %v15397_v30 = vshrl.u32 %v11477_v26, 16  ;;  %v9023_v40 = vld [vmem:[#allocation6 + $0x190] sm:$0xf0] }
 0x2a7   : > { %4925 = vmatmul.bf16.gmra.mxu3 %v12564_v1  ;;  %5167 = vmatpush.bf16.msrb.mxu2 %v9154_v55  ;;  %v1325_v23 = vrot.slane %v15393_v36, 1  ;;  %v10419_v55 = vld [vmem:[#allocation6 + $0x184] sm:$0xf]  ;;  %v15399_v36 = vshrl.u32 %v15394_v24, 16  ;;  %v12591_v59 = vsel %vm12371_vm5, %v1322_v44, 0 }
 0x2a8   : > { %5256 = vmatpush.bf16.msrb.mxu3 %v9282_v52  ;;  %15400 = vst [vmem:[#allocation173_spill] sm:$0xff] %v12591_v59 }
 0x2a9   : > { %v4521_v8 = vpop.f32.mrf.mxu2 }
 0x2aa   : > { %v4345_v45 = vpop.f32.mrf.mxu0  ;;  %v4434_v7 = vpop.f32.mrf.mxu1  ;;  %v4522_v6 = vadd.f32 %v4521_v8, %v4433_v17  ;;  %v9026_v17 = vor.u32 %v10419_v55, %v9023_v40  ;;  %v15402_v8 = vld [vmem:[#allocation151_spill] sm:$0xff] }
 0x2ab   : > { %v4610_v14 = vpop.f32.mrf.mxu3  ;;  %v4346_v1 = vadd.f32 %v4345_v45, %v12252_v51  ;;  %v1324_v51 = vor.u32 %v1323_v12, %v15397_v30 }
 0x2ac   : > { %v12579_v42 = vadd.f32 %v4610_v14, %v4522_v6  ;;  %5078 = vmatpush.bf16.msrb.mxu1 %v9026_v17  ;;  %v15407_v17 = vld [vmem:[#allocation60_spill] sm:$0xff] }
 0x2ad   : > { %v4435_v47 = vadd.f32 %v4434_v7, %v4346_v1  ;;  %v15398_v1 = vshrl.u32 %v11493_v0, 16  ;;  %v1328_v7 = vor.u32 %v1327_v37, %v15399_v36  ;;  %v12595_v31 = vsel %vm12371_vm5, %v1324_v51, 0  ;;  %v15405_v51 = vld [vmem:[#allocation59_spill] sm:$0xff] }
 0x2ae   : > { %15401 = vst [vmem:[#allocation174_spill] sm:$0xff] %v12595_v31  ;;  %v15406_v55 = vshll.u32 %v15405_v51, 16  ;;  %v15414_v24 = vshrl.u32 %v15405_v51, 16  ;;  %v15415_v0 = vshrl.u32 %v15407_v17, 16 }
 0x2af   : > { %v1326_v45 = vor.u32 %v1325_v23, %v15398_v1  ;;  %v12606_v10 = vsel %vm12371_vm5, %v1328_v7, 0  ;;  %v15408_v1 = vshll.u32 %v15407_v17, 16  ;;  %v15428_v17 = vld [vmem:[#allocation69_spill] sm:$0xff] }
 0x2b0   : > { %15404 = vst [vmem:[#allocation175_spill] sm:$0xff] %v12606_v10  ;;  %v1329_v40 = vrot.slane %v15406_v55, 1  ;;  %v15429_v51 = vshll.u32 %v15428_v17, 16 }
 0x2b1   : > { %v4523_v12 = vpop.f32.mrf.mxu2  ;;  %v12602_v37 = vsel %vm12371_vm5, %v1326_v45, 0  ;;  %v1331_v36 = vrot.slane %v15408_v1, 1 }
 0x2b2   : > { %v4348_v2 = vpop.f32.mrf.mxu0  ;;  %v4437_v52 = vpop.f32.mrf.mxu1  ;;  %v4524_v6 = vadd.f32 %v4523_v12, %v4435_v47  ;;  %15403 = vst [vmem:[#allocation151_spill] sm:$0xff] %v12602_v37  ;;  %v1330_v55 = vor.u32 %v1329_v40, %v15414_v24  ;;  %v1341_v54 = vrot.slane %v15429_v51, 1 }
 0x2b3   : > { %v4612_v9 = vpop.f32.mrf.mxu3  ;;  %v4349_v14 = vadd.f32 %v4348_v2, %v15402_v8  ;;  %v1332_v1 = vor.u32 %v1331_v36, %v15415_v0 }
 0x2b4   : > { %v12608_v44 = vadd.f32 %v4612_v9, %v4524_v6  ;;  %v15410_v9 = vld [vmem:[#allocation63_spill] sm:$0xff] }
 0x2b5   : > { %v4438_v23 = vadd.f32 %v4437_v52, %v4349_v14  ;;  %4663 = vmatmul.bf16.gmra.mxu0 %v12591_v59  ;;  %4752 = vmatmul.bf16.gmra.mxu1 %v12595_v31  ;;  %v15409_v52 = vld [vmem:[#allocation152_spill] sm:$0xff]  ;;  %v15411_v14 = vshll.u32 %v15410_v9, 16  ;;  %v15416_v26 = vshrl.u32 %v15410_v9, 16 }
 0x2b6   : > { %4841 = vmatmul.bf16.gmra.mxu2 %v12602_v37  ;;  %v15412_v37 = vld [vmem:[#allocation64_spill] sm:$0xff] }
 0x2b7   : > { %4930 = vmatmul.bf16.gmra.mxu3 %v12606_v10  ;;  %v1333_v6 = vrot.slane %v15411_v14, 1  ;;  %v15413_v31 = vshll.u32 %v15412_v37, 16  ;;  %v9135_v14 = vld [vmem:[#allocation6 + $0x270] sm:$0xf0] }
 0x2b9   : > { %v4526_v45 = vpop.f32.mrf.mxu2  ;;  %v1335_v10 = vrot.slane %v15413_v31, 1  ;;  %v1334_v38 = vor.u32 %v1333_v6, %v15416_v26  ;;  %v12637_v31 = vsel %vm12371_vm5, %v1332_v1, 0  ;;  %v8879_v1 = vld [vmem:[#allocation6 + $0x70] sm:$0xf0] }
 0x2ba   : > { %v4350_v47 = vpop.f32.mrf.mxu0  ;;  %v4439_v30 = vpop.f32.mrf.mxu1  ;;  %v4527_v7 = vadd.f32 %v4526_v45, %v4438_v23  ;;  %v15417_v23 = vshrl.u32 %v15412_v37, 16  ;;  %15419 = vst [vmem:[#allocation176_spill] sm:$0xff] %v12637_v31  ;;  %v15427_v37 = vld [vmem:[#allocation154_spill] sm:$0xff] }
 0x2bb   : > { %v4615_v2 = vpop.f32.mrf.mxu3  ;;  %v4351_v12 = vadd.f32 %v4350_v47, %v15409_v52  ;;  %v12633_v52 = vsel %vm12371_vm5, %v1330_v55, 0  ;;  %v12644_v26 = vsel %vm12371_vm5, %v1334_v38, 0  ;;  %v10383_v55 = vld [vmem:[#allocation6 + $0x64] sm:$0xf] }
 0x2bc   : > { %v12621_v59 = vadd.f32 %v4615_v2, %v4527_v7  ;;  %v1336_v47 = vor.u32 %v1335_v10, %v15417_v23  ;;  %15418 = vst [vmem:[#allocation152_spill] sm:$0xff] %v12633_v52  ;;  %v15420_v2 = vld [vmem:[#allocation153_spill] sm:$0xff] }
 0x2bd   : > { %v4440_v8 = vadd.f32 %v4439_v30, %v4351_v12  ;;  %15421 = vst [vmem:[#allocation153_spill] sm:$0xff] %v12644_v26  ;;  %v10479_v23 = vld [vmem:[#allocation6 + $0x364] sm:$0xf] }
 0x2be   : > { %v12648_v10 = vsel %vm12371_vm5, %v1336_v47, 0  ;;  %v15423_v38 = vld [vmem:[#allocation65_spill] sm:$0xff] }
 0x2bf   : > { %15422 = vst [vmem:[#allocation177_spill] sm:$0xff] %v12648_v10 }
 0x2c1   : > { %v4528_v24 = vpop.f32.mrf.mxu2 }
 0x2c2   : > { %v4353_v30 = vpop.f32.mrf.mxu0  ;;  %v4442_v45 = vpop.f32.mrf.mxu1  ;;  %v4529_v36 = vadd.f32 %v4528_v24, %v4440_v8  ;;  %v10447_v8 = vld [vmem:[#allocation6 + $0x264] sm:$0xf]  ;;  %v15424_v24 = vshll.u32 %v15423_v38, 16 }
 0x2c3   : > { %v4617_v40 = vpop.f32.mrf.mxu3  ;;  %v4354_v0 = vadd.f32 %v4353_v30, %v15420_v2  ;;  %v9138_v6 = vor.u32 %v10447_v8, %v9135_v14 }
 0x2c4   : > { %v12650_v7 = vadd.f32 %v4617_v40, %v4529_v36  ;;  %v1337_v2 = vrot.slane %v15424_v24, 1  ;;  %v8882_v40 = vor.u32 %v10383_v55, %v8879_v1  ;;  %v9263_v36 = vld [vmem:[#allocation6 + $0x370] sm:$0xf0]  ;;  %v1343_v24 = vrot.slane %v15431_v43, 1 }
 0x2c5   : > { %v4443_v12 = vadd.f32 %v4442_v45, %v4354_v0  ;;  %4668 = vmatmul.bf16.gmra.mxu0 %v12633_v52  ;;  %4757 = vmatmul.bf16.gmra.mxu1 %v12637_v31  ;;  %v15425_v0 = vld [vmem:[#allocation66_spill] sm:$0xff]  ;;  %v9266_v9 = vor.u32 %v10479_v23, %v9263_v36  ;;  %v15432_v55 = vshrl.u32 %v15423_v38, 16 }
 0x2c6   : > { %4846 = vmatmul.bf16.gmra.mxu2 %v12644_v26  ;;  %v15426_v47 = vshll.u32 %v15425_v0, 16  ;;  %4990 = vmatpush.bf16.msrb.mxu0 %v8882_v40  ;;  %v9007_v40 = vld [vmem:[#allocation6 + $0x170] sm:$0xf0] }
 0x2c7   : > { %4935 = vmatmul.bf16.gmra.mxu3 %v12648_v10  ;;  %5168 = vmatpush.bf16.msrb.mxu2 %v9138_v6  ;;  %v1338_v1 = vor.u32 %v1337_v2, %v15432_v55  ;;  %v15434_v6 = vshrl.u32 %v15428_v17, 16  ;;  %v10415_v2 = vld [vmem:[#allocation6 + $0x164] sm:$0xf] }
 0x2c8   : > { %v1339_v31 = vrot.slane %v15426_v47, 1  ;;  %5257 = vmatpush.bf16.msrb.mxu3 %v9266_v9  ;;  %v15433_v47 = vshrl.u32 %v15425_v0, 16  ;;  %v9010_v36 = vor.u32 %v10415_v2, %v9007_v40  ;;  %v15446_v40 = vld [vmem:[#allocation79_spill] sm:$0xff] }
 0x2c9   : > { %v4531_v52 = vpop.f32.mrf.mxu2  ;;  %v12675_v43 = vsel %vm12371_vm5, %v1338_v1, 0  ;;  %v15453_v0 = vshrl.u32 %v15446_v40, 16 }
 0x2ca   : > { %v4355_v30 = vpop.f32.mrf.mxu0  ;;  %v4444_v45 = vpop.f32.mrf.mxu1  ;;  %v4532_v8 = vadd.f32 %v4531_v52, %v4443_v12  ;;  %v1342_v52 = vor.u32 %v1341_v54, %v15434_v6  ;;  %v15435_v12 = vshrl.u32 %v15430_v58, 16  ;;  %15436 = vst [vmem:[#allocation154_spill] sm:$0xff] %v12675_v43  ;;  %5079 = vmatpush.bf16.msrb.mxu1 %v9010_v36 }
 0x2cb   : > { %v4620_v26 = vpop.f32.mrf.mxu3  ;;  %v4356_v10 = vadd.f32 %v4355_v30, %v15427_v37  ;;  %v1340_v37 = vor.u32 %v1339_v31, %v15433_v47 }
 0x2cc   : > { %v12663_v16 = vadd.f32 %v4620_v26, %v4532_v8 }
 0x2cd   : > { %v4445_v14 = vadd.f32 %v4444_v45, %v4356_v10  ;;  %v1344_v10 = vor.u32 %v1343_v24, %v15435_v12  ;;  %v12679_v9 = vsel %vm12371_vm5, %v1340_v37, 0  ;;  %v15438_v45 = vld [vmem:[#allocation155_spill] sm:$0xff]  ;;  %v12686_v24 = vsel %vm12371_vm5, %v1342_v52, 0 }
 0x2ce   : > { %15437 = vst [vmem:[#allocation178_spill] sm:$0xff] %v12679_v9  ;;  %v15441_v37 = vld [vmem:[#allocation75_spill] sm:$0xff] }
 0x2cf   : > { %15439 = vst [vmem:[#allocation155_spill] sm:$0xff] %v12686_v24  ;;  %v12690_v55 = vsel %vm12371_vm5, %v1344_v10, 0  ;;  %v15442_v6 = vshll.u32 %v15441_v37, 16  ;;  %v15451_v58 = vshrl.u32 %v15441_v37, 16  ;;  %v15468_v37 = vld [vmem:[#allocation86_spill] sm:$0xff] }
 0x2d0   : > { %15440 = vst [vmem:[#allocation179_spill] sm:$0xff] %v12690_v55 }
 0x2d1   : > { %v4533_v26 = vpop.f32.mrf.mxu2  ;;  %v1345_v12 = vrot.slane %v15442_v6, 1 }
 0x2d2   : > { %v4358_v23 = vpop.f32.mrf.mxu0  ;;  %v4447_v51 = vpop.f32.mrf.mxu1  ;;  %v4534_v54 = vadd.f32 %v4533_v26, %v4445_v14 }
 0x2d3   : > { %v4622_v30 = vpop.f32.mrf.mxu3  ;;  %v4359_v31 = vadd.f32 %v4358_v23, %v15438_v45  ;;  %v15443_v23 = vld [vmem:[#allocation76_spill] sm:$0xff]  ;;  %v1346_v6 = vor.u32 %v1345_v12, %v15451_v58 }
 0x2d4   : > { %v12692_v1 = vadd.f32 %v4622_v30, %v4534_v54  ;;  %v15447_v54 = vshll.u32 %v15446_v40, 16  ;;  %v15452_v17 = vshrl.u32 %v15443_v23, 16 }
 0x2d5   : > { %v4448_v8 = vadd.f32 %v4447_v51, %v4359_v31  ;;  %4673 = vmatmul.bf16.gmra.mxu0 %v12675_v43  ;;  %4762 = vmatmul.bf16.gmra.mxu1 %v12679_v9  ;;  %v15444_v51 = vshll.u32 %v15443_v23, 16  ;;  %v15445_v31 = vld [vmem:[#allocation89_spill] sm:$0xff] }
 0x2d6   : > { %4851 = vmatmul.bf16.gmra.mxu2 %v12686_v24  ;;  %v1349_v36 = vrot.slane %v15447_v54, 1  ;;  %v15448_v24 = vld [vmem:[#allocation80_spill] sm:$0xff] }
 0x2d7   : > { %4940 = vmatmul.bf16.gmra.mxu3 %v12690_v55  ;;  %v1347_v52 = vrot.slane %v15444_v51, 1  ;;  %v15449_v9 = vshll.u32 %v15448_v24, 16 }
 0x2d8   : > { %v1350_v38 = vor.u32 %v1349_v36, %v15453_v0  ;;  %v15461_v36 = vld [vmem:[#allocation81_spill] sm:$0xff] }
 0x2d9   : > { %v4536_v26 = vpop.f32.mrf.mxu2  ;;  %v1351_v55 = vrot.slane %v15449_v9, 1  ;;  %v1348_v51 = vor.u32 %v1347_v52, %v15452_v17  ;;  %v15460_v52 = vld [vmem:[#allocation98_spill] sm:$0xff] }
 0x2da   : > { %v4360_v14 = vpop.f32.mrf.mxu0  ;;  %v4449_v47 = vpop.f32.mrf.mxu1  ;;  %v4537_v2 = vadd.f32 %v4536_v26, %v4448_v8  ;;  %v15454_v8 = vshrl.u32 %v15448_v24, 16  ;;  %v12727_v17 = vsel %vm12371_vm5, %v1350_v38, 0  ;;  %v15463_v38 = vld [vmem:[#allocation82_spill] sm:$0xff] }
 0x2db   : > { %v4625_v45 = vpop.f32.mrf.mxu3  ;;  %v4361_v10 = vadd.f32 %v4360_v14, %v15445_v31  ;;  %v12717_v31 = vsel %vm12371_vm5, %v1346_v6, 0  ;;  %v12721_v9 = vsel %vm12371_vm5, %v1348_v51, 0  ;;  %15457 = vst [vmem:[#allocation182_spill] sm:$0xff] %v12727_v17  ;;  %v15462_v6 = vshll.u32 %v15461_v36, 16 }
 0x2dc   : > { %v12705_v43 = vadd.f32 %v4625_v45, %v4537_v2  ;;  %v1352_v14 = vor.u32 %v1351_v55, %v15454_v8  ;;  %15455 = vst [vmem:[#allocation180_spill] sm:$0xff] %v12717_v31  ;;  %v15464_v8 = vshll.u32 %v15463_v38, 16 }
 0x2dd   : > { %v4450_v30 = vadd.f32 %v4449_v47, %v4361_v10  ;;  %15456 = vst [vmem:[#allocation181_spill] sm:$0xff] %v12721_v9  ;;  %v1353_v51 = vrot.slane %v15462_v6, 1  ;;  %v15469_v6 = vshll.u32 %v15468_v37, 16 }
 0x2de   : > { %15450 = vst [vmem:[#allocation89_spill] sm:$0xff] %v12705_v43  ;;  %v12731_v0 = vsel %vm12371_vm5, %v1352_v14, 0  ;;  %v15471_v43 = vshrl.u32 %v15461_v36, 16 }
 0x2df   : > { %15458 = vst [vmem:[#allocation183_spill] sm:$0xff] %v12731_v0  ;;  %v1359_v28 = vrot.slane %v15469_v6, 1  ;;  %v15479_v6 = vld [vmem:[#allocation108_spill] sm:$0xff] }
 0x2e1   : > { %v4538_v58 = vpop.f32.mrf.mxu2 }
 0x2e2   : > { %v4639_v47 = vpop.f32.mrf.mxu0  ;;  %v4728_v26 = vpop.f32.mrf.mxu1  ;;  %v4539_v45 = vadd.f32 %v4538_v58, %v4450_v30  ;;  %v1355_v58 = vrot.slane %v15464_v8, 1 }
 0x2e3   : > { %v4627_v12 = vpop.f32.mrf.mxu3  ;;  %v4640_v10 = vadd.f32 %v4639_v47, %v15460_v52  ;;  %v12742_v47 = vstv %s8190_s22 }
 0x2e4   : > { %v12733_v55 = vadd.f32 %v4627_v12, %v4539_v45  ;;  %v9119_v12 = vld [vmem:[#allocation6 + $0x250] sm:$0xf0]  ;;  %v10379_v45 = vld [vmem:[#allocation6 + $0x44] sm:$0xf]  ;;  %15465 = vst [vmem:[#allocation98_spill] sm:$0xff] %v12742_v47 }
 0x2e5   : > { %4678 = vmatmul.bf16.gmra.mxu0 %v12717_v31  ;;  %4767 = vmatmul.bf16.gmra.mxu1 %v12721_v9  ;;  %v4729_v2 = vadd.f32 %v4728_v26, %v4640_v10  ;;  %v10443_v31 = vld [vmem:[#allocation6 + $0x244] sm:$0xf]  ;;  %v9247_v26 = vld [vmem:[#allocation6 + $0x350] sm:$0xf0] }
 0x2e6   : > { %15459 = vst [vmem:[#allocation184_spill] sm:$0xff] %v12733_v55  ;;  %4856 = vmatmul.bf16.gmra.mxu2 %v12727_v17  ;;  %v9122_v52 = vor.u32 %v10443_v31, %v9119_v12  ;;  %v8863_v17 = vld [vmem:[#allocation6 + $0x50] sm:$0xf0]  ;;  %v15466_v10 = vld [vmem:[#allocation85_spill] sm:$0xff]  ;;  %v15472_v31 = vshrl.u32 %v15463_v38, 16 }
 0x2e7   : > { %4945 = vmatmul.bf16.gmra.mxu3 %v12731_v0  ;;  %v10475_v0 = vld [vmem:[#allocation6 + $0x344] sm:$0xf]  ;;  %v15467_v40 = vshll.u32 %v15466_v10, 16  ;;  %v8866_v41 = vor.u32 %v10379_v45, %v8863_v17  ;;  %v15473_v12 = vshrl.u32 %v15466_v10, 16 }
 0x2e8   : > { %v9250_v8 = vor.u32 %v10475_v0, %v9247_v26  ;;  %5169 = vmatpush.bf16.msrb.mxu2 %v9122_v52 }
 0x2e9   : > { %v4817_v9 = vpop.f32.mrf.mxu2  ;;  %v1357_v23 = vrot.slane %v15467_v40, 1  ;;  %4991 = vmatpush.bf16.msrb.mxu0 %v8866_v41 }
 0x2ea   : > { %v4641_v30 = vpop.f32.mrf.mxu0  ;;  %v4730_v54 = vpop.f32.mrf.mxu1  ;;  %v4818_v24 = vadd.f32 %v4817_v9, %v4729_v2  ;;  %v1354_v9 = vor.u32 %v1353_v51, %v15471_v43  ;;  %v1356_v2 = vor.u32 %v1355_v58, %v15472_v31  ;;  %5258 = vmatpush.bf16.msrb.mxu3 %v9250_v8 }
 0x2eb   : > { %v4906_v14 = vpop.f32.mrf.mxu3  ;;  %v4642_v55 = vadd.f32 %v4641_v30, %v15470_v56  ;;  %v1358_v17 = vor.u32 %v1357_v23, %v15473_v12 }
 0x2ec   : > { %v4907_v34 = vadd.f32 %v4906_v14, %v4818_v24  ;;  %v15474_v24 = vshrl.u32 %v15468_v37, 16  ;;  %v12760_v43 = vsel %vm12371_vm5, %v1354_v9, 0  ;;  %v12764_v41 = vsel %vm12371_vm5, %v1356_v2, 0 }
 0x2ed   : > { %v4731_v30 = vadd.f32 %v4730_v54, %v4642_v55  ;;  %15475 = vst [vmem:[#allocation81_spill] sm:$0xff] %v12760_v43  ;;  %v12775_v58 = vsel %vm12371_vm5, %v1358_v17, 0  ;;  %v15480_v17 = vld [vmem:[#allocation90_spill] sm:$0xff] }
 0x2ee   : > { %vm8191_vm6 = vcmp.ge.f32.partialorder %v4907_v34, 0.0  ;;  %v8320_v40 = vmul.f32 %v12742_v47, %v4907_v34  ;;  %v1360_v0 = vor.u32 %v1359_v28, %v15474_v24  ;;  %15476 = vst [vmem:[#allocation82_spill] sm:$0xff] %v12764_v41  ;;  %v10411_v28 = vld [vmem:[#allocation6 + $0x144] sm:$0xf]  ;;  %v15481_v24 = vshll.u32 %v15480_v17, 16 }
 0x2ef   : > { %15477 = vst [vmem:[#allocation85_spill] sm:$0xff] %v12775_v58 }
 0x2f0   : > { %v8448_v56 = vsel %vm8191_vm6, %v4907_v34, %v8320_v40  ;;  %v8991_v34 = vld [vmem:[#allocation6 + $0x150] sm:$0xf0]  ;;  %v12779_v52 = vsel %vm12371_vm5, %v1360_v0, 0  ;;  %v15482_v0 = vld [vmem:[#allocation93_spill] sm:$0xff] }
 0x2f1   : > { %8576 = vst [vmem:[%s12768_s27] sm:$0xff] %v8448_v56  ;;  %v4819_v23 = vpop.f32.mrf.mxu2  ;;  %v8994_v54 = vor.u32 %v10411_v28, %v8991_v34  ;;  %v1361_v56 = vrot.slane %v15481_v24, 1  ;;  %v15484_v34 = vld [vmem:[#allocation96_spill] sm:$0xff] }
 0x2f2   : > { %v4644_v14 = vpop.f32.mrf.mxu0  ;;  %v4733_v45 = vpop.f32.mrf.mxu1  ;;  %v4820_v55 = vadd.f32 %v4819_v23, %v4731_v30  ;;  %15478 = vst [vmem:[#allocation99_spill] sm:$0xff] %v12779_v52  ;;  %v15483_v30 = vshll.u32 %v15482_v0, 16 }
 0x2f3   : > { %v4908_v51 = vpop.f32.mrf.mxu3  ;;  %v4645_v8 = vadd.f32 %v4644_v14, %v15479_v6  ;;  %5080 = vmatpush.bf16.msrb.mxu1 %v8994_v54  ;;  %v15486_v6 = vld [vmem:[#allocation97_spill] sm:$0xff] }
 0x2f4   : > { %v4909_v26 = vadd.f32 %v4908_v51, %v4820_v55  ;;  %v1363_v23 = vrot.slane %v15483_v30, 1  ;;  %v15485_v55 = vshll.u32 %v15484_v34, 16 }
 0x2f5   : > { %4683 = vmatmul.bf16.gmra.mxu0 %v12760_v43  ;;  %4772 = vmatmul.bf16.gmra.mxu1 %v12764_v41  ;;  %v4734_v2 = vadd.f32 %v4733_v45, %v4645_v8  ;;  %v15488_v8 = vld [vmem:[#allocation109_spill] sm:$0xff]  ;;  %v15490_v41 = vshrl.u32 %v15482_v0, 16  ;;  %v15504_v0 = vld [vmem:[#allocation118_spill] sm:$0xff] }
 0x2f6   : > { %vm8195_vm7 = vcmp.ge.f32.partialorder %v4909_v26, 0.0  ;;  %v8324_v9 = vmul.f32 %v12742_v47, %v4909_v26  ;;  %4861 = vmatmul.bf16.gmra.mxu2 %v12775_v58  ;;  %v1365_v54 = vrot.slane %v15485_v55, 1  ;;  %v15487_v58 = vshll.u32 %v15486_v6, 16 }
 0x2f7   : > { %4950 = vmatmul.bf16.gmra.mxu3 %v12779_v52  ;;  %v15489_v52 = vshrl.u32 %v15480_v17, 16  ;;  %v1364_v30 = vor.u32 %v1363_v23, %v15490_v41  ;;  %v15492_v55 = vshrl.u32 %v15486_v6, 16 }
 0x2f8   : > { %v8452_v31 = vsel %vm8195_vm7, %v4909_v26, %v8324_v9  ;;  %v1367_v26 = vrot.slane %v15487_v58, 1 }
 0x2f9   : > { %8580 = vst [vmem:[%s12768_s27 + $0x20] sm:$0xff] %v8452_v31  ;;  %v4822_v14 = vpop.f32.mrf.mxu2  ;;  %v1362_v24 = vor.u32 %v1361_v56, %v15489_v52  ;;  %v12810_v41 = vsel %vm12371_vm5, %v1364_v30, 0 }
 0x2fa   : > { %v4646_v40 = vpop.f32.mrf.mxu0  ;;  %v4735_v12 = vpop.f32.mrf.mxu1  ;;  %v4823_v28 = vadd.f32 %v4822_v14, %v4734_v2  ;;  %v15491_v2 = vshrl.u32 %v15484_v34, 16  ;;  %v1368_v43 = vor.u32 %v1367_v26, %v15492_v55  ;;  %15494 = vst [vmem:[#allocation109_spill] sm:$0xff] %v12810_v41 }
 0x2fb   : > { %v4911_v51 = vpop.f32.mrf.mxu3  ;;  %v4647_v9 = vadd.f32 %v4646_v40, %v15488_v8  ;;  %v12806_v40 = vsel %vm12371_vm5, %v1362_v24, 0  ;;  %v15497_v8 = vshll.u32 %v15303_v29, 16 }
 0x2fc   : > { %v4912_v45 = vadd.f32 %v4911_v51, %v4823_v28  ;;  %v1366_v14 = vor.u32 %v1365_v54, %v15491_v2  ;;  %15493 = vst [vmem:[#allocation108_spill] sm:$0xff] %v12806_v40  ;;  %v12821_v54 = vsel %vm12371_vm5, %v1368_v43, 0  ;;  %v15498_v43 = vshll.u32 %v15304_v60, 16 }
 0x2fd   : > { %v4736_v58 = vadd.f32 %v4735_v12, %v4647_v9  ;;  %15496 = vst [vmem:[#allocation186_spill] sm:$0xff] %v12821_v54  ;;  %v1369_v9 = vrot.slane %v15497_v8, 1 }
 0x2fe   : > { %vm8199_vm8 = vcmp.ge.f32.partialorder %v4912_v45, 0.0  ;;  %v8328_v31 = vmul.f32 %v12742_v47, %v4912_v45  ;;  %v12817_v12 = vsel %vm12371_vm5, %v1366_v14, 0  ;;  %v1371_v14 = vrot.slane %v15498_v43, 1 }
 0x2ff   : > { %15495 = vst [vmem:[#allocation185_spill] sm:$0xff] %v12817_v12 }
 0x300   : > { %v8456_v37 = vsel %vm8199_vm8, %v4912_v45, %v8328_v31 }
 0x301   : > { %8584 = vst [vmem:[%s12768_s27 + $0x40] sm:$0xff] %v8456_v37  ;;  %v4824_v52 = vpop.f32.mrf.mxu2 }
 0x302   : > { %v4649_v51 = vpop.f32.mrf.mxu0  ;;  %v4738_v28 = vpop.f32.mrf.mxu1  ;;  %v4825_v23 = vadd.f32 %v4824_v52, %v4736_v58  ;;  %v10439_v58 = vld [vmem:[#allocation6 + $0x224] sm:$0xf] }
 0x303   : > { %v4913_v56 = vpop.f32.mrf.mxu3  ;;  %v4650_v45 = vadd.f32 %v4649_v51, %v12307_v4  ;;  %v9103_v51 = vld [vmem:[#allocation6 + $0x230] sm:$0xf0] }
 0x304   : > { %v4914_v26 = vadd.f32 %v4913_v56, %v4825_v23  ;;  %v9106_v56 = vor.u32 %v10439_v58, %v9103_v51  ;;  %v10375_v23 = vld [vmem:[#allocation6 + $0x24] sm:$0xf] }
 0x305   : > { %4688 = vmatmul.bf16.gmra.mxu0 %v12806_v40  ;;  %4777 = vmatmul.bf16.gmra.mxu1 %v12810_v41  ;;  %v4739_v30 = vadd.f32 %v4738_v28, %v4650_v45  ;;  %v15499_v41 = vshrl.u32 %v15303_v29, 16 }
 0x306   : > { %vm8203_vm9 = vcmp.ge.f32.partialorder %v4914_v26, 0.0  ;;  %v8332_v37 = vmul.f32 %v12742_v47, %v4914_v26  ;;  %4866 = vmatmul.bf16.gmra.mxu2 %v12817_v12  ;;  %v8847_v12 = vld [vmem:[#allocation6 + $0x30] sm:$0xf0] }
 0x307   : > { %4955 = vmatmul.bf16.gmra.mxu3 %v12821_v54  ;;  %v10471_v54 = vld [vmem:[#allocation6 + $0x324] sm:$0xf]  ;;  %v1370_v8 = vor.u32 %v1369_v9, %v15499_v41  ;;  %v8850_v43 = vor.u32 %v10375_v23, %v8847_v12  ;;  %5170 = vmatpush.bf16.msrb.mxu2 %v9106_v56 }
 0x308   : > { %v8460_v24 = vsel %vm8203_vm9, %v4914_v26, %v8332_v37  ;;  %v15500_v26 = vld [vmem:[#allocation104_spill] sm:$0xff]  ;;  %v15502_v37 = vld [vmem:[#allocation105_spill] sm:$0xff] }
 0x309   : > { %8588 = vst [vmem:[%s12768_s27 + $0x60] sm:$0xff] %v8460_v24  ;;  %v4827_v55 = vpop.f32.mrf.mxu2  ;;  %v15501_v28 = vshll.u32 %v15500_v26, 16  ;;  %v15503_v40 = vshll.u32 %v15502_v37, 16  ;;  %v9231_v24 = vld [vmem:[#allocation6 + $0x330] sm:$0xf0]  ;;  %4992 = vmatpush.bf16.msrb.mxu0 %v8850_v43  ;;  %v15506_v9 = vshrl.u32 %v15500_v26, 16 }
 0x30a   : > { %v4651_v31 = vpop.f32.mrf.mxu0  ;;  %v4740_v2 = vpop.f32.mrf.mxu1  ;;  %v4828_v52 = vadd.f32 %v4827_v55, %v4739_v30  ;;  %v15505_v30 = vshrl.u32 %v15304_v60, 16  ;;  %v9234_v58 = vor.u32 %v10471_v54, %v9231_v24 }
 0x30b   : > { %v4916_v4 = vpop.f32.mrf.mxu3  ;;  %v1373_v45 = vrot.slane %v15501_v28, 1  ;;  %v1375_v6 = vrot.slane %v15503_v40, 1  ;;  %v4652_v17 = vadd.f32 %v4651_v31, %v15504_v0  ;;  %v15507_v40 = vshrl.u32 %v15502_v37, 16  ;;  %v10407_v28 = vld [vmem:[#allocation6 + $0x124] sm:$0xf] }
 0x30c   : > { %v4917_v34 = vadd.f32 %v4916_v4, %v4828_v52  ;;  %v1372_v55 = vor.u32 %v1371_v14, %v15505_v30  ;;  %5259 = vmatpush.bf16.msrb.mxu3 %v9234_v58  ;;  %v12848_v14 = vsel %vm12371_vm5, %v1370_v8, 0 }
 0x30d   : > { %v1374_v51 = vor.u32 %v1373_v45, %v15506_v9  ;;  %v1376_v12 = vor.u32 %v1375_v6, %v15507_v40  ;;  %v4741_v52 = vadd.f32 %v4740_v2, %v4652_v17  ;;  %15508 = vst [vmem:[#allocation104_spill] sm:$0xff] %v12848_v14  ;;  %v8975_v45 = vld [vmem:[#allocation6 + $0x130] sm:$0xf0] }
 0x30e   : > { %vm8207_vm10 = vcmp.ge.f32.partialorder %v4917_v34, 0.0  ;;  %v8336_v41 = vmul.f32 %v12742_v47, %v4917_v34  ;;  %v12852_v54 = vsel %vm12371_vm5, %v1372_v55, 0  ;;  %v8978_v24 = vor.u32 %v10407_v28, %v8975_v45  ;;  %v15512_v2 = vld [vmem:[#allocation119_spill] sm:$0xff]  ;;  %v15517_v45 = vld [vmem:[#allocation116_spill] sm:$0xff] }
 0x30f   : > { %15509 = vst [vmem:[#allocation118_spill] sm:$0xff] %v12852_v54  ;;  %v12859_v17 = vsel %vm12371_vm5, %v1374_v51, 0  ;;  %v15513_v51 = vld [vmem:[#allocation112_spill] sm:$0xff] }
 0x310   : > { %v8464_v4 = vsel %vm8207_vm10, %v4917_v34, %v8336_v41  ;;  %15510 = vst [vmem:[#allocation187_spill] sm:$0xff] %v12859_v17  ;;  %v12863_v34 = vsel %vm12371_vm5, %v1376_v12, 0  ;;  %5081 = vmatpush.bf16.msrb.mxu1 %v8978_v24  ;;  %v15514_v40 = vshll.u32 %v15513_v51, 16  ;;  %v15515_v12 = vld [vmem:[#allocation113_spill] sm:$0xff] }
 0x311   : > { %8592 = vst [vmem:[%s12768_s27 + $0x80] sm:$0xff] %v8464_v4  ;;  %v4829_v56 = vpop.f32.mrf.mxu2 }
 0x312   : > { %v4654_v0 = vpop.f32.mrf.mxu0  ;;  %v4743_v31 = vpop.f32.mrf.mxu1  ;;  %v4830_v43 = vadd.f32 %v4829_v56, %v4741_v52  ;;  %15511 = vst [vmem:[#allocation188_spill] sm:$0xff] %v12863_v34  ;;  %v1377_v4 = vrot.slane %v15514_v40, 1  ;;  %v15516_v52 = vshll.u32 %v15515_v12, 16 }
 0x313   : > { %v4918_v23 = vpop.f32.mrf.mxu3  ;;  %v4655_v8 = vadd.f32 %v4654_v0, %v15512_v2  ;;  %v15519_v2 = vld [vmem:[#allocation117_spill] sm:$0xff] }
 0x314   : > { %v4919_v6 = vadd.f32 %v4918_v23, %v4830_v43  ;;  %v1379_v56 = vrot.slane %v15516_v52, 1  ;;  %v15518_v43 = vshll.u32 %v15517_v45, 16 }
 0x315   : > { %4693 = vmatmul.bf16.gmra.mxu0 %v12848_v14  ;;  %4782 = vmatmul.bf16.gmra.mxu1 %v12852_v54  ;;  %v4744_v58 = vadd.f32 %v4743_v31, %v4655_v8  ;;  %v15521_v8 = vld [vmem:[#allocation100_spill] sm:$0xff]  ;;  %v15523_v54 = vshrl.u32 %v15515_v12, 16 }
 0x316   : > { %vm8211_vm11 = vcmp.ge.f32.partialorder %v4919_v6, 0.0  ;;  %v8340_v30 = vmul.f32 %v12742_v47, %v4919_v6  ;;  %4871 = vmatmul.bf16.gmra.mxu2 %v12859_v17  ;;  %v1381_v24 = vrot.slane %v15518_v43, 1  ;;  %v15520_v17 = vshll.u32 %v15519_v2, 16 }
 0x317   : > { %4960 = vmatmul.bf16.gmra.mxu3 %v12863_v34  ;;  %v15522_v34 = vshrl.u32 %v15513_v51, 16  ;;  %v1380_v52 = vor.u32 %v1379_v56, %v15523_v54  ;;  %v15525_v43 = vshrl.u32 %v15519_v2, 16 }
 0x318   : > { %v8468_v55 = vsel %vm8211_vm11, %v4919_v6, %v8340_v30  ;;  %v1383_v6 = vrot.slane %v15520_v17, 1 }
 0x319   : > { %8596 = vst [vmem:[%s12768_s27 + $0xa0] sm:$0xff] %v8468_v55  ;;  %v4832_v0 = vpop.f32.mrf.mxu2  ;;  %v1378_v40 = vor.u32 %v1377_v4, %v15522_v34  ;;  %v12894_v54 = vsel %vm12371_vm5, %v1380_v52, 0 }
 0x31a   : > { %v4656_v41 = vpop.f32.mrf.mxu0  ;;  %v4745_v9 = vpop.f32.mrf.mxu1  ;;  %v4833_v28 = vadd.f32 %v4832_v0, %v4744_v58  ;;  %v15524_v58 = vshrl.u32 %v15517_v45, 16  ;;  %v1384_v14 = vor.u32 %v1383_v6, %v15525_v43  ;;  %15527 = vst [vmem:[#allocation112_spill] sm:$0xff] %v12894_v54 }
 0x31b   : > { %v4921_v23 = vpop.f32.mrf.mxu3  ;;  %v4657_v30 = vadd.f32 %v4656_v41, %v15521_v8  ;;  %v12890_v41 = vsel %vm12371_vm5, %v1378_v40, 0  ;;  %v15530_v8 = vshll.u32 %v11979_v46, 16 }
 0x31c   : > { %v4922_v31 = vadd.f32 %v4921_v23, %v4833_v28  ;;  %v1382_v0 = vor.u32 %v1381_v24, %v15524_v58  ;;  %15526 = vst [vmem:[#allocation119_spill] sm:$0xff] %v12890_v41  ;;  %v12905_v24 = vsel %vm12371_vm5, %v1384_v14, 0  ;;  %v15531_v14 = vshll.u32 %v11981_v39, 16 }
 0x31d   : > { %v4746_v17 = vadd.f32 %v4745_v9, %v4657_v30  ;;  %15529 = vst [vmem:[#allocation100_spill] sm:$0xff] %v12905_v24  ;;  %v1385_v30 = vrot.slane %v15530_v8, 1 }
 0x31e   : > { %vm8215_vm12 = vcmp.ge.f32.partialorder %v4922_v31, 0.0  ;;  %v8344_v55 = vmul.f32 %v12742_v47, %v4922_v31  ;;  %v12901_v9 = vsel %vm12371_vm5, %v1382_v0, 0  ;;  %v1387_v0 = vrot.slane %v15531_v14, 1 }
 0x31f   : > { %15528 = vst [vmem:[#allocation113_spill] sm:$0xff] %v12901_v9 }
 0x320   : > { %v8472_v37 = vsel %vm8215_vm12, %v4922_v31, %v8344_v55 }
 0x321   : > { %8600 = vst [vmem:[%s12768_s27 + $0xc0] sm:$0xff] %v8472_v37  ;;  %v4834_v34 = vpop.f32.mrf.mxu2 }
 0x322   : > { %v4659_v23 = vpop.f32.mrf.mxu0  ;;  %v4748_v28 = vpop.f32.mrf.mxu1  ;;  %v4835_v56 = vadd.f32 %v4834_v34, %v4746_v17  ;;  %v10435_v17 = vld [vmem:[#allocation6 + $0x204] sm:$0xf] }
 0x323   : > { %v4923_v4 = vpop.f32.mrf.mxu3  ;;  %v4660_v31 = vadd.f32 %v4659_v23, %v12327_v61  ;;  %v9087_v23 = vld [vmem:[#allocation6 + $0x210] sm:$0xf0] }
 0x324   : > { %v4924_v6 = vadd.f32 %v4923_v4, %v4835_v56  ;;  %v9090_v4 = vor.u32 %v10435_v17, %v9087_v23  ;;  %v10371_v56 = vld [vmem:[#allocation6 + $0x4] sm:$0xf] }
 0x325   : > { %4698 = vmatmul.bf16.gmra.mxu0 %v12890_v41  ;;  %4787 = vmatmul.bf16.gmra.mxu1 %v12894_v54  ;;  %v4749_v52 = vadd.f32 %v4748_v28, %v4660_v31  ;;  %v15532_v54 = vshrl.u32 %v11979_v46, 16  ;;  %v15533_v28 = vshll.u32 %v15315_v48, 16  ;;  %v15534_v31 = vshll.u32 %v15316_v32, 16 }
 0x326   : > { %vm8219_vm13 = vcmp.ge.f32.partialorder %v4924_v6, 0.0  ;;  %v8348_v37 = vmul.f32 %v12742_v47, %v4924_v6  ;;  %4876 = vmatmul.bf16.gmra.mxu2 %v12901_v9  ;;  %v8831_v9 = vld [vmem:[#allocation6 + $0x10] sm:$0xf0] }
 0x327   : > { %4965 = vmatmul.bf16.gmra.mxu3 %v12905_v24  ;;  %v10467_v24 = vld [vmem:[#allocation6 + $0x304] sm:$0xf]  ;;  %v1386_v8 = vor.u32 %v1385_v30, %v15532_v54  ;;  %v8834_v14 = vor.u32 %v10371_v56, %v8831_v9  ;;  %5171 = vmatpush.bf16.msrb.mxu2 %v9090_v4  ;;  %v15536_v30 = vshrl.u32 %v15315_v48, 16  ;;  %v15537_v9 = vshrl.u32 %v15316_v32, 16 }
 0x328   : > { %v8476_v40 = vsel %vm8219_vm13, %v4924_v6, %v8348_v37  ;;  %v1389_v6 = vrot.slane %v15533_v28, 1  ;;  %v1391_v37 = vrot.slane %v15534_v31, 1  ;;  %v10403_v31 = vld [vmem:[#allocation6 + $0x104] sm:$0xf] }
 0x329   : > { %8604 = vst [vmem:[%s12768_s27 + $0xe0] sm:$0xff] %v8476_v40  ;;  %v4837_v43 = vpop.f32.mrf.mxu2  ;;  %v9215_v40 = vld [vmem:[#allocation6 + $0x310] sm:$0xf0]  ;;  %4993 = vmatpush.bf16.msrb.mxu0 %v8834_v14 }
 0x32a   : > { %v4661_v55 = vpop.f32.mrf.mxu0  ;;  %v4750_v58 = vpop.f32.mrf.mxu1  ;;  %v4838_v34 = vadd.f32 %v4837_v43, %v4749_v52  ;;  %v15535_v52 = vshrl.u32 %v11981_v39, 16  ;;  %v9218_v17 = vor.u32 %v10467_v24, %v9215_v40  ;;  %v1390_v23 = vor.u32 %v1389_v6, %v15536_v30  ;;  %v8959_v6 = vld [vmem:[#allocation6 + $0x110] sm:$0xf0] }
 0x32b   : > { %v4926_v61 = vpop.f32.mrf.mxu3  ;;  %v4662_v2 = vadd.f32 %v4661_v55, %v12332_v19  ;;  %v1392_v56 = vor.u32 %v1391_v37, %v15537_v9  ;;  %v8962_v40 = vor.u32 %v10403_v31, %v8959_v6  ;;  %v15542_v30 = vshll.u32 %v12047_v15, 16  ;;  %v15543_v9 = vld [vmem:[#allocation130_spill] sm:$0xff]  ;;  %v15547_v6 = vld [vmem:[#allocation136_spill] sm:$0xff] }
 0x32c   : > { %v4927_v41 = vadd.f32 %v4926_v61, %v4838_v34  ;;  %v1388_v43 = vor.u32 %v1387_v0, %v15535_v52  ;;  %5260 = vmatpush.bf16.msrb.mxu3 %v9218_v17  ;;  %v12932_v0 = vsel %vm12371_vm5, %v1386_v8, 0 }
 0x32d   : > { %v4751_v34 = vadd.f32 %v4750_v58, %v4662_v2  ;;  %15538 = vst [vmem:[#allocation189_spill] sm:$0xff] %v12932_v0  ;;  %v12943_v2 = vsel %vm12371_vm5, %v1390_v23, 0  ;;  %5082 = vmatpush.bf16.msrb.mxu1 %v8962_v40  ;;  %v1393_v23 = vrot.slane %v15542_v30, 1 }
 0x32e   : > { %vm8223_vm14 = vcmp.ge.f32.partialorder %v4927_v41, 0.0  ;;  %v8352_v54 = vmul.f32 %v12742_v47, %v4927_v41  ;;  %v12936_v24 = vsel %vm12371_vm5, %v1388_v43, 0  ;;  %15540 = vst [vmem:[#allocation191_spill] sm:$0xff] %v12943_v2 }
 0x32f   : > { %15539 = vst [vmem:[#allocation190_spill] sm:$0xff] %v12936_v24 }
 0x330   : > { %v8480_v61 = vsel %vm8223_vm14, %v4927_v41, %v8352_v54  ;;  %v12947_v41 = vsel %vm12371_vm5, %v1392_v56, 0  ;;  %v15544_v56 = vshll.u32 %v15543_v9, 16 }
 0x331   : > { %8608 = vst [vmem:[%s12768_s27 + $0x100] sm:$0xff] %v8480_v61  ;;  %v4839_v4 = vpop.f32.mrf.mxu2 }
 0x332   : > { %v4664_v19 = vpop.f32.mrf.mxu0  ;;  %v4753_v55 = vpop.f32.mrf.mxu1  ;;  %v4840_v14 = vadd.f32 %v4839_v4, %v4751_v34  ;;  %15541 = vst [vmem:[#allocation192_spill] sm:$0xff] %v12947_v41  ;;  %v1395_v61 = vrot.slane %v15544_v56, 1  ;;  %v15545_v4 = vld [vmem:[#allocation134_spill] sm:$0xff] }
 0x333   : > { %v4928_v28 = vpop.f32.mrf.mxu3  ;;  %v4665_v8 = vadd.f32 %v4664_v19, %v12337_v53 }
 0x334   : > { %v4929_v58 = vadd.f32 %v4928_v28, %v4840_v14  ;;  %v15546_v28 = vshll.u32 %v15545_v4, 16  ;;  %v15548_v14 = vshll.u32 %v15547_v6, 16 }
 0x335   : > { %4703 = vmatmul.bf16.gmra.mxu0 %v12932_v0  ;;  %4792 = vmatmul.bf16.gmra.mxu1 %v12936_v24  ;;  %v4754_v43 = vadd.f32 %v4753_v55, %v4665_v8 }
 0x336   : > { %vm8227_vm15 = vcmp.ge.f32.partialorder %v4929_v58, 0.0  ;;  %v8356_v37 = vmul.f32 %v12742_v47, %v4929_v58  ;;  %4881 = vmatmul.bf16.gmra.mxu2 %v12943_v2  ;;  %v1397_v31 = vrot.slane %v15546_v28, 1  ;;  %v1399_v40 = vrot.slane %v15548_v14, 1 }
 0x337   : > { %4970 = vmatmul.bf16.gmra.mxu3 %v12947_v41  ;;  %v15551_v41 = vshrl.u32 %v15543_v9, 16  ;;  %v15553_v28 = vshrl.u32 %v15547_v6, 16 }
 0x338   : > { %v8484_v52 = vsel %vm8227_vm15, %v4929_v58, %v8356_v37  ;;  %v15549_v58 = vld [vmem:[#allocation101_spill] sm:$0xff]  ;;  %v15550_v37 = vshrl.u32 %v12047_v15, 16 }
 0x339   : > { %8612 = vst [vmem:[%s12768_s27 + $0x120] sm:$0xff] %v8484_v52  ;;  %v4842_v53 = vpop.f32.mrf.mxu2  ;;  %v1396_v56 = vor.u32 %v1395_v61, %v15551_v41  ;;  %v1400_v2 = vor.u32 %v1399_v40, %v15553_v28 }
 0x33a   : > { %v4666_v17 = vpop.f32.mrf.mxu0  ;;  %v4755_v54 = vpop.f32.mrf.mxu1  ;;  %v4843_v19 = vadd.f32 %v4842_v53, %v4754_v43  ;;  %v1394_v30 = vor.u32 %v1393_v23, %v15550_v37  ;;  %v15552_v43 = vshrl.u32 %v15545_v4, 16 }
 0x33b   : > { %v4931_v34 = vpop.f32.mrf.mxu3  ;;  %v4667_v8 = vadd.f32 %v4666_v17, %v15549_v58  ;;  %v12978_v41 = vsel %vm12371_vm5, %v1396_v56, 0 }
 0x33c   : > { %v4932_v55 = vadd.f32 %v4931_v34, %v4843_v19  ;;  %v1398_v53 = vor.u32 %v1397_v31, %v15552_v43  ;;  %v12974_v17 = vsel %vm12371_vm5, %v1394_v30, 0  ;;  %15555 = vst [vmem:[#allocation193_spill] sm:$0xff] %v12978_v41  ;;  %v12989_v31 = vsel %vm12371_vm5, %v1400_v2, 0 }
 0x33d   : > { %v4756_v14 = vadd.f32 %v4755_v54, %v4667_v8  ;;  %15554 = vst [vmem:[#allocation101_spill] sm:$0xff] %v12974_v17  ;;  %v15558_v8 = vshll.u32 %v12123_v25, 16  ;;  %v15559_v2 = vshll.u32 %v12125_v27, 16 }
 0x33e   : > { %vm8231_vm0 = vcmp.ge.f32.partialorder %v4932_v55, 0.0  ;;  %v8360_v52 = vmul.f32 %v12742_v47, %v4932_v55  ;;  %v12985_v54 = vsel %vm12371_vm5, %v1398_v53, 0  ;;  %15557 = vst [vmem:[#allocation195_spill] sm:$0xff] %v12989_v31 }
 0x33f   : > { %15556 = vst [vmem:[#allocation194_spill] sm:$0xff] %v12985_v54  ;;  %v1401_v37 = vrot.slane %v15558_v8, 1  ;;  %v1403_v53 = vrot.slane %v15559_v2, 1 }
 0x340   : > { %v8488_v24 = vsel %vm8231_vm0, %v4932_v55, %v8360_v52 }
 0x341   : > { %8616 = vst [vmem:[%s12768_s27 + $0x140] sm:$0xff] %v8488_v24  ;;  %v4844_v23 = vpop.f32.mrf.mxu2 }
 0x342   : > { %v4669_v34 = vpop.f32.mrf.mxu0  ;;  %v4758_v19 = vpop.f32.mrf.mxu1  ;;  %v4845_v58 = vadd.f32 %v4844_v23, %v4756_v14  ;;  %v10591_v14 = vld [vmem:[#allocation6 + $0x6e4] sm:$0xf] }
 0x343   : > { %v4933_v61 = vpop.f32.mrf.mxu3  ;;  %v4670_v55 = vadd.f32 %v4669_v34, %v12347_v3  ;;  %v9711_v34 = vld [vmem:[#allocation6 + $0x6f0] sm:$0xf0] }
 0x344   : > { %v4934_v40 = vadd.f32 %v4933_v61, %v4845_v58  ;;  %v9714_v61 = vor.u32 %v10591_v14, %v9711_v34  ;;  %v10527_v58 = vld [vmem:[#allocation6 + $0x4e4] sm:$0xf] }
 0x345   : > { %4708 = vmatmul.bf16.gmra.mxu0 %v12974_v17  ;;  %4797 = vmatmul.bf16.gmra.mxu1 %v12978_v41  ;;  %v4759_v56 = vadd.f32 %v4758_v19, %v4670_v55  ;;  %v15560_v41 = vshrl.u32 %v12123_v25, 16  ;;  %v15561_v19 = vshll.u32 %v12128_v50, 16  ;;  %v15562_v55 = vshll.u32 %v12130_v20, 16 }
 0x346   : > { %vm8235_vm1 = vcmp.ge.f32.partialorder %v4934_v40, 0.0  ;;  %v8364_v24 = vmul.f32 %v12742_v47, %v4934_v40  ;;  %4886 = vmatmul.bf16.gmra.mxu2 %v12985_v54  ;;  %v9455_v54 = vld [vmem:[#allocation6 + $0x4f0] sm:$0xf0] }
 0x347   : > { %4975 = vmatmul.bf16.gmra.mxu3 %v12989_v31  ;;  %v10623_v31 = vld [vmem:[#allocation6 + $0x7e4] sm:$0xf]  ;;  %v1402_v8 = vor.u32 %v1401_v37, %v15560_v41  ;;  %v9458_v2 = vor.u32 %v10527_v58, %v9455_v54  ;;  %5520 = vmatpush.bf16.msra.mxu2 %v9714_v61  ;;  %v15564_v37 = vshrl.u32 %v12128_v50, 16  ;;  %v15565_v54 = vshrl.u32 %v12130_v20, 16 }
 0x348   : > { %v8492_v30 = vsel %vm8235_vm1, %v4934_v40, %v8364_v24  ;;  %v1405_v40 = vrot.slane %v15561_v19, 1  ;;  %v1407_v24 = vrot.slane %v15562_v55, 1  ;;  %v10559_v55 = vld [vmem:[#allocation6 + $0x5e4] sm:$0xf] }
 0x349   : > { %8620 = vst [vmem:[%s12768_s27 + $0x160] sm:$0xff] %v8492_v30  ;;  %v4847_v28 = vpop.f32.mrf.mxu2  ;;  %v9839_v30 = vld [vmem:[#allocation6 + $0x7f0] sm:$0xf0]  ;;  %5342 = vmatpush.bf16.msra.mxu0 %v9458_v2 }
 0x34a   : > { %v4671_v52 = vpop.f32.mrf.mxu0  ;;  %v4760_v43 = vpop.f32.mrf.mxu1  ;;  %v4848_v23 = vadd.f32 %v4847_v28, %v4759_v56  ;;  %v15563_v56 = vshrl.u32 %v12125_v27, 16  ;;  %v9842_v14 = vor.u32 %v10623_v31, %v9839_v30  ;;  %v1406_v34 = vor.u32 %v1405_v40, %v15564_v37  ;;  %v9583_v40 = vld [vmem:[#allocation6 + $0x5f0] sm:$0xf0] }
 0x34b   : > { %v4936_v3 = vpop.f32.mrf.mxu3  ;;  %v4672_v0 = vadd.f32 %v4671_v52, %v12352_v62  ;;  %v1408_v58 = vor.u32 %v1407_v24, %v15565_v54  ;;  %v9586_v30 = vor.u32 %v10559_v55, %v9583_v40  ;;  %v15570_v40 = vld [vmem:[#allocation17_spill] sm:$0xff] }
 0x34c   : > { %v4937_v17 = vadd.f32 %v4936_v3, %v4848_v23  ;;  %v1404_v28 = vor.u32 %v1403_v53, %v15563_v56  ;;  %5609 = vmatpush.bf16.msra.mxu3 %v9842_v14  ;;  %v13016_v53 = vsel %vm12371_vm5, %v1402_v8, 0 }
 0x34d   : > { %v4761_v23 = vadd.f32 %v4760_v43, %v4672_v0  ;;  %15566 = vst [vmem:[#allocation196_spill] sm:$0xff] %v13016_v53  ;;  %v13027_v0 = vsel %vm12371_vm5, %v1406_v34, 0  ;;  %5431 = vmatpush.bf16.msra.mxu1 %v9586_v30 }
 0x34e   : > { %vm8239_vm2 = vcmp.ge.f32.partialorder %v4937_v17, 0.0  ;;  %v8368_v41 = vmul.f32 %v12742_v47, %v4937_v17  ;;  %v13020_v31 = vsel %vm12371_vm5, %v1404_v28, 0  ;;  %15568 = vst [vmem:[#allocation198_spill] sm:$0xff] %v13027_v0 }
 0x34f   : > { %15567 = vst [vmem:[#allocation197_spill] sm:$0xff] %v13020_v31 }
 0x350   : > { %v8496_v3 = vsel %vm8239_vm2, %v4937_v17, %v8368_v41  ;;  %v13031_v17 = vsel %vm12371_vm5, %v1408_v58, 0 }
 0x351   : > { %8624 = vst [vmem:[%s12768_s27 + $0x180] sm:$0xff] %v8496_v3  ;;  %v4849_v61 = vpop.f32.mrf.mxu2 }
 0x352   : > { %v4674_v62 = vpop.f32.mrf.mxu0  ;;  %v4763_v52 = vpop.f32.mrf.mxu1  ;;  %v4850_v2 = vadd.f32 %v4849_v61, %v4761_v23  ;;  %15569 = vst [vmem:[#allocation199_spill] sm:$0xff] %v13031_v17 }
 0x353   : > { %v4938_v19 = vpop.f32.mrf.mxu3  ;;  %v4675_v8 = vadd.f32 %v4674_v62, %v12365_v13 }
 0x354   : > { %v4939_v43 = vadd.f32 %v4938_v19, %v4850_v2  ;;  %v15571_v2 = vld [vmem:[#allocation18_spill] sm:$0xff] }
 0x355   : > { %4713 = vmatmul.bf16.gmra.mxu0 %v13016_v53  ;;  %4802 = vmatmul.bf16.gmra.mxu1 %v13020_v31  ;;  %v4764_v28 = vadd.f32 %v4763_v52, %v4675_v8  ;;  %v15572_v8 = vld [vmem:[#allocation21_spill] sm:$0xff] }
 0x356   : > { %vm8243_vm3 = vcmp.ge.f32.partialorder %v4939_v43, 0.0  ;;  %v8372_v24 = vmul.f32 %v12742_v47, %v4939_v43  ;;  %4891 = vmatmul.bf16.gmra.mxu2 %v13027_v0  ;;  %v10319_v0 = vld [vmem:[#allocation6 + $0xbb0] sm:$0xf0] }
 0x357   : > { %4980 = vmatmul.bf16.gmra.mxu3 %v13031_v17 }
 0x358   : > { %v8500_v56 = vsel %vm8243_vm3, %v4939_v43, %v8372_v24  ;;  %v15573_v24 = vld [vmem:[#allocation22_spill] sm:$0xff] }
 0x359   : > { %8628 = vst [vmem:[%s12768_s27 + $0x1a0] sm:$0xff] %v8500_v56  ;;  %v4852_v22 = vpop.f32.mrf.mxu2 }
 0x35a   : > { %v4676_v14 = vpop.f32.mrf.mxu0  ;;  %v4765_v41 = vpop.f32.mrf.mxu1  ;;  %v4853_v34 = vadd.f32 %v4852_v22, %v4764_v28 }
 0x35b   : > { %v4941_v37 = vpop.f32.mrf.mxu3  ;;  %v4677_v13 = vadd.f32 %v4676_v14, %v12398_v21 }
 0x35c   : > { %v4942_v54 = vadd.f32 %v4941_v37, %v4853_v34  ;;  %v10587_v34 = vld [vmem:[#allocation6 + $0x6c4] sm:$0xf] }
 0x35d   : > { %v4766_v23 = vadd.f32 %v4765_v41, %v4677_v13 }
 0x35e   : > { %vm8247_vm4 = vcmp.ge.f32.partialorder %v4942_v54, 0.0  ;;  %v8376_v58 = vmul.f32 %v12742_v47, %v4942_v54 }
 0x360   : > { %v8504_v3 = vsel %vm8247_vm4, %v4942_v54, %v8376_v58  ;;  %v9695_v54 = vld [vmem:[#allocation6 + $0x6d0] sm:$0xf0] }
 0x361   : > { %8632 = vst [vmem:[%s12768_s27 + $0x1c0] sm:$0xff] %v8504_v3  ;;  %v4854_v19 = vpop.f32.mrf.mxu2  ;;  %v9698_v58 = vor.u32 %v10587_v34, %v9695_v54  ;;  %v10523_v3 = vld [vmem:[#allocation6 + $0x4c4] sm:$0xf] }
 0x362   : > { %v4679_v62 = vpop.f32.mrf.mxu0  ;;  %v4768_v61 = vpop.f32.mrf.mxu1  ;;  %v4855_v55 = vadd.f32 %v4854_v19, %v4766_v23  ;;  %v10619_v23 = vld [vmem:[#allocation6 + $0x7c4] sm:$0xf]  ;;  %v9823_v19 = vld [vmem:[#allocation6 + $0x7d0] sm:$0xf0] }
 0x363   : > { %v4943_v52 = vpop.f32.mrf.mxu3  ;;  %v4680_v43 = vadd.f32 %v4679_v62, %v12411_v57  ;;  %v9439_v57 = vld [vmem:[#allocation6 + $0x4d0] sm:$0xf0]  ;;  %5521 = vmatpush.bf16.msra.mxu2 %v9698_v58  ;;  %v10555_v54 = vld [vmem:[#allocation6 + $0x5c4] sm:$0xf] }
 0x364   : > { %v4944_v30 = vadd.f32 %v4943_v52, %v4855_v55  ;;  %v9442_v62 = vor.u32 %v10523_v3, %v9439_v57  ;;  %v9567_v3 = vld [vmem:[#allocation6 + $0x5d0] sm:$0xf0] }
 0x365   : > { %4994 = vmatmul.bf16.vlgmr.msrb.gmra.mxu0 %v15570_v40  ;;  %5083 = vmatmul.bf16.vlgmr.msrb.gmra.mxu1 %v15571_v2  ;;  %v4769_v28 = vadd.f32 %v4768_v61, %v4680_v43  ;;  %v9826_v61 = vor.u32 %v10619_v23, %v9823_v19  ;;  %v15576_v23 = vld [vmem:[#allocation29_spill] sm:$0xff] }
 0x366   : > { %vm8251_vm5 = vcmp.ge.f32.partialorder %v4944_v30, 0.0  ;;  %v8380_v21 = vmul.f32 %v12742_v47, %v4944_v30  ;;  %5172 = vmatmul.bf16.vlgmr.msrb.gmra.mxu2 %v15572_v8  ;;  %5343 = vmatpush.bf16.msra.mxu0 %v9442_v62  ;;  %v15577_v62 = vld [vmem:[#allocation31_spill] sm:$0xff] }
 0x367   : > { %5261 = vmatmul.bf16.vlgmr.msrb.gmra.mxu3 %v15573_v24  ;;  %v10335_v8 = vld [vmem:[#allocation6 + $0xbd0] sm:$0xf0] }
 0x368   : > { %v8508_v56 = vsel %vm8251_vm5, %v4944_v30, %v8380_v21  ;;  %5610 = vmatpush.bf16.msra.mxu3 %v9826_v61 }
 0x369   : > { %8636 = vst [vmem:[%s12768_s27 + $0x1e0] sm:$0xff] %v8508_v56  ;;  %v4857_v22 = vpop.f32.mrf.mxu2 }
 0x36a   : > { %v4681_v14 = vpop.f32.mrf.mxu0  ;;  %v4770_v41 = vpop.f32.mrf.mxu1  ;;  %v4858_v13 = vadd.f32 %v4857_v22, %v4769_v28 }
 0x36b   : > { %v4946_v37 = vpop.f32.mrf.mxu3  ;;  %v4682_v55 = vadd.f32 %v4681_v14, %v12440_v11  ;;  %v15574_v11 = vld [vmem:[#allocation27_spill] sm:$0xff]  ;;  %v15575_v14 = vld [vmem:[#allocation28_spill] sm:$0xff] }
 0x36c   : > { %v4947_v52 = vadd.f32 %v4946_v37, %v4858_v13  ;;  %v9570_v13 = vor.u32 %v10555_v54, %v9567_v3 }
 0x36d   : > { %v4771_v21 = vadd.f32 %v4770_v41, %v4682_v55 }
 0x36e   : > { %vm8255_vm6 = vcmp.ge.f32.partialorder %v4947_v52, 0.0  ;;  %v8384_v30 = vmul.f32 %v12742_v47, %v4947_v52  ;;  %5432 = vmatpush.bf16.msra.mxu1 %v9570_v13 }
 0x370   : > { %v8512_v43 = vsel %vm8255_vm6, %v4947_v52, %v8384_v30 }
 0x371   : > { %8640 = vst [vmem:[%s12768_s27 + $0x200] sm:$0xff] %v8512_v43  ;;  %v4859_v22 = vpop.f32.mrf.mxu2 }
 0x372   : > { %v4684_v56 = vpop.f32.mrf.mxu0  ;;  %v4773_v28 = vpop.f32.mrf.mxu1  ;;  %v4860_v37 = vadd.f32 %v4859_v22, %v4771_v21 }
 0x373   : > { %v4948_v34 = vpop.f32.mrf.mxu3  ;;  %v4685_v57 = vadd.f32 %v4684_v56, %v12453_v5 }
 0x374   : > { %v4949_v58 = vadd.f32 %v4948_v34, %v4860_v37 }
 0x375   : > { %4999 = vmatmul.bf16.gmra.mxu0 %v15574_v11  ;;  %5088 = vmatmul.bf16.gmra.mxu1 %v15575_v14  ;;  %v4774_v52 = vadd.f32 %v4773_v28, %v4685_v57  ;;  %v15578_v57 = vld [vmem:[#allocation33_spill] sm:$0xff] }
 0x376   : > { %vm8259_vm7 = vcmp.ge.f32.partialorder %v4949_v58, 0.0  ;;  %v8388_v41 = vmul.f32 %v12742_v47, %v4949_v58  ;;  %5177 = vmatmul.bf16.gmra.mxu2 %v15576_v23  ;;  %v10351_v23 = vld [vmem:[#allocation6 + $0xbf0] sm:$0xf0] }
 0x377   : > { %5266 = vmatmul.bf16.gmra.mxu3 %v15577_v62 }
 0x378   : > { %v8516_v19 = vsel %vm8259_vm7, %v4949_v58, %v8388_v41  ;;  %v15579_v41 = vld [vmem:[#allocation34_spill] sm:$0xff] }
 0x379   : > { %8644 = vst [vmem:[%s12768_s27 + $0x220] sm:$0xff] %v8516_v19  ;;  %v4862_v30 = vpop.f32.mrf.mxu2 }
 0x37a   : > { %v4686_v55 = vpop.f32.mrf.mxu0  ;;  %v4775_v61 = vpop.f32.mrf.mxu1  ;;  %v4863_v21 = vadd.f32 %v4862_v30, %v4774_v52 }
 0x37b   : > { %v4951_v43 = vpop.f32.mrf.mxu3  ;;  %v4687_v5 = vadd.f32 %v4686_v55, %v12482_v33  ;;  %v15580_v55 = vld [vmem:[#allocation38_spill] sm:$0xff] }
 0x37c   : > { %v4952_v22 = vadd.f32 %v4951_v43, %v4863_v21 }
 0x37d   : > { %v4776_v54 = vadd.f32 %v4775_v61, %v4687_v5  ;;  %v15581_v61 = vld [vmem:[#allocation39_spill] sm:$0xff] }
 0x37e   : > { %vm8263_vm8 = vcmp.ge.f32.partialorder %v4952_v22, 0.0  ;;  %v8392_v56 = vmul.f32 %v12742_v47, %v4952_v22 }
 0x380   : > { %v8520_v34 = vsel %vm8263_vm8, %v4952_v22, %v8392_v56 }
 0x381   : > { %8648 = vst [vmem:[%s12768_s27 + $0x240] sm:$0xff] %v8520_v34  ;;  %v4864_v13 = vpop.f32.mrf.mxu2  ;;  %v10583_v34 = vld [vmem:[#allocation6 + $0x6a4] sm:$0xf] }
 0x382   : > { %v4689_v3 = vpop.f32.mrf.mxu0  ;;  %v4778_v37 = vpop.f32.mrf.mxu1  ;;  %v4865_v58 = vadd.f32 %v4864_v13, %v4776_v54  ;;  %v9679_v54 = vld [vmem:[#allocation6 + $0x6b0] sm:$0xf0] }
 0x383   : > { %v4953_v28 = vpop.f32.mrf.mxu3  ;;  %v4690_v52 = vadd.f32 %v4689_v3, %v12495_v63  ;;  %v9423_v63 = vld [vmem:[#allocation6 + $0x4b0] sm:$0xf0]  ;;  %v10615_v3 = vld [vmem:[#allocation6 + $0x7a4] sm:$0xf] }
 0x384   : > { %v4954_v19 = vadd.f32 %v4953_v28, %v4865_v58  ;;  %v9682_v28 = vor.u32 %v10583_v34, %v9679_v54  ;;  %v10519_v58 = vld [vmem:[#allocation6 + $0x4a4] sm:$0xf] }
 0x385   : > { %5004 = vmatmul.bf16.gmra.mxu0 %v15578_v57  ;;  %5093 = vmatmul.bf16.gmra.mxu1 %v15579_v41  ;;  %v4779_v43 = vadd.f32 %v4778_v37, %v4690_v52  ;;  %v9426_v41 = vor.u32 %v10519_v58, %v9423_v63  ;;  %v9807_v57 = vld [vmem:[#allocation6 + $0x7b0] sm:$0xf0]  ;;  %v10551_v54 = vld [vmem:[#allocation6 + $0x5a4] sm:$0xf] }
 0x386   : > { %vm8267_vm9 = vcmp.ge.f32.partialorder %v4954_v19, 0.0  ;;  %v8396_v33 = vmul.f32 %v12742_v47, %v4954_v19  ;;  %5182 = vmatmul.bf16.gmra.mxu2 %v15580_v55  ;;  %v9810_v37 = vor.u32 %v10615_v3, %v9807_v57  ;;  %v9551_v58 = vld [vmem:[#allocation6 + $0x5b0] sm:$0xf0]  ;;  %v15583_v57 = vld [vmem:[#allocation42_spill] sm:$0xff] }
 0x387   : > { %5271 = vmatmul.bf16.gmra.mxu3 %v15581_v61  ;;  %5522 = vmatpush.bf16.msra.mxu2 %v9682_v28 }
 0x388   : > { %v8524_v30 = vsel %vm8267_vm9, %v4954_v19, %v8396_v33  ;;  %5344 = vmatpush.bf16.msra.mxu0 %v9426_v41  ;;  %5611 = vmatpush.bf16.msra.mxu3 %v9810_v37 }
 0x389   : > { %8652 = vst [vmem:[%s12768_s27 + $0x260] sm:$0xff] %v8524_v30  ;;  %v4867_v5 = vpop.f32.mrf.mxu2 }
 0x38a   : > { %v4691_v21 = vpop.f32.mrf.mxu0  ;;  %v4780_v22 = vpop.f32.mrf.mxu1  ;;  %v4868_v13 = vadd.f32 %v4867_v5, %v4779_v43 }
 0x38b   : > { %v4956_v56 = vpop.f32.mrf.mxu3  ;;  %v4692_v61 = vadd.f32 %v4691_v21, %v12524_v35  ;;  %v15582_v35 = vld [vmem:[#allocation41_spill] sm:$0xff] }
 0x38c   : > { %v4957_v55 = vadd.f32 %v4956_v56, %v4868_v13  ;;  %v9554_v13 = vor.u32 %v10551_v54, %v9551_v58 }
 0x38d   : > { %v4781_v33 = vadd.f32 %v4780_v22, %v4692_v61  ;;  %v15584_v61 = vld [vmem:[#allocation45_spill] sm:$0xff]  ;;  %v15585_v22 = vld [vmem:[#allocation46_spill] sm:$0xff] }
 0x38e   : > { %vm8271_vm10 = vcmp.ge.f32.partialorder %v4957_v55, 0.0  ;;  %v8400_v19 = vmul.f32 %v12742_v47, %v4957_v55  ;;  %5433 = vmatpush.bf16.msra.mxu1 %v9554_v13 }
 0x390   : > { %v8528_v52 = vsel %vm8271_vm10, %v4957_v55, %v8400_v19 }
 0x391   : > { %8656 = vst [vmem:[%s12768_s27 + $0x280] sm:$0xff] %v8528_v52  ;;  %v4869_v5 = vpop.f32.mrf.mxu2 }
 0x392   : > { %v4694_v30 = vpop.f32.mrf.mxu0  ;;  %v4783_v43 = vpop.f32.mrf.mxu1  ;;  %v4870_v56 = vadd.f32 %v4869_v5, %v4781_v33 }
 0x393   : > { %v4958_v34 = vpop.f32.mrf.mxu3  ;;  %v4695_v21 = vadd.f32 %v4694_v30, %v12537_v18 }
 0x394   : > { %v4959_v41 = vadd.f32 %v4958_v34, %v4870_v56 }
 0x395   : > { %5009 = vmatmul.bf16.gmra.mxu0 %v15582_v35  ;;  %5098 = vmatmul.bf16.gmra.mxu1 %v15583_v57  ;;  %v4784_v63 = vadd.f32 %v4783_v43, %v4695_v21  ;;  %v15586_v21 = vld [vmem:[#allocation51_spill] sm:$0xff] }
 0x396   : > { %vm8275_vm11 = vcmp.ge.f32.partialorder %v4959_v41, 0.0  ;;  %v8404_v55 = vmul.f32 %v12742_v47, %v4959_v41  ;;  %5187 = vmatmul.bf16.gmra.mxu2 %v15584_v61  ;;  %v9727_v61 = vld [vmem:[#allocation6 + $0x710] sm:$0xf0] }
 0x397   : > { %5276 = vmatmul.bf16.gmra.mxu3 %v15585_v22 }
 0x398   : > { %v8532_v28 = vsel %vm8275_vm11, %v4959_v41, %v8404_v55  ;;  %v15587_v55 = vld [vmem:[#allocation52_spill] sm:$0xff] }
 0x399   : > { %8660 = vst [vmem:[%s12768_s27 + $0x2a0] sm:$0xff] %v8532_v28  ;;  %v4872_v19 = vpop.f32.mrf.mxu2 }
 0x39a   : > { %v4696_v3 = vpop.f32.mrf.mxu0  ;;  %v4785_v37 = vpop.f32.mrf.mxu1  ;;  %v4873_v33 = vadd.f32 %v4872_v19, %v4784_v63 }
 0x39b   : > { %v4961_v52 = vpop.f32.mrf.mxu3  ;;  %v4697_v18 = vadd.f32 %v4696_v3, %v12566_v49  ;;  %v15588_v3 = vld [vmem:[#allocation55_spill] sm:$0xff] }
 0x39c   : > { %v4962_v5 = vadd.f32 %v4961_v52, %v4873_v33 }
 0x39d   : > { %v4786_v54 = vadd.f32 %v4785_v37, %v4697_v18  ;;  %v15589_v37 = vld [vmem:[#allocation56_spill] sm:$0xff] }
 0x39e   : > { %vm8279_vm12 = vcmp.ge.f32.partialorder %v4962_v5, 0.0  ;;  %v8408_v30 = vmul.f32 %v12742_v47, %v4962_v5 }
 0x3a0   : > { %v8536_v34 = vsel %vm8279_vm12, %v4962_v5, %v8408_v30 }
 0x3a1   : > { %8664 = vst [vmem:[%s12768_s27 + $0x2c0] sm:$0xff] %v8536_v34  ;;  %v4874_v13 = vpop.f32.mrf.mxu2  ;;  %v10579_v34 = vld [vmem:[#allocation6 + $0x684] sm:$0xf] }
 0x3a2   : > { %v4699_v58 = vpop.f32.mrf.mxu0  ;;  %v4788_v56 = vpop.f32.mrf.mxu1  ;;  %v4875_v41 = vadd.f32 %v4874_v13, %v4786_v54  ;;  %v9663_v54 = vld [vmem:[#allocation6 + $0x690] sm:$0xf0] }
 0x3a3   : > { %v4963_v43 = vpop.f32.mrf.mxu3  ;;  %v4700_v63 = vadd.f32 %v4699_v58, %v12579_v42  ;;  %v9407_v42 = vld [vmem:[#allocation6 + $0x490] sm:$0xf0]  ;;  %v10611_v58 = vld [vmem:[#allocation6 + $0x784] sm:$0xf] }
 0x3a4   : > { %v4964_v28 = vadd.f32 %v4963_v43, %v4875_v41  ;;  %v9666_v43 = vor.u32 %v10579_v34, %v9663_v54  ;;  %v10515_v41 = vld [vmem:[#allocation6 + $0x484] sm:$0xf] }
 0x3a5   : > { %5014 = vmatmul.bf16.gmra.mxu0 %v15586_v21  ;;  %5103 = vmatmul.bf16.gmra.mxu1 %v15587_v55  ;;  %v4789_v52 = vadd.f32 %v4788_v56, %v4700_v63  ;;  %v9410_v55 = vor.u32 %v10515_v41, %v9407_v42  ;;  %v9791_v21 = vld [vmem:[#allocation6 + $0x790] sm:$0xf0]  ;;  %v10547_v54 = vld [vmem:[#allocation6 + $0x584] sm:$0xf] }
 0x3a6   : > { %vm8283_vm13 = vcmp.ge.f32.partialorder %v4964_v28, 0.0  ;;  %v8412_v49 = vmul.f32 %v12742_v47, %v4964_v28  ;;  %5192 = vmatmul.bf16.gmra.mxu2 %v15588_v3  ;;  %v9794_v56 = vor.u32 %v10611_v58, %v9791_v21  ;;  %v9535_v41 = vld [vmem:[#allocation6 + $0x590] sm:$0xf0]  ;;  %v15591_v21 = vld [vmem:[#allocation58_spill] sm:$0xff] }
 0x3a7   : > { %5281 = vmatmul.bf16.gmra.mxu3 %v15589_v37  ;;  %5523 = vmatpush.bf16.msra.mxu2 %v9666_v43 }
 0x3a8   : > { %v8540_v19 = vsel %vm8283_vm13, %v4964_v28, %v8412_v49  ;;  %5345 = vmatpush.bf16.msra.mxu0 %v9410_v55  ;;  %5612 = vmatpush.bf16.msra.mxu3 %v9794_v56 }
 0x3a9   : > { %8668 = vst [vmem:[%s12768_s27 + $0x2e0] sm:$0xff] %v8540_v19  ;;  %v4877_v18 = vpop.f32.mrf.mxu2 }
 0x3aa   : > { %v4701_v33 = vpop.f32.mrf.mxu0  ;;  %v4790_v5 = vpop.f32.mrf.mxu1  ;;  %v4878_v13 = vadd.f32 %v4877_v18, %v4789_v52 }
 0x3ab   : > { %v4966_v30 = vpop.f32.mrf.mxu3  ;;  %v4702_v37 = vadd.f32 %v4701_v33, %v12608_v44  ;;  %v15590_v44 = vld [vmem:[#allocation57_spill] sm:$0xff] }
 0x3ac   : > { %v4967_v3 = vadd.f32 %v4966_v30, %v4878_v13  ;;  %v9538_v13 = vor.u32 %v10547_v54, %v9535_v41 }
 0x3ad   : > { %v4791_v49 = vadd.f32 %v4790_v5, %v4702_v37  ;;  %v15592_v37 = vld [vmem:[#allocation61_spill] sm:$0xff]  ;;  %v15593_v5 = vld [vmem:[#allocation62_spill] sm:$0xff] }
 0x3ae   : > { %vm8287_vm14 = vcmp.ge.f32.partialorder %v4967_v3, 0.0  ;;  %v8416_v28 = vmul.f32 %v12742_v47, %v4967_v3  ;;  %5434 = vmatpush.bf16.msra.mxu1 %v9538_v13 }
 0x3b0   : > { %v8544_v63 = vsel %vm8287_vm14, %v4967_v3, %v8416_v28 }
 0x3b1   : > { %8672 = vst [vmem:[%s12768_s27 + $0x300] sm:$0xff] %v8544_v63  ;;  %v4879_v18 = vpop.f32.mrf.mxu2 }
 0x3b2   : > { %v4704_v19 = vpop.f32.mrf.mxu0  ;;  %v4793_v52 = vpop.f32.mrf.mxu1  ;;  %v4880_v30 = vadd.f32 %v4879_v18, %v4791_v49 }
 0x3b3   : > { %v4968_v34 = vpop.f32.mrf.mxu3  ;;  %v4705_v33 = vadd.f32 %v4704_v19, %v12621_v59 }
 0x3b4   : > { %v4969_v55 = vadd.f32 %v4968_v34, %v4880_v30 }
 0x3b5   : > { %5019 = vmatmul.bf16.gmra.mxu0 %v15590_v44  ;;  %5108 = vmatmul.bf16.gmra.mxu1 %v15591_v21  ;;  %v4794_v42 = vadd.f32 %v4793_v52, %v4705_v33  ;;  %v15594_v33 = vld [vmem:[#allocation67_spill] sm:$0xff] }
 0x3b6   : > { %vm8291_vm15 = vcmp.ge.f32.partialorder %v4969_v55, 0.0  ;;  %v8420_v3 = vmul.f32 %v12742_v47, %v4969_v55  ;;  %5197 = vmatmul.bf16.gmra.mxu2 %v15592_v37 }
 0x3b7   : > { %5286 = vmatmul.bf16.gmra.mxu3 %v15593_v5 }
 0x3b8   : > { %v8548_v43 = vsel %vm8291_vm15, %v4969_v55, %v8420_v3  ;;  %v15595_v3 = vld [vmem:[#allocation68_spill] sm:$0xff] }
 0x3b9   : > { %8676 = vst [vmem:[%s12768_s27 + $0x320] sm:$0xff] %v8548_v43  ;;  %v4882_v28 = vpop.f32.mrf.mxu2 }
 0x3ba   : > { %v4706_v58 = vpop.f32.mrf.mxu0  ;;  %v4795_v56 = vpop.f32.mrf.mxu1  ;;  %v4883_v49 = vadd.f32 %v4882_v28, %v4794_v42 }
 0x3bb   : > { %v4971_v63 = vpop.f32.mrf.mxu3  ;;  %v4707_v59 = vadd.f32 %v4706_v58, %v12650_v7  ;;  %v15596_v58 = vld [vmem:[#allocation71_spill] sm:$0xff] }
 0x3bc   : > { %v4972_v18 = vadd.f32 %v4971_v63, %v4883_v49 }
 0x3bd   : > { %v4796_v54 = vadd.f32 %v4795_v56, %v4707_v59  ;;  %v15597_v56 = vld [vmem:[#allocation72_spill] sm:$0xff] }
 0x3be   : > { %vm8295_vm0 = vcmp.ge.f32.partialorder %v4972_v18, 0.0  ;;  %v8424_v19 = vmul.f32 %v12742_v47, %v4972_v18 }
 0x3c0   : > { %v8552_v34 = vsel %vm8295_vm0, %v4972_v18, %v8424_v19 }
 0x3c1   : > { %8680 = vst [vmem:[%s12768_s27 + $0x340] sm:$0xff] %v8552_v34  ;;  %v4884_v13 = vpop.f32.mrf.mxu2  ;;  %v10575_v34 = vld [vmem:[#allocation6 + $0x664] sm:$0xf] }
 0x3c2   : > { %v4709_v41 = vpop.f32.mrf.mxu0  ;;  %v4798_v30 = vpop.f32.mrf.mxu1  ;;  %v4885_v55 = vadd.f32 %v4884_v13, %v4796_v54  ;;  %v9647_v54 = vld [vmem:[#allocation6 + $0x670] sm:$0xf0] }
 0x3c3   : > { %v4973_v52 = vpop.f32.mrf.mxu3  ;;  %v4710_v42 = vadd.f32 %v4709_v41, %v12663_v16  ;;  %v9391_v16 = vld [vmem:[#allocation6 + $0x470] sm:$0xf0]  ;;  %v10607_v41 = vld [vmem:[#allocation6 + $0x764] sm:$0xf] }
 0x3c4   : > { %v4974_v43 = vadd.f32 %v4973_v52, %v4885_v55  ;;  %v9650_v52 = vor.u32 %v10575_v34, %v9647_v54  ;;  %v10511_v55 = vld [vmem:[#allocation6 + $0x464] sm:$0xf] }
 0x3c5   : > { %5024 = vmatmul.bf16.gmra.mxu0 %v15594_v33  ;;  %5113 = vmatmul.bf16.gmra.mxu1 %v15595_v3  ;;  %v4799_v63 = vadd.f32 %v4798_v30, %v4710_v42  ;;  %v9394_v3 = vor.u32 %v10511_v55, %v9391_v16  ;;  %v9775_v33 = vld [vmem:[#allocation6 + $0x770] sm:$0xf0] }
 0x3c6   : > { %vm8299_vm1 = vcmp.ge.f32.partialorder %v4974_v43, 0.0  ;;  %v8428_v7 = vmul.f32 %v12742_v47, %v4974_v43  ;;  %5202 = vmatmul.bf16.gmra.mxu2 %v15596_v58  ;;  %v9778_v30 = vor.u32 %v10607_v41, %v9775_v33  ;;  %v9519_v42 = vld [vmem:[#allocation6 + $0x570] sm:$0xf0]  ;;  %v15599_v33 = vld [vmem:[#allocation74_spill] sm:$0xff]  ;;  %v15601_v41 = vld [vmem:[#allocation77_spill] sm:$0xff] }
 0x3c7   : > { %5291 = vmatmul.bf16.gmra.mxu3 %v15597_v56  ;;  %5524 = vmatpush.bf16.msra.mxu2 %v9650_v52  ;;  %v15600_v52 = vld [vmem:[#allocation89_spill] sm:$0xff] }
 0x3c8   : > { %v8556_v28 = vsel %vm8299_vm1, %v4974_v43, %v8428_v7  ;;  %v10543_v43 = vld [vmem:[#allocation6 + $0x564] sm:$0xf]  ;;  %5346 = vmatpush.bf16.msra.mxu0 %v9394_v3  ;;  %5613 = vmatpush.bf16.msra.mxu3 %v9778_v30 }
 0x3c9   : > { %8684 = vst [vmem:[%s12768_s27 + $0x360] sm:$0xff] %v8556_v28  ;;  %v4887_v59 = vpop.f32.mrf.mxu2  ;;  %v9522_v7 = vor.u32 %v10543_v43, %v9519_v42 }
 0x3ca   : > { %v4711_v49 = vpop.f32.mrf.mxu0  ;;  %v4800_v18 = vpop.f32.mrf.mxu1  ;;  %v4888_v13 = vadd.f32 %v4887_v59, %v4799_v63 }
 0x3cb   : > { %v4976_v19 = vpop.f32.mrf.mxu3  ;;  %v4712_v56 = vadd.f32 %v4711_v49, %v12692_v1  ;;  %5435 = vmatpush.bf16.msra.mxu1 %v9522_v7  ;;  %v15598_v49 = vld [vmem:[#allocation73_spill] sm:$0xff] }
 0x3cc   : > { %v4977_v5 = vadd.f32 %v4976_v19, %v4888_v13 }
 0x3cd   : > { %v4801_v59 = vadd.f32 %v4800_v18, %v4712_v56 }
 0x3ce   : > { %vm8303_vm2 = vcmp.ge.f32.partialorder %v4977_v5, 0.0  ;;  %v8432_v28 = vmul.f32 %v12742_v47, %v4977_v5 }
 0x3d0   : > { %v8560_v63 = vsel %vm8303_vm2, %v4977_v5, %v8432_v28  ;;  %v15602_v5 = vld [vmem:[#allocation78_spill] sm:$0xff] }
 0x3d1   : > { %8688 = vst [vmem:[%s12768_s27 + $0x380] sm:$0xff] %v8560_v63  ;;  %v4889_v19 = vpop.f32.mrf.mxu2 }
 0x3d2   : > { %v4714_v34 = vpop.f32.mrf.mxu0  ;;  %v4803_v54 = vpop.f32.mrf.mxu1  ;;  %v4890_v1 = vadd.f32 %v4889_v19, %v4801_v59  ;;  %v15603_v59 = vld [vmem:[#allocation184_spill] sm:$0xff] }
 0x3d3   : > { %v4978_v13 = vpop.f32.mrf.mxu3  ;;  %v4715_v55 = vadd.f32 %v4714_v34, %v15600_v52  ;;  %v10830_v34 = vld [vmem:[#allocation8] sm:$0xf] }
 0x3d4   : > { %v4979_v3 = vadd.f32 %v4978_v13, %v4890_v1  ;;  %v13119_v13 = vperm.slane %v10830_v34, 1 }
 0x3d5   : > { %5029 = vmatmul.bf16.gmra.mxu0 %v15598_v49  ;;  %5118 = vmatmul.bf16.gmra.mxu1 %v15599_v33  ;;  %v4804_v18 = vadd.f32 %v4803_v54, %v4715_v55  ;;  %v9503_v49 = vld [vmem:[#allocation6 + $0x550] sm:$0xf0] }
 0x3d6   : > { %vm8307_vm3 = vcmp.ge.f32.partialorder %v4979_v3, 0.0  ;;  %v8436_v16 = vmul.f32 %v12742_v47, %v4979_v3  ;;  %5207 = vmatmul.bf16.gmra.mxu2 %v15601_v41 }
 0x3d7   : > { %5296 = vmatmul.bf16.gmra.mxu3 %v15602_v5 }
 0x3d8   : > { %v8564_v56 = vsel %vm8307_vm3, %v4979_v3, %v8436_v16 }
 0x3d9   : > { %8692 = vst [vmem:[%s12768_s27 + $0x3a0] sm:$0xff] %v8564_v56  ;;  %v4892_v42 = vpop.f32.mrf.mxu2 }
 0x3da   : > { %v4716_v30 = vpop.f32.mrf.mxu0  ;;  %v4805_v43 = vpop.f32.mrf.mxu1  ;;  %v4893_v28 = vadd.f32 %v4892_v42, %v4804_v18  ;;  %v15604_v42 = vld [vmem:[#allocation83_spill] sm:$0xff] }
 0x3db   : > { %v4981_v7 = vpop.f32.mrf.mxu3  ;;  %v4717_v19 = vadd.f32 %v4716_v30, %v15603_v59  ;;  %v15605_v30 = vld [vmem:[#allocation84_spill] sm:$0xff]  ;;  %v10571_v59 = vld [vmem:[#allocation6 + $0x644] sm:$0xf] }
 0x3dc   : > { %v4982_v63 = vadd.f32 %v4981_v7, %v4893_v28 }
 0x3dd   : > { %v4806_v5 = vadd.f32 %v4805_v43, %v4717_v19  ;;  %v15607_v43 = vld [vmem:[#allocation88_spill] sm:$0xff]  ;;  %v9631_v19 = vld [vmem:[#allocation6 + $0x650] sm:$0xf0] }
 0x3de   : > { %vm8311_vm4 = vcmp.ge.f32.partialorder %v4982_v63, 0.0  ;;  %v8440_v1 = vmul.f32 %v12742_v47, %v4982_v63  ;;  %v9634_v34 = vor.u32 %v10571_v59, %v9631_v19  ;;  %v10539_v19 = vld [vmem:[#allocation6 + $0x544] sm:$0xf] }
 0x3e0   : > { %v8568_v52 = vsel %vm8311_vm4, %v4982_v63, %v8440_v1  ;;  %v15606_v63 = vld [vmem:[#allocation87_spill] sm:$0xff]  ;;  %v10507_v1 = vld [vmem:[#allocation6 + $0x444] sm:$0xf]  ;;  %5525 = vmatpush.bf16.msra.mxu2 %v9634_v34 }
 0x3e1   : > { %8696 = vst [vmem:[%s12768_s27 + $0x3c0] sm:$0xff] %v8568_v52  ;;  %v4894_v55 = vpop.f32.mrf.mxu2  ;;  %v9375_v52 = vld [vmem:[#allocation6 + $0x450] sm:$0xf0] }
 0x3e2   : > { %v4995_v3 = vpop.f32.mrf.mxu0  ;;  %v5084_v54 = vpop.f32.mrf.mxu1  ;;  %v4895_v41 = vadd.f32 %v4894_v55, %v4806_v5  ;;  %v10603_v5 = vld [vmem:[#allocation6 + $0x744] sm:$0xf]  ;;  %v15608_v34 = vld [vmem:[#allocation91_spill] sm:$0xff] }
 0x3e3   : > { %v4983_v16 = vpop.f32.mrf.mxu3  ;;  %v4996_v56 = vadd.f32 %v4995_v3, %v13119_v13 }
 0x3e4   : > { %v4984_v7 = vadd.f32 %v4983_v16, %v4895_v41 }
 0x3e5   : > { %v5085_v18 = vadd.f32 %v5084_v54, %v4996_v56  ;;  %5034 = vmatmul.bf16.gmra.mxu0 %v15604_v42  ;;  %5123 = vmatmul.bf16.gmra.mxu1 %v15605_v30  ;;  %v9378_v56 = vor.u32 %v10507_v1, %v9375_v52  ;;  %v9759_v30 = vld [vmem:[#allocation6 + $0x750] sm:$0xf0] }
 0x3e6   : > { %vm8315_vm5 = vcmp.ge.f32.partialorder %v4984_v7, 0.0  ;;  %v8444_v28 = vmul.f32 %v12742_v47, %v4984_v7  ;;  %5212 = vmatmul.bf16.gmra.mxu2 %v15606_v63  ;;  %v9762_v63 = vor.u32 %v10603_v5, %v9759_v30  ;;  %v15611_v30 = vld [vmem:[#allocation95_spill] sm:$0xff] }
 0x3e7   : > { %5301 = vmatmul.bf16.gmra.mxu3 %v15607_v43  ;;  %5347 = vmatpush.bf16.msra.mxu0 %v9378_v56 }
 0x3e8   : > { %v8572_v3 = vsel %vm8315_vm5, %v4984_v7, %v8444_v28  ;;  %5614 = vmatpush.bf16.msra.mxu3 %v9762_v63  ;;  %v9506_v7 = vor.u32 %v10539_v19, %v9503_v49 }
 0x3e9   : > { %8700 = vst [vmem:[%s12768_s27 + $0x3e0] sm:$0xff] %v8572_v3  ;;  %v5173_v41 = vpop.f32.mrf.mxu2 }
 0x3ea   : > { %v4997_v54 = vpop.f32.mrf.mxu0  ;;  %v5086_v55 = vpop.f32.mrf.mxu1  ;;  %v5174_v33 = vadd.f32 %v5173_v41, %v5085_v18  ;;  %5436 = vmatpush.bf16.msra.mxu1 %v9506_v7  ;;  %v15609_v18 = vld [vmem:[#allocation92_spill] sm:$0xff] }
 0x3eb   : > { %v5262_v16 = vpop.f32.mrf.mxu3  ;;  %v4998_v42 = vadd.f32 %v4997_v54, %v13119_v13 }
 0x3ec   : > { %v13131_v59 = vadd.f32 %v5262_v16, %v5174_v33  ;;  %v15610_v33 = vld [vmem:[#allocation94_spill] sm:$0xff] }
 0x3ed   : > { %v5087_v43 = vadd.f32 %v5086_v55, %v4998_v42 }
 0x3f1   : > { %v5175_v52 = vpop.f32.mrf.mxu2 }
 0x3f2   : > { %v5000_v28 = vpop.f32.mrf.mxu0  ;;  %v5089_v1 = vpop.f32.mrf.mxu1  ;;  %v5176_v37 = vadd.f32 %v5175_v52, %v5087_v43 }
 0x3f3   : > { %v5264_v3 = vpop.f32.mrf.mxu3  ;;  %v5001_v58 = vadd.f32 %v5000_v28, %v13119_v13 }
 0x3f4   : > { %v13136_v42 = vadd.f32 %v5264_v3, %v5176_v37  ;;  %v15612_v3 = vld [vmem:[#allocation102_spill] sm:$0xff] }
 0x3f5   : > { %v5090_v54 = vadd.f32 %v5089_v1, %v5001_v58  ;;  %5039 = vmatmul.bf16.gmra.mxu0 %v15608_v34  ;;  %5128 = vmatmul.bf16.gmra.mxu1 %v15609_v18  ;;  %v15614_v18 = vld [vmem:[#allocation106_spill] sm:$0xff]  ;;  %v9743_v34 = vld [vmem:[#allocation6 + $0x730] sm:$0xf0] }
 0x3f6   : > { %5217 = vmatmul.bf16.gmra.mxu2 %v15610_v33 }
 0x3f7   : > { %5306 = vmatmul.bf16.gmra.mxu3 %v15611_v30  ;;  %v15613_v30 = vld [vmem:[#allocation103_spill] sm:$0xff] }
 0x3f9   : > { %v5178_v5 = vpop.f32.mrf.mxu2 }
 0x3fa   : > { %v5002_v49 = vpop.f32.mrf.mxu0  ;;  %v5091_v63 = vpop.f32.mrf.mxu1  ;;  %v5179_v41 = vadd.f32 %v5178_v5, %v5090_v54  ;;  %v15615_v54 = vld [vmem:[#allocation107_spill] sm:$0xff]  ;;  %v10503_v5 = vld [vmem:[#allocation6 + $0x424] sm:$0xf] }
 0x3fb   : > { %v5267_v55 = vpop.f32.mrf.mxu3  ;;  %v5003_v56 = vadd.f32 %v5002_v49, %v13119_v13  ;;  %v10567_v49 = vld [vmem:[#allocation6 + $0x624] sm:$0xf] }
 0x3fc   : > { %v13141_v43 = vadd.f32 %v5267_v55, %v5179_v41  ;;  %v10599_v41 = vld [vmem:[#allocation6 + $0x724] sm:$0xf] }
 0x3fd   : > { %v5092_v16 = vadd.f32 %v5091_v63, %v5003_v56  ;;  %v9615_v63 = vld [vmem:[#allocation6 + $0x630] sm:$0xf0] }
 0x3fe   : > { %v9618_v55 = vor.u32 %v10567_v49, %v9615_v63  ;;  %v9359_v56 = vld [vmem:[#allocation6 + $0x430] sm:$0xf0] }
 0x3ff   : > { %v9487_v49 = vld [vmem:[#allocation6 + $0x530] sm:$0xf0] }
 0x400   : > { %5526 = vmatpush.bf16.msra.mxu2 %v9618_v55 }
 0x401   : > { %v5180_v7 = vpop.f32.mrf.mxu2 }
 0x402   : > { %v5005_v58 = vpop.f32.mrf.mxu0  ;;  %v5094_v19 = vpop.f32.mrf.mxu1  ;;  %v5181_v1 = vadd.f32 %v5180_v7, %v5092_v16  ;;  %v9746_v7 = vor.u32 %v10599_v41, %v9743_v34 }
 0x403   : > { %v5269_v28 = vpop.f32.mrf.mxu3  ;;  %v5006_v37 = vadd.f32 %v5005_v58, %v13119_v13 }
 0x404   : > { %v13146_v33 = vadd.f32 %v5269_v28, %v5181_v1  ;;  %5615 = vmatpush.bf16.msra.mxu3 %v9746_v7 }
 0x405   : > { %v5095_v52 = vadd.f32 %v5094_v19, %v5006_v37  ;;  %5044 = vmatmul.bf16.gmra.mxu0 %v15612_v3  ;;  %5133 = vmatmul.bf16.gmra.mxu1 %v15613_v30  ;;  %v9362_v19 = vor.u32 %v10503_v5, %v9359_v56  ;;  %v10535_v30 = vld [vmem:[#allocation6 + $0x524] sm:$0xf] }
 0x406   : > { %5222 = vmatmul.bf16.gmra.mxu2 %v15614_v18  ;;  %v9490_v63 = vor.u32 %v10535_v30, %v9487_v49 }
 0x407   : > { %5311 = vmatmul.bf16.gmra.mxu3 %v15615_v54  ;;  %5348 = vmatpush.bf16.msra.mxu0 %v9362_v19 }
 0x408   : > { %5437 = vmatpush.bf16.msra.mxu1 %v9490_v63 }
 0x409   : > { %v5183_v37 = vpop.f32.mrf.mxu2 }
 0x40a   : > { %v5007_v58 = vpop.f32.mrf.mxu0  ;;  %v5096_v16 = vpop.f32.mrf.mxu1  ;;  %v5184_v1 = vadd.f32 %v5183_v37, %v5095_v52  ;;  %v15617_v52 = vld [vmem:[#allocation111_spill] sm:$0xff] }
 0x40b   : > { %v5272_v3 = vpop.f32.mrf.mxu3  ;;  %v5008_v28 = vadd.f32 %v5007_v58, %v13119_v13  ;;  %v15616_v58 = vld [vmem:[#allocation110_spill] sm:$0xff] }
 0x40c   : > { %v13151_v18 = vadd.f32 %v5272_v3, %v5184_v1  ;;  %v15618_v3 = vld [vmem:[#allocation114_spill] sm:$0xff] }
 0x40d   : > { %v5097_v54 = vadd.f32 %v5096_v16, %v5008_v28  ;;  %v15619_v16 = vld [vmem:[#allocation115_spill] sm:$0xff] }
 0x411   : > { %v5185_v22 = vpop.f32.mrf.mxu2 }
 0x412   : > { %v5010_v21 = vpop.f32.mrf.mxu0  ;;  %v5099_v44 = vpop.f32.mrf.mxu1  ;;  %v5186_v56 = vadd.f32 %v5185_v22, %v5097_v54 }
 0x413   : > { %v5274_v5 = vpop.f32.mrf.mxu3  ;;  %v5011_v34 = vadd.f32 %v5010_v21, %v13119_v13 }
 0x414   : > { %v13156_v55 = vadd.f32 %v5274_v5, %v5186_v56 }
 0x415   : > { %v5100_v41 = vadd.f32 %v5099_v44, %v5011_v34  ;;  %5049 = vmatmul.bf16.gmra.mxu0 %v15616_v58  ;;  %5138 = vmatmul.bf16.gmra.mxu1 %v15617_v52  ;;  %v15622_v58 = vld [vmem:[#allocation125_spill] sm:$0xff] }
 0x416   : > { %5227 = vmatmul.bf16.gmra.mxu2 %v15618_v3  ;;  %v15620_v3 = vld [vmem:[#allocation122_spill] sm:$0xff] }
 0x417   : > { %5316 = vmatmul.bf16.gmra.mxu3 %v15619_v16  ;;  %v15621_v16 = vld [vmem:[#allocation123_spill] sm:$0xff] }
 0x419   : > { %v5188_v7 = vpop.f32.mrf.mxu2 }
 0x41a   : > { %v5012_v30 = vpop.f32.mrf.mxu0  ;;  %v5101_v19 = vpop.f32.mrf.mxu1  ;;  %v5189_v1 = vadd.f32 %v5188_v7, %v5100_v41  ;;  %v15623_v41 = vld [vmem:[#allocation126_spill] sm:$0xff]  ;;  %v10499_v7 = vld [vmem:[#allocation6 + $0x404] sm:$0xf] }
 0x41b   : > { %v5277_v37 = vpop.f32.mrf.mxu3  ;;  %v5013_v28 = vadd.f32 %v5012_v30, %v13119_v13  ;;  %v10563_v30 = vld [vmem:[#allocation6 + $0x604] sm:$0xf] }
 0x41c   : > { %v13161_v22 = vadd.f32 %v5277_v37, %v5189_v1  ;;  %v10595_v1 = vld [vmem:[#allocation6 + $0x704] sm:$0xf] }
 0x41d   : > { %v5102_v21 = vadd.f32 %v5101_v19, %v5013_v28  ;;  %v9599_v19 = vld [vmem:[#allocation6 + $0x610] sm:$0xf0] }
 0x41e   : > { %v9602_v37 = vor.u32 %v10563_v30, %v9599_v19  ;;  %v9343_v28 = vld [vmem:[#allocation6 + $0x410] sm:$0xf0] }
 0x41f   : > { %v9471_v30 = vld [vmem:[#allocation6 + $0x510] sm:$0xf0] }
 0x420   : > { %5527 = vmatpush.bf16.msra.mxu2 %v9602_v37 }
 0x421   : > { %v5190_v49 = vpop.f32.mrf.mxu2 }
 0x422   : > { %v5015_v44 = vpop.f32.mrf.mxu0  ;;  %v5104_v54 = vpop.f32.mrf.mxu1  ;;  %v5191_v34 = vadd.f32 %v5190_v49, %v5102_v21  ;;  %v9730_v49 = vor.u32 %v10595_v1, %v9727_v61 }
 0x423   : > { %v5279_v63 = vpop.f32.mrf.mxu3  ;;  %v5016_v5 = vadd.f32 %v5015_v44, %v13119_v13 }
 0x424   : > { %v13166_v52 = vadd.f32 %v5279_v63, %v5191_v34  ;;  %5616 = vmatpush.bf16.msra.mxu3 %v9730_v49 }
 0x425   : > { %v5105_v56 = vadd.f32 %v5104_v54, %v5016_v5  ;;  %5054 = vmatmul.bf16.gmra.mxu0 %v15620_v3  ;;  %5143 = vmatmul.bf16.gmra.mxu1 %v15621_v16  ;;  %v9346_v54 = vor.u32 %v10499_v7, %v9343_v28  ;;  %v10531_v16 = vld [vmem:[#allocation6 + $0x504] sm:$0xf] }
 0x426   : > { %5232 = vmatmul.bf16.gmra.mxu2 %v15622_v58  ;;  %v9474_v19 = vor.u32 %v10531_v16, %v9471_v30 }
 0x427   : > { %5321 = vmatmul.bf16.gmra.mxu3 %v15623_v41  ;;  %5349 = vmatpush.bf16.msra.mxu0 %v9346_v54 }
 0x428   : > { %5438 = vmatpush.bf16.msra.mxu1 %v9474_v19 }
 0x429   : > { %v5193_v5 = vpop.f32.mrf.mxu2 }
 0x42a   : > { %v5017_v44 = vpop.f32.mrf.mxu0  ;;  %v5106_v21 = vpop.f32.mrf.mxu1  ;;  %v5194_v34 = vadd.f32 %v5193_v5, %v5105_v56  ;;  %v15625_v56 = vld [vmem:[#allocation132_spill] sm:$0xff] }
 0x42b   : > { %v5282_v3 = vpop.f32.mrf.mxu3  ;;  %v5018_v63 = vadd.f32 %v5017_v44, %v13119_v13  ;;  %v15624_v44 = vld [vmem:[#allocation131_spill] sm:$0xff] }
 0x42c   : > { %v13171_v58 = vadd.f32 %v5282_v3, %v5194_v34  ;;  %v15626_v3 = vld [vmem:[#allocation133_spill] sm:$0xff] }
 0x42d   : > { %v5107_v41 = vadd.f32 %v5106_v21, %v5018_v63  ;;  %v15627_v21 = vld [vmem:[#allocation135_spill] sm:$0xff] }
 0x431   : > { %v5195_v62 = vpop.f32.mrf.mxu2 }
 0x432   : > { %v5020_v57 = vpop.f32.mrf.mxu0  ;;  %v5109_v35 = vpop.f32.mrf.mxu1  ;;  %v5196_v28 = vadd.f32 %v5195_v62, %v5107_v41 }
 0x433   : > { %v5284_v7 = vpop.f32.mrf.mxu3  ;;  %v5021_v61 = vadd.f32 %v5020_v57, %v13119_v13 }
 0x434   : > { %v13176_v37 = vadd.f32 %v5284_v7, %v5196_v28 }
 0x435   : > { %v5110_v1 = vadd.f32 %v5109_v35, %v5021_v61  ;;  %5059 = vmatmul.bf16.gmra.mxu0 %v15624_v44  ;;  %5148 = vmatmul.bf16.gmra.mxu1 %v15625_v56  ;;  %v15630_v44 = vld [vmem:[#allocation143_spill] sm:$0xff] }
 0x436   : > { %5237 = vmatmul.bf16.gmra.mxu2 %v15626_v3  ;;  %v15628_v3 = vld [vmem:[#allocation137_spill] sm:$0xff] }
 0x437   : > { %5326 = vmatmul.bf16.gmra.mxu3 %v15627_v21  ;;  %v15629_v21 = vld [vmem:[#allocation138_spill] sm:$0xff] }
 0x439   : > { %v5198_v49 = vpop.f32.mrf.mxu2 }
 0x43a   : > { %v5022_v16 = vpop.f32.mrf.mxu0  ;;  %v5111_v54 = vpop.f32.mrf.mxu1  ;;  %v5199_v34 = vadd.f32 %v5198_v49, %v5110_v1  ;;  %v15631_v1 = vld [vmem:[#allocation144_spill] sm:$0xff]  ;;  %v10655_v49 = vld [vmem:[#allocation6 + $0x8e4] sm:$0xf] }
 0x43b   : > { %v5287_v5 = vpop.f32.mrf.mxu3  ;;  %v5023_v63 = vadd.f32 %v5022_v16, %v13119_v13  ;;  %v10719_v16 = vld [vmem:[#allocation6 + $0xae4] sm:$0xf] }
 0x43c   : > { %v13181_v62 = vadd.f32 %v5287_v5, %v5199_v34  ;;  %v10751_v34 = vld [vmem:[#allocation6 + $0xbe4] sm:$0xf] }
 0x43d   : > { %v5112_v57 = vadd.f32 %v5111_v54, %v5023_v63  ;;  %v10223_v54 = vld [vmem:[#allocation6 + $0xaf0] sm:$0xf0] }
 0x43e   : > { %v10226_v5 = vor.u32 %v10719_v16, %v10223_v54  ;;  %v9967_v63 = vld [vmem:[#allocation6 + $0x8f0] sm:$0xf0] }
 0x43f   : > { %v10095_v16 = vld [vmem:[#allocation6 + $0x9f0] sm:$0xf0] }
 0x440   : > { %5876 = vmatpush.bf16.msrb.mxu2 %v10226_v5 }
 0x441   : > { %v5200_v30 = vpop.f32.mrf.mxu2 }
 0x442   : > { %v5025_v35 = vpop.f32.mrf.mxu0  ;;  %v5114_v41 = vpop.f32.mrf.mxu1  ;;  %v5201_v61 = vadd.f32 %v5200_v30, %v5112_v57  ;;  %v10354_v30 = vor.u32 %v10751_v34, %v10351_v23 }
 0x443   : > { %v5289_v19 = vpop.f32.mrf.mxu3  ;;  %v5026_v7 = vadd.f32 %v5025_v35, %v13119_v13 }
 0x444   : > { %v13186_v56 = vadd.f32 %v5289_v19, %v5201_v61  ;;  %5965 = vmatpush.bf16.msrb.mxu3 %v10354_v30 }
 0x445   : > { %v5115_v28 = vadd.f32 %v5114_v41, %v5026_v7  ;;  %5064 = vmatmul.bf16.gmra.mxu0 %v15628_v3  ;;  %5153 = vmatmul.bf16.gmra.mxu1 %v15629_v21  ;;  %v9970_v41 = vor.u32 %v10655_v49, %v9967_v63  ;;  %v10687_v21 = vld [vmem:[#allocation6 + $0x9e4] sm:$0xf] }
 0x446   : > { %5242 = vmatmul.bf16.gmra.mxu2 %v15630_v44  ;;  %v10098_v54 = vor.u32 %v10687_v21, %v10095_v16 }
 0x447   : > { %5331 = vmatmul.bf16.gmra.mxu3 %v15631_v1  ;;  %5698 = vmatpush.bf16.msrb.mxu0 %v9970_v41 }
 0x448   : > { %5787 = vmatpush.bf16.msrb.mxu1 %v10098_v54 }
 0x449   : > { %v5203_v7 = vpop.f32.mrf.mxu2 }
 0x44a   : > { %v5027_v35 = vpop.f32.mrf.mxu0  ;;  %v5116_v57 = vpop.f32.mrf.mxu1  ;;  %v5204_v61 = vadd.f32 %v5203_v7, %v5115_v28  ;;  %v15633_v28 = vld [vmem:[#allocation146_spill] sm:$0xff] }
 0x44b   : > { %v5292_v3 = vpop.f32.mrf.mxu3  ;;  %v5028_v19 = vadd.f32 %v5027_v35, %v13119_v13  ;;  %v15632_v35 = vld [vmem:[#allocation145_spill] sm:$0xff] }
 0x44c   : > { %v13191_v44 = vadd.f32 %v5292_v3, %v5204_v61  ;;  %v15634_v3 = vld [vmem:[#allocation147_spill] sm:$0xff] }
 0x44d   : > { %v5117_v1 = vadd.f32 %v5116_v57, %v5028_v19  ;;  %v15635_v57 = vld [vmem:[#allocation148_spill] sm:$0xff] }
 0x451   : > { %v5205_v24 = vpop.f32.mrf.mxu2 }
 0x452   : > { %v5030_v14 = vpop.f32.mrf.mxu0  ;;  %v5119_v11 = vpop.f32.mrf.mxu1  ;;  %v5206_v63 = vadd.f32 %v5205_v24, %v5117_v1 }
 0x453   : > { %v5294_v49 = vpop.f32.mrf.mxu3  ;;  %v5031_v23 = vadd.f32 %v5030_v14, %v13119_v13 }
 0x454   : > { %v13196_v5 = vadd.f32 %v5294_v49, %v5206_v63 }
 0x455   : > { %v5120_v34 = vadd.f32 %v5119_v11, %v5031_v23  ;;  %5069 = vmatmul.bf16.gmra.mxu0 %v15632_v35  ;;  %5158 = vmatmul.bf16.gmra.mxu1 %v15633_v28  ;;  %v15638_v35 = vld [vmem:[#allocation15_spill] sm:$0xff] }
 0x456   : > { %5247 = vmatmul.bf16.gmra.mxu2 %v15634_v3  ;;  %v15636_v3 = vld [vmem:[#allocation13_spill] sm:$0xff] }
 0x457   : > { %5336 = vmatmul.bf16.gmra.mxu3 %v15635_v57  ;;  %v15637_v57 = vld [vmem:[#allocation14_spill] sm:$0xff] }
 0x459   : > { %v5208_v30 = vpop.f32.mrf.mxu2 }
 0x45a   : > { %v5032_v21 = vpop.f32.mrf.mxu0  ;;  %v5121_v41 = vpop.f32.mrf.mxu1  ;;  %v5209_v61 = vadd.f32 %v5208_v30, %v5120_v34  ;;  %v15639_v34 = vld [vmem:[#allocation16_spill] sm:$0xff]  ;;  %v10651_v30 = vld [vmem:[#allocation6 + $0x8c4] sm:$0xf] }
 0x45b   : > { %v5297_v7 = vpop.f32.mrf.mxu3  ;;  %v5033_v19 = vadd.f32 %v5032_v21, %v13119_v13  ;;  %v10715_v21 = vld [vmem:[#allocation6 + $0xac4] sm:$0xf] }
 0x45c   : > { %v13201_v24 = vadd.f32 %v5297_v7, %v5209_v61  ;;  %v10747_v61 = vld [vmem:[#allocation6 + $0xbc4] sm:$0xf] }
 0x45d   : > { %v5122_v14 = vadd.f32 %v5121_v41, %v5033_v19  ;;  %v10207_v41 = vld [vmem:[#allocation6 + $0xad0] sm:$0xf0] }
 0x45e   : > { %v10210_v7 = vor.u32 %v10715_v21, %v10207_v41  ;;  %v9951_v19 = vld [vmem:[#allocation6 + $0x8d0] sm:$0xf0] }
 0x45f   : > { %v10079_v21 = vld [vmem:[#allocation6 + $0x9d0] sm:$0xf0] }
 0x460   : > { %5877 = vmatpush.bf16.msrb.mxu2 %v10210_v7 }
 0x461   : > { %v5210_v16 = vpop.f32.mrf.mxu2 }
 0x462   : > { %v5035_v11 = vpop.f32.mrf.mxu0  ;;  %v5124_v1 = vpop.f32.mrf.mxu1  ;;  %v5211_v23 = vadd.f32 %v5210_v16, %v5122_v14  ;;  %v10338_v16 = vor.u32 %v10747_v61, %v10335_v8 }
 0x463   : > { %v5299_v54 = vpop.f32.mrf.mxu3  ;;  %v5036_v49 = vadd.f32 %v5035_v11, %v13119_v13 }
 0x464   : > { %v13206_v28 = vadd.f32 %v5299_v54, %v5211_v23  ;;  %5966 = vmatpush.bf16.msrb.mxu3 %v10338_v16 }
 0x465   : > { %v5125_v63 = vadd.f32 %v5124_v1, %v5036_v49  ;;  %5350 = vmatmul.bf16.vlgmr.msra.gmra.mxu0 %v15636_v3  ;;  %5439 = vmatmul.bf16.vlgmr.msra.gmra.mxu1 %v15637_v57  ;;  %v9954_v1 = vor.u32 %v10651_v30, %v9951_v19  ;;  %v10683_v57 = vld [vmem:[#allocation6 + $0x9c4] sm:$0xf] }
 0x466   : > { %5528 = vmatmul.bf16.vlgmr.msra.gmra.mxu2 %v15638_v35  ;;  %v10082_v41 = vor.u32 %v10683_v57, %v10079_v21 }
 0x467   : > { %5617 = vmatmul.bf16.vlgmr.msra.gmra.mxu3 %v15639_v34  ;;  %5699 = vmatpush.bf16.msrb.mxu0 %v9954_v1 }
 0x468   : > { %5788 = vmatpush.bf16.msrb.mxu1 %v10082_v41 }
 0x469   : > { %v5213_v49 = vpop.f32.mrf.mxu2 }
 0x46a   : > { %v5037_v11 = vpop.f32.mrf.mxu0  ;;  %v5126_v14 = vpop.f32.mrf.mxu1  ;;  %v5214_v23 = vadd.f32 %v5213_v49, %v5125_v63  ;;  %v15641_v63 = vld [vmem:[#allocation20_spill] sm:$0xff] }
 0x46b   : > { %v5302_v3 = vpop.f32.mrf.mxu3  ;;  %v5038_v54 = vadd.f32 %v5037_v11, %v13119_v13  ;;  %v15640_v11 = vld [vmem:[#allocation19_spill] sm:$0xff] }
 0x46c   : > { %v13211_v35 = vadd.f32 %v5302_v3, %v5214_v23  ;;  %v15642_v3 = vld [vmem:[#allocation23_spill] sm:$0xff] }
 0x46d   : > { %v5127_v34 = vadd.f32 %v5126_v14, %v5038_v54  ;;  %v15643_v14 = vld [vmem:[#allocation24_spill] sm:$0xff] }
 0x471   : > { %v5215_v17 = vpop.f32.mrf.mxu2 }
 0x472   : > { %v5040_v2 = vpop.f32.mrf.mxu0  ;;  %v5129_v40 = vpop.f32.mrf.mxu1  ;;  %v5216_v19 = vadd.f32 %v5215_v17, %v5127_v34 }
 0x473   : > { %v5304_v30 = vpop.f32.mrf.mxu3  ;;  %v5041_v8 = vadd.f32 %v5040_v2, %v13119_v13 }
 0x474   : > { %v13216_v7 = vadd.f32 %v5304_v30, %v5216_v19 }
 0x475   : > { %v5130_v61 = vadd.f32 %v5129_v40, %v5041_v8  ;;  %5355 = vmatmul.bf16.gmra.mxu0 %v15640_v11  ;;  %5444 = vmatmul.bf16.gmra.mxu1 %v15641_v63  ;;  %v15646_v11 = vld [vmem:[#allocation30_spill] sm:$0xff] }
 0x476   : > { %5533 = vmatmul.bf16.gmra.mxu2 %v15642_v3  ;;  %v15644_v3 = vld [vmem:[#allocation25_spill] sm:$0xff] }
 0x477   : > { %5622 = vmatmul.bf16.gmra.mxu3 %v15643_v14  ;;  %v15645_v14 = vld [vmem:[#allocation26_spill] sm:$0xff] }
 0x479   : > { %v5218_v16 = vpop.f32.mrf.mxu2 }
 0x47a   : > { %v5042_v57 = vpop.f32.mrf.mxu0  ;;  %v5131_v1 = vpop.f32.mrf.mxu1  ;;  %v5219_v23 = vadd.f32 %v5218_v16, %v5130_v61  ;;  %v15647_v61 = vld [vmem:[#allocation32_spill] sm:$0xff]  ;;  %v10647_v16 = vld [vmem:[#allocation6 + $0x8a4] sm:$0xf] }
 0x47b   : > { %v5307_v49 = vpop.f32.mrf.mxu3  ;;  %v5043_v54 = vadd.f32 %v5042_v57, %v13119_v13  ;;  %v10711_v57 = vld [vmem:[#allocation6 + $0xaa4] sm:$0xf] }
 0x47c   : > { %v13221_v17 = vadd.f32 %v5307_v49, %v5219_v23  ;;  %v10743_v23 = vld [vmem:[#allocation6 + $0xba4] sm:$0xf] }
 0x47d   : > { %v5132_v2 = vadd.f32 %v5131_v1, %v5043_v54  ;;  %v10191_v1 = vld [vmem:[#allocation6 + $0xab0] sm:$0xf0] }
 0x47e   : > { %v10194_v49 = vor.u32 %v10711_v57, %v10191_v1  ;;  %v9935_v54 = vld [vmem:[#allocation6 + $0x8b0] sm:$0xf0] }
 0x47f   : > { %v10063_v57 = vld [vmem:[#allocation6 + $0x9b0] sm:$0xf0] }
 0x480   : > { %5878 = vmatpush.bf16.msrb.mxu2 %v10194_v49 }
 0x481   : > { %v5220_v21 = vpop.f32.mrf.mxu2 }
 0x482   : > { %v5045_v40 = vpop.f32.mrf.mxu0  ;;  %v5134_v34 = vpop.f32.mrf.mxu1  ;;  %v5221_v8 = vadd.f32 %v5220_v21, %v5132_v2  ;;  %v10322_v21 = vor.u32 %v10743_v23, %v10319_v0 }
 0x483   : > { %v5309_v41 = vpop.f32.mrf.mxu3  ;;  %v5046_v30 = vadd.f32 %v5045_v40, %v13119_v13 }
 0x484   : > { %v13226_v63 = vadd.f32 %v5309_v41, %v5221_v8  ;;  %5967 = vmatpush.bf16.msrb.mxu3 %v10322_v21 }
 0x485   : > { %v5135_v19 = vadd.f32 %v5134_v34, %v5046_v30  ;;  %5360 = vmatmul.bf16.gmra.mxu0 %v15644_v3  ;;  %5449 = vmatmul.bf16.gmra.mxu1 %v15645_v14  ;;  %v9938_v34 = vor.u32 %v10647_v16, %v9935_v54  ;;  %v10679_v14 = vld [vmem:[#allocation6 + $0x9a4] sm:$0xf] }
 0x486   : > { %5538 = vmatmul.bf16.gmra.mxu2 %v15646_v11  ;;  %v10066_v1 = vor.u32 %v10679_v14, %v10063_v57 }
 0x487   : > { %5627 = vmatmul.bf16.gmra.mxu3 %v15647_v61  ;;  %5700 = vmatpush.bf16.msrb.mxu0 %v9938_v34 }
 0x488   : > { %5789 = vmatpush.bf16.msrb.mxu1 %v10066_v1 }
 0x489   : > { %v5223_v30 = vpop.f32.mrf.mxu2 }
 0x48a   : > { %v5047_v40 = vpop.f32.mrf.mxu0  ;;  %v5136_v2 = vpop.f32.mrf.mxu1  ;;  %v5224_v8 = vadd.f32 %v5223_v30, %v5135_v19  ;;  %v15650_v19 = vld [vmem:[#allocation36_spill] sm:$0xff] }
 0x48b   : > { %v5312_v3 = vpop.f32.mrf.mxu3  ;;  %v5048_v41 = vadd.f32 %v5047_v40, %v13119_v13  ;;  %v15649_v40 = vld [vmem:[#allocation35_spill] sm:$0xff] }
 0x48c   : > { %v13231_v11 = vadd.f32 %v5312_v3, %v5224_v8  ;;  %v15652_v3 = vld [vmem:[#allocation37_spill] sm:$0xff] }
 0x48d   : > { %v5137_v61 = vadd.f32 %v5136_v2, %v5048_v41  ;;  %v15653_v2 = vld [vmem:[#allocation40_spill] sm:$0xff] }
 0x48e   : > { %15648 = vst [vmem:[#allocation89_spill] sm:$0xff] %v13231_v11 }
 0x491   : > { %v5225_v47 = vpop.f32.mrf.mxu2 }
 0x492   : > { %v5050_v31 = vpop.f32.mrf.mxu0  ;;  %v5139_v53 = vpop.f32.mrf.mxu1  ;;  %v5226_v54 = vadd.f32 %v5225_v47, %v5137_v61 }
 0x493   : > { %v5314_v16 = vpop.f32.mrf.mxu3  ;;  %v5051_v0 = vadd.f32 %v5050_v31, %v13119_v13 }
 0x494   : > { %v13236_v49 = vadd.f32 %v5314_v16, %v5226_v54 }
 0x495   : > { %v5140_v23 = vadd.f32 %v5139_v53, %v5051_v0  ;;  %5365 = vmatmul.bf16.gmra.mxu0 %v15649_v40  ;;  %5454 = vmatmul.bf16.gmra.mxu1 %v15650_v19  ;;  %v15658_v40 = vld [vmem:[#allocation47_spill] sm:$0xff] }
 0x496   : > { %15651 = vst [vmem:[#allocation184_spill] sm:$0xff] %v13236_v49  ;;  %5543 = vmatmul.bf16.gmra.mxu2 %v15652_v3  ;;  %v15655_v3 = vld [vmem:[#allocation43_spill] sm:$0xff] }
 0x497   : > { %5632 = vmatmul.bf16.gmra.mxu3 %v15653_v2  ;;  %v15656_v2 = vld [vmem:[#allocation44_spill] sm:$0xff] }
 0x499   : > { %v5228_v21 = vpop.f32.mrf.mxu2 }
 0x49a   : > { %v5052_v14 = vpop.f32.mrf.mxu0  ;;  %v5141_v34 = vpop.f32.mrf.mxu1  ;;  %v5229_v8 = vadd.f32 %v5228_v21, %v5140_v23  ;;  %v15659_v23 = vld [vmem:[#allocation48_spill] sm:$0xff]  ;;  %v10643_v21 = vld [vmem:[#allocation6 + $0x884] sm:$0xf] }
 0x49b   : > { %v5317_v30 = vpop.f32.mrf.mxu3  ;;  %v5053_v41 = vadd.f32 %v5052_v14, %v13119_v13  ;;  %v10707_v14 = vld [vmem:[#allocation6 + $0xa84] sm:$0xf] }
 0x49c   : > { %v13241_v47 = vadd.f32 %v5317_v30, %v5229_v8  ;;  %v10739_v8 = vld [vmem:[#allocation6 + $0xb84] sm:$0xf] }
 0x49d   : > { %v5142_v31 = vadd.f32 %v5141_v34, %v5053_v41  ;;  %v10175_v34 = vld [vmem:[#allocation6 + $0xa90] sm:$0xf0] }
 0x49e   : > { %15654 = vst [vmem:[#allocation200_spill] sm:$0xff] %v13241_v47  ;;  %v10178_v30 = vor.u32 %v10707_v14, %v10175_v34  ;;  %v9919_v41 = vld [vmem:[#allocation6 + $0x890] sm:$0xf0] }
 0x49f   : > { %v10303_v47 = vld [vmem:[#allocation6 + $0xb90] sm:$0xf0] }
 0x4a0   : > { %5879 = vmatpush.bf16.msrb.mxu2 %v10178_v30  ;;  %v10047_v14 = vld [vmem:[#allocation6 + $0x990] sm:$0xf0] }
 0x4a1   : > { %v5230_v57 = vpop.f32.mrf.mxu2 }
 0x4a2   : > { %v5055_v53 = vpop.f32.mrf.mxu0  ;;  %v5144_v61 = vpop.f32.mrf.mxu1  ;;  %v5231_v0 = vadd.f32 %v5230_v57, %v5142_v31  ;;  %v10306_v57 = vor.u32 %v10739_v8, %v10303_v47 }
 0x4a3   : > { %v5319_v1 = vpop.f32.mrf.mxu3  ;;  %v5056_v16 = vadd.f32 %v5055_v53, %v13119_v13 }
 0x4a4   : > { %v13246_v19 = vadd.f32 %v5319_v1, %v5231_v0  ;;  %5968 = vmatpush.bf16.msrb.mxu3 %v10306_v57 }
 0x4a5   : > { %v5145_v54 = vadd.f32 %v5144_v61, %v5056_v16  ;;  %5370 = vmatmul.bf16.gmra.mxu0 %v15655_v3  ;;  %5459 = vmatmul.bf16.gmra.mxu1 %v15656_v2  ;;  %v9922_v61 = vor.u32 %v10643_v21, %v9919_v41  ;;  %v10675_v2 = vld [vmem:[#allocation6 + $0x984] sm:$0xf] }
 0x4a6   : > { %15657 = vst [vmem:[#allocation201_spill] sm:$0xff] %v13246_v19  ;;  %5548 = vmatmul.bf16.gmra.mxu2 %v15658_v40  ;;  %v10050_v34 = vor.u32 %v10675_v2, %v10047_v14 }
 0x4a7   : > { %5637 = vmatmul.bf16.gmra.mxu3 %v15659_v23  ;;  %5701 = vmatpush.bf16.msrb.mxu0 %v9922_v61 }
 0x4a8   : > { %5790 = vmatpush.bf16.msrb.mxu1 %v10050_v34 }
 0x4a9   : > { %v5233_v16 = vpop.f32.mrf.mxu2 }
 0x4aa   : > { %v5057_v53 = vpop.f32.mrf.mxu0  ;;  %v5146_v31 = vpop.f32.mrf.mxu1  ;;  %v5234_v0 = vadd.f32 %v5233_v16, %v5145_v54  ;;  %v15662_v54 = vld [vmem:[#allocation50_spill] sm:$0xff] }
 0x4ab   : > { %v5322_v3 = vpop.f32.mrf.mxu3  ;;  %v5058_v1 = vadd.f32 %v5057_v53, %v13119_v13  ;;  %v15661_v53 = vld [vmem:[#allocation49_spill] sm:$0xff] }
 0x4ac   : > { %v13251_v40 = vadd.f32 %v5322_v3, %v5234_v0  ;;  %v15664_v3 = vld [vmem:[#allocation53_spill] sm:$0xff] }
 0x4ad   : > { %v5147_v23 = vadd.f32 %v5146_v31, %v5058_v1  ;;  %v15665_v31 = vld [vmem:[#allocation54_spill] sm:$0xff] }
 0x4ae   : > { %15660 = vst [vmem:[#allocation202_spill] sm:$0xff] %v13251_v40 }
 0x4b1   : > { %v5235_v11 = vpop.f32.mrf.mxu2 }
 0x4b2   : > { %v5060_v19 = vpop.f32.mrf.mxu0  ;;  %v5149_v49 = vpop.f32.mrf.mxu1  ;;  %v5236_v41 = vadd.f32 %v5235_v11, %v5147_v23 }
 0x4b3   : > { %v5324_v21 = vpop.f32.mrf.mxu3  ;;  %v5061_v47 = vadd.f32 %v5060_v19, %v13119_v13 }
 0x4b4   : > { %v13256_v30 = vadd.f32 %v5324_v21, %v5236_v41 }
 0x4b5   : > { %v5150_v8 = vadd.f32 %v5149_v49, %v5061_v47  ;;  %5375 = vmatmul.bf16.gmra.mxu0 %v15661_v53  ;;  %5464 = vmatmul.bf16.gmra.mxu1 %v15662_v54  ;;  %v15670_v53 = vld [vmem:[#allocation63_spill] sm:$0xff] }
 0x4b6   : > { %15663 = vst [vmem:[#allocation203_spill] sm:$0xff] %v13256_v30  ;;  %5553 = vmatmul.bf16.gmra.mxu2 %v15664_v3  ;;  %v15667_v3 = vld [vmem:[#allocation59_spill] sm:$0xff] }
 0x4b7   : > { %5642 = vmatmul.bf16.gmra.mxu3 %v15665_v31  ;;  %v15668_v31 = vld [vmem:[#allocation60_spill] sm:$0xff] }
 0x4b9   : > { %v5238_v57 = vpop.f32.mrf.mxu2 }
 0x4ba   : > { %v5062_v2 = vpop.f32.mrf.mxu0  ;;  %v5151_v61 = vpop.f32.mrf.mxu1  ;;  %v5239_v0 = vadd.f32 %v5238_v57, %v5150_v8  ;;  %v15671_v8 = vld [vmem:[#allocation64_spill] sm:$0xff]  ;;  %v10639_v57 = vld [vmem:[#allocation6 + $0x864] sm:$0xf] }
 0x4bb   : > { %v5327_v16 = vpop.f32.mrf.mxu3  ;;  %v5063_v1 = vadd.f32 %v5062_v2, %v13119_v13  ;;  %v10703_v2 = vld [vmem:[#allocation6 + $0xa64] sm:$0xf] }
 0x4bc   : > { %v13261_v11 = vadd.f32 %v5327_v16, %v5239_v0  ;;  %v10735_v0 = vld [vmem:[#allocation6 + $0xb64] sm:$0xf] }
 0x4bd   : > { %v5152_v19 = vadd.f32 %v5151_v61, %v5063_v1  ;;  %v10159_v61 = vld [vmem:[#allocation6 + $0xa70] sm:$0xf0] }
 0x4be   : > { %15666 = vst [vmem:[#allocation204_spill] sm:$0xff] %v13261_v11  ;;  %v10162_v16 = vor.u32 %v10703_v2, %v10159_v61  ;;  %v9903_v1 = vld [vmem:[#allocation6 + $0x870] sm:$0xf0] }
 0x4bf   : > { %v10287_v11 = vld [vmem:[#allocation6 + $0xb70] sm:$0xf0] }
 0x4c0   : > { %5880 = vmatpush.bf16.msrb.mxu2 %v10162_v16  ;;  %v10031_v2 = vld [vmem:[#allocation6 + $0x970] sm:$0xf0] }
 0x4c1   : > { %v5240_v14 = vpop.f32.mrf.mxu2 }
 0x4c2   : > { %v5065_v49 = vpop.f32.mrf.mxu0  ;;  %v5154_v23 = vpop.f32.mrf.mxu1  ;;  %v5241_v47 = vadd.f32 %v5240_v14, %v5152_v19  ;;  %v10290_v14 = vor.u32 %v10735_v0, %v10287_v11 }
 0x4c3   : > { %v5329_v34 = vpop.f32.mrf.mxu3  ;;  %v5066_v21 = vadd.f32 %v5065_v49, %v13119_v13 }
 0x4c4   : > { %v13266_v54 = vadd.f32 %v5329_v34, %v5241_v47  ;;  %5969 = vmatpush.bf16.msrb.mxu3 %v10290_v14 }
 0x4c5   : > { %v5155_v41 = vadd.f32 %v5154_v23, %v5066_v21  ;;  %5380 = vmatmul.bf16.gmra.mxu0 %v15667_v3  ;;  %5469 = vmatmul.bf16.gmra.mxu1 %v15668_v31  ;;  %v9906_v23 = vor.u32 %v10639_v57, %v9903_v1  ;;  %v10671_v31 = vld [vmem:[#allocation6 + $0x964] sm:$0xf] }
 0x4c6   : > { %15669 = vst [vmem:[#allocation205_spill] sm:$0xff] %v13266_v54  ;;  %5558 = vmatmul.bf16.gmra.mxu2 %v15670_v53  ;;  %v10034_v61 = vor.u32 %v10671_v31, %v10031_v2 }
 0x4c7   : > { %5647 = vmatmul.bf16.gmra.mxu3 %v15671_v8  ;;  %5702 = vmatpush.bf16.msrb.mxu0 %v9906_v23 }
 0x4c8   : > { %5791 = vmatpush.bf16.msrb.mxu1 %v10034_v61 }
 0x4c9   : > { %v5243_v21 = vpop.f32.mrf.mxu2 }
 0x4ca   : > { %v5067_v49 = vpop.f32.mrf.mxu0  ;;  %v5156_v19 = vpop.f32.mrf.mxu1  ;;  %v5244_v47 = vadd.f32 %v5243_v21, %v5155_v41  ;;  %v15673_v41 = vld [vmem:[#allocation66_spill] sm:$0xff] }
 0x4cb   : > { %v5332_v3 = vpop.f32.mrf.mxu3  ;;  %v5068_v34 = vadd.f32 %v5067_v49, %v13119_v13  ;;  %v15672_v49 = vld [vmem:[#allocation65_spill] sm:$0xff] }
 0x4cc   : > { %v13271_v53 = vadd.f32 %v5332_v3, %v5244_v47  ;;  %v15674_v3 = vld [vmem:[#allocation69_spill] sm:$0xff] }
 0x4cd   : > { %v5157_v8 = vadd.f32 %v5156_v19, %v5068_v34  ;;  %v15675_v19 = vld [vmem:[#allocation70_spill] sm:$0xff] }
 0x4d1   : > { %v5245_v40 = vpop.f32.mrf.mxu2 }
 0x4d2   : > { %v5070_v54 = vpop.f32.mrf.mxu0  ;;  %v5159_v30 = vpop.f32.mrf.mxu1  ;;  %v5246_v1 = vadd.f32 %v5245_v40, %v5157_v8 }
 0x4d3   : > { %v5334_v57 = vpop.f32.mrf.mxu3  ;;  %v5071_v11 = vadd.f32 %v5070_v54, %v13119_v13 }
 0x4d4   : > { %v13276_v16 = vadd.f32 %v5334_v57, %v5246_v1 }
 0x4d5   : > { %v5160_v0 = vadd.f32 %v5159_v30, %v5071_v11  ;;  %5385 = vmatmul.bf16.gmra.mxu0 %v15672_v49  ;;  %5474 = vmatmul.bf16.gmra.mxu1 %v15673_v41  ;;  %v15680_v49 = vld [vmem:[#allocation79_spill] sm:$0xff] }
 0x4d6   : > { %5563 = vmatmul.bf16.gmra.mxu2 %v15674_v3  ;;  %v15677_v3 = vld [vmem:[#allocation75_spill] sm:$0xff] }
 0x4d7   : > { %5652 = vmatmul.bf16.gmra.mxu3 %v15675_v19  ;;  %v15678_v19 = vld [vmem:[#allocation76_spill] sm:$0xff] }
 0x4d9   : > { %v5248_v14 = vpop.f32.mrf.mxu2 }
 0x4da   : > { %v5072_v31 = vpop.f32.mrf.mxu0  ;;  %v5161_v23 = vpop.f32.mrf.mxu1  ;;  %v5249_v47 = vadd.f32 %v5248_v14, %v5160_v0  ;;  %v10699_v0 = vld [vmem:[#allocation6 + $0xa44] sm:$0xf] }
 0x4db   : > { %v5337_v21 = vpop.f32.mrf.mxu3  ;;  %v5073_v34 = vadd.f32 %v5072_v31, %v13119_v13  ;;  %v15681_v13 = vld [vmem:[#allocation80_spill] sm:$0xff]  ;;  %v10143_v31 = vld [vmem:[#allocation6 + $0xa50] sm:$0xf0] }
 0x4dc   : > { %v13281_v40 = vadd.f32 %v5337_v21, %v5249_v47  ;;  %v10146_v14 = vor.u32 %v10699_v0, %v10143_v31  ;;  %v9887_v21 = vld [vmem:[#allocation6 + $0x850] sm:$0xf0] }
 0x4dd   : > { %v5162_v54 = vadd.f32 %v5161_v23, %v5073_v34  ;;  %v10635_v23 = vld [vmem:[#allocation6 + $0x844] sm:$0xf]  ;;  %v10271_v47 = vld [vmem:[#allocation6 + $0xb50] sm:$0xf0] }
 0x4de   : > { %15676 = vst [vmem:[#allocation206_spill] sm:$0xff] %v13281_v40  ;;  %v10731_v34 = vld [vmem:[#allocation6 + $0xb44] sm:$0xf]  ;;  %5881 = vmatpush.bf16.msrb.mxu2 %v10146_v14  ;;  %v10015_v0 = vld [vmem:[#allocation6 + $0x950] sm:$0xf0] }
 0x4e1   : > { %v5250_v2 = vpop.f32.mrf.mxu2 }
 0x4e2   : > { %v5351_v30 = vpop.f32.mrf.mxu0  ;;  %v5440_v8 = vpop.f32.mrf.mxu1  ;;  %v5251_v11 = vadd.f32 %v5250_v2, %v5162_v54 }
 0x4e3   : > { %v5339_v61 = vpop.f32.mrf.mxu3  ;;  %v5352_v57 = vadd.f32 %v5351_v30, %v13131_v59  ;;  %v9890_v30 = vor.u32 %v10635_v23, %v9887_v21 }
 0x4e4   : > { %v13286_v41 = vadd.f32 %v5339_v61, %v5251_v11 }
 0x4e5   : > { %v5441_v1 = vadd.f32 %v5440_v8, %v5352_v57  ;;  %5390 = vmatmul.bf16.gmra.mxu0 %v15677_v3  ;;  %5479 = vmatmul.bf16.gmra.mxu1 %v15678_v19  ;;  %v10274_v8 = vor.u32 %v10731_v34, %v10271_v47  ;;  %v10667_v19 = vld [vmem:[#allocation6 + $0x944] sm:$0xf] }
 0x4e6   : > { %15679 = vst [vmem:[#allocation207_spill] sm:$0xff] %v13286_v41  ;;  %5568 = vmatmul.bf16.gmra.mxu2 %v15680_v49  ;;  %5703 = vmatpush.bf16.msrb.mxu0 %v9890_v30  ;;  %v10018_v31 = vor.u32 %v10667_v19, %v10015_v0  ;;  %v15683_v0 = vld [vmem:[#allocation90_spill] sm:$0xff] }
 0x4e7   : > { %5657 = vmatmul.bf16.gmra.mxu3 %v15681_v13 }
 0x4e8   : > { %5970 = vmatpush.bf16.msrb.mxu3 %v10274_v8  ;;  %5792 = vmatpush.bf16.msrb.mxu1 %v10018_v31  ;;  %v15684_v31 = vld [vmem:[#allocation93_spill] sm:$0xff] }
 0x4e9   : > { %v5529_v2 = vpop.f32.mrf.mxu2 }
 0x4ea   : > { %v5353_v59 = vpop.f32.mrf.mxu0  ;;  %v5442_v54 = vpop.f32.mrf.mxu1  ;;  %v5530_v11 = vadd.f32 %v5529_v2, %v5441_v1  ;;  %v15682_v1 = vld [vmem:[#allocation86_spill] sm:$0xff] }
 0x4eb   : > { %v5618_v57 = vpop.f32.mrf.mxu3  ;;  %v5354_v61 = vadd.f32 %v5353_v59, %v13136_v42 }
 0x4ec   : > { %v13291_v49 = vadd.f32 %v5618_v57, %v5530_v11 }
 0x4ed   : > { %v5443_v13 = vadd.f32 %v5442_v54, %v5354_v61 }
 0x4f1   : > { %v5531_v40 = vpop.f32.mrf.mxu2 }
 0x4f2   : > { %v5356_v3 = vpop.f32.mrf.mxu0  ;;  %v5445_v41 = vpop.f32.mrf.mxu1  ;;  %v5532_v34 = vadd.f32 %v5531_v40, %v5443_v13 }
 0x4f3   : > { %v5620_v23 = vpop.f32.mrf.mxu3  ;;  %v5357_v21 = vadd.f32 %v5356_v3, %v13141_v43 }
 0x4f4   : > { %v13296_v42 = vadd.f32 %v5620_v23, %v5532_v34  ;;  %v10695_v34 = vld [vmem:[#allocation6 + $0xa24] sm:$0xf] }
 0x4f5   : > { %v5446_v47 = vadd.f32 %v5445_v41, %v5357_v21  ;;  %5395 = vmatmul.bf16.gmra.mxu0 %v15461_v36  ;;  %5484 = vmatmul.bf16.gmra.mxu1 %v15463_v38  ;;  %v15685_v21 = vld [vmem:[#allocation96_spill] sm:$0xff] }
 0x4f6   : > { %5573 = vmatmul.bf16.gmra.mxu2 %v15466_v10 }
 0x4f7   : > { %5662 = vmatmul.bf16.gmra.mxu3 %v15682_v1 }
 0x4f9   : > { %v5534_v59 = vpop.f32.mrf.mxu2 }
 0x4fa   : > { %v5358_v19 = vpop.f32.mrf.mxu0  ;;  %v5447_v14 = vpop.f32.mrf.mxu1  ;;  %v5535_v8 = vadd.f32 %v5534_v59, %v5446_v47  ;;  %v10127_v47 = vld [vmem:[#allocation6 + $0xa30] sm:$0xf0] }
 0x4fb   : > { %v5623_v54 = vpop.f32.mrf.mxu3  ;;  %v5359_v30 = vadd.f32 %v5358_v19, %v13146_v33  ;;  %v15686_v33 = vld [vmem:[#allocation97_spill] sm:$0xff]  ;;  %v9871_v59 = vld [vmem:[#allocation6 + $0x830] sm:$0xf0] }
 0x4fc   : > { %v13301_v3 = vadd.f32 %v5623_v54, %v5535_v8  ;;  %v10631_v19 = vld [vmem:[#allocation6 + $0x824] sm:$0xf] }
 0x4fd   : > { %v5448_v43 = vadd.f32 %v5447_v14, %v5359_v30  ;;  %v10130_v14 = vor.u32 %v10695_v34, %v10127_v47  ;;  %v10727_v54 = vld [vmem:[#allocation6 + $0xb24] sm:$0xf]  ;;  %v10255_v30 = vld [vmem:[#allocation6 + $0xb30] sm:$0xf0] }
 0x4fe   : > { %v9999_v34 = vld [vmem:[#allocation6 + $0x930] sm:$0xf0] }
 0x4ff   : > { %5882 = vmatpush.bf16.msrb.mxu2 %v10130_v14 }
 0x501   : > { %v5536_v13 = vpop.f32.mrf.mxu2 }
 0x502   : > { %v5361_v41 = vpop.f32.mrf.mxu0  ;;  %v5450_v40 = vpop.f32.mrf.mxu1  ;;  %v5537_v61 = vadd.f32 %v5536_v13, %v5448_v43  ;;  %v9874_v43 = vor.u32 %v10631_v19, %v9871_v59 }
 0x503   : > { %v5625_v2 = vpop.f32.mrf.mxu3  ;;  %v5362_v57 = vadd.f32 %v5361_v41, %v13151_v18  ;;  %v10258_v41 = vor.u32 %v10727_v54, %v10255_v30 }
 0x504   : > { %v13306_v23 = vadd.f32 %v5625_v2, %v5537_v61  ;;  %5704 = vmatpush.bf16.msrb.mxu0 %v9874_v43 }
 0x505   : > { %v5451_v11 = vadd.f32 %v5450_v40, %v5362_v57  ;;  %5400 = vmatmul.bf16.gmra.mxu0 %v15683_v0  ;;  %5489 = vmatmul.bf16.gmra.mxu1 %v15684_v31 }
 0x506   : > { %5578 = vmatmul.bf16.gmra.mxu2 %v15685_v21  ;;  %5971 = vmatpush.bf16.msrb.mxu3 %v10258_v41  ;;  %v10663_v21 = vld [vmem:[#allocation6 + $0x924] sm:$0xf] }
 0x507   : > { %5667 = vmatmul.bf16.gmra.mxu3 %v15686_v33  ;;  %v10002_v47 = vor.u32 %v10663_v21, %v9999_v34 }
 0x509   : > { %v5539_v40 = vpop.f32.mrf.mxu2  ;;  %5793 = vmatpush.bf16.msrb.mxu1 %v10002_v47  ;;  %v10691_v47 = vld [vmem:[#allocation6 + $0xa04] sm:$0xf] }
 0x50a   : > { %v5363_v18 = vpop.f32.mrf.mxu0  ;;  %v5452_v8 = vpop.f32.mrf.mxu1  ;;  %v5540_v57 = vadd.f32 %v5539_v40, %v5451_v11  ;;  %v15687_v11 = vld [vmem:[#allocation105_spill] sm:$0xff] }
 0x50b   : > { %v5628_v13 = vpop.f32.mrf.mxu3  ;;  %v5364_v2 = vadd.f32 %v5363_v18, %v13156_v55 }
 0x50c   : > { %v13311_v33 = vadd.f32 %v5628_v13, %v5540_v57 }
 0x50d   : > { %v5453_v61 = vadd.f32 %v5452_v8, %v5364_v2 }
 0x511   : > { %v5541_v1 = vpop.f32.mrf.mxu2 }
 0x512   : > { %v5366_v31 = vpop.f32.mrf.mxu0  ;;  %v5455_v0 = vpop.f32.mrf.mxu1  ;;  %v5542_v54 = vadd.f32 %v5541_v1, %v5453_v61 }
 0x513   : > { %v5630_v19 = vpop.f32.mrf.mxu3  ;;  %v5367_v59 = vadd.f32 %v5366_v31, %v13161_v22 }
 0x514   : > { %v13316_v55 = vadd.f32 %v5630_v19, %v5542_v54  ;;  %v10111_v19 = vld [vmem:[#allocation6 + $0xa10] sm:$0xf0] }
 0x515   : > { %v5456_v30 = vadd.f32 %v5455_v0, %v5367_v59  ;;  %5405 = vmatmul.bf16.gmra.mxu0 %v15303_v29  ;;  %5494 = vmatmul.bf16.gmra.mxu1 %v15304_v60  ;;  %v10627_v59 = vld [vmem:[#allocation6 + $0x804] sm:$0xf]  ;;  %v10114_v54 = vor.u32 %v10691_v47, %v10111_v19 }
 0x516   : > { %5583 = vmatmul.bf16.gmra.mxu2 %v15500_v26 }
 0x517   : > { %5672 = vmatmul.bf16.gmra.mxu3 %v15687_v11  ;;  %5883 = vmatpush.bf16.msrb.mxu2 %v10114_v54 }
 0x519   : > { %v5544_v18 = vpop.f32.mrf.mxu2 }
 0x51a   : > { %v5368_v21 = vpop.f32.mrf.mxu0  ;;  %v5457_v14 = vpop.f32.mrf.mxu1  ;;  %v5545_v41 = vadd.f32 %v5544_v18, %v5456_v30  ;;  %v9855_v30 = vld [vmem:[#allocation6 + $0x810] sm:$0xf0] }
 0x51b   : > { %v5633_v8 = vpop.f32.mrf.mxu3  ;;  %v5369_v43 = vadd.f32 %v5368_v21, %v13166_v52  ;;  %v15688_v52 = vld [vmem:[#allocation117_spill] sm:$0xff] }
 0x51c   : > { %v13321_v1 = vadd.f32 %v5633_v8, %v5545_v41  ;;  %v10723_v21 = vld [vmem:[#allocation6 + $0xb04] sm:$0xf]  ;;  %v9858_v8 = vor.u32 %v10627_v59, %v9855_v30 }
 0x51d   : > { %v5458_v22 = vadd.f32 %v5457_v14, %v5369_v43  ;;  %v10239_v14 = vld [vmem:[#allocation6 + $0xb10] sm:$0xf0] }
 0x51e   : > { %v10242_v43 = vor.u32 %v10723_v21, %v10239_v14  ;;  %5705 = vmatpush.bf16.msrb.mxu0 %v9858_v8 }
 0x520   : > { %5972 = vmatpush.bf16.msrb.mxu3 %v10242_v43 }
 0x521   : > { %v5546_v40 = vpop.f32.mrf.mxu2 }
 0x522   : > { %v5371_v0 = vpop.f32.mrf.mxu0  ;;  %v5460_v31 = vpop.f32.mrf.mxu1  ;;  %v5547_v57 = vadd.f32 %v5546_v40, %v5458_v22 }
 0x523   : > { %v5635_v13 = vpop.f32.mrf.mxu3  ;;  %v5372_v2 = vadd.f32 %v5371_v0, %v13171_v58 }
 0x524   : > { %v13326_v34 = vadd.f32 %v5635_v13, %v5547_v57  ;;  %v9983_v57 = vld [vmem:[#allocation6 + $0x910] sm:$0xf0] }
 0x525   : > { %v5461_v61 = vadd.f32 %v5460_v31, %v5372_v2  ;;  %5410 = vmatmul.bf16.gmra.mxu0 %v15513_v51  ;;  %5499 = vmatmul.bf16.gmra.mxu1 %v15515_v12  ;;  %v10659_v2 = vld [vmem:[#allocation6 + $0x904] sm:$0xf] }
 0x526   : > { %5588 = vmatmul.bf16.gmra.mxu2 %v15517_v45  ;;  %v9986_v47 = vor.u32 %v10659_v2, %v9983_v57 }
 0x527   : > { %5677 = vmatmul.bf16.gmra.mxu3 %v15688_v52 }
 0x528   : > { %5794 = vmatpush.bf16.msrb.mxu1 %v9986_v47  ;;  %v10466_v47 = vld [vmem:[#allocation6 + $0x2f4] sm:$0xf0] }
 0x529   : > { %v5549_v41 = vpop.f32.mrf.mxu2 }
 0x52a   : > { %v5373_v58 = vpop.f32.mrf.mxu0  ;;  %v5462_v18 = vpop.f32.mrf.mxu1  ;;  %v5550_v31 = vadd.f32 %v5549_v41, %v5461_v61 }
 0x52b   : > { %v5638_v22 = vpop.f32.mrf.mxu3  ;;  %v5374_v0 = vadd.f32 %v5373_v58, %v13176_v37 }
 0x52c   : > { %v13331_v13 = vadd.f32 %v5638_v22, %v5550_v31 }
 0x52d   : > { %v5463_v40 = vadd.f32 %v5462_v18, %v5374_v0 }
 0x531   : > { %v5551_v45 = vpop.f32.mrf.mxu2 }
 0x532   : > { %v5376_v19 = vpop.f32.mrf.mxu0  ;;  %v5465_v52 = vpop.f32.mrf.mxu1  ;;  %v5552_v21 = vadd.f32 %v5551_v45, %v5463_v40 }
 0x533   : > { %v5640_v59 = vpop.f32.mrf.mxu3  ;;  %v5377_v30 = vadd.f32 %v5376_v19, %v13181_v62  ;;  %v8949_v19 = vld [vmem:[#allocation6 + $0xe8] sm:$0xf] }
 0x534   : > { %v13336_v37 = vadd.f32 %v5640_v59, %v5552_v21  ;;  %v9333_v21 = vld [vmem:[#allocation6 + $0x3e8] sm:$0xf] }
 0x535   : > { %v5466_v14 = vadd.f32 %v5465_v52, %v5377_v30  ;;  %5415 = vmatmul.bf16.gmra.mxu0 %v11979_v46  ;;  %5504 = vmatmul.bf16.gmra.mxu1 %v11981_v39  ;;  %v10402_v30 = vld [vmem:[#allocation6 + $0xf4] sm:$0xf0] }
 0x536   : > { %5593 = vmatmul.bf16.gmra.mxu2 %v15315_v48  ;;  %v15726_v48 = vld [vmem:[#allocation154_spill] sm:$0xff]  ;;  %v10414_v39 = vld [vmem:[#allocation6 + $0x154] sm:$0xf0] }
 0x537   : > { %5682 = vmatmul.bf16.gmra.mxu3 %v15316_v32  ;;  %v9013_v32 = vld [vmem:[#allocation6 + $0x168] sm:$0xf] }
 0x539   : > { %v5554_v58 = vpop.f32.mrf.mxu2 }
 0x53a   : > { %v5378_v61 = vpop.f32.mrf.mxu0  ;;  %v5467_v54 = vpop.f32.mrf.mxu1  ;;  %v5555_v43 = vadd.f32 %v5554_v58, %v5466_v14  ;;  %v10498_v14 = vld [vmem:[#allocation6 + $0x3f4] sm:$0xf0] }
 0x53b   : > { %v5643_v18 = vpop.f32.mrf.mxu3  ;;  %v5379_v8 = vadd.f32 %v5378_v61, %v13186_v56  ;;  %v9205_v56 = vld [vmem:[#allocation6 + $0x2e8] sm:$0xf]  ;;  %v9334_v58 = vor.u32 %v10498_v14, %v9333_v21 }
 0x53c   : > { %v13341_v45 = vadd.f32 %v5643_v18, %v5555_v43  ;;  %v9206_v59 = vor.u32 %v10466_v47, %v9205_v56 }
 0x53d   : > { %v5468_v62 = vadd.f32 %v5467_v54, %v5379_v8  ;;  %v8950_v54 = vor.u32 %v10402_v30, %v8949_v19  ;;  %6321 = vmatpush.bf16.msra.mxu3 %v9334_v58 }
 0x53e   : > { %6232 = vmatpush.bf16.msra.mxu2 %v9206_v59 }
 0x53f   : > { %6054 = vmatpush.bf16.msra.mxu0 %v8950_v54 }
 0x541   : > { %v5556_v22 = vpop.f32.mrf.mxu2 }
 0x542   : > { %v5381_v52 = vpop.f32.mrf.mxu0  ;;  %v5470_v41 = vpop.f32.mrf.mxu1  ;;  %v5557_v40 = vadd.f32 %v5556_v22, %v5468_v62  ;;  %v9077_v22 = vld [vmem:[#allocation6 + $0x1e8] sm:$0xf] }
 0x543   : > { %v5645_v0 = vpop.f32.mrf.mxu3  ;;  %v5382_v31 = vadd.f32 %v5381_v52, %v13191_v44 }
 0x544   : > { %v13346_v57 = vadd.f32 %v5645_v0, %v5557_v40  ;;  %v10434_v0 = vld [vmem:[#allocation6 + $0x1f4] sm:$0xf0] }
 0x545   : > { %v5471_v2 = vadd.f32 %v5470_v41, %v5382_v31  ;;  %5420 = vmatmul.bf16.gmra.mxu0 %v12047_v15  ;;  %5509 = vmatmul.bf16.gmra.mxu1 %v15543_v9  ;;  %v9078_v31 = vor.u32 %v10434_v0, %v9077_v22 }
 0x546   : > { %5598 = vmatmul.bf16.gmra.mxu2 %v15545_v4 }
 0x547   : > { %5687 = vmatmul.bf16.gmra.mxu3 %v15547_v6  ;;  %6143 = vmatpush.bf16.msra.mxu1 %v9078_v31 }
 0x549   : > { %v5559_v18 = vpop.f32.mrf.mxu2 }
 0x54a   : > { %v5383_v44 = vpop.f32.mrf.mxu0  ;;  %v5472_v61 = vpop.f32.mrf.mxu1  ;;  %v5560_v62 = vadd.f32 %v5559_v18, %v5471_v2 }
 0x54b   : > { %v5648_v8 = vpop.f32.mrf.mxu3  ;;  %v5384_v43 = vadd.f32 %v5383_v44, %v13196_v5 }
 0x54c   : > { %v13351_v41 = vadd.f32 %v5648_v8, %v5560_v62 }
 0x54d   : > { %v5473_v52 = vadd.f32 %v5472_v61, %v5384_v43 }
 0x551   : > { %v5561_v47 = vpop.f32.mrf.mxu2 }
 0x552   : > { %v5386_v40 = vpop.f32.mrf.mxu0  ;;  %v5475_v56 = vpop.f32.mrf.mxu1  ;;  %v5562_v21 = vadd.f32 %v5561_v47, %v5473_v52 }
 0x553   : > { %v5650_v19 = vpop.f32.mrf.mxu3  ;;  %v5387_v30 = vadd.f32 %v5386_v40, %v13201_v24  ;;  %v15689_v40 = vld [vmem:[#allocation128_spill] sm:$0xff] }
 0x554   : > { %v13356_v5 = vadd.f32 %v5650_v19, %v5562_v21  ;;  %v15691_v19 = vld [vmem:[#allocation157_spill] sm:$0xff]  ;;  %v10462_v21 = vld [vmem:[#allocation6 + $0x2d4] sm:$0xf0] }
 0x555   : > { %v5476_v14 = vadd.f32 %v5475_v56, %v5387_v30  ;;  %5425 = vmatmul.bf16.gmra.mxu0 %v12123_v25  ;;  %5514 = vmatmul.bf16.gmra.mxu1 %v12125_v27  ;;  %v15690_v56 = vld [vmem:[#allocation156_spill] sm:$0xff]  ;;  %v9189_v30 = vld [vmem:[#allocation6 + $0x2c8] sm:$0xf] }
 0x556   : > { %5603 = vmatmul.bf16.gmra.mxu2 %v12128_v50 }
 0x557   : > { %5692 = vmatmul.bf16.gmra.mxu3 %v12130_v20 }
 0x559   : > { %v5564_v44 = vpop.f32.mrf.mxu2 }
 0x55a   : > { %v5388_v2 = vpop.f32.mrf.mxu0  ;;  %v5477_v59 = vpop.f32.mrf.mxu1  ;;  %v5565_v58 = vadd.f32 %v5564_v44, %v5476_v14  ;;  %v8933_v14 = vld [vmem:[#allocation6 + $0xc8] sm:$0xf] }
 0x55b   : > { %v5653_v61 = vpop.f32.mrf.mxu3  ;;  %v5389_v54 = vadd.f32 %v5388_v2, %v13206_v28  ;;  %v15692_v28 = vld [vmem:[#allocation158_spill] sm:$0xff]  ;;  %v9190_v2 = vor.u32 %v10462_v21, %v9189_v30  ;;  %v9317_v44 = vld [vmem:[#allocation6 + $0x3c8] sm:$0xf]  ;;  %v10430_v30 = vld [vmem:[#allocation6 + $0x1d4] sm:$0xf0] }
 0x55c   : > { %v13361_v18 = vadd.f32 %v5653_v61, %v5565_v58  ;;  %v10494_v61 = vld [vmem:[#allocation6 + $0x3d4] sm:$0xf0] }
 0x55d   : > { %v5478_v24 = vadd.f32 %v5477_v59, %v5389_v54  ;;  %v10398_v59 = vld [vmem:[#allocation6 + $0xd4] sm:$0xf0]  ;;  %6233 = vmatpush.bf16.msra.mxu2 %v9190_v2 }
 0x55e   : > { %v8934_v58 = vor.u32 %v10398_v59, %v8933_v14 }
 0x560   : > { %6055 = vmatpush.bf16.msra.mxu0 %v8934_v58 }
 0x561   : > { %v5566_v62 = vpop.f32.mrf.mxu2 }
 0x562   : > { %v5391_v8 = vpop.f32.mrf.mxu0  ;;  %v5480_v43 = vpop.f32.mrf.mxu1  ;;  %v5567_v0 = vadd.f32 %v5566_v62, %v5478_v24  ;;  %v9318_v24 = vor.u32 %v10494_v61, %v9317_v44 }
 0x563   : > { %v5655_v52 = vpop.f32.mrf.mxu3  ;;  %v5392_v22 = vadd.f32 %v5391_v8, %v13211_v35 }
 0x564   : > { %v13366_v47 = vadd.f32 %v5655_v52, %v5567_v0  ;;  %6322 = vmatpush.bf16.msra.mxu3 %v9318_v24 }
 0x565   : > { %v5481_v31 = vadd.f32 %v5480_v43, %v5392_v22  ;;  %5706 = vmatmul.bf16.vlgmr.msrb.gmra.mxu0 %v15689_v40  ;;  %5795 = vmatmul.bf16.vlgmr.msrb.gmra.mxu1 %v15690_v56 }
 0x566   : > { %5884 = vmatmul.bf16.vlgmr.msrb.gmra.mxu2 %v15691_v19 }
 0x567   : > { %5973 = vmatmul.bf16.vlgmr.msrb.gmra.mxu3 %v15692_v28  ;;  %v9061_v28 = vld [vmem:[#allocation6 + $0x1c8] sm:$0xf] }
 0x568   : > { %v9062_v21 = vor.u32 %v10430_v30, %v9061_v28  ;;  %v15697_v30 = vld [vmem:[#allocation89_spill] sm:$0xff] }
 0x569   : > { %v5569_v8 = vpop.f32.mrf.mxu2 }
 0x56a   : > { %v5393_v35 = vpop.f32.mrf.mxu0  ;;  %v5482_v54 = vpop.f32.mrf.mxu1  ;;  %v5570_v52 = vadd.f32 %v5569_v8, %v5481_v31  ;;  %6144 = vmatpush.bf16.msra.mxu1 %v9062_v21  ;;  %v15694_v31 = vld [vmem:[#allocation160_spill] sm:$0xff] }
 0x56b   : > { %v5658_v43 = vpop.f32.mrf.mxu3  ;;  %v5394_v62 = vadd.f32 %v5393_v35, %v13216_v7  ;;  %v15693_v7 = vld [vmem:[#allocation159_spill] sm:$0xff]  ;;  %v15695_v35 = vld [vmem:[#allocation161_spill] sm:$0xff] }
 0x56c   : > { %v13371_v0 = vadd.f32 %v5658_v43, %v5570_v52 }
 0x56d   : > { %v5483_v22 = vadd.f32 %v5482_v54, %v5394_v62  ;;  %v15696_v54 = vld [vmem:[#allocation162_spill] sm:$0xff] }
 0x571   : > { %v5571_v40 = vpop.f32.mrf.mxu2 }
 0x572   : > { %v5396_v19 = vpop.f32.mrf.mxu0  ;;  %v5485_v56 = vpop.f32.mrf.mxu1  ;;  %v5572_v44 = vadd.f32 %v5571_v40, %v5483_v22 }
 0x573   : > { %v5660_v14 = vpop.f32.mrf.mxu3  ;;  %v5397_v59 = vadd.f32 %v5396_v19, %v13221_v17 }
 0x574   : > { %v13376_v2 = vadd.f32 %v5660_v14, %v5572_v44  ;;  %v15698_v44 = vld [vmem:[#allocation149_spill] sm:$0xff] }
 0x575   : > { %v5486_v61 = vadd.f32 %v5485_v56, %v5397_v59  ;;  %5711 = vmatmul.bf16.gmra.mxu0 %v15693_v7  ;;  %5800 = vmatmul.bf16.gmra.mxu1 %v15694_v31  ;;  %v15700_v31 = vld [vmem:[#allocation164_spill] sm:$0xff] }
 0x576   : > { %5889 = vmatmul.bf16.gmra.mxu2 %v15695_v35 }
 0x577   : > { %5978 = vmatmul.bf16.gmra.mxu3 %v15696_v54  ;;  %v15699_v54 = vld [vmem:[#allocation163_spill] sm:$0xff] }
 0x579   : > { %v5574_v24 = vpop.f32.mrf.mxu2 }
 0x57a   : > { %v5398_v28 = vpop.f32.mrf.mxu0  ;;  %v5487_v58 = vpop.f32.mrf.mxu1  ;;  %v5575_v62 = vadd.f32 %v5574_v24, %v5486_v61  ;;  %v9173_v61 = vld [vmem:[#allocation6 + $0x2a8] sm:$0xf] }
 0x57b   : > { %v5663_v8 = vpop.f32.mrf.mxu3  ;;  %v5399_v43 = vadd.f32 %v5398_v28, %v13226_v63  ;;  %v15701_v63 = vld [vmem:[#allocation165_spill] sm:$0xff]  ;;  %v10458_v28 = vld [vmem:[#allocation6 + $0x2b4] sm:$0xf0] }
 0x57c   : > { %v13381_v40 = vadd.f32 %v5663_v8, %v5575_v62  ;;  %v9174_v24 = vor.u32 %v10458_v28, %v9173_v61  ;;  %v10394_v8 = vld [vmem:[#allocation6 + $0xb4] sm:$0xf0] }
 0x57d   : > { %v5488_v17 = vadd.f32 %v5487_v58, %v5399_v43  ;;  %v8917_v58 = vld [vmem:[#allocation6 + $0xa8] sm:$0xf]  ;;  %v10490_v62 = vld [vmem:[#allocation6 + $0x3b4] sm:$0xf0] }
 0x57e   : > { %v9301_v43 = vld [vmem:[#allocation6 + $0x3a8] sm:$0xf]  ;;  %6234 = vmatpush.bf16.msra.mxu2 %v9174_v24  ;;  %v10426_v61 = vld [vmem:[#allocation6 + $0x1b4] sm:$0xf0] }
 0x581   : > { %v5576_v52 = vpop.f32.mrf.mxu2 }
 0x582   : > { %v5401_v56 = vpop.f32.mrf.mxu0  ;;  %v5490_v19 = vpop.f32.mrf.mxu1  ;;  %v5577_v14 = vadd.f32 %v5576_v52, %v5488_v17  ;;  %v9302_v52 = vor.u32 %v10490_v62, %v9301_v43 }
 0x583   : > { %v5665_v22 = vpop.f32.mrf.mxu3  ;;  %v5402_v21 = vadd.f32 %v5401_v56, %v15697_v30 }
 0x584   : > { %v13386_v35 = vadd.f32 %v5665_v22, %v5577_v14  ;;  %6323 = vmatpush.bf16.msra.mxu3 %v9302_v52 }
 0x585   : > { %v5491_v59 = vadd.f32 %v5490_v19, %v5402_v21  ;;  %5716 = vmatmul.bf16.gmra.mxu0 %v15698_v44  ;;  %5805 = vmatmul.bf16.gmra.mxu1 %v15699_v54  ;;  %v8918_v19 = vor.u32 %v10394_v8, %v8917_v58  ;;  %v15702_v54 = vld [vmem:[#allocation184_spill] sm:$0xff]  ;;  %v9045_v44 = vld [vmem:[#allocation6 + $0x1a8] sm:$0xf] }
 0x586   : > { %5894 = vmatmul.bf16.gmra.mxu2 %v15700_v31  ;;  %v9046_v28 = vor.u32 %v10426_v61, %v9045_v44  ;;  %v15703_v8 = vld [vmem:[#allocation200_spill] sm:$0xff] }
 0x587   : > { %5983 = vmatmul.bf16.gmra.mxu3 %v15701_v63  ;;  %6056 = vmatpush.bf16.msra.mxu0 %v8918_v19 }
 0x588   : > { %6145 = vmatpush.bf16.msra.mxu1 %v9046_v28 }
 0x589   : > { %v5579_v30 = vpop.f32.mrf.mxu2 }
 0x58a   : > { %v5403_v56 = vpop.f32.mrf.mxu0  ;;  %v5492_v17 = vpop.f32.mrf.mxu1  ;;  %v5580_v14 = vadd.f32 %v5579_v30, %v5491_v59  ;;  %v15705_v59 = vld [vmem:[#allocation167_spill] sm:$0xff] }
 0x58b   : > { %v5668_v21 = vpop.f32.mrf.mxu3  ;;  %v5404_v22 = vadd.f32 %v5403_v56, %v15702_v54  ;;  %v15704_v54 = vld [vmem:[#allocation166_spill] sm:$0xff]  ;;  %v15706_v56 = vld [vmem:[#allocation168_spill] sm:$0xff] }
 0x58c   : > { %v13391_v31 = vadd.f32 %v5668_v21, %v5580_v14  ;;  %v15708_v21 = vld [vmem:[#allocation201_spill] sm:$0xff] }
 0x58d   : > { %v5493_v63 = vadd.f32 %v5492_v17, %v5404_v22  ;;  %v15707_v17 = vld [vmem:[#allocation169_spill] sm:$0xff] }
 0x591   : > { %v5581_v50 = vpop.f32.mrf.mxu2 }
 0x592   : > { %v5406_v7 = vpop.f32.mrf.mxu0  ;;  %v5495_v20 = vpop.f32.mrf.mxu1  ;;  %v5582_v62 = vadd.f32 %v5581_v50, %v5493_v63 }
 0x593   : > { %v5670_v58 = vpop.f32.mrf.mxu3  ;;  %v5407_v43 = vadd.f32 %v5406_v7, %v15703_v8 }
 0x594   : > { %v13396_v24 = vadd.f32 %v5670_v58, %v5582_v62  ;;  %v15709_v58 = vld [vmem:[#allocation202_spill] sm:$0xff] }
 0x595   : > { %v5496_v27 = vadd.f32 %v5495_v20, %v5407_v43  ;;  %5721 = vmatmul.bf16.gmra.mxu0 %v15704_v54  ;;  %5810 = vmatmul.bf16.gmra.mxu1 %v15705_v59  ;;  %v15712_v54 = vld [vmem:[#allocation171_spill] sm:$0xff] }
 0x596   : > { %5899 = vmatmul.bf16.gmra.mxu2 %v15706_v56  ;;  %v15710_v56 = vld [vmem:[#allocation150_spill] sm:$0xff] }
 0x597   : > { %5988 = vmatmul.bf16.gmra.mxu3 %v15707_v17  ;;  %v15711_v17 = vld [vmem:[#allocation170_spill] sm:$0xff] }
 0x599   : > { %v5584_v52 = vpop.f32.mrf.mxu2 }
 0x59a   : > { %v5408_v44 = vpop.f32.mrf.mxu0  ;;  %v5497_v19 = vpop.f32.mrf.mxu1  ;;  %v5585_v14 = vadd.f32 %v5584_v52, %v5496_v27  ;;  %v15713_v27 = vld [vmem:[#allocation172_spill] sm:$0xff]  ;;  %v8901_v52 = vld [vmem:[#allocation6 + $0x88] sm:$0xf] }
 0x59b   : > { %v5673_v30 = vpop.f32.mrf.mxu3  ;;  %v5409_v22 = vadd.f32 %v5408_v44, %v15708_v21  ;;  %v9157_v44 = vld [vmem:[#allocation6 + $0x288] sm:$0xf]  ;;  %v10390_v21 = vld [vmem:[#allocation6 + $0x94] sm:$0xf0] }
 0x59c   : > { %v13401_v50 = vadd.f32 %v5673_v30, %v5585_v14  ;;  %v10486_v14 = vld [vmem:[#allocation6 + $0x394] sm:$0xf0] }
 0x59d   : > { %v5498_v7 = vadd.f32 %v5497_v19, %v5409_v22  ;;  %v10454_v19 = vld [vmem:[#allocation6 + $0x294] sm:$0xf0]  ;;  %v9285_v22 = vld [vmem:[#allocation6 + $0x388] sm:$0xf] }
 0x59e   : > { %v9158_v30 = vor.u32 %v10454_v19, %v9157_v44  ;;  %v10422_v44 = vld [vmem:[#allocation6 + $0x194] sm:$0xf0] }
 0x5a0   : > { %6235 = vmatpush.bf16.msra.mxu2 %v9158_v30 }
 0x5a1   : > { %v5586_v61 = vpop.f32.mrf.mxu2 }
 0x5a2   : > { %v5411_v20 = vpop.f32.mrf.mxu0  ;;  %v5500_v63 = vpop.f32.mrf.mxu1  ;;  %v5587_v43 = vadd.f32 %v5586_v61, %v5498_v7  ;;  %v9286_v61 = vor.u32 %v10486_v14, %v9285_v22 }
 0x5a3   : > { %v5675_v28 = vpop.f32.mrf.mxu3  ;;  %v5412_v8 = vadd.f32 %v5411_v20, %v15709_v58 }
 0x5a4   : > { %v13406_v59 = vadd.f32 %v5675_v28, %v5587_v43  ;;  %6324 = vmatpush.bf16.msra.mxu3 %v9286_v61 }
 0x5a5   : > { %v5501_v62 = vadd.f32 %v5500_v63, %v5412_v8  ;;  %5726 = vmatmul.bf16.gmra.mxu0 %v15710_v56  ;;  %5815 = vmatmul.bf16.gmra.mxu1 %v15711_v17  ;;  %v8902_v63 = vor.u32 %v10390_v21, %v8901_v52  ;;  %v15714_v17 = vld [vmem:[#allocation203_spill] sm:$0xff]  ;;  %v9029_v56 = vld [vmem:[#allocation6 + $0x188] sm:$0xf]  ;;  %v15715_v21 = vld [vmem:[#allocation204_spill] sm:$0xff] }
 0x5a6   : > { %5904 = vmatmul.bf16.gmra.mxu2 %v15712_v54  ;;  %v9030_v19 = vor.u32 %v10422_v44, %v9029_v56 }
 0x5a7   : > { %5993 = vmatmul.bf16.gmra.mxu3 %v15713_v27  ;;  %6057 = vmatpush.bf16.msra.mxu0 %v8902_v63 }
 0x5a8   : > { %6146 = vmatpush.bf16.msra.mxu1 %v9030_v19 }
 0x5a9   : > { %v5589_v58 = vpop.f32.mrf.mxu2 }
 0x5aa   : > { %v5413_v20 = vpop.f32.mrf.mxu0  ;;  %v5502_v7 = vpop.f32.mrf.mxu1  ;;  %v5590_v43 = vadd.f32 %v5589_v58, %v5501_v62  ;;  %v15717_v62 = vld [vmem:[#allocation174_spill] sm:$0xff] }
 0x5ab   : > { %v5678_v8 = vpop.f32.mrf.mxu3  ;;  %v5414_v28 = vadd.f32 %v5413_v20, %v15714_v17  ;;  %v15716_v17 = vld [vmem:[#allocation173_spill] sm:$0xff]  ;;  %v15718_v20 = vld [vmem:[#allocation151_spill] sm:$0xff] }
 0x5ac   : > { %v13411_v54 = vadd.f32 %v5678_v8, %v5590_v43  ;;  %v15720_v8 = vld [vmem:[#allocation205_spill] sm:$0xff] }
 0x5ad   : > { %v5503_v27 = vadd.f32 %v5502_v7, %v5414_v28  ;;  %v15719_v7 = vld [vmem:[#allocation175_spill] sm:$0xff] }
 0x5b1   : > { %v5591_v4 = vpop.f32.mrf.mxu2 }
 0x5b2   : > { %v5416_v25 = vpop.f32.mrf.mxu0  ;;  %v5505_v6 = vpop.f32.mrf.mxu1  ;;  %v5592_v14 = vadd.f32 %v5591_v4, %v5503_v27 }
 0x5b3   : > { %v5680_v52 = vpop.f32.mrf.mxu3  ;;  %v5417_v22 = vadd.f32 %v5416_v25, %v15715_v21 }
 0x5b4   : > { %v13416_v30 = vadd.f32 %v5680_v52, %v5592_v14  ;;  %v15721_v14 = vld [vmem:[#allocation152_spill] sm:$0xff] }
 0x5b5   : > { %v5506_v9 = vadd.f32 %v5505_v6, %v5417_v22  ;;  %5731 = vmatmul.bf16.gmra.mxu0 %v15716_v17  ;;  %5820 = vmatmul.bf16.gmra.mxu1 %v15717_v62  ;;  %v15723_v62 = vld [vmem:[#allocation153_spill] sm:$0xff]  ;;  %v15725_v17 = vld [vmem:[#allocation206_spill] sm:$0xff] }
 0x5b6   : > { %5909 = vmatmul.bf16.gmra.mxu2 %v15718_v20 }
 0x5b7   : > { %5998 = vmatmul.bf16.gmra.mxu3 %v15719_v7  ;;  %v15722_v7 = vld [vmem:[#allocation176_spill] sm:$0xff] }
 0x5b9   : > { %v5594_v61 = vpop.f32.mrf.mxu2 }
 0x5ba   : > { %v5418_v56 = vpop.f32.mrf.mxu0  ;;  %v5507_v63 = vpop.f32.mrf.mxu1  ;;  %v5595_v43 = vadd.f32 %v5594_v61, %v5506_v9  ;;  %v15724_v9 = vld [vmem:[#allocation177_spill] sm:$0xff] }
 0x5bb   : > { %v5683_v58 = vpop.f32.mrf.mxu3  ;;  %v5419_v28 = vadd.f32 %v5418_v56, %v15720_v8  ;;  %v9141_v56 = vld [vmem:[#allocation6 + $0x268] sm:$0xf]  ;;  %v10386_v8 = vld [vmem:[#allocation6 + $0x74] sm:$0xf0] }
 0x5bc   : > { %v13421_v4 = vadd.f32 %v5683_v58, %v5595_v43  ;;  %v8885_v61 = vld [vmem:[#allocation6 + $0x68] sm:$0xf]  ;;  %v10482_v43 = vld [vmem:[#allocation6 + $0x374] sm:$0xf0] }
 0x5bd   : > { %v5508_v25 = vadd.f32 %v5507_v63, %v5419_v28  ;;  %v10450_v63 = vld [vmem:[#allocation6 + $0x274] sm:$0xf0]  ;;  %v9269_v28 = vld [vmem:[#allocation6 + $0x368] sm:$0xf] }
 0x5be   : > { %v9142_v58 = vor.u32 %v10450_v63, %v9141_v56 }
 0x5c0   : > { %6236 = vmatpush.bf16.msra.mxu2 %v9142_v58  ;;  %v15728_v58 = vld [vmem:[#allocation155_spill] sm:$0xff] }
 0x5c1   : > { %v5596_v44 = vpop.f32.mrf.mxu2 }
 0x5c2   : > { %v5421_v6 = vpop.f32.mrf.mxu0  ;;  %v5510_v27 = vpop.f32.mrf.mxu1  ;;  %v5597_v21 = vadd.f32 %v5596_v44, %v5508_v25 }
 0x5c3   : > { %v5685_v19 = vpop.f32.mrf.mxu3  ;;  %v5422_v52 = vadd.f32 %v5421_v6, %v13271_v53  ;;  %v8886_v6 = vor.u32 %v10386_v8, %v8885_v61  ;;  %v10418_v61 = vld [vmem:[#allocation6 + $0x174] sm:$0xf0] }
 0x5c4   : > { %v13426_v20 = vadd.f32 %v5685_v19, %v5597_v21 }
 0x5c5   : > { %v5511_v22 = vadd.f32 %v5510_v27, %v5422_v52  ;;  %5736 = vmatmul.bf16.gmra.mxu0 %v15721_v14  ;;  %5825 = vmatmul.bf16.gmra.mxu1 %v15722_v7  ;;  %v9270_v27 = vor.u32 %v10482_v43, %v9269_v28  ;;  %v9014_v28 = vor.u32 %v10418_v61, %v9013_v32  ;;  %v15732_v61 = vld [vmem:[#allocation181_spill] sm:$0xff] }
 0x5c6   : > { %5914 = vmatmul.bf16.gmra.mxu2 %v15723_v62  ;;  %6058 = vmatpush.bf16.msra.mxu0 %v8886_v6 }
 0x5c7   : > { %6003 = vmatmul.bf16.gmra.mxu3 %v15724_v9  ;;  %6147 = vmatpush.bf16.msra.mxu1 %v9014_v28 }
 0x5c8   : > { %6325 = vmatpush.bf16.msra.mxu3 %v9270_v27 }
 0x5c9   : > { %v5599_v44 = vpop.f32.mrf.mxu2 }
 0x5ca   : > { %v5423_v53 = vpop.f32.mrf.mxu0  ;;  %v5512_v25 = vpop.f32.mrf.mxu1  ;;  %v5600_v21 = vadd.f32 %v5599_v44, %v5511_v22 }
 0x5cb   : > { %v5688_v52 = vpop.f32.mrf.mxu3  ;;  %v5424_v19 = vadd.f32 %v5423_v53, %v13276_v16  ;;  %v15727_v16 = vld [vmem:[#allocation178_spill] sm:$0xff]  ;;  %v15729_v53 = vld [vmem:[#allocation179_spill] sm:$0xff] }
 0x5cc   : > { %v13431_v62 = vadd.f32 %v5688_v52, %v5600_v21 }
 0x5cd   : > { %v5513_v9 = vadd.f32 %v5512_v25, %v5424_v19 }
 0x5d1   : > { %v5601_v63 = vpop.f32.mrf.mxu2 }
 0x5d2   : > { %v5426_v7 = vpop.f32.mrf.mxu0  ;;  %v5515_v56 = vpop.f32.mrf.mxu1  ;;  %v5602_v8 = vadd.f32 %v5601_v63, %v5513_v9  ;;  %v15731_v63 = vld [vmem:[#allocation180_spill] sm:$0xff] }
 0x5d3   : > { %v5690_v14 = vpop.f32.mrf.mxu3  ;;  %v5427_v15 = vadd.f32 %v5426_v7, %v15725_v17  ;;  %v15730_v7 = vld [vmem:[#allocation207_spill] sm:$0xff] }
 0x5d4   : > { %v13436_v22 = vadd.f32 %v5690_v14, %v5602_v8 }
 0x5d5   : > { %v5516_v43 = vadd.f32 %v5515_v56, %v5427_v15  ;;  %5741 = vmatmul.bf16.gmra.mxu0 %v15726_v48  ;;  %5830 = vmatmul.bf16.gmra.mxu1 %v15727_v16 }
 0x5d6   : > { %5919 = vmatmul.bf16.gmra.mxu2 %v15728_v58  ;;  %v10382_v58 = vld [vmem:[#allocation6 + $0x54] sm:$0xf0] }
 0x5d7   : > { %6008 = vmatmul.bf16.gmra.mxu3 %v15729_v53  ;;  %v15733_v53 = vld [vmem:[#allocation182_spill] sm:$0xff] }
 0x5d9   : > { %v5604_v27 = vpop.f32.mrf.mxu2 }
 0x5da   : > { %v5428_v25 = vpop.f32.mrf.mxu0  ;;  %v5517_v6 = vpop.f32.mrf.mxu1  ;;  %v5605_v9 = vadd.f32 %v5604_v27, %v5516_v43 }
 0x5db   : > { %v5693_v17 = vpop.f32.mrf.mxu3  ;;  %v5429_v44 = vadd.f32 %v5428_v25, %v15730_v7  ;;  %v15734_v25 = vld [vmem:[#allocation183_spill] sm:$0xff] }
 0x5dc   : > { %v13441_v15 = vadd.f32 %v5693_v17, %v5605_v9  ;;  %v10446_v9 = vld [vmem:[#allocation6 + $0x254] sm:$0xf0] }
 0x5dd   : > { %v5518_v32 = vadd.f32 %v5517_v6, %v5429_v44  ;;  %v9125_v44 = vld [vmem:[#allocation6 + $0x248] sm:$0xf] }
 0x5e1   : > { %v5606_v21 = vpop.f32.mrf.mxu2 }
 0x5e2   : > { %v5707_v52 = vpop.f32.mrf.mxu0  ;;  %v5796_v19 = vpop.f32.mrf.mxu1  ;;  %v5607_v56 = vadd.f32 %v5606_v21, %v5518_v32  ;;  %v8869_v32 = vld [vmem:[#allocation6 + $0x48] sm:$0xf] }
 0x5e3   : > { %v5695_v14 = vpop.f32.mrf.mxu3  ;;  %v5708_v28 = vadd.f32 %v5707_v52, %v13291_v49 }
 0x5e4   : > { %v13445_v8 = vadd.f32 %v5695_v14, %v5607_v56  ;;  %v9253_v14 = vld [vmem:[#allocation6 + $0x348] sm:$0xf]  ;;  %v10478_v56 = vld [vmem:[#allocation6 + $0x354] sm:$0xf0] }
 0x5e5   : > { %5746 = vmatmul.bf16.gmra.mxu0 %v15731_v63  ;;  %5835 = vmatmul.bf16.gmra.mxu1 %v15732_v61  ;;  %v5797_v43 = vadd.f32 %v5796_v19, %v5708_v28  ;;  %v9126_v63 = vor.u32 %v10446_v9, %v9125_v44  ;;  %v8870_v61 = vor.u32 %v10382_v58, %v8869_v32  ;;  %v15735_v19 = vld [vmem:[#allocation98_spill] sm:$0xff]  ;;  %v8997_v9 = vld [vmem:[#allocation6 + $0x148] sm:$0xf] }
 0x5e6   : > { %5924 = vmatmul.bf16.gmra.mxu2 %v15733_v53  ;;  %v9254_v49 = vor.u32 %v10478_v56, %v9253_v14  ;;  %v15736_v32 = vld [vmem:[#allocation81_spill] sm:$0xff] }
 0x5e7   : > { %6013 = vmatmul.bf16.gmra.mxu3 %v15734_v25  ;;  %6237 = vmatpush.bf16.msra.mxu2 %v9126_v63 }
 0x5e8   : > { %6059 = vmatpush.bf16.msra.mxu0 %v8870_v61  ;;  %6326 = vmatpush.bf16.msra.mxu3 %v9254_v49 }
 0x5e9   : > { %v5885_v17 = vpop.f32.mrf.mxu2 }
 0x5ea   : > { %v5709_v6 = vpop.f32.mrf.mxu0  ;;  %v5798_v27 = vpop.f32.mrf.mxu1  ;;  %v5886_v21 = vadd.f32 %v5885_v17, %v5797_v43 }
 0x5eb   : > { %v5974_v7 = vpop.f32.mrf.mxu3  ;;  %v5710_v53 = vadd.f32 %v5709_v6, %v13296_v42  ;;  %v15737_v42 = vld [vmem:[#allocation82_spill] sm:$0xff]  ;;  %v15738_v6 = vld [vmem:[#allocation85_spill] sm:$0xff] }
 0x5ec   : > { %v5975_v52 = vadd.f32 %v5974_v7, %v5886_v21  ;;  %v8998_v7 = vor.u32 %v10414_v39, %v8997_v9 }
 0x5ed   : > { %v5799_v16 = vadd.f32 %v5798_v27, %v5710_v53 }
 0x5ee   : > { %vm8192_vm6 = vcmp.ge.f32.partialorder %v5975_v52, 0.0  ;;  %v8321_v28 = vmul.f32 %v15735_v19, %v5975_v52  ;;  %6148 = vmatpush.bf16.msra.mxu1 %v8998_v7 }
 0x5f0   : > { %v8449_v25 = vsel %vm8192_vm6, %v5975_v52, %v8321_v28 }
 0x5f1   : > { %8577 = vst [vmem:[%s12768_s27 + $0x8] sm:$0xff] %v8449_v25  ;;  %v5887_v17 = vpop.f32.mrf.mxu2  ;;  %v15739_v25 = vld [vmem:[#allocation99_spill] sm:$0xff] }
 0x5f2   : > { %v5712_v48 = vpop.f32.mrf.mxu0  ;;  %v5801_v43 = vpop.f32.mrf.mxu1  ;;  %v5888_v58 = vadd.f32 %v5887_v17, %v5799_v16 }
 0x5f3   : > { %v5976_v44 = vpop.f32.mrf.mxu3  ;;  %v5713_v61 = vadd.f32 %v5712_v48, %v13301_v3 }
 0x5f4   : > { %v5977_v63 = vadd.f32 %v5976_v44, %v5888_v58 }
 0x5f5   : > { %5751 = vmatmul.bf16.gmra.mxu0 %v15736_v32  ;;  %5840 = vmatmul.bf16.gmra.mxu1 %v15737_v42  ;;  %v5802_v21 = vadd.f32 %v5801_v43, %v5713_v61  ;;  %v15741_v61 = vld [vmem:[#allocation109_spill] sm:$0xff] }
 0x5f6   : > { %vm8196_vm7 = vcmp.ge.f32.partialorder %v5977_v63, 0.0  ;;  %v8325_v53 = vmul.f32 %v15735_v19, %v5977_v63  ;;  %5929 = vmatmul.bf16.gmra.mxu2 %v15738_v6 }
 0x5f7   : > { %6018 = vmatmul.bf16.gmra.mxu3 %v15739_v25 }
 0x5f8   : > { %v8453_v27 = vsel %vm8196_vm7, %v5977_v63, %v8325_v53  ;;  %v15740_v63 = vld [vmem:[#allocation108_spill] sm:$0xff] }
 0x5f9   : > { %8581 = vst [vmem:[%s12768_s27 + $0x28] sm:$0xff] %v8453_v27  ;;  %v5890_v14 = vpop.f32.mrf.mxu2 }
 0x5fa   : > { %v5714_v16 = vpop.f32.mrf.mxu0  ;;  %v5803_v39 = vpop.f32.mrf.mxu1  ;;  %v5891_v49 = vadd.f32 %v5890_v14, %v5802_v21  ;;  %v15742_v21 = vld [vmem:[#allocation185_spill] sm:$0xff] }
 0x5fb   : > { %v5979_v56 = vpop.f32.mrf.mxu3  ;;  %v5715_v48 = vadd.f32 %v5714_v16, %v13306_v23  ;;  %v15743_v16 = vld [vmem:[#allocation186_spill] sm:$0xff] }
 0x5fc   : > { %v5980_v52 = vadd.f32 %v5979_v56, %v5891_v49 }
 0x5fd   : > { %v5804_v17 = vadd.f32 %v5803_v39, %v5715_v48 }
 0x5fe   : > { %vm8200_vm8 = vcmp.ge.f32.partialorder %v5980_v52, 0.0  ;;  %v8329_v3 = vmul.f32 %v15735_v19, %v5980_v52 }
 0x600   : > { %v8457_v28 = vsel %vm8200_vm8, %v5980_v52, %v8329_v3  ;;  %v9109_v3 = vld [vmem:[#allocation6 + $0x228] sm:$0xf] }
 0x601   : > { %8585 = vst [vmem:[%s12768_s27 + $0x48] sm:$0xff] %v8457_v28  ;;  %v5892_v58 = vpop.f32.mrf.mxu2  ;;  %v10442_v28 = vld [vmem:[#allocation6 + $0x234] sm:$0xf0] }
 0x602   : > { %v5717_v44 = vpop.f32.mrf.mxu0  ;;  %v5806_v9 = vpop.f32.mrf.mxu1  ;;  %v5893_v7 = vadd.f32 %v5892_v58, %v5804_v17  ;;  %v9110_v58 = vor.u32 %v10442_v28, %v9109_v3  ;;  %v8981_v28 = vld [vmem:[#allocation6 + $0x128] sm:$0xf] }
 0x603   : > { %v5981_v43 = vpop.f32.mrf.mxu3  ;;  %v5718_v27 = vadd.f32 %v5717_v44, %v13311_v33  ;;  %v10378_v33 = vld [vmem:[#allocation6 + $0x34] sm:$0xf0]  ;;  %v9237_v44 = vld [vmem:[#allocation6 + $0x328] sm:$0xf] }
 0x604   : > { %v5982_v53 = vadd.f32 %v5981_v43, %v5893_v7  ;;  %v8853_v43 = vld [vmem:[#allocation6 + $0x28] sm:$0xf]  ;;  %6238 = vmatpush.bf16.msra.mxu2 %v9110_v58 }
 0x605   : > { %5756 = vmatmul.bf16.gmra.mxu0 %v15740_v63  ;;  %5845 = vmatmul.bf16.gmra.mxu1 %v15741_v61  ;;  %v5807_v14 = vadd.f32 %v5806_v9, %v5718_v27  ;;  %v8854_v7 = vor.u32 %v10378_v33, %v8853_v43  ;;  %v10474_v61 = vld [vmem:[#allocation6 + $0x334] sm:$0xf0] }
 0x606   : > { %vm8204_vm9 = vcmp.ge.f32.partialorder %v5982_v53, 0.0  ;;  %v8333_v23 = vmul.f32 %v15735_v19, %v5982_v53  ;;  %5934 = vmatmul.bf16.gmra.mxu2 %v15742_v21  ;;  %v9238_v9 = vor.u32 %v10474_v61, %v9237_v44  ;;  %v10410_v43 = vld [vmem:[#allocation6 + $0x134] sm:$0xf0]  ;;  %v15745_v61 = vld [vmem:[#allocation118_spill] sm:$0xff] }
 0x607   : > { %6023 = vmatmul.bf16.gmra.mxu3 %v15743_v16  ;;  %6060 = vmatpush.bf16.msra.mxu0 %v8854_v7 }
 0x608   : > { %v8461_v39 = vsel %vm8204_vm9, %v5982_v53, %v8333_v23  ;;  %6327 = vmatpush.bf16.msra.mxu3 %v9238_v9 }
 0x609   : > { %8589 = vst [vmem:[%s12768_s27 + $0x68] sm:$0xff] %v8461_v39  ;;  %v5895_v52 = vpop.f32.mrf.mxu2 }
 0x60a   : > { %v5719_v56 = vpop.f32.mrf.mxu0  ;;  %v5808_v49 = vpop.f32.mrf.mxu1  ;;  %v5896_v17 = vadd.f32 %v5895_v52, %v5807_v14 }
 0x60b   : > { %v5984_v48 = vpop.f32.mrf.mxu3  ;;  %v5720_v16 = vadd.f32 %v5719_v56, %v13316_v55  ;;  %v15744_v55 = vld [vmem:[#allocation104_spill] sm:$0xff] }
 0x60c   : > { %v5985_v21 = vadd.f32 %v5984_v48, %v5896_v17  ;;  %v8982_v17 = vor.u32 %v10410_v43, %v8981_v28 }
 0x60d   : > { %v5809_v23 = vadd.f32 %v5808_v49, %v5720_v16  ;;  %v15746_v16 = vld [vmem:[#allocation187_spill] sm:$0xff]  ;;  %v15747_v49 = vld [vmem:[#allocation188_spill] sm:$0xff] }
 0x60e   : > { %vm8208_vm10 = vcmp.ge.f32.partialorder %v5985_v21, 0.0  ;;  %v8337_v53 = vmul.f32 %v15735_v19, %v5985_v21  ;;  %6149 = vmatpush.bf16.msra.mxu1 %v8982_v17 }
 0x610   : > { %v8465_v27 = vsel %vm8208_vm10, %v5985_v21, %v8337_v53 }
 0x611   : > { %8593 = vst [vmem:[%s12768_s27 + $0x88] sm:$0xff] %v8465_v27  ;;  %v5897_v52 = vpop.f32.mrf.mxu2 }
 0x612   : > { %v5722_v39 = vpop.f32.mrf.mxu0  ;;  %v5811_v14 = vpop.f32.mrf.mxu1  ;;  %v5898_v48 = vadd.f32 %v5897_v52, %v5809_v23 }
 0x613   : > { %v5986_v3 = vpop.f32.mrf.mxu3  ;;  %v5723_v58 = vadd.f32 %v5722_v39, %v13321_v1 }
 0x614   : > { %v5987_v56 = vadd.f32 %v5986_v3, %v5898_v48 }
 0x615   : > { %5761 = vmatmul.bf16.gmra.mxu0 %v15744_v55  ;;  %5850 = vmatmul.bf16.gmra.mxu1 %v15745_v61  ;;  %v5812_v44 = vadd.f32 %v5811_v14, %v5723_v58  ;;  %v15748_v58 = vld [vmem:[#allocation119_spill] sm:$0xff] }
 0x616   : > { %vm8212_vm11 = vcmp.ge.f32.partialorder %v5987_v56, 0.0  ;;  %v8341_v21 = vmul.f32 %v15735_v19, %v5987_v56  ;;  %5939 = vmatmul.bf16.gmra.mxu2 %v15746_v16  ;;  %v10738_v55 = vld [vmem:[#allocation6 + $0xb74] sm:$0xf0] }
 0x617   : > { %6028 = vmatmul.bf16.gmra.mxu3 %v15747_v49 }
 0x618   : > { %v8469_v33 = vsel %vm8212_vm11, %v5987_v56, %v8341_v21  ;;  %v15749_v21 = vld [vmem:[#allocation112_spill] sm:$0xff] }
 0x619   : > { %8597 = vst [vmem:[%s12768_s27 + $0xa8] sm:$0xff] %v8469_v33  ;;  %v5900_v53 = vpop.f32.mrf.mxu2 }
 0x61a   : > { %v5724_v7 = vpop.f32.mrf.mxu0  ;;  %v5813_v9 = vpop.f32.mrf.mxu1  ;;  %v5901_v23 = vadd.f32 %v5900_v53, %v5812_v44 }
 0x61b   : > { %v5989_v27 = vpop.f32.mrf.mxu3  ;;  %v5725_v1 = vadd.f32 %v5724_v7, %v13326_v34  ;;  %v15750_v7 = vld [vmem:[#allocation113_spill] sm:$0xff] }
 0x61c   : > { %v5990_v52 = vadd.f32 %v5989_v27, %v5901_v23 }
 0x61d   : > { %v5814_v28 = vadd.f32 %v5813_v9, %v5725_v1  ;;  %v15751_v9 = vld [vmem:[#allocation100_spill] sm:$0xff] }
 0x61e   : > { %vm8216_vm12 = vcmp.ge.f32.partialorder %v5990_v52, 0.0  ;;  %v8345_v39 = vmul.f32 %v15735_v19, %v5990_v52 }
 0x620   : > { %v8473_v3 = vsel %vm8216_vm12, %v5990_v52, %v8345_v39 }
 0x621   : > { %8601 = vst [vmem:[%s12768_s27 + $0xc8] sm:$0xff] %v8473_v3  ;;  %v5902_v17 = vpop.f32.mrf.mxu2  ;;  %v9093_v3 = vld [vmem:[#allocation6 + $0x208] sm:$0xf] }
 0x622   : > { %v5727_v43 = vpop.f32.mrf.mxu0  ;;  %v5816_v48 = vpop.f32.mrf.mxu1  ;;  %v5903_v56 = vadd.f32 %v5902_v17, %v5814_v28  ;;  %v10438_v28 = vld [vmem:[#allocation6 + $0x214] sm:$0xf0] }
 0x623   : > { %v5991_v14 = vpop.f32.mrf.mxu3  ;;  %v5728_v44 = vadd.f32 %v5727_v43, %v13331_v13  ;;  %v10374_v13 = vld [vmem:[#allocation6 + $0x14] sm:$0xf0]  ;;  %v9221_v43 = vld [vmem:[#allocation6 + $0x308] sm:$0xf] }
 0x624   : > { %v5992_v33 = vadd.f32 %v5991_v14, %v5903_v56  ;;  %v9094_v14 = vor.u32 %v10438_v28, %v9093_v3  ;;  %v8837_v56 = vld [vmem:[#allocation6 + $0x8] sm:$0xf] }
 0x625   : > { %5766 = vmatmul.bf16.gmra.mxu0 %v15748_v58  ;;  %5855 = vmatmul.bf16.gmra.mxu1 %v15749_v21  ;;  %v5817_v27 = vadd.f32 %v5816_v48, %v5728_v44  ;;  %v8838_v21 = vor.u32 %v10374_v13, %v8837_v56  ;;  %v10470_v58 = vld [vmem:[#allocation6 + $0x314] sm:$0xf0]  ;;  %v8965_v28 = vld [vmem:[#allocation6 + $0x108] sm:$0xf] }
 0x626   : > { %vm8220_vm13 = vcmp.ge.f32.partialorder %v5992_v33, 0.0  ;;  %v8349_v34 = vmul.f32 %v15735_v19, %v5992_v33  ;;  %5944 = vmatmul.bf16.gmra.mxu2 %v15750_v7  ;;  %v9222_v48 = vor.u32 %v10470_v58, %v9221_v43  ;;  %v10406_v56 = vld [vmem:[#allocation6 + $0x114] sm:$0xf0]  ;;  %v15753_v58 = vld [vmem:[#allocation190_spill] sm:$0xff] }
 0x627   : > { %6033 = vmatmul.bf16.gmra.mxu3 %v15751_v9  ;;  %6239 = vmatpush.bf16.msra.mxu2 %v9094_v14 }
 0x628   : > { %v8477_v53 = vsel %vm8220_vm13, %v5992_v33, %v8349_v34  ;;  %6061 = vmatpush.bf16.msra.mxu0 %v8838_v21  ;;  %6328 = vmatpush.bf16.msra.mxu3 %v9222_v48 }
 0x629   : > { %8605 = vst [vmem:[%s12768_s27 + $0xe8] sm:$0xff] %v8477_v53  ;;  %v5905_v1 = vpop.f32.mrf.mxu2 }
 0x62a   : > { %v5729_v23 = vpop.f32.mrf.mxu0  ;;  %v5818_v52 = vpop.f32.mrf.mxu1  ;;  %v5906_v17 = vadd.f32 %v5905_v1, %v5817_v27 }
 0x62b   : > { %v5994_v39 = vpop.f32.mrf.mxu3  ;;  %v5730_v9 = vadd.f32 %v5729_v23, %v13336_v37  ;;  %v15752_v37 = vld [vmem:[#allocation189_spill] sm:$0xff] }
 0x62c   : > { %v5995_v7 = vadd.f32 %v5994_v39, %v5906_v17  ;;  %v8966_v17 = vor.u32 %v10406_v56, %v8965_v28 }
 0x62d   : > { %v5819_v34 = vadd.f32 %v5818_v52, %v5730_v9  ;;  %v15754_v9 = vld [vmem:[#allocation191_spill] sm:$0xff]  ;;  %v15755_v52 = vld [vmem:[#allocation192_spill] sm:$0xff] }
 0x62e   : > { %vm8224_vm14 = vcmp.ge.f32.partialorder %v5995_v7, 0.0  ;;  %v8353_v33 = vmul.f32 %v15735_v19, %v5995_v7  ;;  %6150 = vmatpush.bf16.msra.mxu1 %v8966_v17 }
 0x630   : > { %v8481_v44 = vsel %vm8224_vm14, %v5995_v7, %v8353_v33 }
 0x631   : > { %8609 = vst [vmem:[%s12768_s27 + $0x108] sm:$0xff] %v8481_v44  ;;  %v5907_v1 = vpop.f32.mrf.mxu2 }
 0x632   : > { %v5732_v53 = vpop.f32.mrf.mxu0  ;;  %v5821_v27 = vpop.f32.mrf.mxu1  ;;  %v5908_v39 = vadd.f32 %v5907_v1, %v5819_v34 }
 0x633   : > { %v5996_v3 = vpop.f32.mrf.mxu3  ;;  %v5733_v23 = vadd.f32 %v5732_v53, %v13341_v45 }
 0x634   : > { %v5997_v21 = vadd.f32 %v5996_v3, %v5908_v39 }
 0x635   : > { %5771 = vmatmul.bf16.gmra.mxu0 %v15752_v37  ;;  %5860 = vmatmul.bf16.gmra.mxu1 %v15753_v58  ;;  %v5822_v13 = vadd.f32 %v5821_v27, %v5733_v23  ;;  %v15756_v23 = vld [vmem:[#allocation101_spill] sm:$0xff]  ;;  %v10742_v37 = vld [vmem:[#allocation6 + $0xb94] sm:$0xf0] }
 0x636   : > { %vm8228_vm15 = vcmp.ge.f32.partialorder %v5997_v21, 0.0  ;;  %v8357_v7 = vmul.f32 %v15735_v19, %v5997_v21  ;;  %5949 = vmatmul.bf16.gmra.mxu2 %v15754_v9 }
 0x637   : > { %6038 = vmatmul.bf16.gmra.mxu3 %v15755_v52 }
 0x638   : > { %v8485_v14 = vsel %vm8228_vm15, %v5997_v21, %v8357_v7  ;;  %v15757_v7 = vld [vmem:[#allocation193_spill] sm:$0xff] }
 0x639   : > { %8613 = vst [vmem:[%s12768_s27 + $0x128] sm:$0xff] %v8485_v14  ;;  %v5910_v33 = vpop.f32.mrf.mxu2 }
 0x63a   : > { %v5734_v43 = vpop.f32.mrf.mxu0  ;;  %v5823_v48 = vpop.f32.mrf.mxu1  ;;  %v5911_v34 = vadd.f32 %v5910_v33, %v5822_v13 }
 0x63b   : > { %v5999_v44 = vpop.f32.mrf.mxu3  ;;  %v5735_v45 = vadd.f32 %v5734_v43, %v13346_v57  ;;  %v15758_v43 = vld [vmem:[#allocation194_spill] sm:$0xff] }
 0x63c   : > { %v6000_v1 = vadd.f32 %v5999_v44, %v5911_v34 }
 0x63d   : > { %v5824_v28 = vadd.f32 %v5823_v48, %v5735_v45  ;;  %v15759_v48 = vld [vmem:[#allocation195_spill] sm:$0xff] }
 0x63e   : > { %vm8232_vm0 = vcmp.ge.f32.partialorder %v6000_v1, 0.0  ;;  %v8361_v53 = vmul.f32 %v15735_v19, %v6000_v1 }
 0x640   : > { %v8489_v3 = vsel %vm8232_vm0, %v6000_v1, %v8361_v53 }
 0x641   : > { %8617 = vst [vmem:[%s12768_s27 + $0x148] sm:$0xff] %v8489_v3  ;;  %v5912_v17 = vpop.f32.mrf.mxu2  ;;  %v9717_v3 = vld [vmem:[#allocation6 + $0x6e8] sm:$0xf] }
 0x642   : > { %v5737_v56 = vpop.f32.mrf.mxu0  ;;  %v5826_v39 = vpop.f32.mrf.mxu1  ;;  %v5913_v21 = vadd.f32 %v5912_v17, %v5824_v28  ;;  %v10594_v28 = vld [vmem:[#allocation6 + $0x6f4] sm:$0xf0] }
 0x643   : > { %v6001_v27 = vpop.f32.mrf.mxu3  ;;  %v5738_v13 = vadd.f32 %v5737_v56, %v13351_v41  ;;  %v10530_v41 = vld [vmem:[#allocation6 + $0x4f4] sm:$0xf0]  ;;  %v9845_v56 = vld [vmem:[#allocation6 + $0x7e8] sm:$0xf] }
 0x644   : > { %v6002_v14 = vadd.f32 %v6001_v27, %v5913_v21  ;;  %v9718_v27 = vor.u32 %v10594_v28, %v9717_v3  ;;  %v9461_v21 = vld [vmem:[#allocation6 + $0x4e8] sm:$0xf] }
 0x645   : > { %5776 = vmatmul.bf16.gmra.mxu0 %v15756_v23  ;;  %5865 = vmatmul.bf16.gmra.mxu1 %v15757_v7  ;;  %v5827_v44 = vadd.f32 %v5826_v39, %v5738_v13  ;;  %v9462_v7 = vor.u32 %v10530_v41, %v9461_v21  ;;  %v10626_v23 = vld [vmem:[#allocation6 + $0x7f4] sm:$0xf0]  ;;  %v9589_v28 = vld [vmem:[#allocation6 + $0x5e8] sm:$0xf] }
 0x646   : > { %vm8236_vm1 = vcmp.ge.f32.partialorder %v6002_v14, 0.0  ;;  %v8365_v57 = vmul.f32 %v15735_v19, %v6002_v14  ;;  %5954 = vmatmul.bf16.gmra.mxu2 %v15758_v43  ;;  %v9846_v39 = vor.u32 %v10626_v23, %v9845_v56  ;;  %v10562_v21 = vld [vmem:[#allocation6 + $0x5f4] sm:$0xf0]  ;;  %v15761_v23 = vld [vmem:[#allocation197_spill] sm:$0xff] }
 0x647   : > { %6043 = vmatmul.bf16.gmra.mxu3 %v15759_v48  ;;  %6588 = vmatpush.bf16.msrb.mxu2 %v9718_v27 }
 0x648   : > { %v8493_v33 = vsel %vm8236_vm1, %v6002_v14, %v8365_v57  ;;  %6410 = vmatpush.bf16.msrb.mxu0 %v9462_v7  ;;  %6677 = vmatpush.bf16.msrb.mxu3 %v9846_v39 }
 0x649   : > { %8621 = vst [vmem:[%s12768_s27 + $0x168] sm:$0xff] %v8493_v33  ;;  %v5915_v45 = vpop.f32.mrf.mxu2 }
 0x64a   : > { %v5739_v34 = vpop.f32.mrf.mxu0  ;;  %v5828_v1 = vpop.f32.mrf.mxu1  ;;  %v5916_v17 = vadd.f32 %v5915_v45, %v5827_v44 }
 0x64b   : > { %v6004_v53 = vpop.f32.mrf.mxu3  ;;  %v5740_v48 = vadd.f32 %v5739_v34, %v13356_v5  ;;  %v15760_v5 = vld [vmem:[#allocation196_spill] sm:$0xff] }
 0x64c   : > { %v6005_v43 = vadd.f32 %v6004_v53, %v5916_v17  ;;  %v9590_v17 = vor.u32 %v10562_v21, %v9589_v28 }
 0x64d   : > { %v5829_v57 = vadd.f32 %v5828_v1, %v5740_v48  ;;  %v15762_v48 = vld [vmem:[#allocation198_spill] sm:$0xff]  ;;  %v15763_v1 = vld [vmem:[#allocation199_spill] sm:$0xff] }
 0x64e   : > { %vm8240_vm2 = vcmp.ge.f32.partialorder %v6005_v43, 0.0  ;;  %v8369_v14 = vmul.f32 %v15735_v19, %v6005_v43  ;;  %6499 = vmatpush.bf16.msrb.mxu1 %v9590_v17 }
 0x650   : > { %v8497_v13 = vsel %vm8240_vm2, %v6005_v43, %v8369_v14 }
 0x651   : > { %8625 = vst [vmem:[%s12768_s27 + $0x188] sm:$0xff] %v8497_v13  ;;  %v5917_v45 = vpop.f32.mrf.mxu2 }
 0x652   : > { %v5742_v33 = vpop.f32.mrf.mxu0  ;;  %v5831_v44 = vpop.f32.mrf.mxu1  ;;  %v5918_v53 = vadd.f32 %v5917_v45, %v5829_v57 }
 0x653   : > { %v6006_v3 = vpop.f32.mrf.mxu3  ;;  %v5743_v34 = vadd.f32 %v5742_v33, %v13361_v18 }
 0x654   : > { %v6007_v7 = vadd.f32 %v6006_v3, %v5918_v53 }
 0x655   : > { %5781 = vmatmul.bf16.gmra.mxu0 %v15760_v5  ;;  %5870 = vmatmul.bf16.gmra.mxu1 %v15761_v23  ;;  %v5832_v41 = vadd.f32 %v5831_v44, %v5743_v34  ;;  %v15764_v34 = vld [vmem:[#allocation17_spill] sm:$0xff]  ;;  %v10746_v5 = vld [vmem:[#allocation6 + $0xbb4] sm:$0xf0] }
 0x656   : > { %vm8244_vm3 = vcmp.ge.f32.partialorder %v6007_v7, 0.0  ;;  %v8373_v43 = vmul.f32 %v15735_v19, %v6007_v7  ;;  %5959 = vmatmul.bf16.gmra.mxu2 %v15762_v48 }
 0x657   : > { %6048 = vmatmul.bf16.gmra.mxu3 %v15763_v1 }
 0x658   : > { %v8501_v27 = vsel %vm8244_vm3, %v6007_v7, %v8373_v43  ;;  %v15765_v43 = vld [vmem:[#allocation18_spill] sm:$0xff] }
 0x659   : > { %8629 = vst [vmem:[%s12768_s27 + $0x1a8] sm:$0xff] %v8501_v27  ;;  %v5920_v14 = vpop.f32.mrf.mxu2 }
 0x65a   : > { %v5744_v56 = vpop.f32.mrf.mxu0  ;;  %v5833_v39 = vpop.f32.mrf.mxu1  ;;  %v5921_v57 = vadd.f32 %v5920_v14, %v5832_v41 }
 0x65b   : > { %v6009_v13 = vpop.f32.mrf.mxu3  ;;  %v5745_v18 = vadd.f32 %v5744_v56, %v13366_v47  ;;  %v15766_v56 = vld [vmem:[#allocation21_spill] sm:$0xff] }
 0x65c   : > { %v6010_v45 = vadd.f32 %v6009_v13, %v5921_v57 }
 0x65d   : > { %v5834_v28 = vadd.f32 %v5833_v39, %v5745_v18  ;;  %v15767_v39 = vld [vmem:[#allocation22_spill] sm:$0xff] }
 0x65e   : > { %vm8248_vm4 = vcmp.ge.f32.partialorder %v6010_v45, 0.0  ;;  %v8377_v33 = vmul.f32 %v15735_v19, %v6010_v45 }
 0x660   : > { %v8505_v3 = vsel %vm8248_vm4, %v6010_v45, %v8377_v33 }
 0x661   : > { %8633 = vst [vmem:[%s12768_s27 + $0x1c8] sm:$0xff] %v8505_v3  ;;  %v5922_v17 = vpop.f32.mrf.mxu2  ;;  %v9701_v3 = vld [vmem:[#allocation6 + $0x6c8] sm:$0xf] }
 0x662   : > { %v5747_v21 = vpop.f32.mrf.mxu0  ;;  %v5836_v53 = vpop.f32.mrf.mxu1  ;;  %v5923_v7 = vadd.f32 %v5922_v17, %v5834_v28  ;;  %v10590_v28 = vld [vmem:[#allocation6 + $0x6d4] sm:$0xf0] }
 0x663   : > { %v6011_v44 = vpop.f32.mrf.mxu3  ;;  %v5748_v41 = vadd.f32 %v5747_v21, %v13371_v0  ;;  %v10526_v0 = vld [vmem:[#allocation6 + $0x4d4] sm:$0xf0]  ;;  %v9829_v21 = vld [vmem:[#allocation6 + $0x7c8] sm:$0xf] }
 0x664   : > { %v6012_v27 = vadd.f32 %v6011_v44, %v5923_v7  ;;  %v9702_v44 = vor.u32 %v10590_v28, %v9701_v3  ;;  %v9445_v7 = vld [vmem:[#allocation6 + $0x4c8] sm:$0xf] }
 0x665   : > { %6062 = vmatmul.bf16.vlgmr.msra.gmra.mxu0 %v15764_v34  ;;  %6151 = vmatmul.bf16.vlgmr.msra.gmra.mxu1 %v15765_v43  ;;  %v5837_v13 = vadd.f32 %v5836_v53, %v5748_v41  ;;  %v9446_v43 = vor.u32 %v10526_v0, %v9445_v7  ;;  %v10622_v34 = vld [vmem:[#allocation6 + $0x7d4] sm:$0xf0]  ;;  %v9573_v28 = vld [vmem:[#allocation6 + $0x5c8] sm:$0xf] }
 0x666   : > { %vm8252_vm5 = vcmp.ge.f32.partialorder %v6012_v27, 0.0  ;;  %v8381_v47 = vmul.f32 %v15735_v19, %v6012_v27  ;;  %6240 = vmatmul.bf16.vlgmr.msra.gmra.mxu2 %v15766_v56  ;;  %v9830_v53 = vor.u32 %v10622_v34, %v9829_v21  ;;  %v10558_v7 = vld [vmem:[#allocation6 + $0x5d4] sm:$0xf0]  ;;  %v15769_v34 = vld [vmem:[#allocation28_spill] sm:$0xff] }
 0x667   : > { %6329 = vmatmul.bf16.vlgmr.msra.gmra.mxu3 %v15767_v39  ;;  %6589 = vmatpush.bf16.msrb.mxu2 %v9702_v44 }
 0x668   : > { %v8509_v14 = vsel %vm8252_vm5, %v6012_v27, %v8381_v47  ;;  %6411 = vmatpush.bf16.msrb.mxu0 %v9446_v43  ;;  %6678 = vmatpush.bf16.msrb.mxu3 %v9830_v53 }
 0x669   : > { %8637 = vst [vmem:[%s12768_s27 + $0x1e8] sm:$0xff] %v8509_v14  ;;  %v5925_v18 = vpop.f32.mrf.mxu2 }
 0x66a   : > { %v5749_v57 = vpop.f32.mrf.mxu0  ;;  %v5838_v45 = vpop.f32.mrf.mxu1  ;;  %v5926_v17 = vadd.f32 %v5925_v18, %v5837_v13 }
 0x66b   : > { %v6014_v33 = vpop.f32.mrf.mxu3  ;;  %v5750_v39 = vadd.f32 %v5749_v57, %v13376_v2  ;;  %v15768_v2 = vld [vmem:[#allocation27_spill] sm:$0xff] }
 0x66c   : > { %v6015_v56 = vadd.f32 %v6014_v33, %v5926_v17  ;;  %v9574_v17 = vor.u32 %v10558_v7, %v9573_v28 }
 0x66d   : > { %v5839_v47 = vadd.f32 %v5838_v45, %v5750_v39  ;;  %v15770_v39 = vld [vmem:[#allocation29_spill] sm:$0xff]  ;;  %v15771_v45 = vld [vmem:[#allocation31_spill] sm:$0xff] }
 0x66e   : > { %vm8256_vm6 = vcmp.ge.f32.partialorder %v6015_v56, 0.0  ;;  %v8385_v27 = vmul.f32 %v15735_v19, %v6015_v56  ;;  %6500 = vmatpush.bf16.msrb.mxu1 %v9574_v17 }
 0x670   : > { %v8513_v41 = vsel %vm8256_vm6, %v6015_v56, %v8385_v27 }
 0x671   : > { %8641 = vst [vmem:[%s12768_s27 + $0x208] sm:$0xff] %v8513_v41  ;;  %v5927_v18 = vpop.f32.mrf.mxu2 }
 0x672   : > { %v5752_v14 = vpop.f32.mrf.mxu0  ;;  %v5841_v13 = vpop.f32.mrf.mxu1  ;;  %v5928_v33 = vadd.f32 %v5927_v18, %v5839_v47 }
 0x673   : > { %v6016_v3 = vpop.f32.mrf.mxu3  ;;  %v5753_v57 = vadd.f32 %v5752_v14, %v13381_v40 }
 0x674   : > { %v6017_v43 = vadd.f32 %v6016_v3, %v5928_v33 }
 0x675   : > { %6067 = vmatmul.bf16.gmra.mxu0 %v15768_v2  ;;  %6156 = vmatmul.bf16.gmra.mxu1 %v15769_v34  ;;  %v5842_v0 = vadd.f32 %v5841_v13, %v5753_v57  ;;  %v15772_v57 = vld [vmem:[#allocation33_spill] sm:$0xff]  ;;  %v10750_v2 = vld [vmem:[#allocation6 + $0xbd4] sm:$0xf0] }
 0x676   : > { %vm8260_vm7 = vcmp.ge.f32.partialorder %v6017_v43, 0.0  ;;  %v8389_v56 = vmul.f32 %v15735_v19, %v6017_v43  ;;  %6245 = vmatmul.bf16.gmra.mxu2 %v15770_v39 }
 0x677   : > { %6334 = vmatmul.bf16.gmra.mxu3 %v15771_v45 }
 0x678   : > { %v8517_v44 = vsel %vm8260_vm7, %v6017_v43, %v8389_v56  ;;  %v15773_v56 = vld [vmem:[#allocation34_spill] sm:$0xff] }
 0x679   : > { %8645 = vst [vmem:[%s12768_s27 + $0x228] sm:$0xff] %v8517_v44  ;;  %v5930_v27 = vpop.f32.mrf.mxu2 }
 0x67a   : > { %v5754_v21 = vpop.f32.mrf.mxu0  ;;  %v5843_v53 = vpop.f32.mrf.mxu1  ;;  %v5931_v47 = vadd.f32 %v5930_v27, %v5842_v0 }
 0x67b   : > { %v6019_v41 = vpop.f32.mrf.mxu3  ;;  %v5755_v40 = vadd.f32 %v5754_v21, %v13386_v35  ;;  %v15774_v21 = vld [vmem:[#allocation38_spill] sm:$0xff] }
 0x67c   : > { %v6020_v18 = vadd.f32 %v6019_v41, %v5931_v47 }
 0x67d   : > { %v5844_v28 = vadd.f32 %v5843_v53, %v5755_v40  ;;  %v15775_v53 = vld [vmem:[#allocation39_spill] sm:$0xff] }
 0x67e   : > { %vm8264_vm8 = vcmp.ge.f32.partialorder %v6020_v18, 0.0  ;;  %v8393_v14 = vmul.f32 %v15735_v19, %v6020_v18 }
 0x680   : > { %v8521_v3 = vsel %vm8264_vm8, %v6020_v18, %v8393_v14 }
 0x681   : > { %8649 = vst [vmem:[%s12768_s27 + $0x248] sm:$0xff] %v8521_v3  ;;  %v5932_v17 = vpop.f32.mrf.mxu2  ;;  %v9685_v3 = vld [vmem:[#allocation6 + $0x6a8] sm:$0xf] }
 0x682   : > { %v5757_v7 = vpop.f32.mrf.mxu0  ;;  %v5846_v33 = vpop.f32.mrf.mxu1  ;;  %v5933_v43 = vadd.f32 %v5932_v17, %v5844_v28  ;;  %v10586_v28 = vld [vmem:[#allocation6 + $0x6b4] sm:$0xf0] }
 0x683   : > { %v6021_v13 = vpop.f32.mrf.mxu3  ;;  %v5758_v0 = vadd.f32 %v5757_v7, %v13391_v31  ;;  %v10522_v31 = vld [vmem:[#allocation6 + $0x4b4] sm:$0xf0]  ;;  %v9813_v7 = vld [vmem:[#allocation6 + $0x7a8] sm:$0xf] }
 0x684   : > { %v6022_v44 = vadd.f32 %v6021_v13, %v5933_v43  ;;  %v9686_v13 = vor.u32 %v10586_v28, %v9685_v3  ;;  %v9429_v43 = vld [vmem:[#allocation6 + $0x4a8] sm:$0xf] }
 0x685   : > { %6072 = vmatmul.bf16.gmra.mxu0 %v15772_v57  ;;  %6161 = vmatmul.bf16.gmra.mxu1 %v15773_v56  ;;  %v5847_v41 = vadd.f32 %v5846_v33, %v5758_v0  ;;  %v9430_v56 = vor.u32 %v10522_v31, %v9429_v43  ;;  %v10618_v57 = vld [vmem:[#allocation6 + $0x7b4] sm:$0xf0]  ;;  %v9557_v28 = vld [vmem:[#allocation6 + $0x5a8] sm:$0xf] }
 0x686   : > { %vm8268_vm9 = vcmp.ge.f32.partialorder %v6022_v44, 0.0  ;;  %v8397_v35 = vmul.f32 %v15735_v19, %v6022_v44  ;;  %6250 = vmatmul.bf16.gmra.mxu2 %v15774_v21  ;;  %v9814_v33 = vor.u32 %v10618_v57, %v9813_v7  ;;  %v10554_v43 = vld [vmem:[#allocation6 + $0x5b4] sm:$0xf0]  ;;  %v15777_v57 = vld [vmem:[#allocation42_spill] sm:$0xff] }
 0x687   : > { %6339 = vmatmul.bf16.gmra.mxu3 %v15775_v53  ;;  %6590 = vmatpush.bf16.msrb.mxu2 %v9686_v13 }
 0x688   : > { %v8525_v27 = vsel %vm8268_vm9, %v6022_v44, %v8397_v35  ;;  %6412 = vmatpush.bf16.msrb.mxu0 %v9430_v56  ;;  %6679 = vmatpush.bf16.msrb.mxu3 %v9814_v33 }
 0x689   : > { %8653 = vst [vmem:[%s12768_s27 + $0x268] sm:$0xff] %v8525_v27  ;;  %v5935_v40 = vpop.f32.mrf.mxu2 }
 0x68a   : > { %v5759_v47 = vpop.f32.mrf.mxu0  ;;  %v5848_v18 = vpop.f32.mrf.mxu1  ;;  %v5936_v17 = vadd.f32 %v5935_v40, %v5847_v41 }
 0x68b   : > { %v6024_v14 = vpop.f32.mrf.mxu3  ;;  %v5760_v53 = vadd.f32 %v5759_v47, %v13396_v24  ;;  %v15776_v24 = vld [vmem:[#allocation41_spill] sm:$0xff] }
 0x68c   : > { %v6025_v21 = vadd.f32 %v6024_v14, %v5936_v17  ;;  %v9558_v17 = vor.u32 %v10554_v43, %v9557_v28 }
 0x68d   : > { %v5849_v35 = vadd.f32 %v5848_v18, %v5760_v53  ;;  %v15778_v53 = vld [vmem:[#allocation45_spill] sm:$0xff]  ;;  %v15779_v18 = vld [vmem:[#allocation46_spill] sm:$0xff] }
 0x68e   : > { %vm8272_vm10 = vcmp.ge.f32.partialorder %v6025_v21, 0.0  ;;  %v8401_v44 = vmul.f32 %v15735_v19, %v6025_v21  ;;  %6501 = vmatpush.bf16.msrb.mxu1 %v9558_v17 }
 0x690   : > { %v8529_v0 = vsel %vm8272_vm10, %v6025_v21, %v8401_v44 }
 0x691   : > { %8657 = vst [vmem:[%s12768_s27 + $0x288] sm:$0xff] %v8529_v0  ;;  %v5937_v40 = vpop.f32.mrf.mxu2 }
 0x692   : > { %v5762_v27 = vpop.f32.mrf.mxu0  ;;  %v5851_v41 = vpop.f32.mrf.mxu1  ;;  %v5938_v14 = vadd.f32 %v5937_v40, %v5849_v35 }
 0x693   : > { %v6026_v3 = vpop.f32.mrf.mxu3  ;;  %v5763_v47 = vadd.f32 %v5762_v27, %v13401_v50 }
 0x694   : > { %v6027_v56 = vadd.f32 %v6026_v3, %v5938_v14 }
 0x695   : > { %6077 = vmatmul.bf16.gmra.mxu0 %v15776_v24  ;;  %6166 = vmatmul.bf16.gmra.mxu1 %v15777_v57  ;;  %v5852_v31 = vadd.f32 %v5851_v41, %v5763_v47  ;;  %v15780_v47 = vld [vmem:[#allocation51_spill] sm:$0xff] }
 0x696   : > { %vm8276_vm11 = vcmp.ge.f32.partialorder %v6027_v56, 0.0  ;;  %v8405_v21 = vmul.f32 %v15735_v19, %v6027_v56  ;;  %6255 = vmatmul.bf16.gmra.mxu2 %v15778_v53  ;;  %v10754_v24 = vld [vmem:[#allocation6 + $0xbf4] sm:$0xf0] }
 0x697   : > { %6344 = vmatmul.bf16.gmra.mxu3 %v15779_v18 }
 0x698   : > { %v8533_v13 = vsel %vm8276_vm11, %v6027_v56, %v8405_v21  ;;  %v15781_v21 = vld [vmem:[#allocation52_spill] sm:$0xff] }
 0x699   : > { %8661 = vst [vmem:[%s12768_s27 + $0x2a8] sm:$0xff] %v8533_v13  ;;  %v5940_v44 = vpop.f32.mrf.mxu2 }
 0x69a   : > { %v5764_v7 = vpop.f32.mrf.mxu0  ;;  %v5853_v33 = vpop.f32.mrf.mxu1  ;;  %v5941_v35 = vadd.f32 %v5940_v44, %v5852_v31 }
 0x69b   : > { %v6029_v0 = vpop.f32.mrf.mxu3  ;;  %v5765_v50 = vadd.f32 %v5764_v7, %v13406_v59  ;;  %v15782_v7 = vld [vmem:[#allocation55_spill] sm:$0xff] }
 0x69c   : > { %v6030_v40 = vadd.f32 %v6029_v0, %v5941_v35 }
 0x69d   : > { %v5854_v28 = vadd.f32 %v5853_v33, %v5765_v50  ;;  %v15783_v33 = vld [vmem:[#allocation56_spill] sm:$0xff] }
 0x69e   : > { %vm8280_vm12 = vcmp.ge.f32.partialorder %v6030_v40, 0.0  ;;  %v8409_v27 = vmul.f32 %v15735_v19, %v6030_v40 }
 0x6a0   : > { %v8537_v3 = vsel %vm8280_vm12, %v6030_v40, %v8409_v27 }
 0x6a1   : > { %8665 = vst [vmem:[%s12768_s27 + $0x2c8] sm:$0xff] %v8537_v3  ;;  %v5942_v17 = vpop.f32.mrf.mxu2  ;;  %v9669_v3 = vld [vmem:[#allocation6 + $0x688] sm:$0xf] }
 0x6a2   : > { %v5767_v43 = vpop.f32.mrf.mxu0  ;;  %v5856_v14 = vpop.f32.mrf.mxu1  ;;  %v5943_v56 = vadd.f32 %v5942_v17, %v5854_v28  ;;  %v10582_v28 = vld [vmem:[#allocation6 + $0x694] sm:$0xf0] }
 0x6a3   : > { %v6031_v41 = vpop.f32.mrf.mxu3  ;;  %v5768_v31 = vadd.f32 %v5767_v43, %v13411_v54  ;;  %v10518_v54 = vld [vmem:[#allocation6 + $0x494] sm:$0xf0]  ;;  %v9797_v43 = vld [vmem:[#allocation6 + $0x788] sm:$0xf] }
 0x6a4   : > { %v6032_v13 = vadd.f32 %v6031_v41, %v5943_v56  ;;  %v9670_v41 = vor.u32 %v10582_v28, %v9669_v3  ;;  %v9413_v56 = vld [vmem:[#allocation6 + $0x488] sm:$0xf] }
 0x6a5   : > { %6082 = vmatmul.bf16.gmra.mxu0 %v15780_v47  ;;  %6171 = vmatmul.bf16.gmra.mxu1 %v15781_v21  ;;  %v5857_v0 = vadd.f32 %v5856_v14, %v5768_v31  ;;  %v9414_v21 = vor.u32 %v10518_v54, %v9413_v56  ;;  %v10614_v47 = vld [vmem:[#allocation6 + $0x794] sm:$0xf0]  ;;  %v9541_v28 = vld [vmem:[#allocation6 + $0x588] sm:$0xf] }
 0x6a6   : > { %vm8284_vm13 = vcmp.ge.f32.partialorder %v6032_v13, 0.0  ;;  %v8413_v59 = vmul.f32 %v15735_v19, %v6032_v13  ;;  %6260 = vmatmul.bf16.gmra.mxu2 %v15782_v7  ;;  %v9798_v14 = vor.u32 %v10614_v47, %v9797_v43  ;;  %v10550_v56 = vld [vmem:[#allocation6 + $0x594] sm:$0xf0]  ;;  %v15785_v47 = vld [vmem:[#allocation58_spill] sm:$0xff] }
 0x6a7   : > { %6349 = vmatmul.bf16.gmra.mxu3 %v15783_v33  ;;  %6591 = vmatpush.bf16.msrb.mxu2 %v9670_v41 }
 0x6a8   : > { %v8541_v44 = vsel %vm8284_vm13, %v6032_v13, %v8413_v59  ;;  %6413 = vmatpush.bf16.msrb.mxu0 %v9414_v21  ;;  %6680 = vmatpush.bf16.msrb.mxu3 %v9798_v14 }
 0x6a9   : > { %8669 = vst [vmem:[%s12768_s27 + $0x2e8] sm:$0xff] %v8541_v44  ;;  %v5945_v50 = vpop.f32.mrf.mxu2 }
 0x6aa   : > { %v5769_v35 = vpop.f32.mrf.mxu0  ;;  %v5858_v40 = vpop.f32.mrf.mxu1  ;;  %v5946_v17 = vadd.f32 %v5945_v50, %v5857_v0 }
 0x6ab   : > { %v6034_v27 = vpop.f32.mrf.mxu3  ;;  %v5770_v33 = vadd.f32 %v5769_v35, %v13416_v30  ;;  %v15784_v30 = vld [vmem:[#allocation57_spill] sm:$0xff] }
 0x6ac   : > { %v6035_v7 = vadd.f32 %v6034_v27, %v5946_v17  ;;  %v9542_v17 = vor.u32 %v10550_v56, %v9541_v28 }
 0x6ad   : > { %v5859_v59 = vadd.f32 %v5858_v40, %v5770_v33  ;;  %v15786_v33 = vld [vmem:[#allocation61_spill] sm:$0xff]  ;;  %v15787_v40 = vld [vmem:[#allocation62_spill] sm:$0xff] }
 0x6ae   : > { %vm8288_vm14 = vcmp.ge.f32.partialorder %v6035_v7, 0.0  ;;  %v8417_v13 = vmul.f32 %v15735_v19, %v6035_v7  ;;  %6502 = vmatpush.bf16.msrb.mxu1 %v9542_v17 }
 0x6b0   : > { %v8545_v31 = vsel %vm8288_vm14, %v6035_v7, %v8417_v13 }
 0x6b1   : > { %8673 = vst [vmem:[%s12768_s27 + $0x308] sm:$0xff] %v8545_v31  ;;  %v5947_v50 = vpop.f32.mrf.mxu2 }
 0x6b2   : > { %v5772_v44 = vpop.f32.mrf.mxu0  ;;  %v5861_v0 = vpop.f32.mrf.mxu1  ;;  %v5948_v27 = vadd.f32 %v5947_v50, %v5859_v59 }
 0x6b3   : > { %v6036_v3 = vpop.f32.mrf.mxu3  ;;  %v5773_v35 = vadd.f32 %v5772_v44, %v13421_v4 }
 0x6b4   : > { %v6037_v21 = vadd.f32 %v6036_v3, %v5948_v27 }
 0x6b5   : > { %6087 = vmatmul.bf16.gmra.mxu0 %v15784_v30  ;;  %6176 = vmatmul.bf16.gmra.mxu1 %v15785_v47  ;;  %v5862_v54 = vadd.f32 %v5861_v0, %v5773_v35  ;;  %v15788_v35 = vld [vmem:[#allocation67_spill] sm:$0xff] }
 0x6b6   : > { %vm8292_vm15 = vcmp.ge.f32.partialorder %v6037_v21, 0.0  ;;  %v8421_v7 = vmul.f32 %v15735_v19, %v6037_v21  ;;  %6265 = vmatmul.bf16.gmra.mxu2 %v15786_v33  ;;  %v10598_v30 = vld [vmem:[#allocation6 + $0x714] sm:$0xf0] }
 0x6b7   : > { %6354 = vmatmul.bf16.gmra.mxu3 %v15787_v40 }
 0x6b8   : > { %v8549_v41 = vsel %vm8292_vm15, %v6037_v21, %v8421_v7  ;;  %v15789_v7 = vld [vmem:[#allocation68_spill] sm:$0xff] }
 0x6b9   : > { %8677 = vst [vmem:[%s12768_s27 + $0x328] sm:$0xff] %v8549_v41  ;;  %v5950_v13 = vpop.f32.mrf.mxu2 }
 0x6ba   : > { %v5774_v43 = vpop.f32.mrf.mxu0  ;;  %v5863_v14 = vpop.f32.mrf.mxu1  ;;  %v5951_v59 = vadd.f32 %v5950_v13, %v5862_v54 }
 0x6bb   : > { %v6039_v31 = vpop.f32.mrf.mxu3  ;;  %v5775_v4 = vadd.f32 %v5774_v43, %v13426_v20  ;;  %v15790_v43 = vld [vmem:[#allocation71_spill] sm:$0xff] }
 0x6bc   : > { %v6040_v50 = vadd.f32 %v6039_v31, %v5951_v59 }
 0x6bd   : > { %v5864_v28 = vadd.f32 %v5863_v14, %v5775_v4  ;;  %v15791_v14 = vld [vmem:[#allocation72_spill] sm:$0xff] }
 0x6be   : > { %vm8296_vm0 = vcmp.ge.f32.partialorder %v6040_v50, 0.0  ;;  %v8425_v44 = vmul.f32 %v15735_v19, %v6040_v50 }
 0x6c0   : > { %v8553_v3 = vsel %vm8296_vm0, %v6040_v50, %v8425_v44 }
 0x6c1   : > { %8681 = vst [vmem:[%s12768_s27 + $0x348] sm:$0xff] %v8553_v3  ;;  %v5952_v17 = vpop.f32.mrf.mxu2  ;;  %v9653_v3 = vld [vmem:[#allocation6 + $0x668] sm:$0xf] }
 0x6c2   : > { %v5777_v56 = vpop.f32.mrf.mxu0  ;;  %v5866_v27 = vpop.f32.mrf.mxu1  ;;  %v5953_v21 = vadd.f32 %v5952_v17, %v5864_v28  ;;  %v10578_v28 = vld [vmem:[#allocation6 + $0x674] sm:$0xf0] }
 0x6c3   : > { %v6041_v0 = vpop.f32.mrf.mxu3  ;;  %v5778_v54 = vadd.f32 %v5777_v56, %v13431_v62  ;;  %v10514_v62 = vld [vmem:[#allocation6 + $0x474] sm:$0xf0]  ;;  %v9781_v56 = vld [vmem:[#allocation6 + $0x768] sm:$0xf] }
 0x6c4   : > { %v6042_v41 = vadd.f32 %v6041_v0, %v5953_v21  ;;  %v9654_v0 = vor.u32 %v10578_v28, %v9653_v3  ;;  %v9397_v21 = vld [vmem:[#allocation6 + $0x468] sm:$0xf] }
 0x6c5   : > { %6092 = vmatmul.bf16.gmra.mxu0 %v15788_v35  ;;  %6181 = vmatmul.bf16.gmra.mxu1 %v15789_v7  ;;  %v5867_v31 = vadd.f32 %v5866_v27, %v5778_v54  ;;  %v9398_v7 = vor.u32 %v10514_v62, %v9397_v21  ;;  %v10610_v35 = vld [vmem:[#allocation6 + $0x774] sm:$0xf0]  ;;  %v15794_v62 = vld [vmem:[#allocation77_spill] sm:$0xff] }
 0x6c6   : > { %vm8300_vm1 = vcmp.ge.f32.partialorder %v6042_v41, 0.0  ;;  %v8429_v20 = vmul.f32 %v15735_v19, %v6042_v41  ;;  %6270 = vmatmul.bf16.gmra.mxu2 %v15790_v43  ;;  %v9782_v27 = vor.u32 %v10610_v35, %v9781_v56  ;;  %v10546_v54 = vld [vmem:[#allocation6 + $0x574] sm:$0xf0]  ;;  %v15793_v35 = vld [vmem:[#allocation74_spill] sm:$0xff] }
 0x6c7   : > { %6359 = vmatmul.bf16.gmra.mxu3 %v15791_v14  ;;  %6592 = vmatpush.bf16.msrb.mxu2 %v9654_v0 }
 0x6c8   : > { %v8557_v13 = vsel %vm8300_vm1, %v6042_v41, %v8429_v20  ;;  %v9525_v41 = vld [vmem:[#allocation6 + $0x568] sm:$0xf]  ;;  %6414 = vmatpush.bf16.msrb.mxu0 %v9398_v7  ;;  %6681 = vmatpush.bf16.msrb.mxu3 %v9782_v27 }
 0x6c9   : > { %8685 = vst [vmem:[%s12768_s27 + $0x368] sm:$0xff] %v8557_v13  ;;  %v5955_v4 = vpop.f32.mrf.mxu2  ;;  %v9526_v20 = vor.u32 %v10546_v54, %v9525_v41 }
 0x6ca   : > { %v5779_v59 = vpop.f32.mrf.mxu0  ;;  %v5868_v50 = vpop.f32.mrf.mxu1  ;;  %v5956_v17 = vadd.f32 %v5955_v4, %v5867_v31 }
 0x6cb   : > { %v6044_v44 = vpop.f32.mrf.mxu3  ;;  %v5780_v14 = vadd.f32 %v5779_v59, %v13436_v22  ;;  %6503 = vmatpush.bf16.msrb.mxu1 %v9526_v20  ;;  %v15792_v59 = vld [vmem:[#allocation73_spill] sm:$0xff] }
 0x6cc   : > { %v6045_v40 = vadd.f32 %v6044_v44, %v5956_v17 }
 0x6cd   : > { %v5869_v4 = vadd.f32 %v5868_v50, %v5780_v14 }
 0x6ce   : > { %vm8304_vm2 = vcmp.ge.f32.partialorder %v6045_v40, 0.0  ;;  %v8433_v13 = vmul.f32 %v15735_v19, %v6045_v40 }
 0x6d0   : > { %v8561_v31 = vsel %vm8304_vm2, %v6045_v40, %v8433_v13  ;;  %v15795_v40 = vld [vmem:[#allocation78_spill] sm:$0xff] }
 0x6d1   : > { %8689 = vst [vmem:[%s12768_s27 + $0x388] sm:$0xff] %v8561_v31  ;;  %v5957_v44 = vpop.f32.mrf.mxu2 }
 0x6d2   : > { %v5782_v3 = vpop.f32.mrf.mxu0  ;;  %v5871_v28 = vpop.f32.mrf.mxu1  ;;  %v5958_v22 = vadd.f32 %v5957_v44, %v5869_v4 }
 0x6d3   : > { %v6046_v17 = vpop.f32.mrf.mxu3  ;;  %v5783_v0 = vadd.f32 %v5782_v3, %v13441_v15  ;;  %v10831_v15 = vld [vmem:[#allocation8] sm:$0xf] }
 0x6d4   : > { %v6047_v7 = vadd.f32 %v6046_v17, %v5958_v22  ;;  %v13601_v4 = vperm.slane %v10831_v15, 2 }
 0x6d5   : > { %6097 = vmatmul.bf16.gmra.mxu0 %v15792_v59  ;;  %6186 = vmatmul.bf16.gmra.mxu1 %v15793_v35  ;;  %v5872_v50 = vadd.f32 %v5871_v28, %v5783_v0 }
 0x6d6   : > { %vm8308_vm3 = vcmp.ge.f32.partialorder %v6047_v7, 0.0  ;;  %v8437_v21 = vmul.f32 %v15735_v19, %v6047_v7  ;;  %6275 = vmatmul.bf16.gmra.mxu2 %v15794_v62  ;;  %v10542_v62 = vld [vmem:[#allocation6 + $0x554] sm:$0xf0] }
 0x6d7   : > { %6364 = vmatmul.bf16.gmra.mxu3 %v15795_v40 }
 0x6d8   : > { %v8565_v14 = vsel %vm8308_vm3, %v6047_v7, %v8437_v21 }
 0x6d9   : > { %8693 = vst [vmem:[%s12768_s27 + $0x3a8] sm:$0xff] %v8565_v14  ;;  %v5960_v41 = vpop.f32.mrf.mxu2 }
 0x6da   : > { %v5784_v56 = vpop.f32.mrf.mxu0  ;;  %v5873_v27 = vpop.f32.mrf.mxu1  ;;  %v5961_v20 = vadd.f32 %v5960_v41, %v5872_v50  ;;  %v15796_v41 = vld [vmem:[#allocation83_spill] sm:$0xff] }
 0x6db   : > { %v6049_v54 = vpop.f32.mrf.mxu3  ;;  %v5785_v31 = vadd.f32 %v5784_v56, %v13445_v8  ;;  %v15797_v8 = vld [vmem:[#allocation84_spill] sm:$0xff] }
 0x6dc   : > { %v6050_v13 = vadd.f32 %v6049_v54, %v5961_v20  ;;  %v15798_v20 = vld [vmem:[#allocation87_spill] sm:$0xff] }
 0x6dd   : > { %v5874_v17 = vadd.f32 %v5873_v27, %v5785_v31  ;;  %v15799_v27 = vld [vmem:[#allocation88_spill] sm:$0xff]  ;;  %v10574_v31 = vld [vmem:[#allocation6 + $0x654] sm:$0xf0] }
 0x6de   : > { %vm8312_vm4 = vcmp.ge.f32.partialorder %v6050_v13, 0.0  ;;  %v8441_v3 = vmul.f32 %v15735_v19, %v6050_v13 }
 0x6e0   : > { %v8569_v44 = vsel %vm8312_vm4, %v6050_v13, %v8441_v3  ;;  %v9637_v13 = vld [vmem:[#allocation6 + $0x648] sm:$0xf] }
 0x6e1   : > { %8697 = vst [vmem:[%s12768_s27 + $0x3c8] sm:$0xff] %v8569_v44  ;;  %v5962_v7 = vpop.f32.mrf.mxu2  ;;  %v9638_v15 = vor.u32 %v10574_v31, %v9637_v13  ;;  %v9381_v3 = vld [vmem:[#allocation6 + $0x448] sm:$0xf]  ;;  %v10510_v44 = vld [vmem:[#allocation6 + $0x454] sm:$0xf0] }
 0x6e2   : > { %v6063_v22 = vpop.f32.mrf.mxu0  ;;  %v6152_v28 = vpop.f32.mrf.mxu1  ;;  %v5963_v14 = vadd.f32 %v5962_v7, %v5874_v17  ;;  %v9765_v17 = vld [vmem:[#allocation6 + $0x748] sm:$0xf] }
 0x6e3   : > { %v6051_v0 = vpop.f32.mrf.mxu3  ;;  %v6064_v21 = vadd.f32 %v6063_v22, %v13601_v4  ;;  %6593 = vmatpush.bf16.msrb.mxu2 %v9638_v15  ;;  %v9509_v31 = vld [vmem:[#allocation6 + $0x548] sm:$0xf]  ;;  %v15800_v15 = vld [vmem:[#allocation91_spill] sm:$0xff] }
 0x6e4   : > { %v6052_v56 = vadd.f32 %v6051_v0, %v5963_v14 }
 0x6e5   : > { %v6153_v50 = vadd.f32 %v6152_v28, %v6064_v21  ;;  %6102 = vmatmul.bf16.gmra.mxu0 %v15796_v41  ;;  %6191 = vmatmul.bf16.gmra.mxu1 %v15797_v8  ;;  %v9382_v21 = vor.u32 %v10510_v44, %v9381_v3  ;;  %v10606_v8 = vld [vmem:[#allocation6 + $0x754] sm:$0xf0] }
 0x6e6   : > { %vm8316_vm5 = vcmp.ge.f32.partialorder %v6052_v56, 0.0  ;;  %v8445_v54 = vmul.f32 %v15735_v19, %v6052_v56  ;;  %6280 = vmatmul.bf16.gmra.mxu2 %v15798_v20  ;;  %v9766_v20 = vor.u32 %v10606_v8, %v9765_v17  ;;  %v15803_v8 = vld [vmem:[#allocation95_spill] sm:$0xff] }
 0x6e7   : > { %6369 = vmatmul.bf16.gmra.mxu3 %v15799_v27  ;;  %6415 = vmatpush.bf16.msrb.mxu0 %v9382_v21 }
 0x6e8   : > { %v8573_v22 = vsel %vm8316_vm5, %v6052_v56, %v8445_v54  ;;  %6682 = vmatpush.bf16.msrb.mxu3 %v9766_v20  ;;  %v9510_v56 = vor.u32 %v10542_v62, %v9509_v31 }
 0x6e9   : > { %8701 = vst [vmem:[%s12768_s27 + $0x3e8] sm:$0xff] %v8573_v22  ;;  %v6241_v0 = vpop.f32.mrf.mxu2 }
 0x6ea   : > { %v6065_v28 = vpop.f32.mrf.mxu0  ;;  %v6154_v7 = vpop.f32.mrf.mxu1  ;;  %v6242_v40 = vadd.f32 %v6241_v0, %v6153_v50  ;;  %6504 = vmatpush.bf16.msrb.mxu1 %v9510_v56  ;;  %v15801_v50 = vld [vmem:[#allocation92_spill] sm:$0xff] }
 0x6eb   : > { %v6330_v14 = vpop.f32.mrf.mxu3  ;;  %v6066_v41 = vadd.f32 %v6065_v28, %v13601_v4 }
 0x6ec   : > { %v13613_v13 = vadd.f32 %v6330_v14, %v6242_v40  ;;  %v15802_v40 = vld [vmem:[#allocation94_spill] sm:$0xff] }
 0x6ed   : > { %v6155_v27 = vadd.f32 %v6154_v7, %v6066_v41 }
 0x6f1   : > { %v6243_v44 = vpop.f32.mrf.mxu2 }
 0x6f2   : > { %v6068_v54 = vpop.f32.mrf.mxu0  ;;  %v6157_v3 = vpop.f32.mrf.mxu1  ;;  %v6244_v59 = vadd.f32 %v6243_v44, %v6155_v27 }
 0x6f3   : > { %v6332_v22 = vpop.f32.mrf.mxu3  ;;  %v6069_v35 = vadd.f32 %v6068_v54, %v13601_v4 }
 0x6f4   : > { %v13618_v41 = vadd.f32 %v6332_v22, %v6244_v59  ;;  %v15804_v22 = vld [vmem:[#allocation102_spill] sm:$0xff] }
 0x6f5   : > { %v6158_v28 = vadd.f32 %v6157_v3, %v6069_v35  ;;  %6107 = vmatmul.bf16.gmra.mxu0 %v15800_v15  ;;  %6196 = vmatmul.bf16.gmra.mxu1 %v15801_v50  ;;  %v15806_v50 = vld [vmem:[#allocation106_spill] sm:$0xff]  ;;  %v10602_v15 = vld [vmem:[#allocation6 + $0x734] sm:$0xf0] }
 0x6f6   : > { %6285 = vmatmul.bf16.gmra.mxu2 %v15802_v40 }
 0x6f7   : > { %6374 = vmatmul.bf16.gmra.mxu3 %v15803_v8  ;;  %v15805_v8 = vld [vmem:[#allocation103_spill] sm:$0xff] }
 0x6f9   : > { %v6246_v17 = vpop.f32.mrf.mxu2 }
 0x6fa   : > { %v6070_v62 = vpop.f32.mrf.mxu0  ;;  %v6159_v20 = vpop.f32.mrf.mxu1  ;;  %v6247_v0 = vadd.f32 %v6246_v17, %v6158_v28  ;;  %v15807_v28 = vld [vmem:[#allocation107_spill] sm:$0xff]  ;;  %v9365_v17 = vld [vmem:[#allocation6 + $0x428] sm:$0xf] }
 0x6fb   : > { %v6335_v7 = vpop.f32.mrf.mxu3  ;;  %v6071_v21 = vadd.f32 %v6070_v62, %v13601_v4  ;;  %v9621_v62 = vld [vmem:[#allocation6 + $0x628] sm:$0xf] }
 0x6fc   : > { %v13623_v27 = vadd.f32 %v6335_v7, %v6247_v0  ;;  %v9749_v0 = vld [vmem:[#allocation6 + $0x728] sm:$0xf] }
 0x6fd   : > { %v6160_v14 = vadd.f32 %v6159_v20, %v6071_v21  ;;  %v10570_v20 = vld [vmem:[#allocation6 + $0x634] sm:$0xf0] }
 0x6fe   : > { %v9622_v7 = vor.u32 %v10570_v20, %v9621_v62  ;;  %v10506_v21 = vld [vmem:[#allocation6 + $0x434] sm:$0xf0] }
 0x6ff   : > { %v10538_v62 = vld [vmem:[#allocation6 + $0x534] sm:$0xf0] }
 0x700   : > { %6594 = vmatpush.bf16.msrb.mxu2 %v9622_v7 }
 0x701   : > { %v6248_v56 = vpop.f32.mrf.mxu2 }
 0x702   : > { %v6073_v35 = vpop.f32.mrf.mxu0  ;;  %v6162_v31 = vpop.f32.mrf.mxu1  ;;  %v6249_v3 = vadd.f32 %v6248_v56, %v6160_v14  ;;  %v9750_v56 = vor.u32 %v10602_v15, %v9749_v0 }
 0x703   : > { %v6337_v54 = vpop.f32.mrf.mxu3  ;;  %v6074_v59 = vadd.f32 %v6073_v35, %v13601_v4 }
 0x704   : > { %v13628_v40 = vadd.f32 %v6337_v54, %v6249_v3  ;;  %6683 = vmatpush.bf16.msrb.mxu3 %v9750_v56 }
 0x705   : > { %v6163_v44 = vadd.f32 %v6162_v31, %v6074_v59  ;;  %6112 = vmatmul.bf16.gmra.mxu0 %v15804_v22  ;;  %6201 = vmatmul.bf16.gmra.mxu1 %v15805_v8  ;;  %v9366_v31 = vor.u32 %v10506_v21, %v9365_v17  ;;  %v9493_v8 = vld [vmem:[#allocation6 + $0x528] sm:$0xf] }
 0x706   : > { %6290 = vmatmul.bf16.gmra.mxu2 %v15806_v50  ;;  %v9494_v20 = vor.u32 %v10538_v62, %v9493_v8 }
 0x707   : > { %6379 = vmatmul.bf16.gmra.mxu3 %v15807_v28  ;;  %6416 = vmatpush.bf16.msrb.mxu0 %v9366_v31 }
 0x708   : > { %6505 = vmatpush.bf16.msrb.mxu1 %v9494_v20 }
 0x709   : > { %v6251_v59 = vpop.f32.mrf.mxu2 }
 0x70a   : > { %v6075_v35 = vpop.f32.mrf.mxu0  ;;  %v6164_v14 = vpop.f32.mrf.mxu1  ;;  %v6252_v3 = vadd.f32 %v6251_v59, %v6163_v44  ;;  %v15809_v44 = vld [vmem:[#allocation111_spill] sm:$0xff] }
 0x70b   : > { %v6340_v22 = vpop.f32.mrf.mxu3  ;;  %v6076_v54 = vadd.f32 %v6075_v35, %v13601_v4  ;;  %v15808_v35 = vld [vmem:[#allocation110_spill] sm:$0xff] }
 0x70c   : > { %v13633_v50 = vadd.f32 %v6340_v22, %v6252_v3  ;;  %v15810_v22 = vld [vmem:[#allocation114_spill] sm:$0xff] }
 0x70d   : > { %v6165_v28 = vadd.f32 %v6164_v14, %v6076_v54  ;;  %v15811_v14 = vld [vmem:[#allocation115_spill] sm:$0xff] }
 0x711   : > { %v6253_v47 = vpop.f32.mrf.mxu2 }
 0x712   : > { %v6078_v43 = vpop.f32.mrf.mxu0  ;;  %v6167_v33 = vpop.f32.mrf.mxu1  ;;  %v6254_v21 = vadd.f32 %v6253_v47, %v6165_v28 }
 0x713   : > { %v6342_v17 = vpop.f32.mrf.mxu3  ;;  %v6079_v15 = vadd.f32 %v6078_v43, %v13601_v4 }
 0x714   : > { %v13638_v7 = vadd.f32 %v6342_v17, %v6254_v21 }
 0x715   : > { %v6168_v0 = vadd.f32 %v6167_v33, %v6079_v15  ;;  %6117 = vmatmul.bf16.gmra.mxu0 %v15808_v35  ;;  %6206 = vmatmul.bf16.gmra.mxu1 %v15809_v44  ;;  %v15814_v35 = vld [vmem:[#allocation125_spill] sm:$0xff] }
 0x716   : > { %6295 = vmatmul.bf16.gmra.mxu2 %v15810_v22  ;;  %v15812_v22 = vld [vmem:[#allocation122_spill] sm:$0xff] }
 0x717   : > { %6384 = vmatmul.bf16.gmra.mxu3 %v15811_v14  ;;  %v15813_v14 = vld [vmem:[#allocation123_spill] sm:$0xff] }
 0x719   : > { %v6256_v56 = vpop.f32.mrf.mxu2 }
 0x71a   : > { %v6080_v8 = vpop.f32.mrf.mxu0  ;;  %v6169_v31 = vpop.f32.mrf.mxu1  ;;  %v6257_v3 = vadd.f32 %v6256_v56, %v6168_v0  ;;  %v15815_v0 = vld [vmem:[#allocation126_spill] sm:$0xff]  ;;  %v9349_v56 = vld [vmem:[#allocation6 + $0x408] sm:$0xf] }
 0x71b   : > { %v6345_v59 = vpop.f32.mrf.mxu3  ;;  %v6081_v54 = vadd.f32 %v6080_v8, %v13601_v4  ;;  %v9605_v8 = vld [vmem:[#allocation6 + $0x608] sm:$0xf] }
 0x71c   : > { %v13643_v47 = vadd.f32 %v6345_v59, %v6257_v3  ;;  %v9733_v3 = vld [vmem:[#allocation6 + $0x708] sm:$0xf] }
 0x71d   : > { %v6170_v43 = vadd.f32 %v6169_v31, %v6081_v54  ;;  %v10566_v31 = vld [vmem:[#allocation6 + $0x614] sm:$0xf0] }
 0x71e   : > { %v9606_v59 = vor.u32 %v10566_v31, %v9605_v8  ;;  %v10502_v54 = vld [vmem:[#allocation6 + $0x414] sm:$0xf0] }
 0x71f   : > { %v10534_v8 = vld [vmem:[#allocation6 + $0x514] sm:$0xf0] }
 0x720   : > { %6595 = vmatpush.bf16.msrb.mxu2 %v9606_v59 }
 0x721   : > { %v6258_v62 = vpop.f32.mrf.mxu2 }
 0x722   : > { %v6083_v33 = vpop.f32.mrf.mxu0  ;;  %v6172_v28 = vpop.f32.mrf.mxu1  ;;  %v6259_v15 = vadd.f32 %v6258_v62, %v6170_v43  ;;  %v9734_v62 = vor.u32 %v10598_v30, %v9733_v3 }
 0x723   : > { %v6347_v20 = vpop.f32.mrf.mxu3  ;;  %v6084_v17 = vadd.f32 %v6083_v33, %v13601_v4 }
 0x724   : > { %v13648_v44 = vadd.f32 %v6347_v20, %v6259_v15  ;;  %6684 = vmatpush.bf16.msrb.mxu3 %v9734_v62 }
 0x725   : > { %v6173_v21 = vadd.f32 %v6172_v28, %v6084_v17  ;;  %6122 = vmatmul.bf16.gmra.mxu0 %v15812_v22  ;;  %6211 = vmatmul.bf16.gmra.mxu1 %v15813_v14  ;;  %v9350_v28 = vor.u32 %v10502_v54, %v9349_v56  ;;  %v9477_v14 = vld [vmem:[#allocation6 + $0x508] sm:$0xf] }
 0x726   : > { %6300 = vmatmul.bf16.gmra.mxu2 %v15814_v35  ;;  %v9478_v31 = vor.u32 %v10534_v8, %v9477_v14 }
 0x727   : > { %6389 = vmatmul.bf16.gmra.mxu3 %v15815_v0  ;;  %6417 = vmatpush.bf16.msrb.mxu0 %v9350_v28 }
 0x728   : > { %6506 = vmatpush.bf16.msrb.mxu1 %v9478_v31 }
 0x729   : > { %v6261_v17 = vpop.f32.mrf.mxu2 }
 0x72a   : > { %v6085_v33 = vpop.f32.mrf.mxu0  ;;  %v6174_v43 = vpop.f32.mrf.mxu1  ;;  %v6262_v15 = vadd.f32 %v6261_v17, %v6173_v21  ;;  %v15817_v21 = vld [vmem:[#allocation132_spill] sm:$0xff] }
 0x72b   : > { %v6350_v22 = vpop.f32.mrf.mxu3  ;;  %v6086_v20 = vadd.f32 %v6085_v33, %v13601_v4  ;;  %v15816_v33 = vld [vmem:[#allocation131_spill] sm:$0xff] }
 0x72c   : > { %v13653_v35 = vadd.f32 %v6350_v22, %v6262_v15  ;;  %v15818_v22 = vld [vmem:[#allocation133_spill] sm:$0xff] }
 0x72d   : > { %v6175_v0 = vadd.f32 %v6174_v43, %v6086_v20  ;;  %v15819_v43 = vld [vmem:[#allocation135_spill] sm:$0xff] }
 0x731   : > { %v6263_v57 = vpop.f32.mrf.mxu2 }
 0x732   : > { %v6088_v18 = vpop.f32.mrf.mxu0  ;;  %v6177_v53 = vpop.f32.mrf.mxu1  ;;  %v6264_v54 = vadd.f32 %v6263_v57, %v6175_v0 }
 0x733   : > { %v6352_v56 = vpop.f32.mrf.mxu3  ;;  %v6089_v30 = vadd.f32 %v6088_v18, %v13601_v4 }
 0x734   : > { %v13658_v59 = vadd.f32 %v6352_v56, %v6264_v54 }
 0x735   : > { %v6178_v3 = vadd.f32 %v6177_v53, %v6089_v30  ;;  %6127 = vmatmul.bf16.gmra.mxu0 %v15816_v33  ;;  %6216 = vmatmul.bf16.gmra.mxu1 %v15817_v21  ;;  %v15822_v33 = vld [vmem:[#allocation143_spill] sm:$0xff] }
 0x736   : > { %6305 = vmatmul.bf16.gmra.mxu2 %v15818_v22  ;;  %v15820_v22 = vld [vmem:[#allocation137_spill] sm:$0xff] }
 0x737   : > { %6394 = vmatmul.bf16.gmra.mxu3 %v15819_v43  ;;  %v15821_v43 = vld [vmem:[#allocation138_spill] sm:$0xff] }
 0x739   : > { %v6266_v62 = vpop.f32.mrf.mxu2 }
 0x73a   : > { %v6090_v14 = vpop.f32.mrf.mxu0  ;;  %v6179_v28 = vpop.f32.mrf.mxu1  ;;  %v6267_v15 = vadd.f32 %v6266_v62, %v6178_v3  ;;  %v15823_v3 = vld [vmem:[#allocation144_spill] sm:$0xff]  ;;  %v9973_v62 = vld [vmem:[#allocation6 + $0x8e8] sm:$0xf] }
 0x73b   : > { %v6355_v17 = vpop.f32.mrf.mxu3  ;;  %v6091_v20 = vadd.f32 %v6090_v14, %v13601_v4  ;;  %v10229_v14 = vld [vmem:[#allocation6 + $0xae8] sm:$0xf] }
 0x73c   : > { %v13663_v57 = vadd.f32 %v6355_v17, %v6267_v15  ;;  %v10357_v15 = vld [vmem:[#allocation6 + $0xbe8] sm:$0xf] }
 0x73d   : > { %v6180_v18 = vadd.f32 %v6179_v28, %v6091_v20  ;;  %v10722_v28 = vld [vmem:[#allocation6 + $0xaf4] sm:$0xf0] }
 0x73e   : > { %v10230_v17 = vor.u32 %v10722_v28, %v10229_v14  ;;  %v10658_v20 = vld [vmem:[#allocation6 + $0x8f4] sm:$0xf0] }
 0x73f   : > { %v10690_v14 = vld [vmem:[#allocation6 + $0x9f4] sm:$0xf0] }
 0x740   : > { %6944 = vmatpush.bf16.msra.mxu2 %v10230_v17 }
 0x741   : > { %v6268_v8 = vpop.f32.mrf.mxu2 }
 0x742   : > { %v6093_v53 = vpop.f32.mrf.mxu0  ;;  %v6182_v0 = vpop.f32.mrf.mxu1  ;;  %v6269_v30 = vadd.f32 %v6268_v8, %v6180_v18  ;;  %v10358_v8 = vor.u32 %v10754_v24, %v10357_v15 }
 0x743   : > { %v6357_v31 = vpop.f32.mrf.mxu3  ;;  %v6094_v56 = vadd.f32 %v6093_v53, %v13601_v4 }
 0x744   : > { %v13668_v21 = vadd.f32 %v6357_v31, %v6269_v30  ;;  %7033 = vmatpush.bf16.msra.mxu3 %v10358_v8 }
 0x745   : > { %v6183_v54 = vadd.f32 %v6182_v0, %v6094_v56  ;;  %6132 = vmatmul.bf16.gmra.mxu0 %v15820_v22  ;;  %6221 = vmatmul.bf16.gmra.mxu1 %v15821_v43  ;;  %v9974_v0 = vor.u32 %v10658_v20, %v9973_v62  ;;  %v10101_v43 = vld [vmem:[#allocation6 + $0x9e8] sm:$0xf] }
 0x746   : > { %6310 = vmatmul.bf16.gmra.mxu2 %v15822_v33  ;;  %v10102_v28 = vor.u32 %v10690_v14, %v10101_v43 }
 0x747   : > { %6399 = vmatmul.bf16.gmra.mxu3 %v15823_v3  ;;  %6766 = vmatpush.bf16.msra.mxu0 %v9974_v0 }
 0x748   : > { %6855 = vmatpush.bf16.msra.mxu1 %v10102_v28 }
 0x749   : > { %v6271_v56 = vpop.f32.mrf.mxu2 }
 0x74a   : > { %v6095_v53 = vpop.f32.mrf.mxu0  ;;  %v6184_v18 = vpop.f32.mrf.mxu1  ;;  %v6272_v30 = vadd.f32 %v6271_v56, %v6183_v54  ;;  %v15825_v54 = vld [vmem:[#allocation146_spill] sm:$0xff] }
 0x74b   : > { %v6360_v22 = vpop.f32.mrf.mxu3  ;;  %v6096_v31 = vadd.f32 %v6095_v53, %v13601_v4  ;;  %v15824_v53 = vld [vmem:[#allocation145_spill] sm:$0xff] }
 0x74c   : > { %v13673_v33 = vadd.f32 %v6360_v22, %v6272_v30  ;;  %v15826_v22 = vld [vmem:[#allocation147_spill] sm:$0xff] }
 0x74d   : > { %v6185_v3 = vadd.f32 %v6184_v18, %v6096_v31  ;;  %v15827_v18 = vld [vmem:[#allocation148_spill] sm:$0xff] }
 0x751   : > { %v6273_v34 = vpop.f32.mrf.mxu2 }
 0x752   : > { %v6098_v45 = vpop.f32.mrf.mxu0  ;;  %v6187_v39 = vpop.f32.mrf.mxu1  ;;  %v6274_v20 = vadd.f32 %v6273_v34, %v6185_v3 }
 0x753   : > { %v6362_v62 = vpop.f32.mrf.mxu3  ;;  %v6099_v24 = vadd.f32 %v6098_v45, %v13601_v4 }
 0x754   : > { %v13678_v17 = vadd.f32 %v6362_v62, %v6274_v20 }
 0x755   : > { %v6188_v15 = vadd.f32 %v6187_v39, %v6099_v24  ;;  %6137 = vmatmul.bf16.gmra.mxu0 %v15824_v53  ;;  %6226 = vmatmul.bf16.gmra.mxu1 %v15825_v54  ;;  %v15830_v53 = vld [vmem:[#allocation15_spill] sm:$0xff] }
 0x756   : > { %6315 = vmatmul.bf16.gmra.mxu2 %v15826_v22  ;;  %v15828_v22 = vld [vmem:[#allocation13_spill] sm:$0xff] }
 0x757   : > { %6404 = vmatmul.bf16.gmra.mxu3 %v15827_v18  ;;  %v15829_v18 = vld [vmem:[#allocation14_spill] sm:$0xff] }
 0x759   : > { %v6276_v8 = vpop.f32.mrf.mxu2 }
 0x75a   : > { %v6100_v43 = vpop.f32.mrf.mxu0  ;;  %v6189_v0 = vpop.f32.mrf.mxu1  ;;  %v6277_v30 = vadd.f32 %v6276_v8, %v6188_v15  ;;  %v15831_v15 = vld [vmem:[#allocation16_spill] sm:$0xff]  ;;  %v9957_v8 = vld [vmem:[#allocation6 + $0x8c8] sm:$0xf] }
 0x75b   : > { %v6365_v56 = vpop.f32.mrf.mxu3  ;;  %v6101_v31 = vadd.f32 %v6100_v43, %v13601_v4  ;;  %v10213_v43 = vld [vmem:[#allocation6 + $0xac8] sm:$0xf] }
 0x75c   : > { %v13683_v34 = vadd.f32 %v6365_v56, %v6277_v30  ;;  %v10341_v30 = vld [vmem:[#allocation6 + $0xbc8] sm:$0xf] }
 0x75d   : > { %v6190_v45 = vadd.f32 %v6189_v0, %v6101_v31  ;;  %v10718_v0 = vld [vmem:[#allocation6 + $0xad4] sm:$0xf0] }
 0x75e   : > { %v10214_v56 = vor.u32 %v10718_v0, %v10213_v43  ;;  %v10654_v31 = vld [vmem:[#allocation6 + $0x8d4] sm:$0xf0] }
 0x75f   : > { %v10686_v43 = vld [vmem:[#allocation6 + $0x9d4] sm:$0xf0] }
 0x760   : > { %6945 = vmatpush.bf16.msra.mxu2 %v10214_v56 }
 0x761   : > { %v6278_v14 = vpop.f32.mrf.mxu2 }
 0x762   : > { %v6103_v39 = vpop.f32.mrf.mxu0  ;;  %v6192_v3 = vpop.f32.mrf.mxu1  ;;  %v6279_v24 = vadd.f32 %v6278_v14, %v6190_v45  ;;  %v10342_v14 = vor.u32 %v10750_v2, %v10341_v30 }
 0x763   : > { %v6367_v28 = vpop.f32.mrf.mxu3  ;;  %v6104_v62 = vadd.f32 %v6103_v39, %v13601_v4 }
 0x764   : > { %v13688_v54 = vadd.f32 %v6367_v28, %v6279_v24  ;;  %7034 = vmatpush.bf16.msra.mxu3 %v10342_v14 }
 0x765   : > { %v6193_v20 = vadd.f32 %v6192_v3, %v6104_v62  ;;  %6418 = vmatmul.bf16.vlgmr.msrb.gmra.mxu0 %v15828_v22  ;;  %6507 = vmatmul.bf16.vlgmr.msrb.gmra.mxu1 %v15829_v18  ;;  %v9958_v3 = vor.u32 %v10654_v31, %v9957_v8  ;;  %v10085_v18 = vld [vmem:[#allocation6 + $0x9c8] sm:$0xf] }
 0x766   : > { %6596 = vmatmul.bf16.vlgmr.msrb.gmra.mxu2 %v15830_v53  ;;  %v10086_v0 = vor.u32 %v10686_v43, %v10085_v18 }
 0x767   : > { %6685 = vmatmul.bf16.vlgmr.msrb.gmra.mxu3 %v15831_v15  ;;  %6767 = vmatpush.bf16.msra.mxu0 %v9958_v3 }
 0x768   : > { %6856 = vmatpush.bf16.msra.mxu1 %v10086_v0 }
 0x769   : > { %v6281_v62 = vpop.f32.mrf.mxu2 }
 0x76a   : > { %v6105_v39 = vpop.f32.mrf.mxu0  ;;  %v6194_v45 = vpop.f32.mrf.mxu1  ;;  %v6282_v24 = vadd.f32 %v6281_v62, %v6193_v20  ;;  %v15833_v20 = vld [vmem:[#allocation20_spill] sm:$0xff] }
 0x76b   : > { %v6370_v22 = vpop.f32.mrf.mxu3  ;;  %v6106_v28 = vadd.f32 %v6105_v39, %v13601_v4  ;;  %v15832_v39 = vld [vmem:[#allocation19_spill] sm:$0xff] }
 0x76c   : > { %v13693_v53 = vadd.f32 %v6370_v22, %v6282_v24  ;;  %v15834_v22 = vld [vmem:[#allocation23_spill] sm:$0xff] }
 0x76d   : > { %v6195_v15 = vadd.f32 %v6194_v45, %v6106_v28  ;;  %v15835_v45 = vld [vmem:[#allocation24_spill] sm:$0xff] }
 0x771   : > { %v6283_v23 = vpop.f32.mrf.mxu2 }
 0x772   : > { %v6108_v1 = vpop.f32.mrf.mxu0  ;;  %v6197_v48 = vpop.f32.mrf.mxu1  ;;  %v6284_v31 = vadd.f32 %v6283_v23, %v6195_v15 }
 0x773   : > { %v6372_v8 = vpop.f32.mrf.mxu3  ;;  %v6109_v2 = vadd.f32 %v6108_v1, %v13601_v4 }
 0x774   : > { %v13698_v56 = vadd.f32 %v6372_v8, %v6284_v31 }
 0x775   : > { %v6198_v30 = vadd.f32 %v6197_v48, %v6109_v2  ;;  %6423 = vmatmul.bf16.gmra.mxu0 %v15832_v39  ;;  %6512 = vmatmul.bf16.gmra.mxu1 %v15833_v20  ;;  %v15838_v39 = vld [vmem:[#allocation30_spill] sm:$0xff] }
 0x776   : > { %6601 = vmatmul.bf16.gmra.mxu2 %v15834_v22  ;;  %v15836_v22 = vld [vmem:[#allocation25_spill] sm:$0xff] }
 0x777   : > { %6690 = vmatmul.bf16.gmra.mxu3 %v15835_v45  ;;  %v15837_v45 = vld [vmem:[#allocation26_spill] sm:$0xff] }
 0x779   : > { %v6286_v14 = vpop.f32.mrf.mxu2 }
 0x77a   : > { %v6110_v18 = vpop.f32.mrf.mxu0  ;;  %v6199_v3 = vpop.f32.mrf.mxu1  ;;  %v6287_v24 = vadd.f32 %v6286_v14, %v6198_v30  ;;  %v15839_v30 = vld [vmem:[#allocation32_spill] sm:$0xff]  ;;  %v9941_v14 = vld [vmem:[#allocation6 + $0x8a8] sm:$0xf] }
 0x77b   : > { %v6375_v62 = vpop.f32.mrf.mxu3  ;;  %v6111_v28 = vadd.f32 %v6110_v18, %v13601_v4  ;;  %v10197_v18 = vld [vmem:[#allocation6 + $0xaa8] sm:$0xf] }
 0x77c   : > { %v13703_v23 = vadd.f32 %v6375_v62, %v6287_v24  ;;  %v10325_v24 = vld [vmem:[#allocation6 + $0xba8] sm:$0xf] }
 0x77d   : > { %v6200_v1 = vadd.f32 %v6199_v3, %v6111_v28  ;;  %v10714_v3 = vld [vmem:[#allocation6 + $0xab4] sm:$0xf0] }
 0x77e   : > { %v10198_v62 = vor.u32 %v10714_v3, %v10197_v18  ;;  %v10650_v28 = vld [vmem:[#allocation6 + $0x8b4] sm:$0xf0] }
 0x77f   : > { %v10682_v18 = vld [vmem:[#allocation6 + $0x9b4] sm:$0xf0] }
 0x780   : > { %6946 = vmatpush.bf16.msra.mxu2 %v10198_v62 }
 0x781   : > { %v6288_v43 = vpop.f32.mrf.mxu2 }
 0x782   : > { %v6113_v48 = vpop.f32.mrf.mxu0  ;;  %v6202_v15 = vpop.f32.mrf.mxu1  ;;  %v6289_v2 = vadd.f32 %v6288_v43, %v6200_v1  ;;  %v10326_v43 = vor.u32 %v10746_v5, %v10325_v24 }
 0x783   : > { %v6377_v0 = vpop.f32.mrf.mxu3  ;;  %v6114_v8 = vadd.f32 %v6113_v48, %v13601_v4 }
 0x784   : > { %v13708_v20 = vadd.f32 %v6377_v0, %v6289_v2  ;;  %7035 = vmatpush.bf16.msra.mxu3 %v10326_v43 }
 0x785   : > { %v6203_v31 = vadd.f32 %v6202_v15, %v6114_v8  ;;  %6428 = vmatmul.bf16.gmra.mxu0 %v15836_v22  ;;  %6517 = vmatmul.bf16.gmra.mxu1 %v15837_v45  ;;  %v9942_v15 = vor.u32 %v10650_v28, %v9941_v14  ;;  %v10069_v45 = vld [vmem:[#allocation6 + $0x9a8] sm:$0xf] }
 0x786   : > { %6606 = vmatmul.bf16.gmra.mxu2 %v15838_v39  ;;  %v10070_v3 = vor.u32 %v10682_v18, %v10069_v45 }
 0x787   : > { %6695 = vmatmul.bf16.gmra.mxu3 %v15839_v30  ;;  %6768 = vmatpush.bf16.msra.mxu0 %v9942_v15 }
 0x788   : > { %6857 = vmatpush.bf16.msra.mxu1 %v10070_v3 }
 0x789   : > { %v6291_v8 = vpop.f32.mrf.mxu2 }
 0x78a   : > { %v6115_v48 = vpop.f32.mrf.mxu0  ;;  %v6204_v1 = vpop.f32.mrf.mxu1  ;;  %v6292_v2 = vadd.f32 %v6291_v8, %v6203_v31  ;;  %v15841_v31 = vld [vmem:[#allocation36_spill] sm:$0xff] }
 0x78b   : > { %v6380_v22 = vpop.f32.mrf.mxu3  ;;  %v6116_v0 = vadd.f32 %v6115_v48, %v13601_v4  ;;  %v15840_v48 = vld [vmem:[#allocation35_spill] sm:$0xff] }
 0x78c   : > { %v13713_v39 = vadd.f32 %v6380_v22, %v6292_v2  ;;  %v15842_v22 = vld [vmem:[#allocation37_spill] sm:$0xff] }
 0x78d   : > { %v6205_v30 = vadd.f32 %v6204_v1, %v6116_v0  ;;  %v15843_v1 = vld [vmem:[#allocation40_spill] sm:$0xff] }
 0x791   : > { %v6293_v58 = vpop.f32.mrf.mxu2 }
 0x792   : > { %v6118_v52 = vpop.f32.mrf.mxu0  ;;  %v6207_v9 = vpop.f32.mrf.mxu1  ;;  %v6294_v28 = vadd.f32 %v6293_v58, %v6205_v30 }
 0x793   : > { %v6382_v14 = vpop.f32.mrf.mxu3  ;;  %v6119_v5 = vadd.f32 %v6118_v52, %v13601_v4 }
 0x794   : > { %v13718_v62 = vadd.f32 %v6382_v14, %v6294_v28 }
 0x795   : > { %v6208_v24 = vadd.f32 %v6207_v9, %v6119_v5  ;;  %6433 = vmatmul.bf16.gmra.mxu0 %v15840_v48  ;;  %6522 = vmatmul.bf16.gmra.mxu1 %v15841_v31  ;;  %v15846_v48 = vld [vmem:[#allocation47_spill] sm:$0xff] }
 0x796   : > { %6611 = vmatmul.bf16.gmra.mxu2 %v15842_v22  ;;  %v15844_v22 = vld [vmem:[#allocation43_spill] sm:$0xff] }
 0x797   : > { %6700 = vmatmul.bf16.gmra.mxu3 %v15843_v1  ;;  %v15845_v1 = vld [vmem:[#allocation44_spill] sm:$0xff] }
 0x799   : > { %v6296_v43 = vpop.f32.mrf.mxu2 }
 0x79a   : > { %v6120_v45 = vpop.f32.mrf.mxu0  ;;  %v6209_v15 = vpop.f32.mrf.mxu1  ;;  %v6297_v2 = vadd.f32 %v6296_v43, %v6208_v24  ;;  %v15847_v24 = vld [vmem:[#allocation48_spill] sm:$0xff]  ;;  %v9925_v43 = vld [vmem:[#allocation6 + $0x888] sm:$0xf] }
 0x79b   : > { %v6385_v8 = vpop.f32.mrf.mxu3  ;;  %v6121_v0 = vadd.f32 %v6120_v45, %v13601_v4  ;;  %v10181_v45 = vld [vmem:[#allocation6 + $0xa88] sm:$0xf] }
 0x79c   : > { %v13723_v58 = vadd.f32 %v6385_v8, %v6297_v2  ;;  %v10309_v2 = vld [vmem:[#allocation6 + $0xb88] sm:$0xf] }
 0x79d   : > { %v6210_v52 = vadd.f32 %v6209_v15, %v6121_v0  ;;  %v10710_v15 = vld [vmem:[#allocation6 + $0xa94] sm:$0xf0] }
 0x79e   : > { %v10182_v8 = vor.u32 %v10710_v15, %v10181_v45  ;;  %v10646_v0 = vld [vmem:[#allocation6 + $0x894] sm:$0xf0] }
 0x79f   : > { %v10678_v45 = vld [vmem:[#allocation6 + $0x994] sm:$0xf0] }
 0x7a0   : > { %6947 = vmatpush.bf16.msra.mxu2 %v10182_v8 }
 0x7a1   : > { %v6298_v18 = vpop.f32.mrf.mxu2 }
 0x7a2   : > { %v6123_v9 = vpop.f32.mrf.mxu0  ;;  %v6212_v30 = vpop.f32.mrf.mxu1  ;;  %v6299_v5 = vadd.f32 %v6298_v18, %v6210_v52  ;;  %v10310_v18 = vor.u32 %v10742_v37, %v10309_v2 }
 0x7a3   : > { %v6387_v3 = vpop.f32.mrf.mxu3  ;;  %v6124_v14 = vadd.f32 %v6123_v9, %v13601_v4 }
 0x7a4   : > { %v13728_v31 = vadd.f32 %v6387_v3, %v6299_v5  ;;  %7036 = vmatpush.bf16.msra.mxu3 %v10310_v18 }
 0x7a5   : > { %v6213_v28 = vadd.f32 %v6212_v30, %v6124_v14  ;;  %6438 = vmatmul.bf16.gmra.mxu0 %v15844_v22  ;;  %6527 = vmatmul.bf16.gmra.mxu1 %v15845_v1  ;;  %v9926_v30 = vor.u32 %v10646_v0, %v9925_v43  ;;  %v10053_v1 = vld [vmem:[#allocation6 + $0x988] sm:$0xf] }
 0x7a6   : > { %6616 = vmatmul.bf16.gmra.mxu2 %v15846_v48  ;;  %v10054_v15 = vor.u32 %v10678_v45, %v10053_v1 }
 0x7a7   : > { %6705 = vmatmul.bf16.gmra.mxu3 %v15847_v24  ;;  %6769 = vmatpush.bf16.msra.mxu0 %v9926_v30 }
 0x7a8   : > { %6858 = vmatpush.bf16.msra.mxu1 %v10054_v15 }
 0x7a9   : > { %v6301_v14 = vpop.f32.mrf.mxu2 }
 0x7aa   : > { %v6125_v9 = vpop.f32.mrf.mxu0  ;;  %v6214_v52 = vpop.f32.mrf.mxu1  ;;  %v6302_v5 = vadd.f32 %v6301_v14, %v6213_v28  ;;  %v15849_v28 = vld [vmem:[#allocation50_spill] sm:$0xff] }
 0x7ab   : > { %v6390_v22 = vpop.f32.mrf.mxu3  ;;  %v6126_v3 = vadd.f32 %v6125_v9, %v13601_v4  ;;  %v15848_v9 = vld [vmem:[#allocation49_spill] sm:$0xff] }
 0x7ac   : > { %v13733_v48 = vadd.f32 %v6390_v22, %v6302_v5  ;;  %v15850_v22 = vld [vmem:[#allocation53_spill] sm:$0xff] }
 0x7ad   : > { %v6215_v24 = vadd.f32 %v6214_v52, %v6126_v3  ;;  %v15851_v52 = vld [vmem:[#allocation54_spill] sm:$0xff] }
 0x7b1   : > { %v6303_v61 = vpop.f32.mrf.mxu2 }
 0x7b2   : > { %v6128_v49 = vpop.f32.mrf.mxu0  ;;  %v6217_v16 = vpop.f32.mrf.mxu1  ;;  %v6304_v0 = vadd.f32 %v6303_v61, %v6215_v24 }
 0x7b3   : > { %v6392_v43 = vpop.f32.mrf.mxu3  ;;  %v6129_v37 = vadd.f32 %v6128_v49, %v13601_v4 }
 0x7b4   : > { %v13738_v8 = vadd.f32 %v6392_v43, %v6304_v0 }
 0x7b5   : > { %v6218_v2 = vadd.f32 %v6217_v16, %v6129_v37  ;;  %6443 = vmatmul.bf16.gmra.mxu0 %v15848_v9  ;;  %6532 = vmatmul.bf16.gmra.mxu1 %v15849_v28  ;;  %v15854_v9 = vld [vmem:[#allocation63_spill] sm:$0xff] }
 0x7b6   : > { %6621 = vmatmul.bf16.gmra.mxu2 %v15850_v22  ;;  %v15852_v22 = vld [vmem:[#allocation59_spill] sm:$0xff] }
 0x7b7   : > { %6710 = vmatmul.bf16.gmra.mxu3 %v15851_v52  ;;  %v15853_v52 = vld [vmem:[#allocation60_spill] sm:$0xff] }
 0x7b9   : > { %v6306_v18 = vpop.f32.mrf.mxu2 }
 0x7ba   : > { %v6130_v1 = vpop.f32.mrf.mxu0  ;;  %v6219_v30 = vpop.f32.mrf.mxu1  ;;  %v6307_v5 = vadd.f32 %v6306_v18, %v6218_v2  ;;  %v15855_v2 = vld [vmem:[#allocation64_spill] sm:$0xff]  ;;  %v9909_v18 = vld [vmem:[#allocation6 + $0x868] sm:$0xf] }
 0x7bb   : > { %v6395_v14 = vpop.f32.mrf.mxu3  ;;  %v6131_v3 = vadd.f32 %v6130_v1, %v13601_v4  ;;  %v10165_v1 = vld [vmem:[#allocation6 + $0xa68] sm:$0xf] }
 0x7bc   : > { %v13743_v61 = vadd.f32 %v6395_v14, %v6307_v5  ;;  %v10293_v5 = vld [vmem:[#allocation6 + $0xb68] sm:$0xf] }
 0x7bd   : > { %v6220_v49 = vadd.f32 %v6219_v30, %v6131_v3  ;;  %v10706_v30 = vld [vmem:[#allocation6 + $0xa74] sm:$0xf0] }
 0x7be   : > { %v10166_v14 = vor.u32 %v10706_v30, %v10165_v1  ;;  %v10642_v3 = vld [vmem:[#allocation6 + $0x874] sm:$0xf0] }
 0x7bf   : > { %v10674_v1 = vld [vmem:[#allocation6 + $0x974] sm:$0xf0] }
 0x7c0   : > { %6948 = vmatpush.bf16.msra.mxu2 %v10166_v14 }
 0x7c1   : > { %v6308_v45 = vpop.f32.mrf.mxu2 }
 0x7c2   : > { %v6133_v16 = vpop.f32.mrf.mxu0  ;;  %v6222_v24 = vpop.f32.mrf.mxu1  ;;  %v6309_v37 = vadd.f32 %v6308_v45, %v6220_v49  ;;  %v10294_v45 = vor.u32 %v10738_v55, %v10293_v5 }
 0x7c3   : > { %v6397_v15 = vpop.f32.mrf.mxu3  ;;  %v6134_v43 = vadd.f32 %v6133_v16, %v13601_v4 }
 0x7c4   : > { %v13748_v28 = vadd.f32 %v6397_v15, %v6309_v37  ;;  %7037 = vmatpush.bf16.msra.mxu3 %v10294_v45 }
 0x7c5   : > { %v6223_v0 = vadd.f32 %v6222_v24, %v6134_v43  ;;  %6448 = vmatmul.bf16.gmra.mxu0 %v15852_v22  ;;  %6537 = vmatmul.bf16.gmra.mxu1 %v15853_v52  ;;  %v9910_v24 = vor.u32 %v10642_v3, %v9909_v18  ;;  %v10037_v52 = vld [vmem:[#allocation6 + $0x968] sm:$0xf] }
 0x7c6   : > { %6626 = vmatmul.bf16.gmra.mxu2 %v15854_v9  ;;  %v10038_v30 = vor.u32 %v10674_v1, %v10037_v52 }
 0x7c7   : > { %6715 = vmatmul.bf16.gmra.mxu3 %v15855_v2  ;;  %6770 = vmatpush.bf16.msra.mxu0 %v9910_v24 }
 0x7c8   : > { %6859 = vmatpush.bf16.msra.mxu1 %v10038_v30 }
 0x7c9   : > { %v6311_v43 = vpop.f32.mrf.mxu2 }
 0x7ca   : > { %v6135_v16 = vpop.f32.mrf.mxu0  ;;  %v6224_v49 = vpop.f32.mrf.mxu1  ;;  %v6312_v37 = vadd.f32 %v6311_v43, %v6223_v0  ;;  %v15857_v0 = vld [vmem:[#allocation66_spill] sm:$0xff] }
 0x7cb   : > { %v6400_v22 = vpop.f32.mrf.mxu3  ;;  %v6136_v15 = vadd.f32 %v6135_v16, %v13601_v4  ;;  %v15856_v16 = vld [vmem:[#allocation65_spill] sm:$0xff] }
 0x7cc   : > { %v13753_v9 = vadd.f32 %v6400_v22, %v6312_v37  ;;  %v15858_v22 = vld [vmem:[#allocation69_spill] sm:$0xff] }
 0x7cd   : > { %v6225_v2 = vadd.f32 %v6224_v49, %v6136_v15  ;;  %v15859_v49 = vld [vmem:[#allocation70_spill] sm:$0xff] }
 0x7d1   : > { %v6313_v6 = vpop.f32.mrf.mxu2 }
 0x7d2   : > { %v6138_v63 = vpop.f32.mrf.mxu0  ;;  %v6227_v25 = vpop.f32.mrf.mxu1  ;;  %v6314_v3 = vadd.f32 %v6313_v6, %v6225_v2 }
 0x7d3   : > { %v6402_v18 = vpop.f32.mrf.mxu3  ;;  %v6139_v55 = vadd.f32 %v6138_v63, %v13601_v4 }
 0x7d4   : > { %v13758_v14 = vadd.f32 %v6402_v18, %v6314_v3 }
 0x7d5   : > { %v6228_v5 = vadd.f32 %v6227_v25, %v6139_v55  ;;  %6453 = vmatmul.bf16.gmra.mxu0 %v15856_v16  ;;  %6542 = vmatmul.bf16.gmra.mxu1 %v15857_v0  ;;  %v15862_v16 = vld [vmem:[#allocation79_spill] sm:$0xff] }
 0x7d6   : > { %6631 = vmatmul.bf16.gmra.mxu2 %v15858_v22  ;;  %v15860_v22 = vld [vmem:[#allocation75_spill] sm:$0xff] }
 0x7d7   : > { %6720 = vmatmul.bf16.gmra.mxu3 %v15859_v49  ;;  %v15861_v49 = vld [vmem:[#allocation76_spill] sm:$0xff] }
 0x7d9   : > { %v6316_v45 = vpop.f32.mrf.mxu2 }
 0x7da   : > { %v6140_v52 = vpop.f32.mrf.mxu0  ;;  %v6229_v24 = vpop.f32.mrf.mxu1  ;;  %v6317_v37 = vadd.f32 %v6316_v45, %v6228_v5  ;;  %v10149_v5 = vld [vmem:[#allocation6 + $0xa48] sm:$0xf] }
 0x7db   : > { %v6405_v43 = vpop.f32.mrf.mxu3  ;;  %v6141_v15 = vadd.f32 %v6140_v52, %v13601_v4  ;;  %v15863_v4 = vld [vmem:[#allocation80_spill] sm:$0xff]  ;;  %v10702_v52 = vld [vmem:[#allocation6 + $0xa54] sm:$0xf0] }
 0x7dc   : > { %v13763_v6 = vadd.f32 %v6405_v43, %v6317_v37  ;;  %v10150_v45 = vor.u32 %v10702_v52, %v10149_v5  ;;  %v10638_v43 = vld [vmem:[#allocation6 + $0x854] sm:$0xf0] }
 0x7dd   : > { %v6230_v63 = vadd.f32 %v6229_v24, %v6141_v15  ;;  %v9893_v24 = vld [vmem:[#allocation6 + $0x848] sm:$0xf]  ;;  %v10734_v37 = vld [vmem:[#allocation6 + $0xb54] sm:$0xf0] }
 0x7de   : > { %v10277_v15 = vld [vmem:[#allocation6 + $0xb48] sm:$0xf]  ;;  %6949 = vmatpush.bf16.msra.mxu2 %v10150_v45  ;;  %v10670_v5 = vld [vmem:[#allocation6 + $0x954] sm:$0xf0] }
 0x7e1   : > { %v6318_v1 = vpop.f32.mrf.mxu2 }
 0x7e2   : > { %v6419_v25 = vpop.f32.mrf.mxu0  ;;  %v6508_v2 = vpop.f32.mrf.mxu1  ;;  %v6319_v55 = vadd.f32 %v6318_v1, %v6230_v63 }
 0x7e3   : > { %v6407_v30 = vpop.f32.mrf.mxu3  ;;  %v6420_v18 = vadd.f32 %v6419_v25, %v13613_v13  ;;  %v9894_v25 = vor.u32 %v10638_v43, %v9893_v24 }
 0x7e4   : > { %v13768_v0 = vadd.f32 %v6407_v30, %v6319_v55 }
 0x7e5   : > { %v6509_v3 = vadd.f32 %v6508_v2, %v6420_v18  ;;  %6458 = vmatmul.bf16.gmra.mxu0 %v15860_v22  ;;  %6547 = vmatmul.bf16.gmra.mxu1 %v15861_v49  ;;  %v10278_v2 = vor.u32 %v10734_v37, %v10277_v15  ;;  %v10021_v49 = vld [vmem:[#allocation6 + $0x948] sm:$0xf] }
 0x7e6   : > { %6636 = vmatmul.bf16.gmra.mxu2 %v15862_v16  ;;  %6771 = vmatpush.bf16.msra.mxu0 %v9894_v25  ;;  %v10022_v52 = vor.u32 %v10670_v5, %v10021_v49  ;;  %v15865_v5 = vld [vmem:[#allocation90_spill] sm:$0xff] }
 0x7e7   : > { %6725 = vmatmul.bf16.gmra.mxu3 %v15863_v4 }
 0x7e8   : > { %7038 = vmatpush.bf16.msra.mxu3 %v10278_v2  ;;  %6860 = vmatpush.bf16.msra.mxu1 %v10022_v52  ;;  %v15866_v52 = vld [vmem:[#allocation93_spill] sm:$0xff] }
 0x7e9   : > { %v6597_v1 = vpop.f32.mrf.mxu2 }
 0x7ea   : > { %v6421_v13 = vpop.f32.mrf.mxu0  ;;  %v6510_v63 = vpop.f32.mrf.mxu1  ;;  %v6598_v55 = vadd.f32 %v6597_v1, %v6509_v3  ;;  %v15864_v3 = vld [vmem:[#allocation86_spill] sm:$0xff] }
 0x7eb   : > { %v6686_v18 = vpop.f32.mrf.mxu3  ;;  %v6422_v30 = vadd.f32 %v6421_v13, %v13618_v41 }
 0x7ec   : > { %v13773_v16 = vadd.f32 %v6686_v18, %v6598_v55 }
 0x7ed   : > { %v6511_v4 = vadd.f32 %v6510_v63, %v6422_v30 }
 0x7f1   : > { %v6599_v32 = vpop.f32.mrf.mxu2 }
 0x7f2   : > { %v6424_v22 = vpop.f32.mrf.mxu0  ;;  %v6513_v42 = vpop.f32.mrf.mxu1  ;;  %v6600_v15 = vadd.f32 %v6599_v32, %v6511_v4 }
 0x7f3   : > { %v6688_v24 = vpop.f32.mrf.mxu3  ;;  %v6425_v43 = vadd.f32 %v6424_v22, %v13623_v27 }
 0x7f4   : > { %v13778_v41 = vadd.f32 %v6688_v24, %v6600_v15  ;;  %v10133_v15 = vld [vmem:[#allocation6 + $0xa28] sm:$0xf] }
 0x7f5   : > { %v6514_v37 = vadd.f32 %v6513_v42, %v6425_v43  ;;  %6463 = vmatmul.bf16.gmra.mxu0 %v15461_v36  ;;  %6552 = vmatmul.bf16.gmra.mxu1 %v15463_v38  ;;  %v15867_v43 = vld [vmem:[#allocation96_spill] sm:$0xff] }
 0x7f6   : > { %6641 = vmatmul.bf16.gmra.mxu2 %v15466_v10 }
 0x7f7   : > { %6730 = vmatmul.bf16.gmra.mxu3 %v15864_v3 }
 0x7f9   : > { %v6602_v13 = vpop.f32.mrf.mxu2 }
 0x7fa   : > { %v6426_v49 = vpop.f32.mrf.mxu0  ;;  %v6515_v45 = vpop.f32.mrf.mxu1  ;;  %v6603_v2 = vadd.f32 %v6602_v13, %v6514_v37  ;;  %v10698_v37 = vld [vmem:[#allocation6 + $0xa34] sm:$0xf0] }
 0x7fb   : > { %v6691_v63 = vpop.f32.mrf.mxu3  ;;  %v6427_v25 = vadd.f32 %v6426_v49, %v13628_v40  ;;  %v15868_v40 = vld [vmem:[#allocation97_spill] sm:$0xff]  ;;  %v10634_v13 = vld [vmem:[#allocation6 + $0x834] sm:$0xf0] }
 0x7fc   : > { %v13783_v32 = vadd.f32 %v6691_v63, %v6603_v2  ;;  %v9877_v49 = vld [vmem:[#allocation6 + $0x828] sm:$0xf] }
 0x7fd   : > { %v6516_v27 = vadd.f32 %v6515_v45, %v6427_v25  ;;  %v10134_v45 = vor.u32 %v10698_v37, %v10133_v15  ;;  %v10261_v63 = vld [vmem:[#allocation6 + $0xb28] sm:$0xf]  ;;  %v10730_v25 = vld [vmem:[#allocation6 + $0xb34] sm:$0xf0] }
 0x7fe   : > { %v10666_v15 = vld [vmem:[#allocation6 + $0x934] sm:$0xf0] }
 0x7ff   : > { %6950 = vmatpush.bf16.msra.mxu2 %v10134_v45 }
 0x801   : > { %v6604_v4 = vpop.f32.mrf.mxu2 }
 0x802   : > { %v6429_v42 = vpop.f32.mrf.mxu0  ;;  %v6518_v22 = vpop.f32.mrf.mxu1  ;;  %v6605_v30 = vadd.f32 %v6604_v4, %v6516_v27  ;;  %v9878_v27 = vor.u32 %v10634_v13, %v9877_v49 }
 0x803   : > { %v6693_v1 = vpop.f32.mrf.mxu3  ;;  %v6430_v18 = vadd.f32 %v6429_v42, %v13633_v50  ;;  %v10262_v42 = vor.u32 %v10730_v25, %v10261_v63 }
 0x804   : > { %v13788_v24 = vadd.f32 %v6693_v1, %v6605_v30  ;;  %6772 = vmatpush.bf16.msra.mxu0 %v9878_v27 }
 0x805   : > { %v6519_v55 = vadd.f32 %v6518_v22, %v6430_v18  ;;  %6468 = vmatmul.bf16.gmra.mxu0 %v15865_v5  ;;  %6557 = vmatmul.bf16.gmra.mxu1 %v15866_v52 }
 0x806   : > { %6646 = vmatmul.bf16.gmra.mxu2 %v15867_v43  ;;  %7039 = vmatpush.bf16.msra.mxu3 %v10262_v42  ;;  %v10005_v43 = vld [vmem:[#allocation6 + $0x928] sm:$0xf] }
 0x807   : > { %6735 = vmatmul.bf16.gmra.mxu3 %v15868_v40  ;;  %v10006_v37 = vor.u32 %v10666_v15, %v10005_v43  ;;  %v15869_v15 = vld [vmem:[#allocation116_spill] sm:$0xff] }
 0x809   : > { %v6607_v22 = vpop.f32.mrf.mxu2  ;;  %6861 = vmatpush.bf16.msra.mxu1 %v10006_v37  ;;  %v10117_v37 = vld [vmem:[#allocation6 + $0xa08] sm:$0xf] }
 0x80a   : > { %v6431_v50 = vpop.f32.mrf.mxu0  ;;  %v6520_v2 = vpop.f32.mrf.mxu1  ;;  %v6608_v18 = vadd.f32 %v6607_v22, %v6519_v55 }
 0x80b   : > { %v6696_v4 = vpop.f32.mrf.mxu3  ;;  %v6432_v1 = vadd.f32 %v6431_v50, %v13638_v7 }
 0x80c   : > { %v13793_v40 = vadd.f32 %v6696_v4, %v6608_v18 }
 0x80d   : > { %v6521_v30 = vadd.f32 %v6520_v2, %v6432_v1 }
 0x811   : > { %v6609_v3 = vpop.f32.mrf.mxu2 }
 0x812   : > { %v6434_v52 = vpop.f32.mrf.mxu0  ;;  %v6523_v5 = vpop.f32.mrf.mxu1  ;;  %v6610_v63 = vadd.f32 %v6609_v3, %v6521_v30 }
 0x813   : > { %v6698_v49 = vpop.f32.mrf.mxu3  ;;  %v6435_v13 = vadd.f32 %v6434_v52, %v13643_v47 }
 0x814   : > { %v13798_v7 = vadd.f32 %v6698_v49, %v6610_v63  ;;  %v10694_v49 = vld [vmem:[#allocation6 + $0xa14] sm:$0xf0] }
 0x815   : > { %v6524_v25 = vadd.f32 %v6523_v5, %v6435_v13  ;;  %6473 = vmatmul.bf16.gmra.mxu0 %v15303_v29  ;;  %6562 = vmatmul.bf16.gmra.mxu1 %v15304_v60  ;;  %v9861_v13 = vld [vmem:[#allocation6 + $0x808] sm:$0xf]  ;;  %v10118_v63 = vor.u32 %v10694_v49, %v10117_v37 }
 0x816   : > { %6651 = vmatmul.bf16.gmra.mxu2 %v15500_v26 }
 0x817   : > { %6740 = vmatmul.bf16.gmra.mxu3 %v15687_v11  ;;  %6951 = vmatpush.bf16.msra.mxu2 %v10118_v63  ;;  %v15872_v63 = vld [vmem:[#allocation124_spill] sm:$0xff] }
 0x819   : > { %v6612_v45 = vpop.f32.mrf.mxu2 }
 0x81a   : > { %v6436_v55 = vpop.f32.mrf.mxu0  ;;  %v6525_v43 = vpop.f32.mrf.mxu1  ;;  %v6613_v27 = vadd.f32 %v6612_v45, %v6524_v25  ;;  %v10630_v25 = vld [vmem:[#allocation6 + $0x814] sm:$0xf0] }
 0x81b   : > { %v6701_v50 = vpop.f32.mrf.mxu3  ;;  %v6437_v2 = vadd.f32 %v6436_v55, %v13648_v44  ;;  %v15870_v44 = vld [vmem:[#allocation117_spill] sm:$0xff] }
 0x81c   : > { %v13803_v3 = vadd.f32 %v6701_v50, %v6613_v27  ;;  %v10245_v55 = vld [vmem:[#allocation6 + $0xb08] sm:$0xf]  ;;  %v9862_v50 = vor.u32 %v10630_v25, %v9861_v13 }
 0x81d   : > { %v6526_v47 = vadd.f32 %v6525_v43, %v6437_v2  ;;  %v10726_v43 = vld [vmem:[#allocation6 + $0xb14] sm:$0xf0] }
 0x81e   : > { %v10246_v2 = vor.u32 %v10726_v43, %v10245_v55  ;;  %6773 = vmatpush.bf16.msra.mxu0 %v9862_v50 }
 0x820   : > { %7040 = vmatpush.bf16.msra.mxu3 %v10246_v2 }
 0x821   : > { %v6614_v42 = vpop.f32.mrf.mxu2 }
 0x822   : > { %v6439_v5 = vpop.f32.mrf.mxu0  ;;  %v6528_v52 = vpop.f32.mrf.mxu1  ;;  %v6615_v1 = vadd.f32 %v6614_v42, %v6526_v47 }
 0x823   : > { %v6703_v22 = vpop.f32.mrf.mxu3  ;;  %v6440_v4 = vadd.f32 %v6439_v5, %v13653_v35 }
 0x824   : > { %v13808_v30 = vadd.f32 %v6703_v22, %v6615_v1  ;;  %v10662_v1 = vld [vmem:[#allocation6 + $0x914] sm:$0xf0] }
 0x825   : > { %v6529_v18 = vadd.f32 %v6528_v52, %v6440_v4  ;;  %6478 = vmatmul.bf16.gmra.mxu0 %v15513_v51  ;;  %6567 = vmatmul.bf16.gmra.mxu1 %v15515_v12  ;;  %v9989_v4 = vld [vmem:[#allocation6 + $0x908] sm:$0xf] }
 0x826   : > { %6656 = vmatmul.bf16.gmra.mxu2 %v15869_v15  ;;  %v9990_v37 = vor.u32 %v10662_v1, %v9989_v4 }
 0x827   : > { %6745 = vmatmul.bf16.gmra.mxu3 %v15870_v44 }
 0x828   : > { %6862 = vmatpush.bf16.msra.mxu1 %v9990_v37 }
 0x829   : > { %v6617_v27 = vpop.f32.mrf.mxu2 }
 0x82a   : > { %v6441_v35 = vpop.f32.mrf.mxu0  ;;  %v6530_v45 = vpop.f32.mrf.mxu1  ;;  %v6618_v52 = vadd.f32 %v6617_v27, %v6529_v18 }
 0x82b   : > { %v6706_v47 = vpop.f32.mrf.mxu3  ;;  %v6442_v5 = vadd.f32 %v6441_v35, %v13658_v59  ;;  %v15871_v59 = vld [vmem:[#allocation121_spill] sm:$0xff]  ;;  %v15873_v35 = vld [vmem:[#allocation127_spill] sm:$0xff] }
 0x82c   : > { %v13813_v22 = vadd.f32 %v6706_v47, %v6618_v52 }
 0x82d   : > { %v6531_v42 = vadd.f32 %v6530_v45, %v6442_v5 }
 0x831   : > { %v6619_v15 = vpop.f32.mrf.mxu2 }
 0x832   : > { %v6444_v49 = vpop.f32.mrf.mxu0  ;;  %v6533_v44 = vpop.f32.mrf.mxu1  ;;  %v6620_v55 = vadd.f32 %v6619_v15, %v6531_v42 }
 0x833   : > { %v6708_v13 = vpop.f32.mrf.mxu3  ;;  %v6445_v25 = vadd.f32 %v6444_v49, %v13663_v57 }
 0x834   : > { %v13818_v18 = vadd.f32 %v6708_v13, %v6620_v55  ;;  %v15874_v13 = vld [vmem:[#allocation129_spill] sm:$0xff] }
 0x835   : > { %v6534_v43 = vadd.f32 %v6533_v44, %v6445_v25  ;;  %6483 = vmatmul.bf16.gmra.mxu0 %v11979_v46  ;;  %6572 = vmatmul.bf16.gmra.mxu1 %v15871_v59  ;;  %v15875_v25 = vld [vmem:[#allocation130_spill] sm:$0xff] }
 0x836   : > { %6661 = vmatmul.bf16.gmra.mxu2 %v15872_v63  ;;  %v15910_v46 = vld [vmem:[#allocation154_spill] sm:$0xff] }
 0x837   : > { %6750 = vmatmul.bf16.gmra.mxu3 %v15873_v35  ;;  %v15876_v35 = vld [vmem:[#allocation134_spill] sm:$0xff] }
 0x839   : > { %v6622_v2 = vpop.f32.mrf.mxu2 }
 0x83a   : > { %v6446_v45 = vpop.f32.mrf.mxu0  ;;  %v6535_v50 = vpop.f32.mrf.mxu1  ;;  %v6623_v5 = vadd.f32 %v6622_v2, %v6534_v43  ;;  %v10464_v43 = vld [vmem:[#allocation6 + $0x2ec] sm:$0xf] }
 0x83b   : > { %v6711_v27 = vpop.f32.mrf.mxu3  ;;  %v6447_v47 = vadd.f32 %v6446_v45, %v13668_v21  ;;  %v15877_v21 = vld [vmem:[#allocation136_spill] sm:$0xff] }
 0x83c   : > { %v13823_v15 = vadd.f32 %v6711_v27, %v6623_v5  ;;  %v9207_v45 = vld [vmem:[#allocation6 + $0x2f8] sm:$0xf0] }
 0x83d   : > { %v6536_v57 = vadd.f32 %v6535_v50, %v6447_v47  ;;  %v10400_v50 = vld [vmem:[#allocation6 + $0xec] sm:$0xf]  ;;  %v9210_v2 = vor.u32 %v10464_v43, %v9207_v45  ;;  %v8951_v27 = vld [vmem:[#allocation6 + $0xf8] sm:$0xf0] }
 0x83e   : > { %v10496_v47 = vld [vmem:[#allocation6 + $0x3ec] sm:$0xf]  ;;  %v9335_v5 = vld [vmem:[#allocation6 + $0x3f8] sm:$0xf0] }
 0x83f   : > { %7300 = vmatpush.bf16.msrb.mxu2 %v9210_v2  ;;  %v9079_v43 = vld [vmem:[#allocation6 + $0x1f8] sm:$0xf0] }
 0x841   : > { %v6624_v42 = vpop.f32.mrf.mxu2 }
 0x842   : > { %v6449_v44 = vpop.f32.mrf.mxu0  ;;  %v6538_v52 = vpop.f32.mrf.mxu1  ;;  %v6625_v37 = vadd.f32 %v6624_v42, %v6536_v57 }
 0x843   : > { %v6713_v4 = vpop.f32.mrf.mxu3  ;;  %v6450_v1 = vadd.f32 %v6449_v44, %v13673_v33  ;;  %v8954_v44 = vor.u32 %v10400_v50, %v8951_v27 }
 0x844   : > { %v13828_v55 = vadd.f32 %v6713_v4, %v6625_v37 }
 0x845   : > { %v6539_v49 = vadd.f32 %v6538_v52, %v6450_v1  ;;  %6488 = vmatmul.bf16.gmra.mxu0 %v15874_v13  ;;  %6577 = vmatmul.bf16.gmra.mxu1 %v15875_v25  ;;  %v9338_v52 = vor.u32 %v10496_v47, %v9335_v5  ;;  %v10432_v25 = vld [vmem:[#allocation6 + $0x1ec] sm:$0xf] }
 0x846   : > { %6666 = vmatmul.bf16.gmra.mxu2 %v15876_v35  ;;  %7122 = vmatpush.bf16.msrb.mxu0 %v8954_v44  ;;  %v9082_v45 = vor.u32 %v10432_v25, %v9079_v43 }
 0x847   : > { %6755 = vmatmul.bf16.gmra.mxu3 %v15877_v21 }
 0x848   : > { %7389 = vmatpush.bf16.msrb.mxu3 %v9338_v52  ;;  %7211 = vmatpush.bf16.msrb.mxu1 %v9082_v45 }
 0x849   : > { %v6627_v42 = vpop.f32.mrf.mxu2 }
 0x84a   : > { %v6451_v33 = vpop.f32.mrf.mxu0  ;;  %v6540_v57 = vpop.f32.mrf.mxu1  ;;  %v6628_v37 = vadd.f32 %v6627_v42, %v6539_v49  ;;  %v15879_v49 = vld [vmem:[#allocation140_spill] sm:$0xff] }
 0x84b   : > { %v6716_v1 = vpop.f32.mrf.mxu3  ;;  %v6452_v4 = vadd.f32 %v6451_v33, %v13678_v17  ;;  %v15878_v17 = vld [vmem:[#allocation139_spill] sm:$0xff]  ;;  %v15880_v33 = vld [vmem:[#allocation141_spill] sm:$0xff] }
 0x84c   : > { %v13833_v35 = vadd.f32 %v6716_v1, %v6628_v37 }
 0x84d   : > { %v6541_v21 = vadd.f32 %v6540_v57, %v6452_v4  ;;  %v15881_v57 = vld [vmem:[#allocation142_spill] sm:$0xff] }
 0x851   : > { %v6629_v59 = vpop.f32.mrf.mxu2 }
 0x852   : > { %v6454_v13 = vpop.f32.mrf.mxu0  ;;  %v6543_v63 = vpop.f32.mrf.mxu1  ;;  %v6630_v47 = vadd.f32 %v6629_v59, %v6541_v21 }
 0x853   : > { %v6718_v50 = vpop.f32.mrf.mxu3  ;;  %v6455_v27 = vadd.f32 %v6454_v13, %v13683_v34 }
 0x854   : > { %v13838_v2 = vadd.f32 %v6718_v50, %v6630_v47  ;;  %v15883_v47 = vld [vmem:[#allocation156_spill] sm:$0xff] }
 0x855   : > { %v6544_v5 = vadd.f32 %v6543_v63, %v6455_v27  ;;  %6493 = vmatmul.bf16.gmra.mxu0 %v15878_v17  ;;  %6582 = vmatmul.bf16.gmra.mxu1 %v15879_v49  ;;  %v15882_v27 = vld [vmem:[#allocation128_spill] sm:$0xff] }
 0x856   : > { %6671 = vmatmul.bf16.gmra.mxu2 %v15880_v33  ;;  %v15884_v33 = vld [vmem:[#allocation157_spill] sm:$0xff] }
 0x857   : > { %6760 = vmatmul.bf16.gmra.mxu3 %v15881_v57 }
 0x859   : > { %v6632_v52 = vpop.f32.mrf.mxu2 }
 0x85a   : > { %v6456_v25 = vpop.f32.mrf.mxu0  ;;  %v6545_v44 = vpop.f32.mrf.mxu1  ;;  %v6633_v4 = vadd.f32 %v6632_v52, %v6544_v5  ;;  %v10460_v5 = vld [vmem:[#allocation6 + $0x2cc] sm:$0xf] }
 0x85b   : > { %v6721_v42 = vpop.f32.mrf.mxu3  ;;  %v6457_v1 = vadd.f32 %v6456_v25, %v13688_v54  ;;  %v15885_v54 = vld [vmem:[#allocation158_spill] sm:$0xff]  ;;  %v9191_v25 = vld [vmem:[#allocation6 + $0x2d8] sm:$0xf0] }
 0x85c   : > { %v13843_v59 = vadd.f32 %v6721_v42, %v6633_v4  ;;  %v9194_v52 = vor.u32 %v10460_v5, %v9191_v25  ;;  %v8935_v42 = vld [vmem:[#allocation6 + $0xd8] sm:$0xf0] }
 0x85d   : > { %v6546_v34 = vadd.f32 %v6545_v44, %v6457_v1  ;;  %v10396_v44 = vld [vmem:[#allocation6 + $0xcc] sm:$0xf]  ;;  %v9319_v4 = vld [vmem:[#allocation6 + $0x3d8] sm:$0xf0] }
 0x85e   : > { %v10492_v1 = vld [vmem:[#allocation6 + $0x3cc] sm:$0xf]  ;;  %7301 = vmatpush.bf16.msrb.mxu2 %v9194_v52  ;;  %v9063_v5 = vld [vmem:[#allocation6 + $0x1d8] sm:$0xf0] }
 0x861   : > { %v6634_v21 = vpop.f32.mrf.mxu2 }
 0x862   : > { %v6459_v63 = vpop.f32.mrf.mxu0  ;;  %v6548_v13 = vpop.f32.mrf.mxu1  ;;  %v6635_v45 = vadd.f32 %v6634_v21, %v6546_v34 }
 0x863   : > { %v6723_v37 = vpop.f32.mrf.mxu3  ;;  %v6460_v43 = vadd.f32 %v6459_v63, %v13693_v53  ;;  %v8938_v63 = vor.u32 %v10396_v44, %v8935_v42 }
 0x864   : > { %v13848_v57 = vadd.f32 %v6723_v37, %v6635_v45 }
 0x865   : > { %v6549_v50 = vadd.f32 %v6548_v13, %v6460_v43  ;;  %6774 = vmatmul.bf16.vlgmr.msra.gmra.mxu0 %v15882_v27  ;;  %6863 = vmatmul.bf16.vlgmr.msra.gmra.mxu1 %v15883_v47  ;;  %v9322_v13 = vor.u32 %v10492_v1, %v9319_v4  ;;  %v10428_v47 = vld [vmem:[#allocation6 + $0x1cc] sm:$0xf] }
 0x866   : > { %6952 = vmatmul.bf16.vlgmr.msra.gmra.mxu2 %v15884_v33  ;;  %7123 = vmatpush.bf16.msrb.mxu0 %v8938_v63  ;;  %v9066_v25 = vor.u32 %v10428_v47, %v9063_v5 }
 0x867   : > { %7041 = vmatmul.bf16.vlgmr.msra.gmra.mxu3 %v15885_v54 }
 0x868   : > { %7390 = vmatpush.bf16.msrb.mxu3 %v9322_v13  ;;  %7212 = vmatpush.bf16.msrb.mxu1 %v9066_v25 }
 0x869   : > { %v6637_v21 = vpop.f32.mrf.mxu2 }
 0x86a   : > { %v6461_v53 = vpop.f32.mrf.mxu0  ;;  %v6550_v34 = vpop.f32.mrf.mxu1  ;;  %v6638_v45 = vadd.f32 %v6637_v21, %v6549_v50  ;;  %v15887_v50 = vld [vmem:[#allocation160_spill] sm:$0xff] }
 0x86b   : > { %v6726_v43 = vpop.f32.mrf.mxu3  ;;  %v6462_v37 = vadd.f32 %v6461_v53, %v13698_v56  ;;  %v15886_v56 = vld [vmem:[#allocation159_spill] sm:$0xff]  ;;  %v15888_v53 = vld [vmem:[#allocation161_spill] sm:$0xff] }
 0x86c   : > { %v13853_v33 = vadd.f32 %v6726_v43, %v6638_v45 }
 0x86d   : > { %v6551_v54 = vadd.f32 %v6550_v34, %v6462_v37  ;;  %v15889_v34 = vld [vmem:[#allocation162_spill] sm:$0xff] }
 0x871   : > { %v6639_v17 = vpop.f32.mrf.mxu2 }
 0x872   : > { %v6464_v27 = vpop.f32.mrf.mxu0  ;;  %v6553_v49 = vpop.f32.mrf.mxu1  ;;  %v6640_v1 = vadd.f32 %v6639_v17, %v6551_v54 }
 0x873   : > { %v6728_v44 = vpop.f32.mrf.mxu3  ;;  %v6465_v42 = vadd.f32 %v6464_v27, %v13703_v23 }
 0x874   : > { %v13858_v52 = vadd.f32 %v6728_v44, %v6640_v1  ;;  %v15891_v1 = vld [vmem:[#allocation163_spill] sm:$0xff] }
 0x875   : > { %v6554_v4 = vadd.f32 %v6553_v49, %v6465_v42  ;;  %6779 = vmatmul.bf16.gmra.mxu0 %v15886_v56  ;;  %6868 = vmatmul.bf16.gmra.mxu1 %v15887_v50  ;;  %v15890_v42 = vld [vmem:[#allocation149_spill] sm:$0xff] }
 0x876   : > { %6957 = vmatmul.bf16.gmra.mxu2 %v15888_v53  ;;  %v15892_v53 = vld [vmem:[#allocation164_spill] sm:$0xff] }
 0x877   : > { %7046 = vmatmul.bf16.gmra.mxu3 %v15889_v34 }
 0x879   : > { %v6642_v13 = vpop.f32.mrf.mxu2 }
 0x87a   : > { %v6466_v47 = vpop.f32.mrf.mxu0  ;;  %v6555_v63 = vpop.f32.mrf.mxu1  ;;  %v6643_v37 = vadd.f32 %v6642_v13, %v6554_v4  ;;  %v10456_v4 = vld [vmem:[#allocation6 + $0x2ac] sm:$0xf] }
 0x87b   : > { %v6731_v21 = vpop.f32.mrf.mxu3  ;;  %v6467_v43 = vadd.f32 %v6466_v47, %v13708_v20  ;;  %v15893_v20 = vld [vmem:[#allocation165_spill] sm:$0xff]  ;;  %v9175_v47 = vld [vmem:[#allocation6 + $0x2b8] sm:$0xf0] }
 0x87c   : > { %v13863_v17 = vadd.f32 %v6731_v21, %v6643_v37  ;;  %v9178_v13 = vor.u32 %v10456_v4, %v9175_v47  ;;  %v8919_v21 = vld [vmem:[#allocation6 + $0xb8] sm:$0xf0] }
 0x87d   : > { %v6556_v23 = vadd.f32 %v6555_v63, %v6467_v43  ;;  %v10392_v63 = vld [vmem:[#allocation6 + $0xac] sm:$0xf]  ;;  %v9303_v37 = vld [vmem:[#allocation6 + $0x3b8] sm:$0xf0] }
 0x87e   : > { %v10488_v43 = vld [vmem:[#allocation6 + $0x3ac] sm:$0xf]  ;;  %7302 = vmatpush.bf16.msrb.mxu2 %v9178_v13  ;;  %v9047_v4 = vld [vmem:[#allocation6 + $0x1b8] sm:$0xf0] }
 0x881   : > { %v6644_v54 = vpop.f32.mrf.mxu2 }
 0x882   : > { %v6469_v49 = vpop.f32.mrf.mxu0  ;;  %v6558_v27 = vpop.f32.mrf.mxu1  ;;  %v6645_v25 = vadd.f32 %v6644_v54, %v6556_v23 }
 0x883   : > { %v6733_v45 = vpop.f32.mrf.mxu3  ;;  %v6470_v5 = vadd.f32 %v6469_v49, %v13713_v39  ;;  %v8922_v49 = vor.u32 %v10392_v63, %v8919_v21 }
 0x884   : > { %v13868_v34 = vadd.f32 %v6733_v45, %v6645_v25 }
 0x885   : > { %v6559_v44 = vadd.f32 %v6558_v27, %v6470_v5  ;;  %6784 = vmatmul.bf16.gmra.mxu0 %v15890_v42  ;;  %6873 = vmatmul.bf16.gmra.mxu1 %v15891_v1  ;;  %v9306_v27 = vor.u32 %v10488_v43, %v9303_v37  ;;  %v10424_v1 = vld [vmem:[#allocation6 + $0x1ac] sm:$0xf] }
 0x886   : > { %6962 = vmatmul.bf16.gmra.mxu2 %v15892_v53  ;;  %7124 = vmatpush.bf16.msrb.mxu0 %v8922_v49  ;;  %v9050_v47 = vor.u32 %v10424_v1, %v9047_v4 }
 0x887   : > { %7051 = vmatmul.bf16.gmra.mxu3 %v15893_v20 }
 0x888   : > { %7391 = vmatpush.bf16.msrb.mxu3 %v9306_v27  ;;  %7213 = vmatpush.bf16.msrb.mxu1 %v9050_v47 }
 0x889   : > { %v6647_v54 = vpop.f32.mrf.mxu2 }
 0x88a   : > { %v6471_v39 = vpop.f32.mrf.mxu0  ;;  %v6560_v23 = vpop.f32.mrf.mxu1  ;;  %v6648_v25 = vadd.f32 %v6647_v54, %v6559_v44  ;;  %v15895_v44 = vld [vmem:[#allocation167_spill] sm:$0xff] }
 0x88b   : > { %v6736_v5 = vpop.f32.mrf.mxu3  ;;  %v6472_v45 = vadd.f32 %v6471_v39, %v13718_v62  ;;  %v15894_v62 = vld [vmem:[#allocation166_spill] sm:$0xff]  ;;  %v15896_v39 = vld [vmem:[#allocation168_spill] sm:$0xff] }
 0x88c   : > { %v13873_v53 = vadd.f32 %v6736_v5, %v6648_v25 }
 0x88d   : > { %v6561_v20 = vadd.f32 %v6560_v23, %v6472_v45  ;;  %v15897_v23 = vld [vmem:[#allocation169_spill] sm:$0xff] }
 0x891   : > { %v6649_v56 = vpop.f32.mrf.mxu2 }
 0x892   : > { %v6474_v42 = vpop.f32.mrf.mxu0  ;;  %v6563_v50 = vpop.f32.mrf.mxu1  ;;  %v6650_v43 = vadd.f32 %v6649_v56, %v6561_v20 }
 0x893   : > { %v6738_v63 = vpop.f32.mrf.mxu3  ;;  %v6475_v21 = vadd.f32 %v6474_v42, %v13723_v58 }
 0x894   : > { %v13878_v13 = vadd.f32 %v6738_v63, %v6650_v43  ;;  %v15899_v43 = vld [vmem:[#allocation170_spill] sm:$0xff] }
 0x895   : > { %v6564_v37 = vadd.f32 %v6563_v50, %v6475_v21  ;;  %6789 = vmatmul.bf16.gmra.mxu0 %v15894_v62  ;;  %6878 = vmatmul.bf16.gmra.mxu1 %v15895_v44  ;;  %v15898_v21 = vld [vmem:[#allocation150_spill] sm:$0xff] }
 0x896   : > { %6967 = vmatmul.bf16.gmra.mxu2 %v15896_v39  ;;  %v15900_v39 = vld [vmem:[#allocation171_spill] sm:$0xff] }
 0x897   : > { %7056 = vmatmul.bf16.gmra.mxu3 %v15897_v23 }
 0x899   : > { %v6652_v27 = vpop.f32.mrf.mxu2 }
 0x89a   : > { %v6476_v1 = vpop.f32.mrf.mxu0  ;;  %v6565_v49 = vpop.f32.mrf.mxu1  ;;  %v6653_v45 = vadd.f32 %v6652_v27, %v6564_v37  ;;  %v10452_v37 = vld [vmem:[#allocation6 + $0x28c] sm:$0xf] }
 0x89b   : > { %v6741_v54 = vpop.f32.mrf.mxu3  ;;  %v6477_v5 = vadd.f32 %v6476_v1, %v13728_v31  ;;  %v15901_v31 = vld [vmem:[#allocation172_spill] sm:$0xff] }
 0x89c   : > { %v13883_v56 = vadd.f32 %v6741_v54, %v6653_v45  ;;  %v9159_v1 = vld [vmem:[#allocation6 + $0x298] sm:$0xf0] }
 0x89d   : > { %v6566_v58 = vadd.f32 %v6565_v49, %v6477_v5  ;;  %v10388_v49 = vld [vmem:[#allocation6 + $0x8c] sm:$0xf]  ;;  %v9162_v27 = vor.u32 %v10452_v37, %v9159_v1  ;;  %v8903_v54 = vld [vmem:[#allocation6 + $0x98] sm:$0xf0] }
 0x89e   : > { %v10484_v5 = vld [vmem:[#allocation6 + $0x38c] sm:$0xf]  ;;  %v9287_v45 = vld [vmem:[#allocation6 + $0x398] sm:$0xf0] }
 0x89f   : > { %7303 = vmatpush.bf16.msrb.mxu2 %v9162_v27  ;;  %v9031_v37 = vld [vmem:[#allocation6 + $0x198] sm:$0xf0] }
 0x8a1   : > { %v6654_v20 = vpop.f32.mrf.mxu2 }
 0x8a2   : > { %v6479_v50 = vpop.f32.mrf.mxu0  ;;  %v6568_v42 = vpop.f32.mrf.mxu1  ;;  %v6655_v47 = vadd.f32 %v6654_v20, %v6566_v58 }
 0x8a3   : > { %v6743_v25 = vpop.f32.mrf.mxu3  ;;  %v6480_v4 = vadd.f32 %v6479_v50, %v13733_v48  ;;  %v8906_v50 = vor.u32 %v10388_v49, %v8903_v54 }
 0x8a4   : > { %v13888_v23 = vadd.f32 %v6743_v25, %v6655_v47 }
 0x8a5   : > { %v6569_v63 = vadd.f32 %v6568_v42, %v6480_v4  ;;  %6794 = vmatmul.bf16.gmra.mxu0 %v15898_v21  ;;  %6883 = vmatmul.bf16.gmra.mxu1 %v15899_v43  ;;  %v9290_v42 = vor.u32 %v10484_v5, %v9287_v45  ;;  %v10420_v43 = vld [vmem:[#allocation6 + $0x18c] sm:$0xf] }
 0x8a6   : > { %6972 = vmatmul.bf16.gmra.mxu2 %v15900_v39  ;;  %7125 = vmatpush.bf16.msrb.mxu0 %v8906_v50  ;;  %v9034_v1 = vor.u32 %v10420_v43, %v9031_v37 }
 0x8a7   : > { %7061 = vmatmul.bf16.gmra.mxu3 %v15901_v31 }
 0x8a8   : > { %7392 = vmatpush.bf16.msrb.mxu3 %v9290_v42  ;;  %7214 = vmatpush.bf16.msrb.mxu1 %v9034_v1 }
 0x8a9   : > { %v6657_v20 = vpop.f32.mrf.mxu2 }
 0x8aa   : > { %v6481_v48 = vpop.f32.mrf.mxu0  ;;  %v6570_v58 = vpop.f32.mrf.mxu1  ;;  %v6658_v47 = vadd.f32 %v6657_v20, %v6569_v63  ;;  %v15903_v63 = vld [vmem:[#allocation174_spill] sm:$0xff] }
 0x8ab   : > { %v6746_v4 = vpop.f32.mrf.mxu3  ;;  %v6482_v25 = vadd.f32 %v6481_v48, %v13738_v8  ;;  %v15902_v8 = vld [vmem:[#allocation173_spill] sm:$0xff]  ;;  %v15904_v48 = vld [vmem:[#allocation151_spill] sm:$0xff] }
 0x8ac   : > { %v13893_v39 = vadd.f32 %v6746_v4, %v6658_v47 }
 0x8ad   : > { %v6571_v31 = vadd.f32 %v6570_v58, %v6482_v25  ;;  %v15905_v58 = vld [vmem:[#allocation175_spill] sm:$0xff] }
 0x8b1   : > { %v6659_v62 = vpop.f32.mrf.mxu2 }
 0x8b2   : > { %v6484_v21 = vpop.f32.mrf.mxu0  ;;  %v6573_v44 = vpop.f32.mrf.mxu1  ;;  %v6660_v5 = vadd.f32 %v6659_v62, %v6571_v31 }
 0x8b3   : > { %v6748_v49 = vpop.f32.mrf.mxu3  ;;  %v6485_v54 = vadd.f32 %v6484_v21, %v13743_v61 }
 0x8b4   : > { %v13898_v27 = vadd.f32 %v6748_v49, %v6660_v5  ;;  %v15907_v5 = vld [vmem:[#allocation176_spill] sm:$0xff] }
 0x8b5   : > { %v6574_v45 = vadd.f32 %v6573_v44, %v6485_v54  ;;  %6799 = vmatmul.bf16.gmra.mxu0 %v15902_v8  ;;  %6888 = vmatmul.bf16.gmra.mxu1 %v15903_v63  ;;  %v15906_v54 = vld [vmem:[#allocation152_spill] sm:$0xff]  ;;  %v10416_v8 = vld [vmem:[#allocation6 + $0x16c] sm:$0xf] }
 0x8b6   : > { %6977 = vmatmul.bf16.gmra.mxu2 %v15904_v48  ;;  %v15908_v48 = vld [vmem:[#allocation153_spill] sm:$0xff] }
 0x8b7   : > { %7066 = vmatmul.bf16.gmra.mxu3 %v15905_v58 }
 0x8b9   : > { %v6662_v42 = vpop.f32.mrf.mxu2 }
 0x8ba   : > { %v6486_v43 = vpop.f32.mrf.mxu0  ;;  %v6575_v50 = vpop.f32.mrf.mxu1  ;;  %v6663_v25 = vadd.f32 %v6662_v42, %v6574_v45  ;;  %v10448_v45 = vld [vmem:[#allocation6 + $0x26c] sm:$0xf] }
 0x8bb   : > { %v6751_v20 = vpop.f32.mrf.mxu3  ;;  %v6487_v4 = vadd.f32 %v6486_v43, %v13748_v28  ;;  %v15909_v28 = vld [vmem:[#allocation177_spill] sm:$0xff]  ;;  %v9143_v43 = vld [vmem:[#allocation6 + $0x278] sm:$0xf0] }
 0x8bc   : > { %v13903_v62 = vadd.f32 %v6751_v20, %v6663_v25  ;;  %v9146_v42 = vor.u32 %v10448_v45, %v9143_v43  ;;  %v8887_v20 = vld [vmem:[#allocation6 + $0x78] sm:$0xf0] }
 0x8bd   : > { %v6576_v61 = vadd.f32 %v6575_v50, %v6487_v4  ;;  %v10384_v50 = vld [vmem:[#allocation6 + $0x6c] sm:$0xf]  ;;  %v9271_v25 = vld [vmem:[#allocation6 + $0x378] sm:$0xf0] }
 0x8be   : > { %v10480_v4 = vld [vmem:[#allocation6 + $0x36c] sm:$0xf]  ;;  %7304 = vmatpush.bf16.msrb.mxu2 %v9146_v42  ;;  %v15912_v42 = vld [vmem:[#allocation155_spill] sm:$0xff] }
 0x8c1   : > { %v6664_v31 = vpop.f32.mrf.mxu2 }
 0x8c2   : > { %v6489_v44 = vpop.f32.mrf.mxu0  ;;  %v6578_v21 = vpop.f32.mrf.mxu1  ;;  %v6665_v1 = vadd.f32 %v6664_v31, %v6576_v61 }
 0x8c3   : > { %v6753_v47 = vpop.f32.mrf.mxu3  ;;  %v6490_v37 = vadd.f32 %v6489_v44, %v13753_v9  ;;  %v8890_v44 = vor.u32 %v10384_v50, %v8887_v20  ;;  %v9015_v50 = vld [vmem:[#allocation6 + $0x178] sm:$0xf0] }
 0x8c4   : > { %v13908_v58 = vadd.f32 %v6753_v47, %v6665_v1 }
 0x8c5   : > { %v6579_v49 = vadd.f32 %v6578_v21, %v6490_v37  ;;  %6804 = vmatmul.bf16.gmra.mxu0 %v15906_v54  ;;  %6893 = vmatmul.bf16.gmra.mxu1 %v15907_v5  ;;  %v9274_v21 = vor.u32 %v10480_v4, %v9271_v25  ;;  %v9018_v4 = vor.u32 %v10416_v8, %v9015_v50 }
 0x8c6   : > { %6982 = vmatmul.bf16.gmra.mxu2 %v15908_v48  ;;  %7126 = vmatpush.bf16.msrb.mxu0 %v8890_v44 }
 0x8c7   : > { %7071 = vmatmul.bf16.gmra.mxu3 %v15909_v28  ;;  %7215 = vmatpush.bf16.msrb.mxu1 %v9018_v4  ;;  %v15916_v4 = vld [vmem:[#allocation182_spill] sm:$0xff] }
 0x8c8   : > { %7393 = vmatpush.bf16.msrb.mxu3 %v9274_v21 }
 0x8c9   : > { %v6667_v31 = vpop.f32.mrf.mxu2 }
 0x8ca   : > { %v6491_v9 = vpop.f32.mrf.mxu0  ;;  %v6580_v61 = vpop.f32.mrf.mxu1  ;;  %v6668_v1 = vadd.f32 %v6667_v31, %v6579_v49 }
 0x8cb   : > { %v6756_v37 = vpop.f32.mrf.mxu3  ;;  %v6492_v47 = vadd.f32 %v6491_v9, %v13758_v14  ;;  %v15911_v14 = vld [vmem:[#allocation178_spill] sm:$0xff]  ;;  %v15913_v9 = vld [vmem:[#allocation179_spill] sm:$0xff] }
 0x8cc   : > { %v13913_v48 = vadd.f32 %v6756_v37, %v6668_v1 }
 0x8cd   : > { %v6581_v28 = vadd.f32 %v6580_v61, %v6492_v47 }
 0x8d1   : > { %v6669_v43 = vpop.f32.mrf.mxu2 }
 0x8d2   : > { %v6494_v5 = vpop.f32.mrf.mxu0  ;;  %v6583_v45 = vpop.f32.mrf.mxu1  ;;  %v6670_v20 = vadd.f32 %v6669_v43, %v6581_v28  ;;  %v15915_v43 = vld [vmem:[#allocation181_spill] sm:$0xff] }
 0x8d3   : > { %v6758_v54 = vpop.f32.mrf.mxu3  ;;  %v6495_v63 = vadd.f32 %v6494_v5, %v13763_v6 }
 0x8d4   : > { %v13918_v49 = vadd.f32 %v6758_v54, %v6670_v20 }
 0x8d5   : > { %v6584_v25 = vadd.f32 %v6583_v45, %v6495_v63  ;;  %6809 = vmatmul.bf16.gmra.mxu0 %v15910_v46  ;;  %6898 = vmatmul.bf16.gmra.mxu1 %v15911_v14  ;;  %v15914_v45 = vld [vmem:[#allocation180_spill] sm:$0xff] }
 0x8d6   : > { %6987 = vmatmul.bf16.gmra.mxu2 %v15912_v42  ;;  %v8999_v14 = vld [vmem:[#allocation6 + $0x158] sm:$0xf0] }
 0x8d7   : > { %7076 = vmatmul.bf16.gmra.mxu3 %v15913_v9  ;;  %v8871_v9 = vld [vmem:[#allocation6 + $0x58] sm:$0xf0] }
 0x8d9   : > { %v6672_v21 = vpop.f32.mrf.mxu2 }
 0x8da   : > { %v6496_v61 = vpop.f32.mrf.mxu0  ;;  %v6585_v44 = vpop.f32.mrf.mxu1  ;;  %v6673_v28 = vadd.f32 %v6672_v21, %v6584_v25 }
 0x8db   : > { %v6761_v6 = vpop.f32.mrf.mxu3  ;;  %v6497_v5 = vadd.f32 %v6496_v61, %v13768_v0  ;;  %v15917_v0 = vld [vmem:[#allocation183_spill] sm:$0xff] }
 0x8dc   : > { %v13923_v63 = vadd.f32 %v6761_v6, %v6673_v28  ;;  %v9127_v28 = vld [vmem:[#allocation6 + $0x258] sm:$0xf0] }
 0x8dd   : > { %v6586_v8 = vadd.f32 %v6585_v44, %v6497_v5  ;;  %v10444_v5 = vld [vmem:[#allocation6 + $0x24c] sm:$0xf] }
 0x8e1   : > { %v6674_v47 = vpop.f32.mrf.mxu2 }
 0x8e2   : > { %v6775_v31 = vpop.f32.mrf.mxu0  ;;  %v6864_v37 = vpop.f32.mrf.mxu1  ;;  %v6675_v1 = vadd.f32 %v6674_v47, %v6586_v8  ;;  %v10380_v8 = vld [vmem:[#allocation6 + $0x4c] sm:$0xf] }
 0x8e3   : > { %v6763_v54 = vpop.f32.mrf.mxu3  ;;  %v6776_v20 = vadd.f32 %v6775_v31, %v13773_v16 }
 0x8e4   : > { %v13927_v50 = vadd.f32 %v6763_v54, %v6675_v1  ;;  %v10476_v54 = vld [vmem:[#allocation6 + $0x34c] sm:$0xf]  ;;  %v9255_v1 = vld [vmem:[#allocation6 + $0x358] sm:$0xf0] }
 0x8e5   : > { %6814 = vmatmul.bf16.gmra.mxu0 %v15914_v45  ;;  %6903 = vmatmul.bf16.gmra.mxu1 %v15915_v43  ;;  %v6865_v25 = vadd.f32 %v6864_v37, %v6776_v20  ;;  %v9130_v45 = vor.u32 %v10444_v5, %v9127_v28  ;;  %v8874_v43 = vor.u32 %v10380_v8, %v8871_v9  ;;  %v10412_v28 = vld [vmem:[#allocation6 + $0x14c] sm:$0xf]  ;;  %v15918_v8 = vld [vmem:[#allocation81_spill] sm:$0xff] }
 0x8e6   : > { %6992 = vmatmul.bf16.gmra.mxu2 %v15916_v4  ;;  %v9258_v16 = vor.u32 %v10476_v54, %v9255_v1 }
 0x8e7   : > { %7081 = vmatmul.bf16.gmra.mxu3 %v15917_v0  ;;  %7305 = vmatpush.bf16.msrb.mxu2 %v9130_v45 }
 0x8e8   : > { %7127 = vmatpush.bf16.msrb.mxu0 %v8874_v43  ;;  %7394 = vmatpush.bf16.msrb.mxu3 %v9258_v16 }
 0x8e9   : > { %v6953_v21 = vpop.f32.mrf.mxu2 }
 0x8ea   : > { %v6777_v61 = vpop.f32.mrf.mxu0  ;;  %v6866_v44 = vpop.f32.mrf.mxu1  ;;  %v6954_v47 = vadd.f32 %v6953_v21, %v6865_v25 }
 0x8eb   : > { %v7042_v6 = vpop.f32.mrf.mxu3  ;;  %v6778_v4 = vadd.f32 %v6777_v61, %v13778_v41  ;;  %v15919_v41 = vld [vmem:[#allocation82_spill] sm:$0xff]  ;;  %v15920_v61 = vld [vmem:[#allocation85_spill] sm:$0xff] }
 0x8ec   : > { %v7043_v31 = vadd.f32 %v7042_v6, %v6954_v47  ;;  %v9002_v6 = vor.u32 %v10412_v28, %v8999_v14 }
 0x8ed   : > { %v6867_v0 = vadd.f32 %v6866_v44, %v6778_v4  ;;  %v15921_v44 = vld [vmem:[#allocation99_spill] sm:$0xff] }
 0x8ee   : > { %vm8193_vm6 = vcmp.ge.f32.partialorder %v7043_v31, 0.0  ;;  %v8322_v37 = vmul.f32 %v15735_v19, %v7043_v31  ;;  %7216 = vmatpush.bf16.msrb.mxu1 %v9002_v6 }
 0x8f0   : > { %v8450_v20 = vsel %vm8193_vm6, %v7043_v31, %v8322_v37 }
 0x8f1   : > { %8578 = vst [vmem:[%s12768_s27 + $0x10] sm:$0xff] %v8450_v20  ;;  %v6955_v21 = vpop.f32.mrf.mxu2 }
 0x8f2   : > { %v6780_v42 = vpop.f32.mrf.mxu0  ;;  %v6869_v25 = vpop.f32.mrf.mxu1  ;;  %v6956_v9 = vadd.f32 %v6955_v21, %v6867_v0 }
 0x8f3   : > { %v7044_v5 = vpop.f32.mrf.mxu3  ;;  %v6781_v43 = vadd.f32 %v6780_v42, %v13783_v32 }
 0x8f4   : > { %v7045_v45 = vadd.f32 %v7044_v5, %v6956_v9 }
 0x8f5   : > { %6819 = vmatmul.bf16.gmra.mxu0 %v15918_v8  ;;  %6908 = vmatmul.bf16.gmra.mxu1 %v15919_v41  ;;  %v6870_v54 = vadd.f32 %v6869_v25, %v6781_v43  ;;  %v15923_v43 = vld [vmem:[#allocation109_spill] sm:$0xff] }
 0x8f6   : > { %vm8197_vm7 = vcmp.ge.f32.partialorder %v7045_v45, 0.0  ;;  %v8326_v4 = vmul.f32 %v15735_v19, %v7045_v45  ;;  %6997 = vmatmul.bf16.gmra.mxu2 %v15920_v61 }
 0x8f7   : > { %7086 = vmatmul.bf16.gmra.mxu3 %v15921_v44 }
 0x8f8   : > { %v8454_v47 = vsel %vm8197_vm7, %v7045_v45, %v8326_v4  ;;  %v15922_v45 = vld [vmem:[#allocation108_spill] sm:$0xff] }
 0x8f9   : > { %8582 = vst [vmem:[%s12768_s27 + $0x30] sm:$0xff] %v8454_v47  ;;  %v6958_v1 = vpop.f32.mrf.mxu2 }
 0x8fa   : > { %v6782_v0 = vpop.f32.mrf.mxu0  ;;  %v6871_v14 = vpop.f32.mrf.mxu1  ;;  %v6959_v31 = vadd.f32 %v6958_v1, %v6870_v54  ;;  %v15924_v54 = vld [vmem:[#allocation185_spill] sm:$0xff] }
 0x8fb   : > { %v7047_v16 = vpop.f32.mrf.mxu3  ;;  %v6783_v32 = vadd.f32 %v6782_v0, %v13788_v24  ;;  %v15925_v0 = vld [vmem:[#allocation186_spill] sm:$0xff] }
 0x8fc   : > { %v7048_v37 = vadd.f32 %v7047_v16, %v6959_v31 }
 0x8fd   : > { %v6872_v21 = vadd.f32 %v6871_v14, %v6783_v32 }
 0x8fe   : > { %vm8201_vm8 = vcmp.ge.f32.partialorder %v7048_v37, 0.0  ;;  %v8330_v42 = vmul.f32 %v15735_v19, %v7048_v37 }
 0x900   : > { %v8458_v20 = vsel %vm8201_vm8, %v7048_v37, %v8330_v42  ;;  %v10440_v42 = vld [vmem:[#allocation6 + $0x22c] sm:$0xf] }
 0x901   : > { %8586 = vst [vmem:[%s12768_s27 + $0x50] sm:$0xff] %v8458_v20  ;;  %v6960_v9 = vpop.f32.mrf.mxu2  ;;  %v9111_v20 = vld [vmem:[#allocation6 + $0x238] sm:$0xf0] }
 0x902   : > { %v6785_v5 = vpop.f32.mrf.mxu0  ;;  %v6874_v28 = vpop.f32.mrf.mxu1  ;;  %v6961_v6 = vadd.f32 %v6960_v9, %v6872_v21  ;;  %v9114_v9 = vor.u32 %v10440_v42, %v9111_v20  ;;  %v10408_v20 = vld [vmem:[#allocation6 + $0x12c] sm:$0xf] }
 0x903   : > { %v7049_v25 = vpop.f32.mrf.mxu3  ;;  %v6786_v47 = vadd.f32 %v6785_v5, %v13793_v40  ;;  %v8855_v40 = vld [vmem:[#allocation6 + $0x38] sm:$0xf0]  ;;  %v10472_v5 = vld [vmem:[#allocation6 + $0x32c] sm:$0xf] }
 0x904   : > { %v7050_v4 = vadd.f32 %v7049_v25, %v6961_v6  ;;  %v10376_v25 = vld [vmem:[#allocation6 + $0x2c] sm:$0xf]  ;;  %7306 = vmatpush.bf16.msrb.mxu2 %v9114_v9 }
 0x905   : > { %6824 = vmatmul.bf16.gmra.mxu0 %v15922_v45  ;;  %6913 = vmatmul.bf16.gmra.mxu1 %v15923_v43  ;;  %v6875_v1 = vadd.f32 %v6874_v28, %v6786_v47  ;;  %v8858_v6 = vor.u32 %v10376_v25, %v8855_v40  ;;  %v9239_v43 = vld [vmem:[#allocation6 + $0x338] sm:$0xf0] }
 0x906   : > { %vm8205_vm9 = vcmp.ge.f32.partialorder %v7050_v4, 0.0  ;;  %v8334_v24 = vmul.f32 %v15735_v19, %v7050_v4  ;;  %7002 = vmatmul.bf16.gmra.mxu2 %v15924_v54  ;;  %v9242_v28 = vor.u32 %v10472_v5, %v9239_v43  ;;  %v8983_v25 = vld [vmem:[#allocation6 + $0x138] sm:$0xf0]  ;;  %v15927_v43 = vld [vmem:[#allocation118_spill] sm:$0xff] }
 0x907   : > { %7091 = vmatmul.bf16.gmra.mxu3 %v15925_v0  ;;  %7128 = vmatpush.bf16.msrb.mxu0 %v8858_v6 }
 0x908   : > { %v8462_v14 = vsel %vm8205_vm9, %v7050_v4, %v8334_v24  ;;  %7395 = vmatpush.bf16.msrb.mxu3 %v9242_v28 }
 0x909   : > { %8590 = vst [vmem:[%s12768_s27 + $0x70] sm:$0xff] %v8462_v14  ;;  %v6963_v37 = vpop.f32.mrf.mxu2 }
 0x90a   : > { %v6787_v16 = vpop.f32.mrf.mxu0  ;;  %v6876_v31 = vpop.f32.mrf.mxu1  ;;  %v6964_v21 = vadd.f32 %v6963_v37, %v6875_v1 }
 0x90b   : > { %v7052_v32 = vpop.f32.mrf.mxu3  ;;  %v6788_v0 = vadd.f32 %v6787_v16, %v13798_v7  ;;  %v15926_v7 = vld [vmem:[#allocation104_spill] sm:$0xff] }
 0x90c   : > { %v7053_v54 = vadd.f32 %v7052_v32, %v6964_v21  ;;  %v8986_v21 = vor.u32 %v10408_v20, %v8983_v25 }
 0x90d   : > { %v6877_v24 = vadd.f32 %v6876_v31, %v6788_v0  ;;  %v15928_v0 = vld [vmem:[#allocation187_spill] sm:$0xff]  ;;  %v15929_v31 = vld [vmem:[#allocation188_spill] sm:$0xff] }
 0x90e   : > { %vm8209_vm10 = vcmp.ge.f32.partialorder %v7053_v54, 0.0  ;;  %v8338_v4 = vmul.f32 %v15735_v19, %v7053_v54  ;;  %7217 = vmatpush.bf16.msrb.mxu1 %v8986_v21 }
 0x910   : > { %v8466_v47 = vsel %vm8209_vm10, %v7053_v54, %v8338_v4 }
 0x911   : > { %8594 = vst [vmem:[%s12768_s27 + $0x90] sm:$0xff] %v8466_v47  ;;  %v6965_v37 = vpop.f32.mrf.mxu2 }
 0x912   : > { %v6790_v14 = vpop.f32.mrf.mxu0  ;;  %v6879_v1 = vpop.f32.mrf.mxu1  ;;  %v6966_v32 = vadd.f32 %v6965_v37, %v6877_v24 }
 0x913   : > { %v7054_v42 = vpop.f32.mrf.mxu3  ;;  %v6791_v9 = vadd.f32 %v6790_v14, %v13803_v3 }
 0x914   : > { %v7055_v16 = vadd.f32 %v7054_v42, %v6966_v32 }
 0x915   : > { %6829 = vmatmul.bf16.gmra.mxu0 %v15926_v7  ;;  %6918 = vmatmul.bf16.gmra.mxu1 %v15927_v43  ;;  %v6880_v5 = vadd.f32 %v6879_v1, %v6791_v9  ;;  %v15930_v9 = vld [vmem:[#allocation119_spill] sm:$0xff]  ;;  %v10295_v7 = vld [vmem:[#allocation6 + $0xb78] sm:$0xf0] }
 0x916   : > { %vm8213_vm11 = vcmp.ge.f32.partialorder %v7055_v16, 0.0  ;;  %v8342_v54 = vmul.f32 %v15735_v19, %v7055_v16  ;;  %7007 = vmatmul.bf16.gmra.mxu2 %v15928_v0 }
 0x917   : > { %7096 = vmatmul.bf16.gmra.mxu3 %v15929_v31 }
 0x918   : > { %v8470_v40 = vsel %vm8213_vm11, %v7055_v16, %v8342_v54  ;;  %v15931_v54 = vld [vmem:[#allocation112_spill] sm:$0xff] }
 0x919   : > { %8598 = vst [vmem:[%s12768_s27 + $0xb0] sm:$0xff] %v8470_v40  ;;  %v6968_v4 = vpop.f32.mrf.mxu2 }
 0x91a   : > { %v6792_v6 = vpop.f32.mrf.mxu0  ;;  %v6881_v28 = vpop.f32.mrf.mxu1  ;;  %v6969_v24 = vadd.f32 %v6968_v4, %v6880_v5 }
 0x91b   : > { %v7057_v47 = vpop.f32.mrf.mxu3  ;;  %v6793_v3 = vadd.f32 %v6792_v6, %v13808_v30  ;;  %v15932_v6 = vld [vmem:[#allocation113_spill] sm:$0xff] }
 0x91c   : > { %v7058_v37 = vadd.f32 %v7057_v47, %v6969_v24 }
 0x91d   : > { %v6882_v20 = vadd.f32 %v6881_v28, %v6793_v3  ;;  %v15933_v28 = vld [vmem:[#allocation100_spill] sm:$0xff] }
 0x91e   : > { %vm8217_vm12 = vcmp.ge.f32.partialorder %v7058_v37, 0.0  ;;  %v8346_v14 = vmul.f32 %v15735_v19, %v7058_v37 }
 0x920   : > { %v8474_v42 = vsel %vm8217_vm12, %v7058_v37, %v8346_v14 }
 0x921   : > { %8602 = vst [vmem:[%s12768_s27 + $0xd0] sm:$0xff] %v8474_v42  ;;  %v6970_v21 = vpop.f32.mrf.mxu2  ;;  %v10436_v42 = vld [vmem:[#allocation6 + $0x20c] sm:$0xf] }
 0x922   : > { %v6795_v25 = vpop.f32.mrf.mxu0  ;;  %v6884_v32 = vpop.f32.mrf.mxu1  ;;  %v6971_v16 = vadd.f32 %v6970_v21, %v6882_v20  ;;  %v9095_v20 = vld [vmem:[#allocation6 + $0x218] sm:$0xf0] }
 0x923   : > { %v7059_v1 = vpop.f32.mrf.mxu3  ;;  %v6796_v5 = vadd.f32 %v6795_v25, %v13813_v22  ;;  %v8839_v22 = vld [vmem:[#allocation6 + $0x18] sm:$0xf0]  ;;  %v10468_v25 = vld [vmem:[#allocation6 + $0x30c] sm:$0xf] }
 0x924   : > { %v7060_v40 = vadd.f32 %v7059_v1, %v6971_v16  ;;  %v9098_v1 = vor.u32 %v10436_v42, %v9095_v20  ;;  %v10372_v16 = vld [vmem:[#allocation6 + $0xc] sm:$0xf] }
 0x925   : > { %6834 = vmatmul.bf16.gmra.mxu0 %v15930_v9  ;;  %6923 = vmatmul.bf16.gmra.mxu1 %v15931_v54  ;;  %v6885_v47 = vadd.f32 %v6884_v32, %v6796_v5  ;;  %v8842_v54 = vor.u32 %v10372_v16, %v8839_v22  ;;  %v9223_v9 = vld [vmem:[#allocation6 + $0x318] sm:$0xf0]  ;;  %v10404_v20 = vld [vmem:[#allocation6 + $0x10c] sm:$0xf] }
 0x926   : > { %vm8221_vm13 = vcmp.ge.f32.partialorder %v7060_v40, 0.0  ;;  %v8350_v30 = vmul.f32 %v15735_v19, %v7060_v40  ;;  %7012 = vmatmul.bf16.gmra.mxu2 %v15932_v6  ;;  %v9226_v32 = vor.u32 %v10468_v25, %v9223_v9  ;;  %v8967_v16 = vld [vmem:[#allocation6 + $0x118] sm:$0xf0]  ;;  %v15935_v9 = vld [vmem:[#allocation190_spill] sm:$0xff] }
 0x927   : > { %7101 = vmatmul.bf16.gmra.mxu3 %v15933_v28  ;;  %7307 = vmatpush.bf16.msrb.mxu2 %v9098_v1 }
 0x928   : > { %v8478_v4 = vsel %vm8221_vm13, %v7060_v40, %v8350_v30  ;;  %7129 = vmatpush.bf16.msrb.mxu0 %v8842_v54  ;;  %7396 = vmatpush.bf16.msrb.mxu3 %v9226_v32 }
 0x929   : > { %8606 = vst [vmem:[%s12768_s27 + $0xf0] sm:$0xff] %v8478_v4  ;;  %v6973_v3 = vpop.f32.mrf.mxu2 }
 0x92a   : > { %v6797_v24 = vpop.f32.mrf.mxu0  ;;  %v6886_v37 = vpop.f32.mrf.mxu1  ;;  %v6974_v21 = vadd.f32 %v6973_v3, %v6885_v47 }
 0x92b   : > { %v7062_v14 = vpop.f32.mrf.mxu3  ;;  %v6798_v28 = vadd.f32 %v6797_v24, %v13818_v18  ;;  %v15934_v18 = vld [vmem:[#allocation189_spill] sm:$0xff] }
 0x92c   : > { %v7063_v6 = vadd.f32 %v7062_v14, %v6974_v21  ;;  %v8970_v21 = vor.u32 %v10404_v20, %v8967_v16 }
 0x92d   : > { %v6887_v30 = vadd.f32 %v6886_v37, %v6798_v28  ;;  %v15936_v28 = vld [vmem:[#allocation191_spill] sm:$0xff]  ;;  %v15937_v37 = vld [vmem:[#allocation192_spill] sm:$0xff] }
 0x92e   : > { %vm8225_vm14 = vcmp.ge.f32.partialorder %v7063_v6, 0.0  ;;  %v8354_v40 = vmul.f32 %v15735_v19, %v7063_v6  ;;  %7218 = vmatpush.bf16.msrb.mxu1 %v8970_v21 }
 0x930   : > { %v8482_v5 = vsel %vm8225_vm14, %v7063_v6, %v8354_v40 }
 0x931   : > { %8610 = vst [vmem:[%s12768_s27 + $0x110] sm:$0xff] %v8482_v5  ;;  %v6975_v3 = vpop.f32.mrf.mxu2 }
 0x932   : > { %v6800_v4 = vpop.f32.mrf.mxu0  ;;  %v6889_v47 = vpop.f32.mrf.mxu1  ;;  %v6976_v14 = vadd.f32 %v6975_v3, %v6887_v30 }
 0x933   : > { %v7064_v42 = vpop.f32.mrf.mxu3  ;;  %v6801_v24 = vadd.f32 %v6800_v4, %v13823_v15 }
 0x934   : > { %v7065_v54 = vadd.f32 %v7064_v42, %v6976_v14 }
 0x935   : > { %6839 = vmatmul.bf16.gmra.mxu0 %v15934_v18  ;;  %6928 = vmatmul.bf16.gmra.mxu1 %v15935_v9  ;;  %v6890_v22 = vadd.f32 %v6889_v47, %v6801_v24  ;;  %v15938_v24 = vld [vmem:[#allocation101_spill] sm:$0xff]  ;;  %v10311_v18 = vld [vmem:[#allocation6 + $0xb98] sm:$0xf0] }
 0x936   : > { %vm8229_vm15 = vcmp.ge.f32.partialorder %v7065_v54, 0.0  ;;  %v8358_v6 = vmul.f32 %v15735_v19, %v7065_v54  ;;  %7017 = vmatmul.bf16.gmra.mxu2 %v15936_v28 }
 0x937   : > { %7106 = vmatmul.bf16.gmra.mxu3 %v15937_v37 }
 0x938   : > { %v8486_v1 = vsel %vm8229_vm15, %v7065_v54, %v8358_v6  ;;  %v15939_v6 = vld [vmem:[#allocation193_spill] sm:$0xff] }
 0x939   : > { %8614 = vst [vmem:[%s12768_s27 + $0x130] sm:$0xff] %v8486_v1  ;;  %v6978_v40 = vpop.f32.mrf.mxu2 }
 0x93a   : > { %v6802_v25 = vpop.f32.mrf.mxu0  ;;  %v6891_v32 = vpop.f32.mrf.mxu1  ;;  %v6979_v30 = vadd.f32 %v6978_v40, %v6890_v22 }
 0x93b   : > { %v7067_v5 = vpop.f32.mrf.mxu3  ;;  %v6803_v15 = vadd.f32 %v6802_v25, %v13828_v55  ;;  %v15940_v25 = vld [vmem:[#allocation194_spill] sm:$0xff] }
 0x93c   : > { %v7068_v3 = vadd.f32 %v7067_v5, %v6979_v30 }
 0x93d   : > { %v6892_v20 = vadd.f32 %v6891_v32, %v6803_v15  ;;  %v15941_v32 = vld [vmem:[#allocation195_spill] sm:$0xff] }
 0x93e   : > { %vm8233_vm0 = vcmp.ge.f32.partialorder %v7068_v3, 0.0  ;;  %v8362_v4 = vmul.f32 %v15735_v19, %v7068_v3 }
 0x940   : > { %v8490_v42 = vsel %vm8233_vm0, %v7068_v3, %v8362_v4 }
 0x941   : > { %8618 = vst [vmem:[%s12768_s27 + $0x150] sm:$0xff] %v8490_v42  ;;  %v6980_v21 = vpop.f32.mrf.mxu2  ;;  %v10592_v42 = vld [vmem:[#allocation6 + $0x6ec] sm:$0xf] }
 0x942   : > { %v6805_v16 = vpop.f32.mrf.mxu0  ;;  %v6894_v14 = vpop.f32.mrf.mxu1  ;;  %v6981_v54 = vadd.f32 %v6980_v21, %v6892_v20  ;;  %v9719_v20 = vld [vmem:[#allocation6 + $0x6f8] sm:$0xf0] }
 0x943   : > { %v7069_v47 = vpop.f32.mrf.mxu3  ;;  %v6806_v22 = vadd.f32 %v6805_v16, %v13833_v35  ;;  %v9463_v35 = vld [vmem:[#allocation6 + $0x4f8] sm:$0xf0]  ;;  %v10624_v16 = vld [vmem:[#allocation6 + $0x7ec] sm:$0xf] }
 0x944   : > { %v7070_v1 = vadd.f32 %v7069_v47, %v6981_v54  ;;  %v9722_v47 = vor.u32 %v10592_v42, %v9719_v20  ;;  %v10528_v54 = vld [vmem:[#allocation6 + $0x4ec] sm:$0xf] }
 0x945   : > { %6844 = vmatmul.bf16.gmra.mxu0 %v15938_v24  ;;  %6933 = vmatmul.bf16.gmra.mxu1 %v15939_v6  ;;  %v6895_v5 = vadd.f32 %v6894_v14, %v6806_v22  ;;  %v9466_v6 = vor.u32 %v10528_v54, %v9463_v35  ;;  %v9847_v24 = vld [vmem:[#allocation6 + $0x7f8] sm:$0xf0]  ;;  %v10560_v20 = vld [vmem:[#allocation6 + $0x5ec] sm:$0xf] }
 0x946   : > { %vm8237_vm1 = vcmp.ge.f32.partialorder %v7070_v1, 0.0  ;;  %v8366_v55 = vmul.f32 %v15735_v19, %v7070_v1  ;;  %7022 = vmatmul.bf16.gmra.mxu2 %v15940_v25  ;;  %v9850_v14 = vor.u32 %v10624_v16, %v9847_v24  ;;  %v9591_v54 = vld [vmem:[#allocation6 + $0x5f8] sm:$0xf0]  ;;  %v15943_v24 = vld [vmem:[#allocation197_spill] sm:$0xff] }
 0x947   : > { %7111 = vmatmul.bf16.gmra.mxu3 %v15941_v32  ;;  %7656 = vmatpush.bf16.msra.mxu2 %v9722_v47 }
 0x948   : > { %v8494_v40 = vsel %vm8237_vm1, %v7070_v1, %v8366_v55  ;;  %7478 = vmatpush.bf16.msra.mxu0 %v9466_v6  ;;  %7745 = vmatpush.bf16.msra.mxu3 %v9850_v14 }
 0x949   : > { %8622 = vst [vmem:[%s12768_s27 + $0x170] sm:$0xff] %v8494_v40  ;;  %v6983_v15 = vpop.f32.mrf.mxu2 }
 0x94a   : > { %v6807_v30 = vpop.f32.mrf.mxu0  ;;  %v6896_v3 = vpop.f32.mrf.mxu1  ;;  %v6984_v21 = vadd.f32 %v6983_v15, %v6895_v5 }
 0x94b   : > { %v7072_v4 = vpop.f32.mrf.mxu3  ;;  %v6808_v32 = vadd.f32 %v6807_v30, %v13838_v2  ;;  %v15942_v2 = vld [vmem:[#allocation196_spill] sm:$0xff] }
 0x94c   : > { %v7073_v25 = vadd.f32 %v7072_v4, %v6984_v21  ;;  %v9594_v21 = vor.u32 %v10560_v20, %v9591_v54 }
 0x94d   : > { %v6897_v55 = vadd.f32 %v6896_v3, %v6808_v32  ;;  %v15944_v32 = vld [vmem:[#allocation198_spill] sm:$0xff]  ;;  %v15945_v3 = vld [vmem:[#allocation199_spill] sm:$0xff] }
 0x94e   : > { %vm8241_vm2 = vcmp.ge.f32.partialorder %v7073_v25, 0.0  ;;  %v8370_v1 = vmul.f32 %v15735_v19, %v7073_v25  ;;  %7567 = vmatpush.bf16.msra.mxu1 %v9594_v21 }
 0x950   : > { %v8498_v22 = vsel %vm8241_vm2, %v7073_v25, %v8370_v1 }
 0x951   : > { %8626 = vst [vmem:[%s12768_s27 + $0x190] sm:$0xff] %v8498_v22  ;;  %v6985_v15 = vpop.f32.mrf.mxu2 }
 0x952   : > { %v6810_v40 = vpop.f32.mrf.mxu0  ;;  %v6899_v5 = vpop.f32.mrf.mxu1  ;;  %v6986_v4 = vadd.f32 %v6985_v15, %v6897_v55 }
 0x953   : > { %v7074_v42 = vpop.f32.mrf.mxu3  ;;  %v6811_v30 = vadd.f32 %v6810_v40, %v13843_v59 }
 0x954   : > { %v7075_v6 = vadd.f32 %v7074_v42, %v6986_v4 }
 0x955   : > { %6849 = vmatmul.bf16.gmra.mxu0 %v15942_v2  ;;  %6938 = vmatmul.bf16.gmra.mxu1 %v15943_v24  ;;  %v6900_v35 = vadd.f32 %v6899_v5, %v6811_v30  ;;  %v15946_v30 = vld [vmem:[#allocation17_spill] sm:$0xff]  ;;  %v10327_v2 = vld [vmem:[#allocation6 + $0xbb8] sm:$0xf0] }
 0x956   : > { %vm8245_vm3 = vcmp.ge.f32.partialorder %v7075_v6, 0.0  ;;  %v8374_v25 = vmul.f32 %v15735_v19, %v7075_v6  ;;  %7027 = vmatmul.bf16.gmra.mxu2 %v15944_v32 }
 0x957   : > { %7116 = vmatmul.bf16.gmra.mxu3 %v15945_v3 }
 0x958   : > { %v8502_v47 = vsel %vm8245_vm3, %v7075_v6, %v8374_v25  ;;  %v15947_v25 = vld [vmem:[#allocation18_spill] sm:$0xff] }
 0x959   : > { %8630 = vst [vmem:[%s12768_s27 + $0x1b0] sm:$0xff] %v8502_v47  ;;  %v6988_v1 = vpop.f32.mrf.mxu2 }
 0x95a   : > { %v6812_v16 = vpop.f32.mrf.mxu0  ;;  %v6901_v14 = vpop.f32.mrf.mxu1  ;;  %v6989_v55 = vadd.f32 %v6988_v1, %v6900_v35 }
 0x95b   : > { %v7077_v22 = vpop.f32.mrf.mxu3  ;;  %v6813_v59 = vadd.f32 %v6812_v16, %v13848_v57  ;;  %v15948_v16 = vld [vmem:[#allocation21_spill] sm:$0xff] }
 0x95c   : > { %v7078_v15 = vadd.f32 %v7077_v22, %v6989_v55 }
 0x95d   : > { %v6902_v20 = vadd.f32 %v6901_v14, %v6813_v59  ;;  %v15949_v14 = vld [vmem:[#allocation22_spill] sm:$0xff] }
 0x95e   : > { %vm8249_vm4 = vcmp.ge.f32.partialorder %v7078_v15, 0.0  ;;  %v8378_v40 = vmul.f32 %v15735_v19, %v7078_v15 }
 0x960   : > { %v8506_v42 = vsel %vm8249_vm4, %v7078_v15, %v8378_v40 }
 0x961   : > { %8634 = vst [vmem:[%s12768_s27 + $0x1d0] sm:$0xff] %v8506_v42  ;;  %v6990_v21 = vpop.f32.mrf.mxu2  ;;  %v10588_v42 = vld [vmem:[#allocation6 + $0x6cc] sm:$0xf] }
 0x962   : > { %v6815_v54 = vpop.f32.mrf.mxu0  ;;  %v6904_v4 = vpop.f32.mrf.mxu1  ;;  %v6991_v6 = vadd.f32 %v6990_v21, %v6902_v20  ;;  %v9703_v20 = vld [vmem:[#allocation6 + $0x6d8] sm:$0xf0] }
 0x963   : > { %v7079_v5 = vpop.f32.mrf.mxu3  ;;  %v6816_v35 = vadd.f32 %v6815_v54, %v13853_v33  ;;  %v9447_v33 = vld [vmem:[#allocation6 + $0x4d8] sm:$0xf0]  ;;  %v10620_v54 = vld [vmem:[#allocation6 + $0x7cc] sm:$0xf] }
 0x964   : > { %v7080_v47 = vadd.f32 %v7079_v5, %v6991_v6  ;;  %v9706_v5 = vor.u32 %v10588_v42, %v9703_v20  ;;  %v10524_v6 = vld [vmem:[#allocation6 + $0x4cc] sm:$0xf] }
 0x965   : > { %7130 = vmatmul.bf16.vlgmr.msrb.gmra.mxu0 %v15946_v30  ;;  %7219 = vmatmul.bf16.vlgmr.msrb.gmra.mxu1 %v15947_v25  ;;  %v6905_v22 = vadd.f32 %v6904_v4, %v6816_v35  ;;  %v9450_v30 = vor.u32 %v10524_v6, %v9447_v33  ;;  %v9831_v25 = vld [vmem:[#allocation6 + $0x7d8] sm:$0xf0]  ;;  %v10556_v20 = vld [vmem:[#allocation6 + $0x5cc] sm:$0xf] }
 0x966   : > { %vm8253_vm5 = vcmp.ge.f32.partialorder %v7080_v47, 0.0  ;;  %v8382_v57 = vmul.f32 %v15735_v19, %v7080_v47  ;;  %7308 = vmatmul.bf16.vlgmr.msrb.gmra.mxu2 %v15948_v16  ;;  %v9834_v4 = vor.u32 %v10620_v54, %v9831_v25  ;;  %v9575_v6 = vld [vmem:[#allocation6 + $0x5d8] sm:$0xf0]  ;;  %v15952_v54 = vld [vmem:[#allocation29_spill] sm:$0xff] }
 0x967   : > { %7397 = vmatmul.bf16.vlgmr.msrb.gmra.mxu3 %v15949_v14  ;;  %7657 = vmatpush.bf16.msra.mxu2 %v9706_v5 }
 0x968   : > { %v8510_v1 = vsel %vm8253_vm5, %v7080_v47, %v8382_v57  ;;  %7479 = vmatpush.bf16.msra.mxu0 %v9450_v30  ;;  %7746 = vmatpush.bf16.msra.mxu3 %v9834_v4  ;;  %v15953_v30 = vld [vmem:[#allocation31_spill] sm:$0xff] }
 0x969   : > { %8638 = vst [vmem:[%s12768_s27 + $0x1f0] sm:$0xff] %v8510_v1  ;;  %v6993_v59 = vpop.f32.mrf.mxu2 }
 0x96a   : > { %v6817_v55 = vpop.f32.mrf.mxu0  ;;  %v6906_v15 = vpop.f32.mrf.mxu1  ;;  %v6994_v21 = vadd.f32 %v6993_v59, %v6905_v22 }
 0x96b   : > { %v7082_v40 = vpop.f32.mrf.mxu3  ;;  %v6818_v14 = vadd.f32 %v6817_v55, %v13858_v52  ;;  %v15950_v52 = vld [vmem:[#allocation27_spill] sm:$0xff]  ;;  %v15951_v55 = vld [vmem:[#allocation28_spill] sm:$0xff] }
 0x96c   : > { %v7083_v16 = vadd.f32 %v7082_v40, %v6994_v21  ;;  %v9578_v21 = vor.u32 %v10556_v20, %v9575_v6 }
 0x96d   : > { %v6907_v57 = vadd.f32 %v6906_v15, %v6818_v14 }
 0x96e   : > { %vm8257_vm6 = vcmp.ge.f32.partialorder %v7083_v16, 0.0  ;;  %v8386_v47 = vmul.f32 %v15735_v19, %v7083_v16  ;;  %7568 = vmatpush.bf16.msra.mxu1 %v9578_v21 }
 0x970   : > { %v8514_v35 = vsel %vm8257_vm6, %v7083_v16, %v8386_v47 }
 0x971   : > { %8642 = vst [vmem:[%s12768_s27 + $0x210] sm:$0xff] %v8514_v35  ;;  %v6995_v59 = vpop.f32.mrf.mxu2 }
 0x972   : > { %v6820_v1 = vpop.f32.mrf.mxu0  ;;  %v6909_v22 = vpop.f32.mrf.mxu1  ;;  %v6996_v40 = vadd.f32 %v6995_v59, %v6907_v57 }
 0x973   : > { %v7084_v42 = vpop.f32.mrf.mxu3  ;;  %v6821_v33 = vadd.f32 %v6820_v1, %v13863_v17 }
 0x974   : > { %v7085_v5 = vadd.f32 %v7084_v42, %v6996_v40 }
 0x975   : > { %7135 = vmatmul.bf16.gmra.mxu0 %v15950_v52  ;;  %7224 = vmatmul.bf16.gmra.mxu1 %v15951_v55  ;;  %v6910_v16 = vadd.f32 %v6909_v22, %v6821_v33  ;;  %v15954_v55 = vld [vmem:[#allocation33_spill] sm:$0xff] }
 0x976   : > { %vm8261_vm7 = vcmp.ge.f32.partialorder %v7085_v5, 0.0  ;;  %v8390_v15 = vmul.f32 %v15735_v19, %v7085_v5  ;;  %7313 = vmatmul.bf16.gmra.mxu2 %v15952_v54  ;;  %v15956_v54 = vld [vmem:[#allocation38_spill] sm:$0xff] }
 0x977   : > { %7402 = vmatmul.bf16.gmra.mxu3 %v15953_v30  ;;  %v15957_v30 = vld [vmem:[#allocation39_spill] sm:$0xff] }
 0x978   : > { %v8518_v25 = vsel %vm8261_vm7, %v7085_v5, %v8390_v15  ;;  %v15955_v5 = vld [vmem:[#allocation34_spill] sm:$0xff] }
 0x979   : > { %8646 = vst [vmem:[%s12768_s27 + $0x230] sm:$0xff] %v8518_v25  ;;  %v6998_v47 = vpop.f32.mrf.mxu2 }
 0x97a   : > { %v6822_v14 = vpop.f32.mrf.mxu0  ;;  %v6911_v4 = vpop.f32.mrf.mxu1  ;;  %v6999_v57 = vadd.f32 %v6998_v47, %v6910_v16 }
 0x97b   : > { %v7087_v35 = vpop.f32.mrf.mxu3  ;;  %v6823_v17 = vadd.f32 %v6822_v14, %v13868_v34 }
 0x97c   : > { %v7088_v59 = vadd.f32 %v7087_v35, %v6999_v57  ;;  %v10584_v57 = vld [vmem:[#allocation6 + $0x6ac] sm:$0xf] }
 0x97d   : > { %v6912_v20 = vadd.f32 %v6911_v4, %v6823_v17 }
 0x97e   : > { %vm8265_vm8 = vcmp.ge.f32.partialorder %v7088_v59, 0.0  ;;  %v8394_v1 = vmul.f32 %v15735_v19, %v7088_v59 }
 0x980   : > { %v8522_v42 = vsel %vm8265_vm8, %v7088_v59, %v8394_v1  ;;  %v9687_v59 = vld [vmem:[#allocation6 + $0x6b8] sm:$0xf0] }
 0x981   : > { %8650 = vst [vmem:[%s12768_s27 + $0x250] sm:$0xff] %v8522_v42  ;;  %v7000_v21 = vpop.f32.mrf.mxu2  ;;  %v9690_v1 = vor.u32 %v10584_v57, %v9687_v59  ;;  %v10520_v42 = vld [vmem:[#allocation6 + $0x4ac] sm:$0xf] }
 0x982   : > { %v6825_v6 = vpop.f32.mrf.mxu0  ;;  %v6914_v40 = vpop.f32.mrf.mxu1  ;;  %v7001_v52 = vadd.f32 %v7000_v21, %v6912_v20  ;;  %v10616_v20 = vld [vmem:[#allocation6 + $0x7ac] sm:$0xf]  ;;  %v9815_v21 = vld [vmem:[#allocation6 + $0x7b8] sm:$0xf0] }
 0x983   : > { %v7089_v22 = vpop.f32.mrf.mxu3  ;;  %v6826_v15 = vadd.f32 %v6825_v6, %v13873_v53  ;;  %v9431_v53 = vld [vmem:[#allocation6 + $0x4b8] sm:$0xf0]  ;;  %7658 = vmatpush.bf16.msra.mxu2 %v9690_v1  ;;  %v15961_v1 = vld [vmem:[#allocation46_spill] sm:$0xff] }
 0x984   : > { %v7090_v33 = vadd.f32 %v7089_v22, %v7001_v52  ;;  %v9434_v6 = vor.u32 %v10520_v42, %v9431_v53 }
 0x985   : > { %7140 = vmatmul.bf16.gmra.mxu0 %v15954_v55  ;;  %7229 = vmatmul.bf16.gmra.mxu1 %v15955_v5  ;;  %v6915_v16 = vadd.f32 %v6914_v40, %v6826_v15  ;;  %v9818_v40 = vor.u32 %v10616_v20, %v9815_v21 }
 0x986   : > { %vm8269_vm9 = vcmp.ge.f32.partialorder %v7090_v33, 0.0  ;;  %v8398_v34 = vmul.f32 %v15735_v19, %v7090_v33  ;;  %7318 = vmatmul.bf16.gmra.mxu2 %v15956_v54  ;;  %7480 = vmatpush.bf16.msra.mxu0 %v9434_v6 }
 0x987   : > { %7407 = vmatmul.bf16.gmra.mxu3 %v15957_v30 }
 0x988   : > { %v8526_v25 = vsel %vm8269_vm9, %v7090_v33, %v8398_v34  ;;  %7747 = vmatpush.bf16.msra.mxu3 %v9818_v40 }
 0x989   : > { %8654 = vst [vmem:[%s12768_s27 + $0x270] sm:$0xff] %v8526_v25  ;;  %v7003_v47 = vpop.f32.mrf.mxu2  ;;  %v10552_v25 = vld [vmem:[#allocation6 + $0x5ac] sm:$0xf] }
 0x98a   : > { %v6827_v14 = vpop.f32.mrf.mxu0  ;;  %v6916_v4 = vpop.f32.mrf.mxu1  ;;  %v7004_v17 = vadd.f32 %v7003_v47, %v6915_v16  ;;  %v9559_v16 = vld [vmem:[#allocation6 + $0x5b8] sm:$0xf0] }
 0x98b   : > { %v7092_v35 = vpop.f32.mrf.mxu3  ;;  %v6828_v52 = vadd.f32 %v6827_v14, %v13878_v13  ;;  %v15958_v13 = vld [vmem:[#allocation41_spill] sm:$0xff]  ;;  %v15959_v14 = vld [vmem:[#allocation42_spill] sm:$0xff] }
 0x98c   : > { %v7093_v22 = vadd.f32 %v7092_v35, %v7004_v17  ;;  %v9562_v35 = vor.u32 %v10552_v25, %v9559_v16  ;;  %v15960_v17 = vld [vmem:[#allocation45_spill] sm:$0xff]  ;;  %v15962_v16 = vld [vmem:[#allocation51_spill] sm:$0xff] }
 0x98d   : > { %v6917_v33 = vadd.f32 %v6916_v4, %v6828_v52 }
 0x98e   : > { %vm8273_vm10 = vcmp.ge.f32.partialorder %v7093_v22, 0.0  ;;  %v8402_v55 = vmul.f32 %v15735_v19, %v7093_v22  ;;  %7569 = vmatpush.bf16.msra.mxu1 %v9562_v35 }
 0x990   : > { %v8530_v5 = vsel %vm8273_vm10, %v7093_v22, %v8402_v55 }
 0x991   : > { %8658 = vst [vmem:[%s12768_s27 + $0x290] sm:$0xff] %v8530_v5  ;;  %v7005_v54 = vpop.f32.mrf.mxu2 }
 0x992   : > { %v6830_v15 = vpop.f32.mrf.mxu0  ;;  %v6919_v34 = vpop.f32.mrf.mxu1  ;;  %v7006_v47 = vadd.f32 %v7005_v54, %v6917_v33 }
 0x993   : > { %v7094_v30 = vpop.f32.mrf.mxu3  ;;  %v6831_v59 = vadd.f32 %v6830_v15, %v13883_v56 }
 0x994   : > { %v7095_v57 = vadd.f32 %v7094_v30, %v7006_v47  ;;  %v15963_v47 = vld [vmem:[#allocation52_spill] sm:$0xff] }
 0x995   : > { %7145 = vmatmul.bf16.gmra.mxu0 %v15958_v13  ;;  %7234 = vmatmul.bf16.gmra.mxu1 %v15959_v14  ;;  %v6920_v53 = vadd.f32 %v6919_v34, %v6831_v59  ;;  %v15964_v14 = vld [vmem:[#allocation55_spill] sm:$0xff] }
 0x996   : > { %vm8277_vm11 = vcmp.ge.f32.partialorder %v7095_v57, 0.0  ;;  %v8406_v4 = vmul.f32 %v15735_v19, %v7095_v57  ;;  %7323 = vmatmul.bf16.gmra.mxu2 %v15960_v17 }
 0x997   : > { %7412 = vmatmul.bf16.gmra.mxu3 %v15961_v1 }
 0x998   : > { %v8534_v42 = vsel %vm8277_vm11, %v7095_v57, %v8406_v4  ;;  %v15965_v57 = vld [vmem:[#allocation56_spill] sm:$0xff] }
 0x999   : > { %8662 = vst [vmem:[%s12768_s27 + $0x2b0] sm:$0xff] %v8534_v42  ;;  %v7008_v21 = vpop.f32.mrf.mxu2 }
 0x99a   : > { %v6832_v20 = vpop.f32.mrf.mxu0  ;;  %v6921_v6 = vpop.f32.mrf.mxu1  ;;  %v7009_v52 = vadd.f32 %v7008_v21, %v6920_v53 }
 0x99b   : > { %v7097_v22 = vpop.f32.mrf.mxu3  ;;  %v6833_v56 = vadd.f32 %v6832_v20, %v13888_v23  ;;  %v10580_v20 = vld [vmem:[#allocation6 + $0x68c] sm:$0xf] }
 0x99c   : > { %v7098_v40 = vadd.f32 %v7097_v22, %v7009_v52  ;;  %v10516_v52 = vld [vmem:[#allocation6 + $0x48c] sm:$0xf] }
 0x99d   : > { %v6922_v33 = vadd.f32 %v6921_v6, %v6833_v56  ;;  %v9671_v6 = vld [vmem:[#allocation6 + $0x698] sm:$0xf0] }
 0x99e   : > { %vm8281_vm12 = vcmp.ge.f32.partialorder %v7098_v40, 0.0  ;;  %v8410_v55 = vmul.f32 %v15735_v19, %v7098_v40  ;;  %v9674_v22 = vor.u32 %v10580_v20, %v9671_v6 }
 0x9a0   : > { %v8538_v5 = vsel %vm8281_vm12, %v7098_v40, %v8410_v55  ;;  %v10612_v40 = vld [vmem:[#allocation6 + $0x78c] sm:$0xf]  ;;  %v9799_v55 = vld [vmem:[#allocation6 + $0x798] sm:$0xf0]  ;;  %7659 = vmatpush.bf16.msra.mxu2 %v9674_v22 }
 0x9a1   : > { %8666 = vst [vmem:[%s12768_s27 + $0x2d0] sm:$0xff] %v8538_v5  ;;  %v7010_v30 = vpop.f32.mrf.mxu2 }
 0x9a2   : > { %v6835_v15 = vpop.f32.mrf.mxu0  ;;  %v6924_v54 = vpop.f32.mrf.mxu1  ;;  %v7011_v25 = vadd.f32 %v7010_v30, %v6922_v33 }
 0x9a3   : > { %v7099_v34 = vpop.f32.mrf.mxu3  ;;  %v6836_v13 = vadd.f32 %v6835_v15, %v13893_v39  ;;  %v9415_v39 = vld [vmem:[#allocation6 + $0x498] sm:$0xf0]  ;;  %v9802_v15 = vor.u32 %v10612_v40, %v9799_v55 }
 0x9a4   : > { %v7100_v35 = vadd.f32 %v7099_v34, %v7011_v25  ;;  %v9418_v56 = vor.u32 %v10516_v52, %v9415_v39 }
 0x9a5   : > { %7150 = vmatmul.bf16.gmra.mxu0 %v15962_v16  ;;  %7239 = vmatmul.bf16.gmra.mxu1 %v15963_v47  ;;  %v6925_v4 = vadd.f32 %v6924_v54, %v6836_v13  ;;  %v10548_v13 = vld [vmem:[#allocation6 + $0x58c] sm:$0xf] }
 0x9a6   : > { %vm8285_vm13 = vcmp.ge.f32.partialorder %v7100_v35, 0.0  ;;  %v8414_v23 = vmul.f32 %v15735_v19, %v7100_v35  ;;  %7328 = vmatmul.bf16.gmra.mxu2 %v15964_v14  ;;  %7481 = vmatpush.bf16.msra.mxu0 %v9418_v56 }
 0x9a7   : > { %7417 = vmatmul.bf16.gmra.mxu3 %v15965_v57 }
 0x9a8   : > { %v8542_v59 = vsel %vm8285_vm13, %v7100_v35, %v8414_v23  ;;  %7748 = vmatpush.bf16.msra.mxu3 %v9802_v15  ;;  %v9543_v23 = vld [vmem:[#allocation6 + $0x598] sm:$0xf0] }
 0x9a9   : > { %8670 = vst [vmem:[%s12768_s27 + $0x2f0] sm:$0xff] %v8542_v59  ;;  %v7013_v42 = vpop.f32.mrf.mxu2  ;;  %v9546_v57 = vor.u32 %v10548_v13, %v9543_v23  ;;  %v15967_v59 = vld [vmem:[#allocation58_spill] sm:$0xff]  ;;  %v15972_v23 = vld [vmem:[#allocation71_spill] sm:$0xff] }
 0x9aa   : > { %v6837_v17 = vpop.f32.mrf.mxu0  ;;  %v6926_v1 = vpop.f32.mrf.mxu1  ;;  %v7014_v21 = vadd.f32 %v7013_v42, %v6925_v4  ;;  %v15968_v42 = vld [vmem:[#allocation61_spill] sm:$0xff] }
 0x9ab   : > { %v7102_v53 = vpop.f32.mrf.mxu3  ;;  %v6838_v33 = vadd.f32 %v6837_v17, %v13898_v27  ;;  %v15966_v27 = vld [vmem:[#allocation57_spill] sm:$0xff]  ;;  %7570 = vmatpush.bf16.msra.mxu1 %v9546_v57 }
 0x9ac   : > { %v7103_v5 = vadd.f32 %v7102_v53, %v7014_v21  ;;  %v15969_v53 = vld [vmem:[#allocation62_spill] sm:$0xff] }
 0x9ad   : > { %v6927_v34 = vadd.f32 %v6926_v1, %v6838_v33 }
 0x9ae   : > { %vm8289_vm14 = vcmp.ge.f32.partialorder %v7103_v5, 0.0  ;;  %v8418_v54 = vmul.f32 %v15735_v19, %v7103_v5 }
 0x9b0   : > { %v8546_v30 = vsel %vm8289_vm14, %v7103_v5, %v8418_v54 }
 0x9b1   : > { %8674 = vst [vmem:[%s12768_s27 + $0x310] sm:$0xff] %v8546_v30  ;;  %v7015_v47 = vpop.f32.mrf.mxu2 }
 0x9b2   : > { %v6840_v25 = vpop.f32.mrf.mxu0  ;;  %v6929_v16 = vpop.f32.mrf.mxu1  ;;  %v7016_v14 = vadd.f32 %v7015_v47, %v6927_v34  ;;  %v15971_v47 = vld [vmem:[#allocation68_spill] sm:$0xff] }
 0x9b3   : > { %v7104_v35 = vpop.f32.mrf.mxu3  ;;  %v6841_v17 = vadd.f32 %v6840_v25, %v13903_v62 }
 0x9b4   : > { %v7105_v4 = vadd.f32 %v7104_v35, %v7016_v14  ;;  %v15973_v14 = vld [vmem:[#allocation72_spill] sm:$0xff] }
 0x9b5   : > { %7155 = vmatmul.bf16.gmra.mxu0 %v15966_v27  ;;  %7244 = vmatmul.bf16.gmra.mxu1 %v15967_v59  ;;  %v6930_v6 = vadd.f32 %v6929_v16, %v6841_v17  ;;  %v15970_v16 = vld [vmem:[#allocation67_spill] sm:$0xff] }
 0x9b6   : > { %vm8293_vm15 = vcmp.ge.f32.partialorder %v7105_v4, 0.0  ;;  %v8422_v1 = vmul.f32 %v15735_v19, %v7105_v4  ;;  %7333 = vmatmul.bf16.gmra.mxu2 %v15968_v42  ;;  %v10576_v42 = vld [vmem:[#allocation6 + $0x66c] sm:$0xf] }
 0x9b7   : > { %7422 = vmatmul.bf16.gmra.mxu3 %v15969_v53  ;;  %v9655_v53 = vld [vmem:[#allocation6 + $0x678] sm:$0xf0] }
 0x9b8   : > { %v8550_v20 = vsel %vm8293_vm15, %v7105_v4, %v8422_v1 }
 0x9b9   : > { %8678 = vst [vmem:[%s12768_s27 + $0x330] sm:$0xff] %v8550_v20  ;;  %v7018_v52 = vpop.f32.mrf.mxu2 }
 0x9ba   : > { %v6842_v21 = vpop.f32.mrf.mxu0  ;;  %v6931_v22 = vpop.f32.mrf.mxu1  ;;  %v7019_v40 = vadd.f32 %v7018_v52, %v6930_v6  ;;  %v9658_v6 = vor.u32 %v10576_v42, %v9655_v53 }
 0x9bb   : > { %v7107_v39 = vpop.f32.mrf.mxu3  ;;  %v6843_v62 = vadd.f32 %v6842_v21, %v13908_v58  ;;  %v10512_v21 = vld [vmem:[#allocation6 + $0x46c] sm:$0xf] }
 0x9bc   : > { %v7108_v56 = vadd.f32 %v7107_v39, %v7019_v40  ;;  %v9783_v39 = vld [vmem:[#allocation6 + $0x778] sm:$0xf0]  ;;  %7660 = vmatpush.bf16.msra.mxu2 %v9658_v6 }
 0x9bd   : > { %v6932_v33 = vadd.f32 %v6931_v22, %v6843_v62  ;;  %v10608_v22 = vld [vmem:[#allocation6 + $0x76c] sm:$0xf] }
 0x9be   : > { %vm8297_vm0 = vcmp.ge.f32.partialorder %v7108_v56, 0.0  ;;  %v8426_v55 = vmul.f32 %v15735_v19, %v7108_v56  ;;  %v9786_v62 = vor.u32 %v10608_v22, %v9783_v39 }
 0x9c0   : > { %v8554_v5 = vsel %vm8297_vm0, %v7108_v56, %v8426_v55  ;;  %v10544_v55 = vld [vmem:[#allocation6 + $0x56c] sm:$0xf]  ;;  %7749 = vmatpush.bf16.msra.mxu3 %v9786_v62 }
 0x9c1   : > { %8682 = vst [vmem:[%s12768_s27 + $0x350] sm:$0xff] %v8554_v5  ;;  %v7020_v30 = vpop.f32.mrf.mxu2  ;;  %v9527_v5 = vld [vmem:[#allocation6 + $0x578] sm:$0xf0] }
 0x9c2   : > { %v6845_v15 = vpop.f32.mrf.mxu0  ;;  %v6934_v54 = vpop.f32.mrf.mxu1  ;;  %v7021_v25 = vadd.f32 %v7020_v30, %v6932_v33  ;;  %v9530_v33 = vor.u32 %v10544_v55, %v9527_v5 }
 0x9c3   : > { %v7109_v34 = vpop.f32.mrf.mxu3  ;;  %v6846_v13 = vadd.f32 %v6845_v15, %v13913_v48  ;;  %v9399_v48 = vld [vmem:[#allocation6 + $0x478] sm:$0xf0] }
 0x9c4   : > { %v7110_v35 = vadd.f32 %v7109_v34, %v7021_v25  ;;  %v9402_v52 = vor.u32 %v10512_v21, %v9399_v48  ;;  %7571 = vmatpush.bf16.msra.mxu1 %v9530_v33 }
 0x9c5   : > { %7160 = vmatmul.bf16.gmra.mxu0 %v15970_v16  ;;  %7249 = vmatmul.bf16.gmra.mxu1 %v15971_v47  ;;  %v6935_v27 = vadd.f32 %v6934_v54, %v6846_v13  ;;  %v15975_v13 = vld [vmem:[#allocation74_spill] sm:$0xff] }
 0x9c6   : > { %vm8301_vm1 = vcmp.ge.f32.partialorder %v7110_v35, 0.0  ;;  %v8430_v58 = vmul.f32 %v15735_v19, %v7110_v35  ;;  %7338 = vmatmul.bf16.gmra.mxu2 %v15972_v23  ;;  %7482 = vmatpush.bf16.msra.mxu0 %v9402_v52 }
 0x9c7   : > { %7427 = vmatmul.bf16.gmra.mxu3 %v15973_v14 }
 0x9c8   : > { %v8558_v57 = vsel %vm8301_vm1, %v7110_v35, %v8430_v58  ;;  %v15974_v35 = vld [vmem:[#allocation73_spill] sm:$0xff] }
 0x9c9   : > { %8686 = vst [vmem:[%s12768_s27 + $0x370] sm:$0xff] %v8558_v57  ;;  %v7023_v17 = vpop.f32.mrf.mxu2  ;;  %v15976_v57 = vld [vmem:[#allocation77_spill] sm:$0xff] }
 0x9ca   : > { %v6847_v59 = vpop.f32.mrf.mxu0  ;;  %v6936_v4 = vpop.f32.mrf.mxu1  ;;  %v7024_v20 = vadd.f32 %v7023_v17, %v6935_v27  ;;  %v15977_v27 = vld [vmem:[#allocation78_spill] sm:$0xff] }
 0x9cb   : > { %v7112_v1 = vpop.f32.mrf.mxu3  ;;  %v6848_v56 = vadd.f32 %v6847_v59, %v13918_v49 }
 0x9cc   : > { %v7113_v40 = vadd.f32 %v7112_v1, %v7024_v20 }
 0x9cd   : > { %v6937_v30 = vadd.f32 %v6936_v4, %v6848_v56 }
 0x9ce   : > { %vm8305_vm2 = vcmp.ge.f32.partialorder %v7113_v40, 0.0  ;;  %v8434_v15 = vmul.f32 %v15735_v19, %v7113_v40 }
 0x9d0   : > { %v8562_v54 = vsel %vm8305_vm2, %v7113_v40, %v8434_v15 }
 0x9d1   : > { %8690 = vst [vmem:[%s12768_s27 + $0x390] sm:$0xff] %v8562_v54  ;;  %v7025_v16 = vpop.f32.mrf.mxu2  ;;  %v15978_v54 = vld [vmem:[#allocation83_spill] sm:$0xff] }
 0x9d2   : > { %v6850_v34 = vpop.f32.mrf.mxu0  ;;  %v6939_v25 = vpop.f32.mrf.mxu1  ;;  %v7026_v49 = vadd.f32 %v7025_v16, %v6937_v30  ;;  %v15981_v16 = vld [vmem:[#allocation88_spill] sm:$0xff] }
 0x9d3   : > { %v7114_v47 = vpop.f32.mrf.mxu3  ;;  %v6851_v23 = vadd.f32 %v6850_v34, %v13923_v63  ;;  %v10832_v63 = vld [vmem:[#allocation8] sm:$0xf] }
 0x9d4   : > { %v7115_v58 = vadd.f32 %v7114_v47, %v7026_v49  ;;  %v14083_v48 = vperm.slane %v10832_v63, 3  ;;  %v10572_v47 = vld [vmem:[#allocation6 + $0x64c] sm:$0xf]  ;;  %v9639_v49 = vld [vmem:[#allocation6 + $0x658] sm:$0xf0] }
 0x9d5   : > { %7165 = vmatmul.bf16.gmra.mxu0 %v15974_v35  ;;  %7254 = vmatmul.bf16.gmra.mxu1 %v15975_v13  ;;  %v6940_v4 = vadd.f32 %v6939_v25, %v6851_v23  ;;  %v15980_v25 = vld [vmem:[#allocation87_spill] sm:$0xff]  ;;  %v9642_v35 = vor.u32 %v10572_v47, %v9639_v49  ;;  %v10508_v13 = vld [vmem:[#allocation6 + $0x44c] sm:$0xf] }
 0x9d6   : > { %vm8309_vm3 = vcmp.ge.f32.partialorder %v7115_v58, 0.0  ;;  %v8438_v14 = vmul.f32 %v15735_v19, %v7115_v58  ;;  %7343 = vmatmul.bf16.gmra.mxu2 %v15976_v57  ;;  %v10604_v23 = vld [vmem:[#allocation6 + $0x74c] sm:$0xf] }
 0x9d7   : > { %7432 = vmatmul.bf16.gmra.mxu3 %v15977_v27  ;;  %7661 = vmatpush.bf16.msra.mxu2 %v9642_v35  ;;  %v10540_v63 = vld [vmem:[#allocation6 + $0x54c] sm:$0xf] }
 0x9d8   : > { %v8566_v59 = vsel %vm8309_vm3, %v7115_v58, %v8438_v14  ;;  %v9383_v58 = vld [vmem:[#allocation6 + $0x458] sm:$0xf0] }
 0x9d9   : > { %8694 = vst [vmem:[%s12768_s27 + $0x3b0] sm:$0xff] %v8566_v59  ;;  %v7028_v42 = vpop.f32.mrf.mxu2  ;;  %v9386_v59 = vor.u32 %v10508_v13, %v9383_v58 }
 0x9da   : > { %v6852_v17 = vpop.f32.mrf.mxu0  ;;  %v6941_v1 = vpop.f32.mrf.mxu1  ;;  %v7029_v20 = vadd.f32 %v7028_v42, %v6940_v4  ;;  %v9767_v4 = vld [vmem:[#allocation6 + $0x758] sm:$0xf0] }
 0x9db   : > { %v7117_v53 = vpop.f32.mrf.mxu3  ;;  %v6853_v21 = vadd.f32 %v6852_v17, %v13927_v50  ;;  %v15979_v50 = vld [vmem:[#allocation84_spill] sm:$0xff]  ;;  %7483 = vmatpush.bf16.msra.mxu0 %v9386_v59 }
 0x9dc   : > { %v7118_v6 = vadd.f32 %v7117_v53, %v7029_v20  ;;  %v9770_v53 = vor.u32 %v10604_v23, %v9767_v4 }
 0x9dd   : > { %v6942_v39 = vadd.f32 %v6941_v1, %v6853_v21 }
 0x9de   : > { %vm8313_vm4 = vcmp.ge.f32.partialorder %v7118_v6, 0.0  ;;  %v8442_v22 = vmul.f32 %v15735_v19, %v7118_v6  ;;  %7750 = vmatpush.bf16.msra.mxu3 %v9770_v53  ;;  %v15987_v53 = vld [vmem:[#allocation103_spill] sm:$0xff] }
 0x9e0   : > { %v8570_v52 = vsel %vm8313_vm4, %v7118_v6, %v8442_v22  ;;  %v9511_v22 = vld [vmem:[#allocation6 + $0x558] sm:$0xf0] }
 0x9e1   : > { %8698 = vst [vmem:[%s12768_s27 + $0x3d0] sm:$0xff] %v8570_v52  ;;  %v7030_v62 = vpop.f32.mrf.mxu2  ;;  %v9514_v52 = vor.u32 %v10540_v63, %v9511_v22  ;;  %v15989_v63 = vld [vmem:[#allocation107_spill] sm:$0xff]  ;;  %v10568_v22 = vld [vmem:[#allocation6 + $0x62c] sm:$0xf] }
 0x9e2   : > { %v7131_v40 = vpop.f32.mrf.mxu0  ;;  %v7220_v56 = vpop.f32.mrf.mxu1  ;;  %v7031_v33 = vadd.f32 %v7030_v62, %v6942_v39 }
 0x9e3   : > { %v7119_v55 = vpop.f32.mrf.mxu3  ;;  %v7132_v5 = vadd.f32 %v7131_v40, %v14083_v48  ;;  %7572 = vmatpush.bf16.msra.mxu1 %v9514_v52  ;;  %v9623_v52 = vld [vmem:[#allocation6 + $0x638] sm:$0xf0] }
 0x9e4   : > { %v7120_v30 = vadd.f32 %v7119_v55, %v7031_v33 }
 0x9e5   : > { %v7221_v15 = vadd.f32 %v7220_v56, %v7132_v5  ;;  %7170 = vmatmul.bf16.gmra.mxu0 %v15978_v54  ;;  %7259 = vmatmul.bf16.gmra.mxu1 %v15979_v50  ;;  %v15982_v54 = vld [vmem:[#allocation91_spill] sm:$0xff] }
 0x9e6   : > { %vm8317_vm5 = vcmp.ge.f32.partialorder %v7120_v30, 0.0  ;;  %v8446_v34 = vmul.f32 %v15735_v19, %v7120_v30  ;;  %7348 = vmatmul.bf16.gmra.mxu2 %v15980_v25 }
 0x9e7   : > { %7437 = vmatmul.bf16.gmra.mxu3 %v15981_v16 }
 0x9e8   : > { %v8574_v14 = vsel %vm8317_vm5, %v7120_v30, %v8446_v34  ;;  %v15984_v30 = vld [vmem:[#allocation94_spill] sm:$0xff]  ;;  %v15985_v34 = vld [vmem:[#allocation95_spill] sm:$0xff] }
 0x9e9   : > { %8702 = vst [vmem:[%s12768_s27 + $0x3f0] sm:$0xff] %v8574_v14  ;;  %v7309_v17 = vpop.f32.mrf.mxu2 }
 0x9ea   : > { %v7133_v57 = vpop.f32.mrf.mxu0  ;;  %v7222_v27 = vpop.f32.mrf.mxu1  ;;  %v7310_v20 = vadd.f32 %v7309_v17, %v7221_v15  ;;  %v15983_v15 = vld [vmem:[#allocation92_spill] sm:$0xff] }
 0x9eb   : > { %v7398_v1 = vpop.f32.mrf.mxu3  ;;  %v7134_v42 = vadd.f32 %v7133_v57, %v14083_v48 }
 0x9ec   : > { %v14095_v21 = vadd.f32 %v7398_v1, %v7310_v20 }
 0x9ed   : > { %v7223_v6 = vadd.f32 %v7222_v27, %v7134_v42  ;;  %v15986_v42 = vld [vmem:[#allocation102_spill] sm:$0xff] }
 0x9f1   : > { %v7311_v56 = vpop.f32.mrf.mxu2 }
 0x9f2   : > { %v7136_v39 = vpop.f32.mrf.mxu0  ;;  %v7225_v40 = vpop.f32.mrf.mxu1  ;;  %v7312_v5 = vadd.f32 %v7311_v56, %v7223_v6  ;;  %v15988_v6 = vld [vmem:[#allocation106_spill] sm:$0xff]  ;;  %v9367_v56 = vld [vmem:[#allocation6 + $0x438] sm:$0xf0] }
 0x9f3   : > { %v7400_v62 = vpop.f32.mrf.mxu3  ;;  %v7137_v55 = vadd.f32 %v7136_v39, %v14083_v48  ;;  %v10504_v39 = vld [vmem:[#allocation6 + $0x42c] sm:$0xf] }
 0x9f4   : > { %v14100_v50 = vadd.f32 %v7400_v62, %v7312_v5  ;;  %v10600_v62 = vld [vmem:[#allocation6 + $0x72c] sm:$0xf] }
 0x9f5   : > { %v7226_v33 = vadd.f32 %v7225_v40, %v7137_v55  ;;  %7175 = vmatmul.bf16.gmra.mxu0 %v15982_v54  ;;  %7264 = vmatmul.bf16.gmra.mxu1 %v15983_v15  ;;  %v9626_v40 = vor.u32 %v10568_v22, %v9623_v52  ;;  %v9751_v55 = vld [vmem:[#allocation6 + $0x738] sm:$0xf0]  ;;  %v9370_v54 = vor.u32 %v10504_v39, %v9367_v56  ;;  %v15993_v22 = vld [vmem:[#allocation115_spill] sm:$0xff] }
 0x9f6   : > { %7353 = vmatmul.bf16.gmra.mxu2 %v15984_v30  ;;  %v9754_v15 = vor.u32 %v10600_v62, %v9751_v55 }
 0x9f7   : > { %7442 = vmatmul.bf16.gmra.mxu3 %v15985_v34  ;;  %7662 = vmatpush.bf16.msra.mxu2 %v9626_v40 }
 0x9f8   : > { %7484 = vmatpush.bf16.msra.mxu0 %v9370_v54  ;;  %7751 = vmatpush.bf16.msra.mxu3 %v9754_v15 }
 0x9f9   : > { %v7314_v47 = vpop.f32.mrf.mxu2 }
 0x9fa   : > { %v7138_v25 = vpop.f32.mrf.mxu0  ;;  %v7227_v16 = vpop.f32.mrf.mxu1  ;;  %v7315_v13 = vadd.f32 %v7314_v47, %v7226_v33 }
 0x9fb   : > { %v7403_v49 = vpop.f32.mrf.mxu3  ;;  %v7139_v35 = vadd.f32 %v7138_v25, %v14083_v48 }
 0x9fc   : > { %v14105_v23 = vadd.f32 %v7403_v49, %v7315_v13  ;;  %v9495_v13 = vld [vmem:[#allocation6 + $0x538] sm:$0xf0] }
 0x9fd   : > { %v7228_v58 = vadd.f32 %v7227_v16, %v7139_v35  ;;  %v10536_v35 = vld [vmem:[#allocation6 + $0x52c] sm:$0xf] }
 0xa01   : > { %v7316_v27 = vpop.f32.mrf.mxu2 }
 0xa02   : > { %v7141_v14 = vpop.f32.mrf.mxu0  ;;  %v7230_v57 = vpop.f32.mrf.mxu1  ;;  %v7317_v17 = vadd.f32 %v7316_v27, %v7228_v58  ;;  %v9498_v58 = vor.u32 %v10536_v35, %v9495_v13  ;;  %v15994_v35 = vld [vmem:[#allocation122_spill] sm:$0xff]  ;;  %v15995_v13 = vld [vmem:[#allocation123_spill] sm:$0xff] }
 0xa03   : > { %v7405_v59 = vpop.f32.mrf.mxu3  ;;  %v7142_v4 = vadd.f32 %v7141_v14, %v14083_v48 }
 0xa04   : > { %v14110_v20 = vadd.f32 %v7405_v59, %v7317_v17  ;;  %7573 = vmatpush.bf16.msra.mxu1 %v9498_v58 }
 0xa05   : > { %v7231_v1 = vadd.f32 %v7230_v57, %v7142_v4  ;;  %7180 = vmatmul.bf16.gmra.mxu0 %v15986_v42  ;;  %7269 = vmatmul.bf16.gmra.mxu1 %v15987_v53  ;;  %v15990_v53 = vld [vmem:[#allocation110_spill] sm:$0xff] }
 0xa06   : > { %7358 = vmatmul.bf16.gmra.mxu2 %v15988_v6 }
 0xa07   : > { %7447 = vmatmul.bf16.gmra.mxu3 %v15989_v63  ;;  %v15992_v63 = vld [vmem:[#allocation114_spill] sm:$0xff] }
 0xa09   : > { %v7319_v30 = vpop.f32.mrf.mxu2 }
 0xa0a   : > { %v7143_v5 = vpop.f32.mrf.mxu0  ;;  %v7232_v33 = vpop.f32.mrf.mxu1  ;;  %v7320_v16 = vadd.f32 %v7319_v30, %v7231_v1  ;;  %v15991_v1 = vld [vmem:[#allocation111_spill] sm:$0xff] }
 0xa0b   : > { %v7408_v34 = vpop.f32.mrf.mxu3  ;;  %v7144_v25 = vadd.f32 %v7143_v5, %v14083_v48 }
 0xa0c   : > { %v14115_v49 = vadd.f32 %v7408_v34, %v7320_v16 }
 0xa0d   : > { %v7233_v47 = vadd.f32 %v7232_v33, %v7144_v25 }
 0xa11   : > { %v7321_v27 = vpop.f32.mrf.mxu2 }
 0xa12   : > { %v7146_v14 = vpop.f32.mrf.mxu0  ;;  %v7235_v57 = vpop.f32.mrf.mxu1  ;;  %v7322_v17 = vadd.f32 %v7321_v27, %v7233_v47  ;;  %v10564_v27 = vld [vmem:[#allocation6 + $0x60c] sm:$0xf] }
 0xa13   : > { %v7410_v59 = vpop.f32.mrf.mxu3  ;;  %v7147_v4 = vadd.f32 %v7146_v14, %v14083_v48  ;;  %v15996_v14 = vld [vmem:[#allocation125_spill] sm:$0xff] }
 0xa14   : > { %v14120_v6 = vadd.f32 %v7410_v59, %v7322_v17  ;;  %v9607_v59 = vld [vmem:[#allocation6 + $0x618] sm:$0xf0] }
 0xa15   : > { %v7236_v42 = vadd.f32 %v7235_v57, %v7147_v4  ;;  %7185 = vmatmul.bf16.gmra.mxu0 %v15990_v53  ;;  %7274 = vmatmul.bf16.gmra.mxu1 %v15991_v1  ;;  %v15997_v57 = vld [vmem:[#allocation126_spill] sm:$0xff]  ;;  %v9610_v17 = vor.u32 %v10564_v27, %v9607_v59  ;;  %v9735_v1 = vld [vmem:[#allocation6 + $0x718] sm:$0xf0]  ;;  %v15998_v59 = vld [vmem:[#allocation131_spill] sm:$0xff] }
 0xa16   : > { %7363 = vmatmul.bf16.gmra.mxu2 %v15992_v63  ;;  %v10500_v4 = vld [vmem:[#allocation6 + $0x40c] sm:$0xf] }
 0xa17   : > { %7452 = vmatmul.bf16.gmra.mxu3 %v15993_v22  ;;  %v10596_v53 = vld [vmem:[#allocation6 + $0x70c] sm:$0xf]  ;;  %7663 = vmatpush.bf16.msra.mxu2 %v9610_v17  ;;  %v16000_v17 = vld [vmem:[#allocation133_spill] sm:$0xff] }
 0xa19   : > { %v7324_v40 = vpop.f32.mrf.mxu2 }
 0xa1a   : > { %v7148_v52 = vpop.f32.mrf.mxu0  ;;  %v7237_v39 = vpop.f32.mrf.mxu1  ;;  %v7325_v55 = vadd.f32 %v7324_v40, %v7236_v42  ;;  %v9351_v42 = vld [vmem:[#allocation6 + $0x418] sm:$0xf0] }
 0xa1b   : > { %v7413_v56 = vpop.f32.mrf.mxu3  ;;  %v7149_v62 = vadd.f32 %v7148_v52, %v14083_v48  ;;  %v9354_v52 = vor.u32 %v10500_v4, %v9351_v42  ;;  %v16001_v42 = vld [vmem:[#allocation135_spill] sm:$0xff] }
 0xa1c   : > { %v14125_v33 = vadd.f32 %v7413_v56, %v7325_v55 }
 0xa1d   : > { %v7238_v5 = vadd.f32 %v7237_v39, %v7149_v62  ;;  %v9738_v39 = vor.u32 %v10596_v53, %v9735_v1  ;;  %7485 = vmatpush.bf16.msra.mxu0 %v9354_v52 }
 0xa1f   : > { %7752 = vmatpush.bf16.msra.mxu3 %v9738_v39 }
 0xa21   : > { %v7326_v30 = vpop.f32.mrf.mxu2 }
 0xa22   : > { %v7151_v54 = vpop.f32.mrf.mxu0  ;;  %v7240_v15 = vpop.f32.mrf.mxu1  ;;  %v7327_v16 = vadd.f32 %v7326_v30, %v7238_v5  ;;  %v9479_v30 = vld [vmem:[#allocation6 + $0x518] sm:$0xf0] }
 0xa23   : > { %v7415_v34 = vpop.f32.mrf.mxu3  ;;  %v7152_v25 = vadd.f32 %v7151_v54, %v14083_v48 }
 0xa24   : > { %v14130_v58 = vadd.f32 %v7415_v34, %v7327_v16 }
 0xa25   : > { %v7241_v47 = vadd.f32 %v7240_v15, %v7152_v25  ;;  %7190 = vmatmul.bf16.gmra.mxu0 %v15994_v35  ;;  %7279 = vmatmul.bf16.gmra.mxu1 %v15995_v13  ;;  %v10532_v15 = vld [vmem:[#allocation6 + $0x50c] sm:$0xf] }
 0xa26   : > { %7368 = vmatmul.bf16.gmra.mxu2 %v15996_v14  ;;  %v9482_v34 = vor.u32 %v10532_v15, %v9479_v30 }
 0xa27   : > { %7457 = vmatmul.bf16.gmra.mxu3 %v15997_v57 }
 0xa28   : > { %7574 = vmatpush.bf16.msra.mxu1 %v9482_v34 }
 0xa29   : > { %v7329_v40 = vpop.f32.mrf.mxu2 }
 0xa2a   : > { %v7153_v63 = vpop.f32.mrf.mxu0  ;;  %v7242_v22 = vpop.f32.mrf.mxu1  ;;  %v7330_v55 = vadd.f32 %v7329_v40, %v7241_v47  ;;  %v15999_v47 = vld [vmem:[#allocation132_spill] sm:$0xff] }
 0xa2b   : > { %v7418_v56 = vpop.f32.mrf.mxu3  ;;  %v7154_v62 = vadd.f32 %v7153_v63, %v14083_v48 }
 0xa2c   : > { %v14135_v54 = vadd.f32 %v7418_v56, %v7330_v55 }
 0xa2d   : > { %v7243_v5 = vadd.f32 %v7242_v22, %v7154_v62 }
 0xa31   : > { %v7331_v35 = vpop.f32.mrf.mxu2 }
 0xa32   : > { %v7156_v25 = vpop.f32.mrf.mxu0  ;;  %v7245_v16 = vpop.f32.mrf.mxu1  ;;  %v7332_v57 = vadd.f32 %v7331_v35, %v7243_v5  ;;  %v16003_v35 = vld [vmem:[#allocation138_spill] sm:$0xff] }
 0xa33   : > { %v7420_v13 = vpop.f32.mrf.mxu3  ;;  %v7157_v14 = vadd.f32 %v7156_v25, %v14083_v48 }
 0xa34   : > { %v14140_v4 = vadd.f32 %v7420_v13, %v7332_v57  ;;  %v16005_v57 = vld [vmem:[#allocation144_spill] sm:$0xff] }
 0xa35   : > { %v7246_v27 = vadd.f32 %v7245_v16, %v7157_v14  ;;  %7195 = vmatmul.bf16.gmra.mxu0 %v15998_v59  ;;  %7284 = vmatmul.bf16.gmra.mxu1 %v15999_v47  ;;  %v16002_v16 = vld [vmem:[#allocation137_spill] sm:$0xff]  ;;  %v16004_v14 = vld [vmem:[#allocation143_spill] sm:$0xff]  ;;  %v10231_v59 = vld [vmem:[#allocation6 + $0xaf8] sm:$0xf0] }
 0xa36   : > { %7373 = vmatmul.bf16.gmra.mxu2 %v16000_v17  ;;  %v10656_v47 = vld [vmem:[#allocation6 + $0x8ec] sm:$0xf] }
 0xa37   : > { %7462 = vmatmul.bf16.gmra.mxu3 %v16001_v42  ;;  %v9975_v42 = vld [vmem:[#allocation6 + $0x8f8] sm:$0xf0] }
 0xa39   : > { %v7334_v63 = vpop.f32.mrf.mxu2 }
 0xa3a   : > { %v7158_v53 = vpop.f32.mrf.mxu0  ;;  %v7247_v1 = vpop.f32.mrf.mxu1  ;;  %v7335_v39 = vadd.f32 %v7334_v63, %v7246_v27  ;;  %v10720_v27 = vld [vmem:[#allocation6 + $0xaec] sm:$0xf] }
 0xa3b   : > { %v7423_v22 = vpop.f32.mrf.mxu3  ;;  %v7159_v52 = vadd.f32 %v7158_v53, %v14083_v48  ;;  %v10234_v17 = vor.u32 %v10720_v27, %v10231_v59  ;;  %v10752_v53 = vld [vmem:[#allocation6 + $0xbec] sm:$0xf] }
 0xa3c   : > { %v14145_v56 = vadd.f32 %v7423_v22, %v7335_v39 }
 0xa3d   : > { %v7248_v40 = vadd.f32 %v7247_v1, %v7159_v52  ;;  %v10359_v1 = vld [vmem:[#allocation6 + $0xbf8] sm:$0xf0]  ;;  %v9978_v52 = vor.u32 %v10656_v47, %v9975_v42  ;;  %8012 = vmatpush.bf16.msrb.mxu2 %v10234_v17 }
 0xa3e   : > { %v10362_v39 = vor.u32 %v10752_v53, %v10359_v1  ;;  %v16006_v1 = vld [vmem:[#allocation145_spill] sm:$0xff] }
 0xa3f   : > { %7834 = vmatpush.bf16.msrb.mxu0 %v9978_v52 }
 0xa40   : > { %8101 = vmatpush.bf16.msrb.mxu3 %v10362_v39 }
 0xa41   : > { %v7336_v5 = vpop.f32.mrf.mxu2 }
 0xa42   : > { %v7161_v62 = vpop.f32.mrf.mxu0  ;;  %v7250_v55 = vpop.f32.mrf.mxu1  ;;  %v7337_v34 = vadd.f32 %v7336_v5, %v7248_v40 }
 0xa43   : > { %v7425_v15 = vpop.f32.mrf.mxu3  ;;  %v7162_v30 = vadd.f32 %v7161_v62, %v14083_v48 }
 0xa44   : > { %v14150_v13 = vadd.f32 %v7425_v15, %v7337_v34  ;;  %v10688_v34 = vld [vmem:[#allocation6 + $0x9ec] sm:$0xf] }
 0xa45   : > { %v7251_v25 = vadd.f32 %v7250_v55, %v7162_v30  ;;  %7200 = vmatmul.bf16.gmra.mxu0 %v16002_v16  ;;  %7289 = vmatmul.bf16.gmra.mxu1 %v16003_v35  ;;  %v10103_v16 = vld [vmem:[#allocation6 + $0x9f8] sm:$0xf0] }
 0xa46   : > { %7378 = vmatmul.bf16.gmra.mxu2 %v16004_v14  ;;  %v10106_v35 = vor.u32 %v10688_v34, %v10103_v16 }
 0xa47   : > { %7467 = vmatmul.bf16.gmra.mxu3 %v16005_v57 }
 0xa48   : > { %7923 = vmatpush.bf16.msrb.mxu1 %v10106_v35 }
 0xa49   : > { %v7339_v40 = vpop.f32.mrf.mxu2 }
 0xa4a   : > { %v7163_v63 = vpop.f32.mrf.mxu0  ;;  %v7252_v22 = vpop.f32.mrf.mxu1  ;;  %v7340_v5 = vadd.f32 %v7339_v40, %v7251_v25  ;;  %v16007_v25 = vld [vmem:[#allocation146_spill] sm:$0xff] }
 0xa4b   : > { %v7428_v62 = vpop.f32.mrf.mxu3  ;;  %v7164_v55 = vadd.f32 %v7163_v63, %v14083_v48  ;;  %v16008_v63 = vld [vmem:[#allocation147_spill] sm:$0xff] }
 0xa4c   : > { %v14155_v30 = vadd.f32 %v7428_v62, %v7340_v5 }
 0xa4d   : > { %v7253_v15 = vadd.f32 %v7252_v22, %v7164_v55  ;;  %v16009_v22 = vld [vmem:[#allocation148_spill] sm:$0xff] }
 0xa51   : > { %v7341_v27 = vpop.f32.mrf.mxu2 }
 0xa52   : > { %v7166_v14 = vpop.f32.mrf.mxu0  ;;  %v7255_v57 = vpop.f32.mrf.mxu1  ;;  %v7342_v42 = vadd.f32 %v7341_v27, %v7253_v15 }
 0xa53   : > { %v7430_v59 = vpop.f32.mrf.mxu3  ;;  %v7167_v47 = vadd.f32 %v7166_v14, %v14083_v48 }
 0xa54   : > { %v14160_v17 = vadd.f32 %v7430_v59, %v7342_v42  ;;  %v16010_v42 = vld [vmem:[#allocation13_spill] sm:$0xff] }
 0xa55   : > { %v7256_v53 = vadd.f32 %v7255_v57, %v7167_v47  ;;  %7205 = vmatmul.bf16.gmra.mxu0 %v16006_v1  ;;  %7294 = vmatmul.bf16.gmra.mxu1 %v16007_v25  ;;  %v16011_v1 = vld [vmem:[#allocation14_spill] sm:$0xff] }
 0xa56   : > { %7383 = vmatmul.bf16.gmra.mxu2 %v16008_v63  ;;  %v16012_v63 = vld [vmem:[#allocation15_spill] sm:$0xff] }
 0xa57   : > { %7472 = vmatmul.bf16.gmra.mxu3 %v16009_v22  ;;  %v10716_v22 = vld [vmem:[#allocation6 + $0xacc] sm:$0xf] }
 0xa59   : > { %v7344_v40 = vpop.f32.mrf.mxu2 }
 0xa5a   : > { %v7168_v52 = vpop.f32.mrf.mxu0  ;;  %v7257_v39 = vpop.f32.mrf.mxu1  ;;  %v7345_v5 = vadd.f32 %v7344_v40, %v7256_v53  ;;  %v16013_v53 = vld [vmem:[#allocation16_spill] sm:$0xff] }
 0xa5b   : > { %v7433_v62 = vpop.f32.mrf.mxu3  ;;  %v7169_v55 = vadd.f32 %v7168_v52, %v14083_v48  ;;  %v10215_v52 = vld [vmem:[#allocation6 + $0xad8] sm:$0xf0] }
 0xa5c   : > { %v14165_v15 = vadd.f32 %v7433_v62, %v7345_v5  ;;  %v10218_v40 = vor.u32 %v10716_v22, %v10215_v52  ;;  %v9959_v62 = vld [vmem:[#allocation6 + $0x8d8] sm:$0xf0] }
 0xa5d   : > { %v7258_v34 = vadd.f32 %v7257_v39, %v7169_v55  ;;  %v10652_v39 = vld [vmem:[#allocation6 + $0x8cc] sm:$0xf]  ;;  %v10343_v5 = vld [vmem:[#allocation6 + $0xbd8] sm:$0xf0] }
 0xa5e   : > { %v10748_v55 = vld [vmem:[#allocation6 + $0xbcc] sm:$0xf]  ;;  %8013 = vmatpush.bf16.msrb.mxu2 %v10218_v40  ;;  %v10087_v22 = vld [vmem:[#allocation6 + $0x9d8] sm:$0xf0] }
 0xa61   : > { %v7346_v14 = vpop.f32.mrf.mxu2 }
 0xa62   : > { %v7171_v16 = vpop.f32.mrf.mxu0  ;;  %v7260_v35 = vpop.f32.mrf.mxu1  ;;  %v7347_v59 = vadd.f32 %v7346_v14, %v7258_v34  ;;  %v10346_v14 = vor.u32 %v10748_v55, %v10343_v5 }
 0xa63   : > { %v7435_v57 = vpop.f32.mrf.mxu3  ;;  %v7172_v27 = vadd.f32 %v7171_v16, %v14083_v48 }
 0xa64   : > { %v14170_v25 = vadd.f32 %v7435_v57, %v7347_v59  ;;  %8102 = vmatpush.bf16.msrb.mxu3 %v10346_v14 }
 0xa65   : > { %v7261_v47 = vadd.f32 %v7260_v35, %v7172_v27  ;;  %7486 = vmatmul.bf16.vlgmr.msra.gmra.mxu0 %v16010_v42  ;;  %7575 = vmatmul.bf16.vlgmr.msra.gmra.mxu1 %v16011_v1  ;;  %v9962_v35 = vor.u32 %v10652_v39, %v9959_v62 }
 0xa66   : > { %7664 = vmatmul.bf16.vlgmr.msra.gmra.mxu2 %v16012_v63 }
 0xa67   : > { %7753 = vmatmul.bf16.vlgmr.msra.gmra.mxu3 %v16013_v53  ;;  %7835 = vmatpush.bf16.msrb.mxu0 %v9962_v35  ;;  %v10684_v53 = vld [vmem:[#allocation6 + $0x9cc] sm:$0xf]  ;;  %v16017_v35 = vld [vmem:[#allocation24_spill] sm:$0xff] }
 0xa68   : > { %v10090_v52 = vor.u32 %v10684_v53, %v10087_v22 }
 0xa69   : > { %v7349_v27 = vpop.f32.mrf.mxu2 }
 0xa6a   : > { %v7173_v16 = vpop.f32.mrf.mxu0  ;;  %v7262_v34 = vpop.f32.mrf.mxu1  ;;  %v7350_v59 = vadd.f32 %v7349_v27, %v7261_v47  ;;  %7924 = vmatpush.bf16.msrb.mxu1 %v10090_v52  ;;  %v16015_v47 = vld [vmem:[#allocation20_spill] sm:$0xff] }
 0xa6b   : > { %v7438_v42 = vpop.f32.mrf.mxu3  ;;  %v7174_v57 = vadd.f32 %v7173_v16, %v14083_v48  ;;  %v16014_v16 = vld [vmem:[#allocation19_spill] sm:$0xff] }
 0xa6c   : > { %v14175_v63 = vadd.f32 %v7438_v42, %v7350_v59 }
 0xa6d   : > { %v7263_v1 = vadd.f32 %v7262_v34, %v7174_v57  ;;  %v16016_v34 = vld [vmem:[#allocation23_spill] sm:$0xff] }
 0xa71   : > { %v7351_v24 = vpop.f32.mrf.mxu2 }
 0xa72   : > { %v7176_v3 = vpop.f32.mrf.mxu0  ;;  %v7265_v32 = vpop.f32.mrf.mxu1  ;;  %v7352_v55 = vadd.f32 %v7351_v24, %v7263_v1 }
 0xa73   : > { %v7440_v39 = vpop.f32.mrf.mxu3  ;;  %v7177_v62 = vadd.f32 %v7176_v3, %v14083_v48 }
 0xa74   : > { %v14180_v40 = vadd.f32 %v7440_v39, %v7352_v55 }
 0xa75   : > { %v7266_v5 = vadd.f32 %v7265_v32, %v7177_v62  ;;  %7491 = vmatmul.bf16.gmra.mxu0 %v16014_v16  ;;  %7580 = vmatmul.bf16.gmra.mxu1 %v16015_v47  ;;  %v16018_v16 = vld [vmem:[#allocation25_spill] sm:$0xff]  ;;  %v16019_v47 = vld [vmem:[#allocation26_spill] sm:$0xff] }
 0xa76   : > { %7669 = vmatmul.bf16.gmra.mxu2 %v16016_v34 }
 0xa77   : > { %7758 = vmatmul.bf16.gmra.mxu3 %v16017_v35  ;;  %v16020_v35 = vld [vmem:[#allocation30_spill] sm:$0xff] }
 0xa79   : > { %v7354_v42 = vpop.f32.mrf.mxu2 }
 0xa7a   : > { %v7178_v14 = vpop.f32.mrf.mxu0  ;;  %v7267_v27 = vpop.f32.mrf.mxu1  ;;  %v7355_v53 = vadd.f32 %v7354_v42, %v7266_v5  ;;  %v16021_v5 = vld [vmem:[#allocation32_spill] sm:$0xff]  ;;  %v10648_v42 = vld [vmem:[#allocation6 + $0x8ac] sm:$0xf] }
 0xa7b   : > { %v7443_v57 = vpop.f32.mrf.mxu3  ;;  %v7179_v59 = vadd.f32 %v7178_v14, %v14083_v48  ;;  %v10712_v14 = vld [vmem:[#allocation6 + $0xaac] sm:$0xf] }
 0xa7c   : > { %v14185_v24 = vadd.f32 %v7443_v57, %v7355_v53  ;;  %v10744_v53 = vld [vmem:[#allocation6 + $0xbac] sm:$0xf] }
 0xa7d   : > { %v7268_v3 = vadd.f32 %v7267_v27, %v7179_v59  ;;  %v10199_v27 = vld [vmem:[#allocation6 + $0xab8] sm:$0xf0] }
 0xa7e   : > { %v10202_v57 = vor.u32 %v10712_v14, %v10199_v27  ;;  %v9943_v59 = vld [vmem:[#allocation6 + $0x8b8] sm:$0xf0] }
 0xa7f   : > { %v10071_v14 = vld [vmem:[#allocation6 + $0x9b8] sm:$0xf0] }
 0xa80   : > { %8014 = vmatpush.bf16.msrb.mxu2 %v10202_v57 }
 0xa81   : > { %v7356_v22 = vpop.f32.mrf.mxu2 }
 0xa82   : > { %v7181_v32 = vpop.f32.mrf.mxu0  ;;  %v7270_v1 = vpop.f32.mrf.mxu1  ;;  %v7357_v62 = vadd.f32 %v7356_v22, %v7268_v3  ;;  %v10330_v22 = vor.u32 %v10744_v53, %v10327_v2 }
 0xa83   : > { %v7445_v52 = vpop.f32.mrf.mxu3  ;;  %v7182_v39 = vadd.f32 %v7181_v32, %v14083_v48 }
 0xa84   : > { %v14190_v34 = vadd.f32 %v7445_v52, %v7357_v62  ;;  %8103 = vmatpush.bf16.msrb.mxu3 %v10330_v22 }
 0xa85   : > { %v7271_v55 = vadd.f32 %v7270_v1, %v7182_v39  ;;  %7496 = vmatmul.bf16.gmra.mxu0 %v16018_v16  ;;  %7585 = vmatmul.bf16.gmra.mxu1 %v16019_v47  ;;  %v9946_v1 = vor.u32 %v10648_v42, %v9943_v59 }
 0xa86   : > { %7674 = vmatmul.bf16.gmra.mxu2 %v16020_v35 }
 0xa87   : > { %7763 = vmatmul.bf16.gmra.mxu3 %v16021_v5  ;;  %7836 = vmatpush.bf16.msrb.mxu0 %v9946_v1  ;;  %v10680_v5 = vld [vmem:[#allocation6 + $0x9ac] sm:$0xf]  ;;  %v16025_v1 = vld [vmem:[#allocation40_spill] sm:$0xff] }
 0xa88   : > { %v10074_v27 = vor.u32 %v10680_v5, %v10071_v14 }
 0xa89   : > { %v7359_v39 = vpop.f32.mrf.mxu2 }
 0xa8a   : > { %v7183_v32 = vpop.f32.mrf.mxu0  ;;  %v7272_v3 = vpop.f32.mrf.mxu1  ;;  %v7360_v62 = vadd.f32 %v7359_v39, %v7271_v55  ;;  %7925 = vmatpush.bf16.msrb.mxu1 %v10074_v27  ;;  %v16023_v55 = vld [vmem:[#allocation36_spill] sm:$0xff] }
 0xa8b   : > { %v7448_v16 = vpop.f32.mrf.mxu3  ;;  %v7184_v52 = vadd.f32 %v7183_v32, %v14083_v48  ;;  %v16022_v32 = vld [vmem:[#allocation35_spill] sm:$0xff] }
 0xa8c   : > { %v14195_v35 = vadd.f32 %v7448_v16, %v7360_v62 }
 0xa8d   : > { %v7273_v47 = vadd.f32 %v7272_v3, %v7184_v52  ;;  %v16024_v3 = vld [vmem:[#allocation37_spill] sm:$0xff] }
 0xa91   : > { %v7361_v9 = vpop.f32.mrf.mxu2 }
 0xa92   : > { %v7186_v37 = vpop.f32.mrf.mxu0  ;;  %v7275_v28 = vpop.f32.mrf.mxu1  ;;  %v7362_v59 = vadd.f32 %v7361_v9, %v7273_v47 }
 0xa93   : > { %v7450_v42 = vpop.f32.mrf.mxu3  ;;  %v7187_v2 = vadd.f32 %v7186_v37, %v14083_v48 }
 0xa94   : > { %v14200_v57 = vadd.f32 %v7450_v42, %v7362_v59 }
 0xa95   : > { %v7276_v53 = vadd.f32 %v7275_v28, %v7187_v2  ;;  %7501 = vmatmul.bf16.gmra.mxu0 %v16022_v32  ;;  %7590 = vmatmul.bf16.gmra.mxu1 %v16023_v55  ;;  %v16026_v32 = vld [vmem:[#allocation43_spill] sm:$0xff]  ;;  %v16027_v55 = vld [vmem:[#allocation44_spill] sm:$0xff] }
 0xa96   : > { %7679 = vmatmul.bf16.gmra.mxu2 %v16024_v3 }
 0xa97   : > { %7768 = vmatmul.bf16.gmra.mxu3 %v16025_v1  ;;  %v16028_v1 = vld [vmem:[#allocation47_spill] sm:$0xff] }
 0xa99   : > { %v7364_v16 = vpop.f32.mrf.mxu2 }
 0xa9a   : > { %v7188_v22 = vpop.f32.mrf.mxu0  ;;  %v7277_v39 = vpop.f32.mrf.mxu1  ;;  %v7365_v5 = vadd.f32 %v7364_v16, %v7276_v53  ;;  %v16029_v53 = vld [vmem:[#allocation48_spill] sm:$0xff]  ;;  %v10644_v16 = vld [vmem:[#allocation6 + $0x88c] sm:$0xf] }
 0xa9b   : > { %v7453_v52 = vpop.f32.mrf.mxu3  ;;  %v7189_v62 = vadd.f32 %v7188_v22, %v14083_v48  ;;  %v10708_v22 = vld [vmem:[#allocation6 + $0xa8c] sm:$0xf] }
 0xa9c   : > { %v14205_v9 = vadd.f32 %v7453_v52, %v7365_v5  ;;  %v10740_v5 = vld [vmem:[#allocation6 + $0xb8c] sm:$0xf] }
 0xa9d   : > { %v7278_v37 = vadd.f32 %v7277_v39, %v7189_v62  ;;  %v10183_v39 = vld [vmem:[#allocation6 + $0xa98] sm:$0xf0] }
 0xa9e   : > { %v10186_v52 = vor.u32 %v10708_v22, %v10183_v39  ;;  %v9927_v62 = vld [vmem:[#allocation6 + $0x898] sm:$0xf0] }
 0xa9f   : > { %v10055_v22 = vld [vmem:[#allocation6 + $0x998] sm:$0xf0] }
 0xaa0   : > { %8015 = vmatpush.bf16.msrb.mxu2 %v10186_v52 }
 0xaa1   : > { %v7366_v14 = vpop.f32.mrf.mxu2 }
 0xaa2   : > { %v7191_v28 = vpop.f32.mrf.mxu0  ;;  %v7280_v47 = vpop.f32.mrf.mxu1  ;;  %v7367_v2 = vadd.f32 %v7366_v14, %v7278_v37  ;;  %v10314_v14 = vor.u32 %v10740_v5, %v10311_v18 }
 0xaa3   : > { %v7455_v27 = vpop.f32.mrf.mxu3  ;;  %v7192_v42 = vadd.f32 %v7191_v28, %v14083_v48 }
 0xaa4   : > { %v14210_v3 = vadd.f32 %v7455_v27, %v7367_v2  ;;  %8104 = vmatpush.bf16.msrb.mxu3 %v10314_v14 }
 0xaa5   : > { %v7281_v59 = vadd.f32 %v7280_v47, %v7192_v42  ;;  %7506 = vmatmul.bf16.gmra.mxu0 %v16026_v32  ;;  %7595 = vmatmul.bf16.gmra.mxu1 %v16027_v55  ;;  %v9930_v47 = vor.u32 %v10644_v16, %v9927_v62 }
 0xaa6   : > { %7684 = vmatmul.bf16.gmra.mxu2 %v16028_v1 }
 0xaa7   : > { %7773 = vmatmul.bf16.gmra.mxu3 %v16029_v53  ;;  %7837 = vmatpush.bf16.msrb.mxu0 %v9930_v47  ;;  %v10676_v53 = vld [vmem:[#allocation6 + $0x98c] sm:$0xf] }
 0xaa8   : > { %v10058_v39 = vor.u32 %v10676_v53, %v10055_v22  ;;  %v16033_v47 = vld [vmem:[#allocation54_spill] sm:$0xff] }
 0xaa9   : > { %v7369_v42 = vpop.f32.mrf.mxu2 }
 0xaaa   : > { %v7193_v28 = vpop.f32.mrf.mxu0  ;;  %v7282_v37 = vpop.f32.mrf.mxu1  ;;  %v7370_v2 = vadd.f32 %v7369_v42, %v7281_v59  ;;  %7926 = vmatpush.bf16.msrb.mxu1 %v10058_v39  ;;  %v16031_v59 = vld [vmem:[#allocation50_spill] sm:$0xff] }
 0xaab   : > { %v7458_v32 = vpop.f32.mrf.mxu3  ;;  %v7194_v27 = vadd.f32 %v7193_v28, %v14083_v48  ;;  %v16030_v28 = vld [vmem:[#allocation49_spill] sm:$0xff] }
 0xaac   : > { %v14215_v1 = vadd.f32 %v7458_v32, %v7370_v2 }
 0xaad   : > { %v7283_v55 = vadd.f32 %v7282_v37, %v7194_v27  ;;  %v16032_v37 = vld [vmem:[#allocation53_spill] sm:$0xff] }
 0xab1   : > { %v7371_v43 = vpop.f32.mrf.mxu2 }
 0xab2   : > { %v7196_v31 = vpop.f32.mrf.mxu0  ;;  %v7285_v0 = vpop.f32.mrf.mxu1  ;;  %v7372_v62 = vadd.f32 %v7371_v43, %v7283_v55 }
 0xab3   : > { %v7460_v16 = vpop.f32.mrf.mxu3  ;;  %v7197_v18 = vadd.f32 %v7196_v31, %v14083_v48 }
 0xab4   : > { %v14220_v52 = vadd.f32 %v7460_v16, %v7372_v62 }
 0xab5   : > { %v7286_v5 = vadd.f32 %v7285_v0, %v7197_v18  ;;  %7511 = vmatmul.bf16.gmra.mxu0 %v16030_v28  ;;  %7600 = vmatmul.bf16.gmra.mxu1 %v16031_v59  ;;  %v16034_v28 = vld [vmem:[#allocation59_spill] sm:$0xff]  ;;  %v16035_v59 = vld [vmem:[#allocation60_spill] sm:$0xff] }
 0xab6   : > { %7689 = vmatmul.bf16.gmra.mxu2 %v16032_v37 }
 0xab7   : > { %7778 = vmatmul.bf16.gmra.mxu3 %v16033_v47  ;;  %v16036_v47 = vld [vmem:[#allocation63_spill] sm:$0xff] }
 0xab9   : > { %v7374_v32 = vpop.f32.mrf.mxu2 }
 0xaba   : > { %v7198_v14 = vpop.f32.mrf.mxu0  ;;  %v7287_v42 = vpop.f32.mrf.mxu1  ;;  %v7375_v53 = vadd.f32 %v7374_v32, %v7286_v5  ;;  %v16037_v5 = vld [vmem:[#allocation64_spill] sm:$0xff]  ;;  %v10640_v32 = vld [vmem:[#allocation6 + $0x86c] sm:$0xf] }
 0xabb   : > { %v7463_v27 = vpop.f32.mrf.mxu3  ;;  %v7199_v2 = vadd.f32 %v7198_v14, %v14083_v48  ;;  %v10704_v14 = vld [vmem:[#allocation6 + $0xa6c] sm:$0xf] }
 0xabc   : > { %v14225_v43 = vadd.f32 %v7463_v27, %v7375_v53  ;;  %v10736_v53 = vld [vmem:[#allocation6 + $0xb6c] sm:$0xf] }
 0xabd   : > { %v7288_v31 = vadd.f32 %v7287_v42, %v7199_v2  ;;  %v10167_v42 = vld [vmem:[#allocation6 + $0xa78] sm:$0xf0] }
 0xabe   : > { %v10170_v27 = vor.u32 %v10704_v14, %v10167_v42  ;;  %v9911_v2 = vld [vmem:[#allocation6 + $0x878] sm:$0xf0] }
 0xabf   : > { %v10039_v14 = vld [vmem:[#allocation6 + $0x978] sm:$0xf0] }
 0xac0   : > { %8016 = vmatpush.bf16.msrb.mxu2 %v10170_v27 }
 0xac1   : > { %v7376_v22 = vpop.f32.mrf.mxu2 }
 0xac2   : > { %v7201_v0 = vpop.f32.mrf.mxu0  ;;  %v7290_v55 = vpop.f32.mrf.mxu1  ;;  %v7377_v18 = vadd.f32 %v7376_v22, %v7288_v31  ;;  %v10298_v22 = vor.u32 %v10736_v53, %v10295_v7 }
 0xac3   : > { %v7465_v39 = vpop.f32.mrf.mxu3  ;;  %v7202_v16 = vadd.f32 %v7201_v0, %v14083_v48 }
 0xac4   : > { %v14230_v37 = vadd.f32 %v7465_v39, %v7377_v18  ;;  %8105 = vmatpush.bf16.msrb.mxu3 %v10298_v22 }
 0xac5   : > { %v7291_v62 = vadd.f32 %v7290_v55, %v7202_v16  ;;  %7516 = vmatmul.bf16.gmra.mxu0 %v16034_v28  ;;  %7605 = vmatmul.bf16.gmra.mxu1 %v16035_v59  ;;  %v9914_v55 = vor.u32 %v10640_v32, %v9911_v2 }
 0xac6   : > { %7694 = vmatmul.bf16.gmra.mxu2 %v16036_v47 }
 0xac7   : > { %7783 = vmatmul.bf16.gmra.mxu3 %v16037_v5  ;;  %7838 = vmatpush.bf16.msrb.mxu0 %v9914_v55  ;;  %v10672_v5 = vld [vmem:[#allocation6 + $0x96c] sm:$0xf] }
 0xac8   : > { %v10042_v42 = vor.u32 %v10672_v5, %v10039_v14  ;;  %v16041_v55 = vld [vmem:[#allocation70_spill] sm:$0xff] }
 0xac9   : > { %v7379_v16 = vpop.f32.mrf.mxu2 }
 0xaca   : > { %v7203_v0 = vpop.f32.mrf.mxu0  ;;  %v7292_v31 = vpop.f32.mrf.mxu1  ;;  %v7380_v18 = vadd.f32 %v7379_v16, %v7291_v62  ;;  %7927 = vmatpush.bf16.msrb.mxu1 %v10042_v42  ;;  %v16039_v62 = vld [vmem:[#allocation66_spill] sm:$0xff] }
 0xacb   : > { %v7468_v28 = vpop.f32.mrf.mxu3  ;;  %v7204_v39 = vadd.f32 %v7203_v0, %v14083_v48  ;;  %v16038_v0 = vld [vmem:[#allocation65_spill] sm:$0xff] }
 0xacc   : > { %v14235_v47 = vadd.f32 %v7468_v28, %v7380_v18 }
 0xacd   : > { %v7293_v59 = vadd.f32 %v7292_v31, %v7204_v39  ;;  %v16040_v31 = vld [vmem:[#allocation69_spill] sm:$0xff] }
 0xad1   : > { %v7381_v61 = vpop.f32.mrf.mxu2 }
 0xad2   : > { %v7206_v45 = vpop.f32.mrf.mxu0  ;;  %v7295_v44 = vpop.f32.mrf.mxu1  ;;  %v7382_v2 = vadd.f32 %v7381_v61, %v7293_v59 }
 0xad3   : > { %v7470_v32 = vpop.f32.mrf.mxu3  ;;  %v7207_v7 = vadd.f32 %v7206_v45, %v14083_v48 }
 0xad4   : > { %v14240_v27 = vadd.f32 %v7470_v32, %v7382_v2 }
 0xad5   : > { %v7296_v53 = vadd.f32 %v7295_v44, %v7207_v7  ;;  %7521 = vmatmul.bf16.gmra.mxu0 %v16038_v0  ;;  %7610 = vmatmul.bf16.gmra.mxu1 %v16039_v62  ;;  %v16042_v0 = vld [vmem:[#allocation75_spill] sm:$0xff]  ;;  %v16043_v62 = vld [vmem:[#allocation76_spill] sm:$0xff] }
 0xad6   : > { %7699 = vmatmul.bf16.gmra.mxu2 %v16040_v31 }
 0xad7   : > { %7788 = vmatmul.bf16.gmra.mxu3 %v16041_v55  ;;  %v16044_v55 = vld [vmem:[#allocation79_spill] sm:$0xff] }
 0xad9   : > { %v7384_v28 = vpop.f32.mrf.mxu2 }
 0xada   : > { %v7208_v22 = vpop.f32.mrf.mxu0  ;;  %v7297_v16 = vpop.f32.mrf.mxu1  ;;  %v7385_v5 = vadd.f32 %v7384_v28, %v7296_v53  ;;  %v10700_v53 = vld [vmem:[#allocation6 + $0xa4c] sm:$0xf] }
 0xadb   : > { %v7473_v39 = vpop.f32.mrf.mxu3  ;;  %v7209_v18 = vadd.f32 %v7208_v22, %v14083_v48  ;;  %v16045_v48 = vld [vmem:[#allocation80_spill] sm:$0xff] }
 0xadc   : > { %v14245_v61 = vadd.f32 %v7473_v39, %v7385_v5  ;;  %v10151_v22 = vld [vmem:[#allocation6 + $0xa58] sm:$0xf0] }
 0xadd   : > { %v7298_v45 = vadd.f32 %v7297_v16, %v7209_v18  ;;  %v10636_v16 = vld [vmem:[#allocation6 + $0x84c] sm:$0xf]  ;;  %v10154_v28 = vor.u32 %v10700_v53, %v10151_v22  ;;  %v9895_v39 = vld [vmem:[#allocation6 + $0x858] sm:$0xf0] }
 0xade   : > { %v10732_v18 = vld [vmem:[#allocation6 + $0xb4c] sm:$0xf]  ;;  %v10279_v5 = vld [vmem:[#allocation6 + $0xb58] sm:$0xf0] }
 0xadf   : > { %8017 = vmatpush.bf16.msrb.mxu2 %v10154_v28 }
 0xae1   : > { %v7386_v14 = vpop.f32.mrf.mxu2 }
 0xae2   : > { %v7487_v44 = vpop.f32.mrf.mxu0  ;;  %v7576_v59 = vpop.f32.mrf.mxu1  ;;  %v7387_v7 = vadd.f32 %v7386_v14, %v7298_v45 }
 0xae3   : > { %v7475_v42 = vpop.f32.mrf.mxu3  ;;  %v7488_v32 = vadd.f32 %v7487_v44, %v14095_v21  ;;  %v9898_v44 = vor.u32 %v10636_v16, %v9895_v39 }
 0xae4   : > { %v14250_v31 = vadd.f32 %v7475_v42, %v7387_v7 }
 0xae5   : > { %v7577_v2 = vadd.f32 %v7576_v59, %v7488_v32  ;;  %7526 = vmatmul.bf16.gmra.mxu0 %v16042_v0  ;;  %7615 = vmatmul.bf16.gmra.mxu1 %v16043_v62  ;;  %v10282_v59 = vor.u32 %v10732_v18, %v10279_v5 }
 0xae6   : > { %7704 = vmatmul.bf16.gmra.mxu2 %v16044_v55  ;;  %7839 = vmatpush.bf16.msrb.mxu0 %v9898_v44  ;;  %v10668_v55 = vld [vmem:[#allocation6 + $0x94c] sm:$0xf] }
 0xae7   : > { %7793 = vmatmul.bf16.gmra.mxu3 %v16045_v48  ;;  %v10023_v48 = vld [vmem:[#allocation6 + $0x958] sm:$0xf0] }
 0xae8   : > { %8106 = vmatpush.bf16.msrb.mxu3 %v10282_v59  ;;  %v10026_v53 = vor.u32 %v10668_v55, %v10023_v48  ;;  %v16048_v55 = vld [vmem:[#allocation93_spill] sm:$0xff] }
 0xae9   : > { %v7665_v14 = vpop.f32.mrf.mxu2 }
 0xaea   : > { %v7489_v21 = vpop.f32.mrf.mxu0  ;;  %v7578_v45 = vpop.f32.mrf.mxu1  ;;  %v7666_v7 = vadd.f32 %v7665_v14, %v7577_v2  ;;  %7928 = vmatpush.bf16.msrb.mxu1 %v10026_v53  ;;  %v16046_v2 = vld [vmem:[#allocation86_spill] sm:$0xff]  ;;  %v16049_v53 = vld [vmem:[#allocation96_spill] sm:$0xff] }
 0xaeb   : > { %v7754_v32 = vpop.f32.mrf.mxu3  ;;  %v7490_v42 = vadd.f32 %v7489_v21, %v14100_v50 }
 0xaec   : > { %v14255_v62 = vadd.f32 %v7754_v32, %v7666_v7 }
 0xaed   : > { %v7579_v0 = vadd.f32 %v7578_v45, %v7490_v42 }
 0xaf1   : > { %v7667_v8 = vpop.f32.mrf.mxu2 }
 0xaf2   : > { %v7492_v22 = vpop.f32.mrf.mxu0  ;;  %v7581_v41 = vpop.f32.mrf.mxu1  ;;  %v7668_v18 = vadd.f32 %v7667_v8, %v7579_v0  ;;  %v16047_v0 = vld [vmem:[#allocation90_spill] sm:$0xff] }
 0xaf3   : > { %v7756_v16 = vpop.f32.mrf.mxu3  ;;  %v7493_v39 = vadd.f32 %v7492_v22, %v14105_v23  ;;  %v10696_v22 = vld [vmem:[#allocation6 + $0xa2c] sm:$0xf] }
 0xaf4   : > { %v14260_v50 = vadd.f32 %v7756_v16, %v7668_v18  ;;  %v10135_v16 = vld [vmem:[#allocation6 + $0xa38] sm:$0xf0] }
 0xaf5   : > { %v7582_v5 = vadd.f32 %v7581_v41, %v7493_v39  ;;  %7531 = vmatmul.bf16.gmra.mxu0 %v15461_v36  ;;  %7620 = vmatmul.bf16.gmra.mxu1 %v15463_v38  ;;  %v10632_v39 = vld [vmem:[#allocation6 + $0x82c] sm:$0xf]  ;;  %v10138_v18 = vor.u32 %v10696_v22, %v10135_v16 }
 0xaf6   : > { %7709 = vmatmul.bf16.gmra.mxu2 %v15466_v10 }
 0xaf7   : > { %7798 = vmatmul.bf16.gmra.mxu3 %v16046_v2  ;;  %v10728_v2 = vld [vmem:[#allocation6 + $0xb2c] sm:$0xf]  ;;  %8018 = vmatpush.bf16.msrb.mxu2 %v10138_v18 }
 0xaf9   : > { %v7670_v45 = vpop.f32.mrf.mxu2 }
 0xafa   : > { %v7494_v28 = vpop.f32.mrf.mxu0  ;;  %v7583_v21 = vpop.f32.mrf.mxu1  ;;  %v7671_v14 = vadd.f32 %v7670_v45, %v7582_v5  ;;  %v9879_v5 = vld [vmem:[#allocation6 + $0x838] sm:$0xf0] }
 0xafb   : > { %v7759_v44 = vpop.f32.mrf.mxu3  ;;  %v7495_v59 = vadd.f32 %v7494_v28, %v14110_v20  ;;  %v16050_v20 = vld [vmem:[#allocation97_spill] sm:$0xff]  ;;  %v10263_v28 = vld [vmem:[#allocation6 + $0xb38] sm:$0xf0]  ;;  %v9882_v45 = vor.u32 %v10632_v39, %v9879_v5 }
 0xafc   : > { %v14265_v8 = vadd.f32 %v7759_v44, %v7671_v14  ;;  %v10266_v44 = vor.u32 %v10728_v2, %v10263_v28 }
 0xafd   : > { %v7584_v23 = vadd.f32 %v7583_v21, %v7495_v59  ;;  %7840 = vmatpush.bf16.msrb.mxu0 %v9882_v45 }
 0xafe   : > { %8107 = vmatpush.bf16.msrb.mxu3 %v10266_v44 }
 0xb01   : > { %v7672_v32 = vpop.f32.mrf.mxu2 }
 0xb02   : > { %v7497_v41 = vpop.f32.mrf.mxu0  ;;  %v7586_v36 = vpop.f32.mrf.mxu1  ;;  %v7673_v7 = vadd.f32 %v7672_v32, %v7584_v23 }
 0xb03   : > { %v7761_v38 = vpop.f32.mrf.mxu3  ;;  %v7498_v42 = vadd.f32 %v7497_v41, %v14115_v49 }
 0xb04   : > { %v14270_v48 = vadd.f32 %v7761_v38, %v7673_v7  ;;  %v10664_v38 = vld [vmem:[#allocation6 + $0x92c] sm:$0xf] }
 0xb05   : > { %v7587_v10 = vadd.f32 %v7586_v36, %v7498_v42  ;;  %7536 = vmatmul.bf16.gmra.mxu0 %v16047_v0  ;;  %7625 = vmatmul.bf16.gmra.mxu1 %v16048_v55  ;;  %v10007_v42 = vld [vmem:[#allocation6 + $0x938] sm:$0xf0] }
 0xb06   : > { %7714 = vmatmul.bf16.gmra.mxu2 %v16049_v53  ;;  %v10010_v7 = vor.u32 %v10664_v38, %v10007_v42  ;;  %v10628_v38 = vld [vmem:[#allocation6 + $0x80c] sm:$0xf] }
 0xb07   : > { %7803 = vmatmul.bf16.gmra.mxu3 %v16050_v20 }
 0xb08   : > { %7929 = vmatpush.bf16.msrb.mxu1 %v10010_v7  ;;  %v9863_v7 = vld [vmem:[#allocation6 + $0x818] sm:$0xf0] }
 0xb09   : > { %v7675_v59 = vpop.f32.mrf.mxu2 }
 0xb0a   : > { %v7499_v49 = vpop.f32.mrf.mxu0  ;;  %v7588_v21 = vpop.f32.mrf.mxu1  ;;  %v7676_v41 = vadd.f32 %v7675_v59, %v7587_v10 }
 0xb0b   : > { %v7764_v14 = vpop.f32.mrf.mxu3  ;;  %v7500_v23 = vadd.f32 %v7499_v49, %v14120_v6 }
 0xb0c   : > { %v14275_v32 = vadd.f32 %v7764_v14, %v7676_v41  ;;  %v10692_v41 = vld [vmem:[#allocation6 + $0xa0c] sm:$0xf] }
 0xb0d   : > { %v7589_v36 = vadd.f32 %v7588_v21, %v7500_v23  ;;  %v16051_v23 = vld [vmem:[#allocation116_spill] sm:$0xff] }
 0xb11   : > { %v7677_v53 = vpop.f32.mrf.mxu2 }
 0xb12   : > { %v7502_v0 = vpop.f32.mrf.mxu0  ;;  %v7591_v55 = vpop.f32.mrf.mxu1  ;;  %v7678_v16 = vadd.f32 %v7677_v53, %v7589_v36  ;;  %v10119_v36 = vld [vmem:[#allocation6 + $0xa18] sm:$0xf0] }
 0xb13   : > { %v7766_v20 = vpop.f32.mrf.mxu3  ;;  %v7503_v22 = vadd.f32 %v7502_v0, %v14125_v33  ;;  %v10122_v42 = vor.u32 %v10692_v41, %v10119_v36  ;;  %v10724_v0 = vld [vmem:[#allocation6 + $0xb0c] sm:$0xf] }
 0xb14   : > { %v14280_v6 = vadd.f32 %v7766_v20, %v7678_v16  ;;  %v9866_v20 = vor.u32 %v10628_v38, %v9863_v7 }
 0xb15   : > { %v7592_v39 = vadd.f32 %v7591_v55, %v7503_v22  ;;  %7541 = vmatmul.bf16.gmra.mxu0 %v15303_v29  ;;  %7630 = vmatmul.bf16.gmra.mxu1 %v15304_v60  ;;  %v10247_v55 = vld [vmem:[#allocation6 + $0xb18] sm:$0xf0] }
 0xb16   : > { %7719 = vmatmul.bf16.gmra.mxu2 %v15500_v26  ;;  %v10250_v22 = vor.u32 %v10724_v0, %v10247_v55  ;;  %7841 = vmatpush.bf16.msrb.mxu0 %v9866_v20 }
 0xb17   : > { %7808 = vmatmul.bf16.gmra.mxu3 %v15687_v11  ;;  %8019 = vmatpush.bf16.msrb.mxu2 %v10122_v42 }
 0xb18   : > { %8108 = vmatpush.bf16.msrb.mxu3 %v10250_v22 }
 0xb19   : > { %v7680_v5 = vpop.f32.mrf.mxu2 }
 0xb1a   : > { %v7504_v10 = vpop.f32.mrf.mxu0  ;;  %v7593_v18 = vpop.f32.mrf.mxu1  ;;  %v7681_v49 = vadd.f32 %v7680_v5, %v7592_v39  ;;  %v10660_v5 = vld [vmem:[#allocation6 + $0x90c] sm:$0xf] }
 0xb1b   : > { %v7769_v2 = vpop.f32.mrf.mxu3  ;;  %v7505_v28 = vadd.f32 %v7504_v10, %v14130_v58  ;;  %v16052_v58 = vld [vmem:[#allocation117_spill] sm:$0xff] }
 0xb1c   : > { %v14285_v21 = vadd.f32 %v7769_v2, %v7681_v49  ;;  %v9991_v2 = vld [vmem:[#allocation6 + $0x918] sm:$0xf0] }
 0xb1d   : > { %v7594_v33 = vadd.f32 %v7593_v18, %v7505_v28  ;;  %v9994_v28 = vor.u32 %v10660_v5, %v9991_v2  ;;  %v16059_v2 = vld [vmem:[#allocation134_spill] sm:$0xff] }
 0xb1f   : > { %7930 = vmatpush.bf16.msrb.mxu1 %v9994_v28 }
 0xb21   : > { %v7682_v44 = vpop.f32.mrf.mxu2 }
 0xb22   : > { %v7507_v45 = vpop.f32.mrf.mxu0  ;;  %v7596_v29 = vpop.f32.mrf.mxu1  ;;  %v7683_v14 = vadd.f32 %v7682_v44, %v7594_v33 }
 0xb23   : > { %v7771_v60 = vpop.f32.mrf.mxu3  ;;  %v7508_v59 = vadd.f32 %v7507_v45, %v14135_v54 }
 0xb24   : > { %v14290_v11 = vadd.f32 %v7771_v60, %v7683_v14  ;;  %v16054_v14 = vld [vmem:[#allocation121_spill] sm:$0xff] }
 0xb25   : > { %v7597_v26 = vadd.f32 %v7596_v29, %v7508_v59  ;;  %7546 = vmatmul.bf16.gmra.mxu0 %v15513_v51  ;;  %7635 = vmatmul.bf16.gmra.mxu1 %v15515_v12 }
 0xb26   : > { %7724 = vmatmul.bf16.gmra.mxu2 %v16051_v23  ;;  %v16055_v23 = vld [vmem:[#allocation124_spill] sm:$0xff] }
 0xb27   : > { %7813 = vmatmul.bf16.gmra.mxu3 %v16052_v58  ;;  %v16056_v58 = vld [vmem:[#allocation127_spill] sm:$0xff] }
 0xb29   : > { %v7685_v51 = vpop.f32.mrf.mxu2 }
 0xb2a   : > { %v7509_v54 = vpop.f32.mrf.mxu0  ;;  %v7598_v53 = vpop.f32.mrf.mxu1  ;;  %v7686_v39 = vadd.f32 %v7685_v51, %v7597_v26 }
 0xb2b   : > { %v7774_v16 = vpop.f32.mrf.mxu3  ;;  %v7510_v12 = vadd.f32 %v7509_v54, %v14140_v4  ;;  %v16053_v4 = vld [vmem:[#allocation120_spill] sm:$0xff] }
 0xb2c   : > { %v14295_v18 = vadd.f32 %v7774_v16, %v7686_v39  ;;  %v16057_v39 = vld [vmem:[#allocation129_spill] sm:$0xff] }
 0xb2d   : > { %v7599_v10 = vadd.f32 %v7598_v53, %v7510_v12 }
 0xb31   : > { %v7687_v45 = vpop.f32.mrf.mxu2 }
 0xb32   : > { %v7512_v49 = vpop.f32.mrf.mxu0  ;;  %v7601_v33 = vpop.f32.mrf.mxu1  ;;  %v7688_v60 = vadd.f32 %v7687_v45, %v7599_v10  ;;  %v16058_v10 = vld [vmem:[#allocation130_spill] sm:$0xff] }
 0xb33   : > { %v7776_v29 = vpop.f32.mrf.mxu3  ;;  %v7513_v44 = vadd.f32 %v7512_v49, %v14145_v56 }
 0xb34   : > { %v14300_v26 = vadd.f32 %v7776_v29, %v7688_v60 }
 0xb35   : > { %v7602_v59 = vadd.f32 %v7601_v33, %v7513_v44  ;;  %7551 = vmatmul.bf16.gmra.mxu0 %v16053_v4  ;;  %7640 = vmatmul.bf16.gmra.mxu1 %v16054_v14 }
 0xb36   : > { %7729 = vmatmul.bf16.gmra.mxu2 %v16055_v23 }
 0xb37   : > { %7818 = vmatmul.bf16.gmra.mxu3 %v16056_v58 }
 0xb39   : > { %v7690_v38 = vpop.f32.mrf.mxu2 }
 0xb3a   : > { %v7514_v41 = vpop.f32.mrf.mxu0  ;;  %v7603_v36 = vpop.f32.mrf.mxu1  ;;  %v7691_v0 = vadd.f32 %v7690_v38, %v7602_v59  ;;  %v16061_v38 = vld [vmem:[#allocation139_spill] sm:$0xff] }
 0xb3b   : > { %v7779_v42 = vpop.f32.mrf.mxu3  ;;  %v7515_v7 = vadd.f32 %v7514_v41, %v14150_v13  ;;  %v16060_v13 = vld [vmem:[#allocation136_spill] sm:$0xff] }
 0xb3c   : > { %v14305_v55 = vadd.f32 %v7779_v42, %v7691_v0  ;;  %v16062_v42 = vld [vmem:[#allocation140_spill] sm:$0xff]  ;;  %v16063_v0 = vld [vmem:[#allocation141_spill] sm:$0xff] }
 0xb3d   : > { %v7604_v56 = vadd.f32 %v7603_v36, %v7515_v7 }
 0xb41   : > { %v7692_v20 = vpop.f32.mrf.mxu2 }
 0xb42   : > { %v7517_v54 = vpop.f32.mrf.mxu0  ;;  %v7606_v53 = vpop.f32.mrf.mxu1  ;;  %v7693_v16 = vadd.f32 %v7692_v20, %v7604_v56 }
 0xb43   : > { %v7781_v22 = vpop.f32.mrf.mxu3  ;;  %v7518_v51 = vadd.f32 %v7517_v54, %v14155_v30 }
 0xb44   : > { %v14310_v5 = vadd.f32 %v7781_v22, %v7693_v16 }
 0xb45   : > { %v7607_v12 = vadd.f32 %v7606_v53, %v7518_v51  ;;  %7556 = vmatmul.bf16.gmra.mxu0 %v16057_v39  ;;  %7645 = vmatmul.bf16.gmra.mxu1 %v16058_v10 }
 0xb46   : > { %7734 = vmatmul.bf16.gmra.mxu2 %v16059_v2 }
 0xb47   : > { %7823 = vmatmul.bf16.gmra.mxu3 %v16060_v13 }
 0xb49   : > { %v7695_v33 = vpop.f32.mrf.mxu2 }
 0xb4a   : > { %v7519_v28 = vpop.f32.mrf.mxu0  ;;  %v7608_v49 = vpop.f32.mrf.mxu1  ;;  %v7696_v44 = vadd.f32 %v7695_v33, %v7607_v12  ;;  %v16065_v33 = vld [vmem:[#allocation128_spill] sm:$0xff] }
 0xb4b   : > { %v7784_v45 = vpop.f32.mrf.mxu3  ;;  %v7520_v29 = vadd.f32 %v7519_v28, %v14160_v17  ;;  %v16064_v17 = vld [vmem:[#allocation142_spill] sm:$0xff] }
 0xb4c   : > { %v14315_v60 = vadd.f32 %v7784_v45, %v7696_v44  ;;  %v16066_v45 = vld [vmem:[#allocation156_spill] sm:$0xff]  ;;  %v16067_v44 = vld [vmem:[#allocation157_spill] sm:$0xff] }
 0xb4d   : > { %v7609_v30 = vadd.f32 %v7608_v49, %v7520_v29 }
 0xb51   : > { %v7697_v14 = vpop.f32.mrf.mxu2 }
 0xb52   : > { %v7522_v59 = vpop.f32.mrf.mxu0  ;;  %v7611_v4 = vpop.f32.mrf.mxu1  ;;  %v7698_v41 = vadd.f32 %v7697_v14, %v7609_v30 }
 0xb53   : > { %v7786_v23 = vpop.f32.mrf.mxu3  ;;  %v7523_v58 = vadd.f32 %v7522_v59, %v14165_v15 }
 0xb54   : > { %v14320_v7 = vadd.f32 %v7786_v23, %v7698_v41 }
 0xb55   : > { %v7612_v36 = vadd.f32 %v7611_v4, %v7523_v58  ;;  %7561 = vmatmul.bf16.gmra.mxu0 %v16061_v38  ;;  %7650 = vmatmul.bf16.gmra.mxu1 %v16062_v42 }
 0xb56   : > { %7739 = vmatmul.bf16.gmra.mxu2 %v16063_v0 }
 0xb57   : > { %7828 = vmatmul.bf16.gmra.mxu3 %v16064_v17 }
 0xb59   : > { %v7700_v53 = vpop.f32.mrf.mxu2 }
 0xb5a   : > { %v7524_v56 = vpop.f32.mrf.mxu0  ;;  %v7613_v54 = vpop.f32.mrf.mxu1  ;;  %v7701_v51 = vadd.f32 %v7700_v53, %v7612_v36  ;;  %v16069_v53 = vld [vmem:[#allocation159_spill] sm:$0xff] }
 0xb5b   : > { %v7789_v20 = vpop.f32.mrf.mxu3  ;;  %v7525_v22 = vadd.f32 %v7524_v56, %v14170_v25  ;;  %v16068_v25 = vld [vmem:[#allocation158_spill] sm:$0xff] }
 0xb5c   : > { %v14325_v16 = vadd.f32 %v7789_v20, %v7701_v51  ;;  %v16070_v20 = vld [vmem:[#allocation160_spill] sm:$0xff]  ;;  %v16071_v51 = vld [vmem:[#allocation161_spill] sm:$0xff] }
 0xb5d   : > { %v7614_v15 = vadd.f32 %v7613_v54, %v7525_v22 }
 0xb61   : > { %v7702_v10 = vpop.f32.mrf.mxu2 }
 0xb62   : > { %v7527_v12 = vpop.f32.mrf.mxu0  ;;  %v7616_v39 = vpop.f32.mrf.mxu1  ;;  %v7703_v28 = vadd.f32 %v7702_v10, %v7614_v15 }
 0xb63   : > { %v7791_v2 = vpop.f32.mrf.mxu3  ;;  %v7528_v13 = vadd.f32 %v7527_v12, %v14175_v63 }
 0xb64   : > { %v14330_v29 = vadd.f32 %v7791_v2, %v7703_v28 }
 0xb65   : > { %v7617_v49 = vadd.f32 %v7616_v39, %v7528_v13  ;;  %7842 = vmatmul.bf16.vlgmr.msrb.gmra.mxu0 %v16065_v33  ;;  %7931 = vmatmul.bf16.vlgmr.msrb.gmra.mxu1 %v16066_v45 }
 0xb66   : > { %8020 = vmatmul.bf16.vlgmr.msrb.gmra.mxu2 %v16067_v44 }
 0xb67   : > { %8109 = vmatmul.bf16.vlgmr.msrb.gmra.mxu3 %v16068_v25 }
 0xb69   : > { %v7705_v4 = vpop.f32.mrf.mxu2 }
 0xb6a   : > { %v7529_v30 = vpop.f32.mrf.mxu0  ;;  %v7618_v59 = vpop.f32.mrf.mxu1  ;;  %v7706_v58 = vadd.f32 %v7705_v4, %v7617_v49  ;;  %v16073_v4 = vld [vmem:[#allocation149_spill] sm:$0xff] }
 0xb6b   : > { %v7794_v14 = vpop.f32.mrf.mxu3  ;;  %v7530_v23 = vadd.f32 %v7529_v30, %v14180_v40  ;;  %v16072_v40 = vld [vmem:[#allocation162_spill] sm:$0xff] }
 0xb6c   : > { %v14335_v41 = vadd.f32 %v7794_v14, %v7706_v58  ;;  %v16074_v14 = vld [vmem:[#allocation163_spill] sm:$0xff]  ;;  %v16075_v58 = vld [vmem:[#allocation164_spill] sm:$0xff] }
 0xb6d   : > { %v7619_v63 = vadd.f32 %v7618_v59, %v7530_v23 }
 0xb71   : > { %v7707_v42 = vpop.f32.mrf.mxu2 }
 0xb72   : > { %v7532_v36 = vpop.f32.mrf.mxu0  ;;  %v7621_v38 = vpop.f32.mrf.mxu1  ;;  %v7708_v56 = vadd.f32 %v7707_v42, %v7619_v63 }
 0xb73   : > { %v7796_v0 = vpop.f32.mrf.mxu3  ;;  %v7533_v17 = vadd.f32 %v7532_v36, %v14185_v24 }
 0xb74   : > { %v14340_v22 = vadd.f32 %v7796_v0, %v7708_v56 }
 0xb75   : > { %v7622_v54 = vadd.f32 %v7621_v38, %v7533_v17  ;;  %7847 = vmatmul.bf16.gmra.mxu0 %v16069_v53  ;;  %7936 = vmatmul.bf16.gmra.mxu1 %v16070_v20 }
 0xb76   : > { %8025 = vmatmul.bf16.gmra.mxu2 %v16071_v51 }
 0xb77   : > { %8114 = vmatmul.bf16.gmra.mxu3 %v16072_v40 }
 0xb79   : > { %v7710_v39 = vpop.f32.mrf.mxu2 }
 0xb7a   : > { %v7534_v15 = vpop.f32.mrf.mxu0  ;;  %v7623_v12 = vpop.f32.mrf.mxu1  ;;  %v7711_v13 = vadd.f32 %v7710_v39, %v7622_v54  ;;  %v16077_v39 = vld [vmem:[#allocation166_spill] sm:$0xff] }
 0xb7b   : > { %v7799_v10 = vpop.f32.mrf.mxu3  ;;  %v7535_v2 = vadd.f32 %v7534_v15, %v14190_v34  ;;  %v16076_v34 = vld [vmem:[#allocation165_spill] sm:$0xff] }
 0xb7c   : > { %v14345_v28 = vadd.f32 %v7799_v10, %v7711_v13  ;;  %v16078_v10 = vld [vmem:[#allocation167_spill] sm:$0xff]  ;;  %v16079_v13 = vld [vmem:[#allocation168_spill] sm:$0xff] }
 0xb7d   : > { %v7624_v24 = vadd.f32 %v7623_v12, %v7535_v2 }
 0xb81   : > { %v7712_v45 = vpop.f32.mrf.mxu2 }
 0xb82   : > { %v7537_v49 = vpop.f32.mrf.mxu0  ;;  %v7626_v33 = vpop.f32.mrf.mxu1  ;;  %v7713_v30 = vadd.f32 %v7712_v45, %v7624_v24 }
 0xb83   : > { %v7801_v44 = vpop.f32.mrf.mxu3  ;;  %v7538_v25 = vadd.f32 %v7537_v49, %v14195_v35 }
 0xb84   : > { %v14350_v23 = vadd.f32 %v7801_v44, %v7713_v30 }
 0xb85   : > { %v7627_v59 = vadd.f32 %v7626_v33, %v7538_v25  ;;  %7852 = vmatmul.bf16.gmra.mxu0 %v16073_v4  ;;  %7941 = vmatmul.bf16.gmra.mxu1 %v16074_v14 }
 0xb86   : > { %8030 = vmatmul.bf16.gmra.mxu2 %v16075_v58 }
 0xb87   : > { %8119 = vmatmul.bf16.gmra.mxu3 %v16076_v34 }
 0xb89   : > { %v7715_v38 = vpop.f32.mrf.mxu2 }
 0xb8a   : > { %v7539_v63 = vpop.f32.mrf.mxu0  ;;  %v7628_v36 = vpop.f32.mrf.mxu1  ;;  %v7716_v17 = vadd.f32 %v7715_v38, %v7627_v59  ;;  %v16081_v38 = vld [vmem:[#allocation150_spill] sm:$0xff] }
 0xb8b   : > { %v7804_v42 = vpop.f32.mrf.mxu3  ;;  %v7540_v0 = vadd.f32 %v7539_v63, %v14200_v57  ;;  %v16080_v57 = vld [vmem:[#allocation169_spill] sm:$0xff] }
 0xb8c   : > { %v14355_v56 = vadd.f32 %v7804_v42, %v7716_v17  ;;  %v16082_v42 = vld [vmem:[#allocation170_spill] sm:$0xff]  ;;  %v16083_v17 = vld [vmem:[#allocation171_spill] sm:$0xff] }
 0xb8d   : > { %v7629_v35 = vadd.f32 %v7628_v36, %v7540_v0 }
 0xb91   : > { %v7717_v20 = vpop.f32.mrf.mxu2 }
 0xb92   : > { %v7542_v54 = vpop.f32.mrf.mxu0  ;;  %v7631_v53 = vpop.f32.mrf.mxu1  ;;  %v7718_v15 = vadd.f32 %v7717_v20, %v7629_v35 }
 0xb93   : > { %v7806_v51 = vpop.f32.mrf.mxu3  ;;  %v7543_v40 = vadd.f32 %v7542_v54, %v14205_v9 }
 0xb94   : > { %v14360_v2 = vadd.f32 %v7806_v51, %v7718_v15 }
 0xb95   : > { %v7632_v12 = vadd.f32 %v7631_v53, %v7543_v40  ;;  %7857 = vmatmul.bf16.gmra.mxu0 %v16077_v39  ;;  %7946 = vmatmul.bf16.gmra.mxu1 %v16078_v10 }
 0xb96   : > { %8035 = vmatmul.bf16.gmra.mxu2 %v16079_v13 }
 0xb97   : > { %8124 = vmatmul.bf16.gmra.mxu3 %v16080_v57 }
 0xb99   : > { %v7720_v33 = vpop.f32.mrf.mxu2 }
 0xb9a   : > { %v7544_v24 = vpop.f32.mrf.mxu0  ;;  %v7633_v49 = vpop.f32.mrf.mxu1  ;;  %v7721_v25 = vadd.f32 %v7720_v33, %v7632_v12  ;;  %v16085_v33 = vld [vmem:[#allocation173_spill] sm:$0xff] }
 0xb9b   : > { %v7809_v45 = vpop.f32.mrf.mxu3  ;;  %v7545_v44 = vadd.f32 %v7544_v24, %v14210_v3  ;;  %v16084_v3 = vld [vmem:[#allocation172_spill] sm:$0xff] }
 0xb9c   : > { %v14365_v30 = vadd.f32 %v7809_v45, %v7721_v25  ;;  %v16086_v45 = vld [vmem:[#allocation174_spill] sm:$0xff]  ;;  %v16087_v25 = vld [vmem:[#allocation151_spill] sm:$0xff] }
 0xb9d   : > { %v7634_v9 = vadd.f32 %v7633_v49, %v7545_v44 }
 0xba1   : > { %v7722_v14 = vpop.f32.mrf.mxu2 }
 0xba2   : > { %v7547_v59 = vpop.f32.mrf.mxu0  ;;  %v7636_v4 = vpop.f32.mrf.mxu1  ;;  %v7723_v63 = vadd.f32 %v7722_v14, %v7634_v9 }
 0xba3   : > { %v7811_v58 = vpop.f32.mrf.mxu3  ;;  %v7548_v34 = vadd.f32 %v7547_v59, %v14215_v1 }
 0xba4   : > { %v14370_v0 = vadd.f32 %v7811_v58, %v7723_v63 }
 0xba5   : > { %v7637_v36 = vadd.f32 %v7636_v4, %v7548_v34  ;;  %7862 = vmatmul.bf16.gmra.mxu0 %v16081_v38  ;;  %7951 = vmatmul.bf16.gmra.mxu1 %v16082_v42 }
 0xba6   : > { %8040 = vmatmul.bf16.gmra.mxu2 %v16083_v17 }
 0xba7   : > { %8129 = vmatmul.bf16.gmra.mxu3 %v16084_v3 }
 0xba9   : > { %v7725_v53 = vpop.f32.mrf.mxu2 }
 0xbaa   : > { %v7549_v35 = vpop.f32.mrf.mxu0  ;;  %v7638_v54 = vpop.f32.mrf.mxu1  ;;  %v7726_v40 = vadd.f32 %v7725_v53, %v7637_v36  ;;  %v16089_v53 = vld [vmem:[#allocation152_spill] sm:$0xff] }
 0xbab   : > { %v7814_v20 = vpop.f32.mrf.mxu3  ;;  %v7550_v51 = vadd.f32 %v7549_v35, %v14220_v52  ;;  %v16088_v52 = vld [vmem:[#allocation175_spill] sm:$0xff] }
 0xbac   : > { %v14375_v15 = vadd.f32 %v7814_v20, %v7726_v40  ;;  %v16090_v20 = vld [vmem:[#allocation176_spill] sm:$0xff]  ;;  %v16091_v40 = vld [vmem:[#allocation153_spill] sm:$0xff] }
 0xbad   : > { %v7639_v1 = vadd.f32 %v7638_v54, %v7550_v51 }
 0xbb1   : > { %v7727_v10 = vpop.f32.mrf.mxu2 }
 0xbb2   : > { %v7552_v12 = vpop.f32.mrf.mxu0  ;;  %v7641_v39 = vpop.f32.mrf.mxu1  ;;  %v7728_v24 = vadd.f32 %v7727_v10, %v7639_v1 }
 0xbb3   : > { %v7816_v13 = vpop.f32.mrf.mxu3  ;;  %v7553_v57 = vadd.f32 %v7552_v12, %v14225_v43 }
 0xbb4   : > { %v14380_v44 = vadd.f32 %v7816_v13, %v7728_v24 }
 0xbb5   : > { %v7642_v49 = vadd.f32 %v7641_v39, %v7553_v57  ;;  %7867 = vmatmul.bf16.gmra.mxu0 %v16085_v33  ;;  %7956 = vmatmul.bf16.gmra.mxu1 %v16086_v45 }
 0xbb6   : > { %8045 = vmatmul.bf16.gmra.mxu2 %v16087_v25 }
 0xbb7   : > { %8134 = vmatmul.bf16.gmra.mxu3 %v16088_v52 }
 0xbb9   : > { %v7730_v4 = vpop.f32.mrf.mxu2 }
 0xbba   : > { %v7554_v9 = vpop.f32.mrf.mxu0  ;;  %v7643_v59 = vpop.f32.mrf.mxu1  ;;  %v7731_v34 = vadd.f32 %v7730_v4, %v7642_v49  ;;  %v16093_v4 = vld [vmem:[#allocation178_spill] sm:$0xff] }
 0xbbb   : > { %v7819_v14 = vpop.f32.mrf.mxu3  ;;  %v7555_v58 = vadd.f32 %v7554_v9, %v14230_v37  ;;  %v16092_v37 = vld [vmem:[#allocation177_spill] sm:$0xff] }
 0xbbc   : > { %v14385_v63 = vadd.f32 %v7819_v14, %v7731_v34 }
 0xbbd   : > { %v7644_v43 = vadd.f32 %v7643_v59, %v7555_v58  ;;  %v16094_v58 = vld [vmem:[#allocation155_spill] sm:$0xff] }
 0xbc1   : > { %v7732_v42 = vpop.f32.mrf.mxu2 }
 0xbc2   : > { %v7557_v36 = vpop.f32.mrf.mxu0  ;;  %v7646_v38 = vpop.f32.mrf.mxu1  ;;  %v7733_v35 = vadd.f32 %v7732_v42, %v7644_v43 }
 0xbc3   : > { %v7821_v17 = vpop.f32.mrf.mxu3  ;;  %v7558_v3 = vadd.f32 %v7557_v36, %v14235_v47 }
 0xbc4   : > { %v14390_v51 = vadd.f32 %v7821_v17, %v7733_v35 }
 0xbc5   : > { %v7647_v54 = vadd.f32 %v7646_v38, %v7558_v3  ;;  %7872 = vmatmul.bf16.gmra.mxu0 %v16089_v53  ;;  %7961 = vmatmul.bf16.gmra.mxu1 %v16090_v20 }
 0xbc6   : > { %8050 = vmatmul.bf16.gmra.mxu2 %v16091_v40  ;;  %v16096_v40 = vld [vmem:[#allocation180_spill] sm:$0xff] }
 0xbc7   : > { %8139 = vmatmul.bf16.gmra.mxu3 %v16092_v37  ;;  %v16097_v37 = vld [vmem:[#allocation181_spill] sm:$0xff] }
 0xbc9   : > { %v7735_v39 = vpop.f32.mrf.mxu2 }
 0xbca   : > { %v7559_v1 = vpop.f32.mrf.mxu0  ;;  %v7648_v12 = vpop.f32.mrf.mxu1  ;;  %v7736_v57 = vadd.f32 %v7735_v39, %v7647_v54  ;;  %v16098_v39 = vld [vmem:[#allocation182_spill] sm:$0xff] }
 0xbcb   : > { %v7824_v10 = vpop.f32.mrf.mxu3  ;;  %v7560_v13 = vadd.f32 %v7559_v1, %v14240_v27  ;;  %v16095_v27 = vld [vmem:[#allocation179_spill] sm:$0xff] }
 0xbcc   : > { %v14395_v24 = vadd.f32 %v7824_v10, %v7736_v57 }
 0xbcd   : > { %v7649_v47 = vadd.f32 %v7648_v12, %v7560_v13 }
 0xbd1   : > { %v7737_v45 = vpop.f32.mrf.mxu2 }
 0xbd2   : > { %v7562_v49 = vpop.f32.mrf.mxu0  ;;  %v7651_v33 = vpop.f32.mrf.mxu1  ;;  %v7738_v9 = vadd.f32 %v7737_v45, %v7649_v47 }
 0xbd3   : > { %v7826_v25 = vpop.f32.mrf.mxu3  ;;  %v7563_v52 = vadd.f32 %v7562_v49, %v14245_v61 }
 0xbd4   : > { %v14400_v14 = vadd.f32 %v7826_v25, %v7738_v9 }
 0xbd5   : > { %v7652_v59 = vadd.f32 %v7651_v33, %v7563_v52  ;;  %7877 = vmatmul.bf16.gmra.mxu0 %v15910_v46  ;;  %7966 = vmatmul.bf16.gmra.mxu1 %v16093_v4 }
 0xbd6   : > { %8055 = vmatmul.bf16.gmra.mxu2 %v16094_v58 }
 0xbd7   : > { %8144 = vmatmul.bf16.gmra.mxu3 %v16095_v27 }
 0xbd9   : > { %v7740_v36 = vpop.f32.mrf.mxu2 }
 0xbda   : > { %v7564_v34 = vpop.f32.mrf.mxu0  ;;  %v7653_v43 = vpop.f32.mrf.mxu1  ;;  %v7741_v17 = vadd.f32 %v7740_v36, %v7652_v59  ;;  %v16101_v36 = vld [vmem:[#allocation82_spill] sm:$0xff] }
 0xbdb   : > { %v7829_v38 = vpop.f32.mrf.mxu3  ;;  %v7565_v42 = vadd.f32 %v7564_v34, %v14250_v31  ;;  %v16099_v31 = vld [vmem:[#allocation183_spill] sm:$0xff] }
 0xbdc   : > { %v14405_v3 = vadd.f32 %v7829_v38, %v7741_v17  ;;  %v16102_v17 = vld [vmem:[#allocation85_spill] sm:$0xff] }
 0xbdd   : > { %v7654_v61 = vadd.f32 %v7653_v43, %v7565_v42  ;;  %v16100_v43 = vld [vmem:[#allocation81_spill] sm:$0xff] }
 0xbe1   : > { %v7742_v54 = vpop.f32.mrf.mxu2 }
 0xbe2   : > { %v7843_v35 = vpop.f32.mrf.mxu0  ;;  %v7932_v46 = vpop.f32.mrf.mxu1  ;;  %v7743_v20 = vadd.f32 %v7742_v54, %v7654_v61  ;;  %v16103_v61 = vld [vmem:[#allocation99_spill] sm:$0xff] }
 0xbe3   : > { %v7831_v53 = vpop.f32.mrf.mxu3  ;;  %v7844_v12 = vadd.f32 %v7843_v35, %v14255_v62 }
 0xbe4   : > { %v14409_v1 = vadd.f32 %v7831_v53, %v7743_v20 }
 0xbe5   : > { %7882 = vmatmul.bf16.gmra.mxu0 %v16096_v40  ;;  %7971 = vmatmul.bf16.gmra.mxu1 %v16097_v37  ;;  %v7933_v10 = vadd.f32 %v7932_v46, %v7844_v12 }
 0xbe6   : > { %8060 = vmatmul.bf16.gmra.mxu2 %v16098_v39 }
 0xbe7   : > { %8149 = vmatmul.bf16.gmra.mxu3 %v16099_v31 }
 0xbe9   : > { %v8021_v47 = vpop.f32.mrf.mxu2 }
 0xbea   : > { %v7845_v13 = vpop.f32.mrf.mxu0  ;;  %v7934_v57 = vpop.f32.mrf.mxu1  ;;  %v8022_v33 = vadd.f32 %v8021_v47, %v7933_v10 }
 0xbeb   : > { %v8110_v49 = vpop.f32.mrf.mxu3  ;;  %v7846_v25 = vadd.f32 %v7845_v13, %v14260_v50 }
 0xbec   : > { %v8111_v45 = vadd.f32 %v8110_v49, %v8022_v33 }
 0xbed   : > { %v7935_v59 = vadd.f32 %v7934_v57, %v7846_v25  ;;  %v16105_v25 = vld [vmem:[#allocation109_spill] sm:$0xff] }
 0xbee   : > { %vm8194_vm6 = vcmp.ge.f32.partialorder %v8111_v45, 0.0  ;;  %v8323_v52 = vmul.f32 %v15735_v19, %v8111_v45 }
 0xbf0   : > { %v8451_v9 = vsel %vm8194_vm6, %v8111_v45, %v8323_v52  ;;  %v16104_v45 = vld [vmem:[#allocation108_spill] sm:$0xff] }
 0xbf1   : > { %8579 = vst [vmem:[%s12768_s27 + $0x18] sm:$0xff] %v8451_v9  ;;  %v8023_v58 = vpop.f32.mrf.mxu2 }
 0xbf2   : > { %v7848_v62 = vpop.f32.mrf.mxu0  ;;  %v7937_v4 = vpop.f32.mrf.mxu1  ;;  %v8024_v34 = vadd.f32 %v8023_v58, %v7935_v59  ;;  %v16106_v59 = vld [vmem:[#allocation185_spill] sm:$0xff] }
 0xbf3   : > { %v8112_v27 = vpop.f32.mrf.mxu3  ;;  %v7849_v42 = vadd.f32 %v7848_v62, %v14265_v8  ;;  %v16107_v62 = vld [vmem:[#allocation186_spill] sm:$0xff] }
 0xbf4   : > { %v8113_v38 = vadd.f32 %v8112_v27, %v8024_v34 }
 0xbf5   : > { %7887 = vmatmul.bf16.gmra.mxu0 %v16100_v43  ;;  %7976 = vmatmul.bf16.gmra.mxu1 %v16101_v36  ;;  %v7938_v46 = vadd.f32 %v7937_v4, %v7849_v42 }
 0xbf6   : > { %vm8198_vm7 = vcmp.ge.f32.partialorder %v8113_v38, 0.0  ;;  %v8327_v50 = vmul.f32 %v15735_v19, %v8113_v38  ;;  %8065 = vmatmul.bf16.gmra.mxu2 %v16102_v17 }
 0xbf7   : > { %8154 = vmatmul.bf16.gmra.mxu3 %v16103_v61 }
 0xbf8   : > { %v8455_v35 = vsel %vm8198_vm7, %v8113_v38, %v8327_v50 }
 0xbf9   : > { %8583 = vst [vmem:[%s12768_s27 + $0x38] sm:$0xff] %v8455_v35  ;;  %v8026_v20 = vpop.f32.mrf.mxu2 }
 0xbfa   : > { %v7850_v54 = vpop.f32.mrf.mxu0  ;;  %v7939_v53 = vpop.f32.mrf.mxu1  ;;  %v8027_v37 = vadd.f32 %v8026_v20, %v7938_v46 }
 0xbfb   : > { %v8115_v40 = vpop.f32.mrf.mxu3  ;;  %v7851_v39 = vadd.f32 %v7850_v54, %v14270_v48 }
 0xbfc   : > { %v8116_v12 = vadd.f32 %v8115_v40, %v8027_v37  ;;  %v16108_v40 = vld [vmem:[#allocation104_spill] sm:$0xff]  ;;  %v16109_v37 = vld [vmem:[#allocation118_spill] sm:$0xff] }
 0xbfd   : > { %v7940_v10 = vadd.f32 %v7939_v53, %v7851_v39 }
 0xbfe   : > { %vm8202_vm8 = vcmp.ge.f32.partialorder %v8116_v12, 0.0  ;;  %v8331_v8 = vmul.f32 %v15735_v19, %v8116_v12 }
 0xc00   : > { %v8459_v31 = vsel %vm8202_vm8, %v8116_v12, %v8331_v8  ;;  %v16110_v8 = vld [vmem:[#allocation187_spill] sm:$0xff] }
 0xc01   : > { %8587 = vst [vmem:[%s12768_s27 + $0x58] sm:$0xff] %v8459_v31  ;;  %v8028_v47 = vpop.f32.mrf.mxu2  ;;  %v16111_v31 = vld [vmem:[#allocation188_spill] sm:$0xff] }
 0xc02   : > { %v7853_v13 = vpop.f32.mrf.mxu0  ;;  %v7942_v57 = vpop.f32.mrf.mxu1  ;;  %v8029_v33 = vadd.f32 %v8028_v47, %v7940_v10 }
 0xc03   : > { %v8117_v49 = vpop.f32.mrf.mxu3  ;;  %v7854_v9 = vadd.f32 %v7853_v13, %v14275_v32 }
 0xc04   : > { %v8118_v52 = vadd.f32 %v8117_v49, %v8029_v33 }
 0xc05   : > { %7892 = vmatmul.bf16.gmra.mxu0 %v16104_v45  ;;  %7981 = vmatmul.bf16.gmra.mxu1 %v16105_v25  ;;  %v7943_v58 = vadd.f32 %v7942_v57, %v7854_v9 }
 0xc06   : > { %vm8206_vm9 = vcmp.ge.f32.partialorder %v8118_v52, 0.0  ;;  %v8335_v48 = vmul.f32 %v15735_v19, %v8118_v52  ;;  %8070 = vmatmul.bf16.gmra.mxu2 %v16106_v59 }
 0xc07   : > { %8159 = vmatmul.bf16.gmra.mxu3 %v16107_v62 }
 0xc08   : > { %v8463_v4 = vsel %vm8206_vm9, %v8118_v52, %v8335_v48 }
 0xc09   : > { %8591 = vst [vmem:[%s12768_s27 + $0x78] sm:$0xff] %v8463_v4  ;;  %v8031_v43 = vpop.f32.mrf.mxu2 }
 0xc0a   : > { %v7855_v27 = vpop.f32.mrf.mxu0  ;;  %v7944_v34 = vpop.f32.mrf.mxu1  ;;  %v8032_v38 = vadd.f32 %v8031_v43, %v7943_v58  ;;  %v16113_v43 = vld [vmem:[#allocation112_spill] sm:$0xff] }
 0xc0b   : > { %v8120_v36 = vpop.f32.mrf.mxu3  ;;  %v7856_v50 = vadd.f32 %v7855_v27, %v14280_v6 }
 0xc0c   : > { %v8121_v42 = vadd.f32 %v8120_v36, %v8032_v38 }
 0xc0d   : > { %v7945_v61 = vadd.f32 %v7944_v34, %v7856_v50  ;;  %v16112_v34 = vld [vmem:[#allocation119_spill] sm:$0xff]  ;;  %v16115_v50 = vld [vmem:[#allocation100_spill] sm:$0xff] }
 0xc0e   : > { %vm8210_vm10 = vcmp.ge.f32.partialorder %v8121_v42, 0.0  ;;  %v8339_v32 = vmul.f32 %v15735_v19, %v8121_v42 }
 0xc10   : > { %v8467_v17 = vsel %vm8210_vm10, %v8121_v42, %v8339_v32  ;;  %v16114_v42 = vld [vmem:[#allocation113_spill] sm:$0xff] }
 0xc11   : > { %8595 = vst [vmem:[%s12768_s27 + $0x98] sm:$0xff] %v8467_v17  ;;  %v8033_v54 = vpop.f32.mrf.mxu2 }
 0xc12   : > { %v7858_v35 = vpop.f32.mrf.mxu0  ;;  %v7947_v46 = vpop.f32.mrf.mxu1  ;;  %v8034_v20 = vadd.f32 %v8033_v54, %v7945_v61 }
 0xc13   : > { %v8122_v53 = vpop.f32.mrf.mxu3  ;;  %v7859_v39 = vadd.f32 %v7858_v35, %v14285_v21 }
 0xc14   : > { %v8123_v12 = vadd.f32 %v8122_v53, %v8034_v20 }
 0xc15   : > { %7897 = vmatmul.bf16.gmra.mxu0 %v16108_v40  ;;  %7986 = vmatmul.bf16.gmra.mxu1 %v16109_v37  ;;  %v7948_v13 = vadd.f32 %v7947_v46, %v7859_v39 }
 0xc16   : > { %vm8214_vm11 = vcmp.ge.f32.partialorder %v8123_v12, 0.0  ;;  %v8343_v6 = vmul.f32 %v15735_v19, %v8123_v12  ;;  %8075 = vmatmul.bf16.gmra.mxu2 %v16110_v8 }
 0xc17   : > { %8164 = vmatmul.bf16.gmra.mxu3 %v16111_v31 }
 0xc18   : > { %v8471_v10 = vsel %vm8214_vm11, %v8123_v12, %v8343_v6 }
 0xc19   : > { %8599 = vst [vmem:[%s12768_s27 + $0xb8] sm:$0xff] %v8471_v10  ;;  %v8036_v49 = vpop.f32.mrf.mxu2 }
 0xc1a   : > { %v7860_v57 = vpop.f32.mrf.mxu0  ;;  %v7949_v47 = vpop.f32.mrf.mxu1  ;;  %v8037_v45 = vadd.f32 %v8036_v49, %v7948_v13  ;;  %v16116_v13 = vld [vmem:[#allocation189_spill] sm:$0xff] }
 0xc1b   : > { %v8125_v33 = vpop.f32.mrf.mxu3  ;;  %v7861_v52 = vadd.f32 %v7860_v57, %v14290_v11  ;;  %v16117_v57 = vld [vmem:[#allocation190_spill] sm:$0xff] }
 0xc1c   : > { %v8126_v25 = vadd.f32 %v8125_v33, %v8037_v45  ;;  %v16118_v33 = vld [vmem:[#allocation191_spill] sm:$0xff]  ;;  %v16119_v45 = vld [vmem:[#allocation192_spill] sm:$0xff] }
 0xc1d   : > { %v7950_v48 = vadd.f32 %v7949_v47, %v7861_v52 }
 0xc1e   : > { %vm8218_vm12 = vcmp.ge.f32.partialorder %v8126_v25, 0.0  ;;  %v8347_v21 = vmul.f32 %v15735_v19, %v8126_v25 }
 0xc20   : > { %v8475_v9 = vsel %vm8218_vm12, %v8126_v25, %v8347_v21 }
 0xc21   : > { %8603 = vst [vmem:[%s12768_s27 + $0xd8] sm:$0xff] %v8475_v9  ;;  %v8038_v4 = vpop.f32.mrf.mxu2 }
 0xc22   : > { %v7863_v59 = vpop.f32.mrf.mxu0  ;;  %v7952_v62 = vpop.f32.mrf.mxu1  ;;  %v8039_v27 = vadd.f32 %v8038_v4, %v7950_v48 }
 0xc23   : > { %v8127_v58 = vpop.f32.mrf.mxu3  ;;  %v7864_v38 = vadd.f32 %v7863_v59, %v14295_v18 }
 0xc24   : > { %v8128_v36 = vadd.f32 %v8127_v58, %v8039_v27 }
 0xc25   : > { %7902 = vmatmul.bf16.gmra.mxu0 %v16112_v34  ;;  %7991 = vmatmul.bf16.gmra.mxu1 %v16113_v43  ;;  %v7953_v17 = vadd.f32 %v7952_v62, %v7864_v38 }
 0xc26   : > { %vm8222_vm13 = vcmp.ge.f32.partialorder %v8128_v36, 0.0  ;;  %v8351_v11 = vmul.f32 %v15735_v19, %v8128_v36  ;;  %8080 = vmatmul.bf16.gmra.mxu2 %v16114_v42 }
 0xc27   : > { %8169 = vmatmul.bf16.gmra.mxu3 %v16115_v50  ;;  %v16120_v50 = vld [vmem:[#allocation101_spill] sm:$0xff] }
 0xc28   : > { %v8479_v32 = vsel %vm8222_vm13, %v8128_v36, %v8351_v11 }
 0xc29   : > { %8607 = vst [vmem:[%s12768_s27 + $0xf8] sm:$0xff] %v8479_v32  ;;  %v8041_v46 = vpop.f32.mrf.mxu2  ;;  %v16121_v32 = vld [vmem:[#allocation193_spill] sm:$0xff] }
 0xc2a   : > { %v7865_v61 = vpop.f32.mrf.mxu0  ;;  %v7954_v35 = vpop.f32.mrf.mxu1  ;;  %v8042_v53 = vadd.f32 %v8041_v46, %v7953_v17  ;;  %v16123_v46 = vld [vmem:[#allocation195_spill] sm:$0xff] }
 0xc2b   : > { %v8130_v54 = vpop.f32.mrf.mxu3  ;;  %v7866_v40 = vadd.f32 %v7865_v61, %v14300_v26 }
 0xc2c   : > { %v8131_v20 = vadd.f32 %v8130_v54, %v8042_v53 }
 0xc2d   : > { %v7955_v12 = vadd.f32 %v7954_v35, %v7866_v40  ;;  %v16122_v35 = vld [vmem:[#allocation194_spill] sm:$0xff] }
 0xc2e   : > { %vm8226_vm14 = vcmp.ge.f32.partialorder %v8131_v20, 0.0  ;;  %v8355_v18 = vmul.f32 %v15735_v19, %v8131_v20 }
 0xc30   : > { %v8483_v37 = vsel %vm8226_vm14, %v8131_v20, %v8355_v18 }
 0xc31   : > { %8611 = vst [vmem:[%s12768_s27 + $0x118] sm:$0xff] %v8483_v37  ;;  %v8043_v8 = vpop.f32.mrf.mxu2 }
 0xc32   : > { %v7868_v39 = vpop.f32.mrf.mxu0  ;;  %v7957_v6 = vpop.f32.mrf.mxu1  ;;  %v8044_v10 = vadd.f32 %v8043_v8, %v7955_v12 }
 0xc33   : > { %v8132_v31 = vpop.f32.mrf.mxu3  ;;  %v7869_v49 = vadd.f32 %v7868_v39, %v14305_v55 }
 0xc34   : > { %v8133_v47 = vadd.f32 %v8132_v31, %v8044_v10 }
 0xc35   : > { %7907 = vmatmul.bf16.gmra.mxu0 %v16116_v13  ;;  %7996 = vmatmul.bf16.gmra.mxu1 %v16117_v57  ;;  %v7958_v52 = vadd.f32 %v7957_v6, %v7869_v49 }
 0xc36   : > { %vm8230_vm15 = vcmp.ge.f32.partialorder %v8133_v47, 0.0  ;;  %v8359_v26 = vmul.f32 %v15735_v19, %v8133_v47  ;;  %8085 = vmatmul.bf16.gmra.mxu2 %v16118_v33  ;;  %v16125_v33 = vld [vmem:[#allocation197_spill] sm:$0xff] }
 0xc37   : > { %8174 = vmatmul.bf16.gmra.mxu3 %v16119_v45 }
 0xc38   : > { %v8487_v25 = vsel %vm8230_vm15, %v8133_v47, %v8359_v26  ;;  %v16124_v26 = vld [vmem:[#allocation196_spill] sm:$0xff] }
 0xc39   : > { %8615 = vst [vmem:[%s12768_s27 + $0x138] sm:$0xff] %v8487_v25  ;;  %v8046_v48 = vpop.f32.mrf.mxu2 }
 0xc3a   : > { %v7870_v21 = vpop.f32.mrf.mxu0  ;;  %v7959_v9 = vpop.f32.mrf.mxu1  ;;  %v8047_v62 = vadd.f32 %v8046_v48, %v7958_v52  ;;  %v16126_v52 = vld [vmem:[#allocation198_spill] sm:$0xff] }
 0xc3b   : > { %v8135_v59 = vpop.f32.mrf.mxu3  ;;  %v7871_v58 = vadd.f32 %v7870_v21, %v14310_v5  ;;  %v16127_v21 = vld [vmem:[#allocation199_spill] sm:$0xff] }
 0xc3c   : > { %v8136_v4 = vadd.f32 %v8135_v59, %v8047_v62 }
 0xc3d   : > { %v7960_v34 = vadd.f32 %v7959_v9, %v7871_v58 }
 0xc3e   : > { %vm8234_vm0 = vcmp.ge.f32.partialorder %v8136_v4, 0.0  ;;  %v8363_v55 = vmul.f32 %v15735_v19, %v8136_v4 }
 0xc40   : > { %v8491_v27 = vsel %vm8234_vm0, %v8136_v4, %v8363_v55 }
 0xc41   : > { %8619 = vst [vmem:[%s12768_s27 + $0x158] sm:$0xff] %v8491_v27  ;;  %v8048_v38 = vpop.f32.mrf.mxu2 }
 0xc42   : > { %v7873_v43 = vpop.f32.mrf.mxu0  ;;  %v7962_v36 = vpop.f32.mrf.mxu1  ;;  %v8049_v42 = vadd.f32 %v8048_v38, %v7960_v34 }
 0xc43   : > { %v8137_v11 = vpop.f32.mrf.mxu3  ;;  %v7874_v61 = vadd.f32 %v7873_v43, %v14315_v60 }
 0xc44   : > { %v8138_v17 = vadd.f32 %v8137_v11, %v8049_v42 }
 0xc45   : > { %7912 = vmatmul.bf16.gmra.mxu0 %v16120_v50  ;;  %8001 = vmatmul.bf16.gmra.mxu1 %v16121_v32  ;;  %v7963_v53 = vadd.f32 %v7962_v36, %v7874_v61 }
 0xc46   : > { %vm8238_vm1 = vcmp.ge.f32.partialorder %v8138_v17, 0.0  ;;  %v8367_v5 = vmul.f32 %v15735_v19, %v8138_v17  ;;  %8090 = vmatmul.bf16.gmra.mxu2 %v16122_v35 }
 0xc47   : > { %8179 = vmatmul.bf16.gmra.mxu3 %v16123_v46 }
 0xc48   : > { %v8495_v54 = vsel %vm8238_vm1, %v8138_v17, %v8367_v5 }
 0xc49   : > { %8623 = vst [vmem:[%s12768_s27 + $0x178] sm:$0xff] %v8495_v54  ;;  %v8051_v18 = vpop.f32.mrf.mxu2 }
 0xc4a   : > { %v7875_v20 = vpop.f32.mrf.mxu0  ;;  %v7964_v40 = vpop.f32.mrf.mxu1  ;;  %v8052_v12 = vadd.f32 %v8051_v18, %v7963_v53 }
 0xc4b   : > { %v8140_v37 = vpop.f32.mrf.mxu3  ;;  %v7876_v6 = vadd.f32 %v7875_v20, %v14320_v7 }
 0xc4c   : > { %v8141_v39 = vadd.f32 %v8140_v37, %v8052_v12 }
 0xc4d   : > { %v7965_v31 = vadd.f32 %v7964_v40, %v7876_v6 }
 0xc4e   : > { %vm8242_vm2 = vcmp.ge.f32.partialorder %v8141_v39, 0.0  ;;  %v8371_v60 = vmul.f32 %v15735_v19, %v8141_v39 }
 0xc50   : > { %v8499_v8 = vsel %vm8242_vm2, %v8141_v39, %v8371_v60 }
 0xc51   : > { %8627 = vst [vmem:[%s12768_s27 + $0x198] sm:$0xff] %v8499_v8  ;;  %v8053_v57 = vpop.f32.mrf.mxu2 }
 0xc52   : > { %v7878_v10 = vpop.f32.mrf.mxu0  ;;  %v7967_v13 = vpop.f32.mrf.mxu1  ;;  %v8054_v49 = vadd.f32 %v8053_v57, %v7965_v31 }
 0xc53   : > { %v8142_v47 = vpop.f32.mrf.mxu3  ;;  %v7879_v25 = vadd.f32 %v7878_v10, %v14325_v16 }
 0xc54   : > { %v8143_v45 = vadd.f32 %v8142_v47, %v8054_v49 }
 0xc55   : > { %7917 = vmatmul.bf16.gmra.mxu0 %v16124_v26  ;;  %8006 = vmatmul.bf16.gmra.mxu1 %v16125_v33  ;;  %v7968_v48 = vadd.f32 %v7967_v13, %v7879_v25 }
 0xc56   : > { %vm8246_vm3 = vcmp.ge.f32.partialorder %v8143_v45, 0.0  ;;  %v8375_v7 = vmul.f32 %v15735_v19, %v8143_v45  ;;  %8095 = vmatmul.bf16.gmra.mxu2 %v16126_v52 }
 0xc57   : > { %8184 = vmatmul.bf16.gmra.mxu3 %v16127_v21 }
 0xc58   : > { %v8503_v9 = vsel %vm8246_vm3, %v8143_v45, %v8375_v7 }
 0xc59   : > { %8631 = vst [vmem:[%s12768_s27 + $0x1b8] sm:$0xff] %v8503_v9  ;;  %v8056_v4 = vpop.f32.mrf.mxu2 }
 0xc5a   : > { %v7880_v59 = vpop.f32.mrf.mxu0  ;;  %v7969_v62 = vpop.f32.mrf.mxu1  ;;  %v8057_v55 = vadd.f32 %v8056_v4, %v7968_v48 }
 0xc5b   : > { %v8145_v58 = vpop.f32.mrf.mxu3  ;;  %v7881_v34 = vadd.f32 %v7880_v59, %v14330_v29 }
 0xc5c   : > { %v8146_v27 = vadd.f32 %v8145_v58, %v8057_v55 }
 0xc5d   : > { %v7970_v36 = vadd.f32 %v7969_v62, %v7881_v34 }
 0xc5e   : > { %vm8250_vm4 = vcmp.ge.f32.partialorder %v8146_v27, 0.0  ;;  %v8379_v16 = vmul.f32 %v15735_v19, %v8146_v27 }
 0xc60   : > { %v8507_v43 = vsel %vm8250_vm4, %v8146_v27, %v8379_v16 }
 0xc61   : > { %8635 = vst [vmem:[%s12768_s27 + $0x1d8] sm:$0xff] %v8507_v43  ;;  %v8058_v42 = vpop.f32.mrf.mxu2 }
 0xc62   : > { %v7883_v38 = vpop.f32.mrf.mxu0  ;;  %v7972_v11 = vpop.f32.mrf.mxu1  ;;  %v8059_v32 = vadd.f32 %v8058_v42, %v7970_v36 }
 0xc63   : > { %v8147_v50 = vpop.f32.mrf.mxu3  ;;  %v7884_v61 = vadd.f32 %v7883_v38, %v14335_v41 }
 0xc64   : > { %v8148_v17 = vadd.f32 %v8147_v50, %v8059_v32 }
 0xc65   : > { %v7973_v29 = vadd.f32 %v7972_v11, %v7884_v61 }
 0xc66   : > { %vm8254_vm5 = vcmp.ge.f32.partialorder %v8148_v17, 0.0  ;;  %v8383_v5 = vmul.f32 %v15735_v19, %v8148_v17 }
 0xc68   : > { %v8511_v35 = vsel %vm8254_vm5, %v8148_v17, %v8383_v5 }
 0xc69   : > { %8639 = vst [vmem:[%s12768_s27 + $0x1f8] sm:$0xff] %v8511_v35  ;;  %v8061_v53 = vpop.f32.mrf.mxu2 }
 0xc6a   : > { %v7885_v46 = vpop.f32.mrf.mxu0  ;;  %v7974_v54 = vpop.f32.mrf.mxu1  ;;  %v8062_v40 = vadd.f32 %v8061_v53, %v7973_v29 }
 0xc6b   : > { %v8150_v20 = vpop.f32.mrf.mxu3  ;;  %v7886_v37 = vadd.f32 %v7885_v46, %v14340_v22 }
 0xc6c   : > { %v8151_v18 = vadd.f32 %v8150_v20, %v8062_v40 }
 0xc6d   : > { %v7975_v41 = vadd.f32 %v7974_v54, %v7886_v37 }
 0xc6e   : > { %vm8258_vm6 = vcmp.ge.f32.partialorder %v8151_v18, 0.0  ;;  %v8387_v12 = vmul.f32 %v15735_v19, %v8151_v18 }
 0xc70   : > { %v8515_v39 = vsel %vm8258_vm6, %v8151_v18, %v8387_v12 }
 0xc71   : > { %8643 = vst [vmem:[%s12768_s27 + $0x218] sm:$0xff] %v8515_v39  ;;  %v8063_v8 = vpop.f32.mrf.mxu2 }
 0xc72   : > { %v7888_v6 = vpop.f32.mrf.mxu0  ;;  %v7977_v60 = vpop.f32.mrf.mxu1  ;;  %v8064_v10 = vadd.f32 %v8063_v8, %v7975_v41 }
 0xc73   : > { %v8152_v31 = vpop.f32.mrf.mxu3  ;;  %v7889_v57 = vadd.f32 %v7888_v6, %v14345_v28 }
 0xc74   : > { %v8153_v13 = vadd.f32 %v8152_v31, %v8064_v10 }
 0xc75   : > { %v7978_v22 = vadd.f32 %v7977_v60, %v7889_v57 }
 0xc76   : > { %vm8262_vm7 = vcmp.ge.f32.partialorder %v8153_v13, 0.0  ;;  %v8391_v47 = vmul.f32 %v15735_v19, %v8153_v13 }
 0xc78   : > { %v8519_v49 = vsel %vm8262_vm7, %v8153_v13, %v8391_v47 }
 0xc79   : > { %8647 = vst [vmem:[%s12768_s27 + $0x238] sm:$0xff] %v8519_v49  ;;  %v8066_v45 = vpop.f32.mrf.mxu2 }
 0xc7a   : > { %v7890_v26 = vpop.f32.mrf.mxu0  ;;  %v7979_v33 = vpop.f32.mrf.mxu1  ;;  %v8067_v7 = vadd.f32 %v8066_v45, %v7978_v22 }
 0xc7b   : > { %v8155_v25 = vpop.f32.mrf.mxu3  ;;  %v7891_v21 = vadd.f32 %v7890_v26, %v14350_v23 }
 0xc7c   : > { %v8156_v52 = vadd.f32 %v8155_v25, %v8067_v7 }
 0xc7d   : > { %v7980_v28 = vadd.f32 %v7979_v33, %v7891_v21 }
 0xc7e   : > { %vm8266_vm8 = vcmp.ge.f32.partialorder %v8156_v52, 0.0  ;;  %v8395_v9 = vmul.f32 %v15735_v19, %v8156_v52 }
 0xc80   : > { %v8523_v48 = vsel %vm8266_vm8, %v8156_v52, %v8395_v9 }
 0xc81   : > { %8651 = vst [vmem:[%s12768_s27 + $0x258] sm:$0xff] %v8523_v48  ;;  %v8068_v4 = vpop.f32.mrf.mxu2 }
 0xc82   : > { %v7893_v59 = vpop.f32.mrf.mxu0  ;;  %v7982_v62 = vpop.f32.mrf.mxu1  ;;  %v8069_v55 = vadd.f32 %v8068_v4, %v7980_v28 }
 0xc83   : > { %v8157_v58 = vpop.f32.mrf.mxu3  ;;  %v7894_v34 = vadd.f32 %v7893_v59, %v14355_v56 }
 0xc84   : > { %v8158_v27 = vadd.f32 %v8157_v58, %v8069_v55 }
 0xc85   : > { %v7983_v23 = vadd.f32 %v7982_v62, %v7894_v34 }
 0xc86   : > { %vm8270_vm9 = vcmp.ge.f32.partialorder %v8158_v27, 0.0  ;;  %v8399_v16 = vmul.f32 %v15735_v19, %v8158_v27 }
 0xc88   : > { %v8527_v43 = vsel %vm8270_vm9, %v8158_v27, %v8399_v16 }
 0xc89   : > { %8655 = vst [vmem:[%s12768_s27 + $0x278] sm:$0xff] %v8527_v43  ;;  %v8071_v11 = vpop.f32.mrf.mxu2 }
 0xc8a   : > { %v7895_v36 = vpop.f32.mrf.mxu0  ;;  %v7984_v38 = vpop.f32.mrf.mxu1  ;;  %v8072_v50 = vadd.f32 %v8071_v11, %v7983_v23 }
 0xc8b   : > { %v8160_v42 = vpop.f32.mrf.mxu3  ;;  %v7896_v17 = vadd.f32 %v7895_v36, %v14360_v2 }
 0xc8c   : > { %v8161_v32 = vadd.f32 %v8160_v42, %v8072_v50 }
 0xc8d   : > { %v7985_v56 = vadd.f32 %v7984_v38, %v7896_v17 }
 0xc8e   : > { %vm8274_vm10 = vcmp.ge.f32.partialorder %v8161_v32, 0.0  ;;  %v8403_v61 = vmul.f32 %v15735_v19, %v8161_v32 }
 0xc90   : > { %v8531_v5 = vsel %vm8274_vm10, %v8161_v32, %v8403_v61 }
 0xc91   : > { %8659 = vst [vmem:[%s12768_s27 + $0x298] sm:$0xff] %v8531_v5  ;;  %v8073_v46 = vpop.f32.mrf.mxu2 }
 0xc92   : > { %v7898_v35 = vpop.f32.mrf.mxu0  ;;  %v7987_v29 = vpop.f32.mrf.mxu1  ;;  %v8074_v53 = vadd.f32 %v8073_v46, %v7985_v56 }
 0xc93   : > { %v8162_v54 = vpop.f32.mrf.mxu3  ;;  %v7899_v40 = vadd.f32 %v7898_v35, %v14365_v30 }
 0xc94   : > { %v8163_v20 = vadd.f32 %v8162_v54, %v8074_v53 }
 0xc95   : > { %v7988_v2 = vadd.f32 %v7987_v29, %v7899_v40 }
 0xc96   : > { %vm8278_vm11 = vcmp.ge.f32.partialorder %v8163_v20, 0.0  ;;  %v8407_v18 = vmul.f32 %v15735_v19, %v8163_v20 }
 0xc98   : > { %v8535_v37 = vsel %vm8278_vm11, %v8163_v20, %v8407_v18 }
 0xc99   : > { %8663 = vst [vmem:[%s12768_s27 + $0x2b8] sm:$0xff] %v8535_v37  ;;  %v8076_v41 = vpop.f32.mrf.mxu2 }
 0xc9a   : > { %v7900_v12 = vpop.f32.mrf.mxu0  ;;  %v7989_v39 = vpop.f32.mrf.mxu1  ;;  %v8077_v60 = vadd.f32 %v8076_v41, %v7988_v2 }
 0xc9b   : > { %v8165_v6 = vpop.f32.mrf.mxu3  ;;  %v7901_v31 = vadd.f32 %v7900_v12, %v14370_v0 }
 0xc9c   : > { %v8166_v8 = vadd.f32 %v8165_v6, %v8077_v60 }
 0xc9d   : > { %v7990_v30 = vadd.f32 %v7989_v39, %v7901_v31 }
 0xc9e   : > { %vm8282_vm12 = vcmp.ge.f32.partialorder %v8166_v8, 0.0  ;;  %v8411_v10 = vmul.f32 %v15735_v19, %v8166_v8 }
 0xca0   : > { %v8539_v13 = vsel %vm8282_vm12, %v8166_v8, %v8411_v10 }
 0xca1   : > { %8667 = vst [vmem:[%s12768_s27 + $0x2d8] sm:$0xff] %v8539_v13  ;;  %v8078_v49 = vpop.f32.mrf.mxu2 }
 0xca2   : > { %v7903_v57 = vpop.f32.mrf.mxu0  ;;  %v7992_v47 = vpop.f32.mrf.mxu1  ;;  %v8079_v26 = vadd.f32 %v8078_v49, %v7990_v30 }
 0xca3   : > { %v8167_v22 = vpop.f32.mrf.mxu3  ;;  %v7904_v45 = vadd.f32 %v7903_v57, %v14375_v15 }
 0xca4   : > { %v8168_v33 = vadd.f32 %v8167_v22, %v8079_v26 }
 0xca5   : > { %v7993_v0 = vadd.f32 %v7992_v47, %v7904_v45 }
 0xca6   : > { %vm8286_vm13 = vcmp.ge.f32.partialorder %v8168_v33, 0.0  ;;  %v8415_v25 = vmul.f32 %v15735_v19, %v8168_v33 }
 0xca8   : > { %v8543_v7 = vsel %vm8286_vm13, %v8168_v33, %v8415_v25 }
 0xca9   : > { %8671 = vst [vmem:[%s12768_s27 + $0x2f8] sm:$0xff] %v8543_v7  ;;  %v8081_v9 = vpop.f32.mrf.mxu2 }
 0xcaa   : > { %v7905_v52 = vpop.f32.mrf.mxu0  ;;  %v7994_v21 = vpop.f32.mrf.mxu1  ;;  %v8082_v28 = vadd.f32 %v8081_v9, %v7993_v0 }
 0xcab   : > { %v8170_v48 = vpop.f32.mrf.mxu3  ;;  %v7906_v62 = vadd.f32 %v7905_v52, %v14380_v44 }
 0xcac   : > { %v8171_v59 = vadd.f32 %v8170_v48, %v8082_v28 }
 0xcad   : > { %v7995_v15 = vadd.f32 %v7994_v21, %v7906_v62 }
 0xcae   : > { %vm8290_vm14 = vcmp.ge.f32.partialorder %v8171_v59, 0.0  ;;  %v8419_v4 = vmul.f32 %v15735_v19, %v8171_v59 }
 0xcb0   : > { %v8547_v58 = vsel %vm8290_vm14, %v8171_v59, %v8419_v4 }
 0xcb1   : > { %8675 = vst [vmem:[%s12768_s27 + $0x318] sm:$0xff] %v8547_v58  ;;  %v8083_v34 = vpop.f32.mrf.mxu2 }
 0xcb2   : > { %v7908_v55 = vpop.f32.mrf.mxu0  ;;  %v7997_v27 = vpop.f32.mrf.mxu1  ;;  %v8084_v43 = vadd.f32 %v8083_v34, %v7995_v15 }
 0xcb3   : > { %v8172_v16 = vpop.f32.mrf.mxu3  ;;  %v7909_v36 = vadd.f32 %v7908_v55, %v14385_v63 }
 0xcb4   : > { %v8173_v23 = vadd.f32 %v8172_v16, %v8084_v43 }
 0xcb5   : > { %v7998_v44 = vadd.f32 %v7997_v27, %v7909_v36 }
 0xcb6   : > { %vm8294_vm15 = vcmp.ge.f32.partialorder %v8173_v23, 0.0  ;;  %v8423_v38 = vmul.f32 %v15735_v19, %v8173_v23 }
 0xcb8   : > { %v8551_v11 = vsel %vm8294_vm15, %v8173_v23, %v8423_v38 }
 0xcb9   : > { %8679 = vst [vmem:[%s12768_s27 + $0x338] sm:$0xff] %v8551_v11  ;;  %v8086_v32 = vpop.f32.mrf.mxu2 }
 0xcba   : > { %v7910_v42 = vpop.f32.mrf.mxu0  ;;  %v7999_v50 = vpop.f32.mrf.mxu1  ;;  %v8087_v61 = vadd.f32 %v8086_v32, %v7998_v44 }
 0xcbb   : > { %v8175_v17 = vpop.f32.mrf.mxu3  ;;  %v7911_v56 = vadd.f32 %v7910_v42, %v14390_v51 }
 0xcbc   : > { %v8176_v5 = vadd.f32 %v8175_v17, %v8087_v61 }
 0xcbd   : > { %v8000_v29 = vadd.f32 %v7999_v50, %v7911_v56 }
 0xcbe   : > { %vm8298_vm0 = vcmp.ge.f32.partialorder %v8176_v5, 0.0  ;;  %v8427_v35 = vmul.f32 %v15735_v19, %v8176_v5 }
 0xcc0   : > { %v8555_v63 = vsel %vm8298_vm0, %v8176_v5, %v8427_v35 }
 0xcc1   : > { %8683 = vst [vmem:[%s12768_s27 + $0x358] sm:$0xff] %v8555_v63  ;;  %v8088_v53 = vpop.f32.mrf.mxu2 }
 0xcc2   : > { %v7913_v46 = vpop.f32.mrf.mxu0  ;;  %v8002_v54 = vpop.f32.mrf.mxu1  ;;  %v8089_v40 = vadd.f32 %v8088_v53, %v8000_v29 }
 0xcc3   : > { %v8177_v20 = vpop.f32.mrf.mxu3  ;;  %v7914_v37 = vadd.f32 %v7913_v46, %v14395_v24 }
 0xcc4   : > { %v8178_v18 = vadd.f32 %v8177_v20, %v8089_v40 }
 0xcc5   : > { %v8003_v12 = vadd.f32 %v8002_v54, %v7914_v37 }
 0xcc6   : > { %vm8302_vm1 = vcmp.ge.f32.partialorder %v8178_v18, 0.0  ;;  %v8431_v2 = vmul.f32 %v15735_v19, %v8178_v18 }
 0xcc8   : > { %v8559_v51 = vsel %vm8302_vm1, %v8178_v18, %v8431_v2 }
 0xcc9   : > { %8687 = vst [vmem:[%s12768_s27 + $0x378] sm:$0xff] %v8559_v51  ;;  %v8091_v41 = vpop.f32.mrf.mxu2 }
 0xcca   : > { %v7915_v39 = vpop.f32.mrf.mxu0  ;;  %v8092_v60 = vadd.f32 %v8091_v41, %v8003_v12  ;;  %v8004_v8 = vpop.f32.mrf.mxu1 }
 0xccb   : > { %v8180_v6 = vpop.f32.mrf.mxu3  ;;  %v7916_v10 = vadd.f32 %v7915_v39, %v14400_v14 }
 0xccc   : > { %v8181_v31 = vadd.f32 %v8180_v6, %v8092_v60 }
 0xccd   : > { %v8005_v30 = vadd.f32 %v8004_v8, %v7916_v10 }
 0xcce   : > { %vm8306_vm2 = vcmp.ge.f32.partialorder %v8181_v31, 0.0  ;;  %v8435_v13 = vmul.f32 %v15735_v19, %v8181_v31 }
 0xcd0   : > { %v8563_v24 = vsel %vm8306_vm2, %v8181_v31, %v8435_v13 }
 0xcd1   : > { %8691 = vst [vmem:[%s12768_s27 + $0x398] sm:$0xff] %v8563_v24  ;;  %v8093_v47 = vpop.f32.mrf.mxu2 }
 0xcd2   : > { %v7918_v57 = vpop.f32.mrf.mxu0  ;;  %v8094_v22 = vadd.f32 %v8093_v47, %v8005_v30  ;;  %v8007_v45 = vpop.f32.mrf.mxu1 }
 0xcd3   : > { %v8182_v49 = vpop.f32.mrf.mxu3  ;;  %v7919_v33 = vadd.f32 %v7918_v57, %v14405_v3 }
 0xcd4   : > { %v8183_v26 = vadd.f32 %v8182_v49, %v8094_v22 }
 0xcd5   : > { %v8008_v7 = vadd.f32 %v8007_v45, %v7919_v33 }
 0xcd6   : > { %vm8310_vm3 = vcmp.ge.f32.partialorder %v8183_v26, 0.0  ;;  %v8439_v25 = vmul.f32 %v15735_v19, %v8183_v26 }
 0xcd8   : > { %v8567_v14 = vsel %vm8310_vm3, %v8183_v26, %v8439_v25 }
 0xcd9   : > { %8695 = vst [vmem:[%s12768_s27 + $0x3b8] sm:$0xff] %v8567_v14  ;;  %v8096_v52 = vpop.f32.mrf.mxu2 }
 0xcda   : > { %v7920_v0 = vpop.f32.mrf.mxu0  ;;  %v8097_v9 = vadd.f32 %v8096_v52, %v8008_v7  ;;  %v8009_v59 = vpop.f32.mrf.mxu1 }
 0xcdb   : > { %v8185_v21 = vpop.f32.mrf.mxu3  ;;  %v7921_v28 = vadd.f32 %v7920_v0, %v14409_v1 }
 0xcdc   : > { %v8186_v48 = vadd.f32 %v8185_v21, %v8097_v9 }
 0xcdd   : > { %v8010_v4 = vadd.f32 %v8009_v59, %v7921_v28 }
 0xcde   : > { %vm8314_vm4 = vcmp.ge.f32.partialorder %v8186_v48, 0.0  ;;  %v8443_v3 = vmul.f32 %v15735_v19, %v8186_v48 }
 0xce0   : > { %v8571_v62 = vsel %vm8314_vm4, %v8186_v48, %v8443_v3 }
 0xce1   : > { %8699 = vst [vmem:[%s12768_s27 + $0x3d8] sm:$0xff] %v8571_v62  ;;  %v8098_v58 = vpop.f32.mrf.mxu2 }
 0xce2   : > { %v8099_v15 = vadd.f32 %v8098_v58, %v8010_v4 }
 0xce3   : > { %v8187_v55 = vpop.f32.mrf.mxu3 }
 0xce4   : > { %v8188_v1 = vadd.f32 %v8187_v55, %v8099_v15 }
 0xce6   : > { %vm8318_vm5 = vcmp.ge.f32.partialorder %v8188_v1, 0.0  ;;  %v8447_v27 = vmul.f32 %v15735_v19, %v8188_v1 }
 0xce8   : > { %v8575_v34 = vsel %vm8318_vm5, %v8188_v1, %v8447_v27 }
 0xce9   : > { %8703 = vst [vmem:[%s12768_s27 + $0x3f8] sm:$0xff] %v8575_v34 }
 0xcea   : > { %10950 = shalt.err (!%p10947_p10)
}
 0xceb   : > { %s11001_s26 = smov 512   ;;  %s11002_s29 = smov 32  }
 0xcec   : > { %10767 = dma.vmem_to_hbm [thread:$0]  (%p11097_p3), %s8719_s9, 16384, %s8721_s10, %s8705_s3, %s11001_s26, %s11001_s26, %s11002_s29  }
 0xced PF: > { %s8735_s8 = sand.u32 1, %s10981_s17   ;;  %p16128_p12 = scmp.ge.s32.totalorder %s10993_s20, 2 }
 0xcee   : > { %s8736_s22 = scalar_lea.sflag [#allocation5], %s8735_s8 }
 0xcef   : > { %p10781_p13 = pnand %p16128_p12, %p11066_p6 }
 0xcf1   : > { %p10782_p0 = pneg %p10781_p13 }
 0xcf3   : > { %10976 = dma.done.wait (%p10782_p0), %s8736_s22, 16384  }
 0xcf4   : > { %10978 = vsyncadd (%p10782_p0), %s8736_s22, 4294950912  ;;  %p19_p5 = scmp.ge.s32.totalorder %s11087_s11, 4   ;;  %s16129_s17 = smov %s10985_s18 }
 0xcf5   : > { %s16130_s18 = smov %s10989_s19  ;;  %s16131_s19 = smov %s11103_s15 }
 0xcf6   : > { %s16132_s20 = smov %s11087_s11  ;;  %21 = sbr.rel (!%p19_p5) target bundleno = 8 (0x8), region = 89 }
 0xcfb   :  { %8742 = vsyncpa [#allocation4], 1 }
 0xcfc   :  { %8744 = vsyncpa [#allocation4 + $0x1], 1 }
 0xcfd   :  { %8745 = vsyncpa [#allocation7], 1 }
 0xcfe   :  { %8746 = vsyncpa [#allocation5], 1 }
 0xcff   :  { %8748 = vsyncpa [#allocation5 + $0x1], 1 }

</bundles_post_ra>
